<compile_context>
chip_gen: v6e
topology: v6e:2x2x1
jax: 0.10.0
libtpu: 0.0.40
codegen_flags: <defaults>
</compile_context>

<pallas_src>
import functools

import jax
import jax.numpy as jnp
from jax.experimental import pallas as pl
from jax.experimental.pallas import tpu as pltpu


# ----------------------------- Pallas kernel --------------------------------
def _agcrn_layer_kernel(xz_ref, xr_ref, xu_ref, h0_ref, sup_ref, wsg_ref, wsu_ref,
                        embn_ref, ssum_ref, out_ref, *, T, R, K, H, DH, mxu_dtype):
    # Per-program shapes (R = batches_per_program * N rows, d-major weight columns):
    #   xz/xr/xu : (T, R, H)      hoisted x-projection + bias for z / r / candidate
    #   h0       : (R, H)         initial hidden state
    #   sup      : (K*R, R)       block-diag (over batch), poly-scaled supports,
    #                             all K terms stacked along the rows
    #   wsg      : (K, H, 2*DH)   state-column weights, gate; z columns then r columns
    #   wsu      : (K, H, DH)     state-column weights, candidate
    #   embn     : (R, DH)        node embeddings broadcast to the d-major acc layout
    #   ssum     : (DH, H)        constant 0/1 summation matrix (MXU-side D-reduction)
    #   out      : (T, R, H)

    # Only the small, very frequently used invariants are hoisted into loop-invariant
    # values.  The weight slabs / summation matrix together exceed the 64-vreg file,
    # so hoisting them would only turn ref-loads into spill-reloads; they are loaded
    # at point of use (right next to the matmul that consumes them).
    sup = sup_ref[...]        # (K*R, R)
    embn = embn_ref[...]      # (R, DH), f32 (VPU path)

    def graph_conv(state_in, w_ref, n_out):
        # State-dependent half of the adaptive graph conv.
        # 1) One merged support matmul for all K Chebyshev terms and all batches.
        sk = jnp.dot(sup, state_in.astype(mxu_dtype),
                     preferred_element_type=jnp.float32)             # (K*R, H)
        # 2) K accumulated weight matmuls on sublane-aligned (multiple-of-8) slices.
        acc = jnp.dot(sk[0:R].astype(mxu_dtype), w_ref[0],
                      preferred_element_type=jnp.float32)            # (R, n_out*DH)
        for k in range(1, K):
            acc = acc + jnp.dot(sk[k * R:(k + 1) * R].astype(mxu_dtype), w_ref[k],
                                preferred_element_type=jnp.float32)
        # 3) Embedding contraction over D: elementwise multiply in the flat d-major
        #    layout, then reduce with an MXU matmul against the 0/1 summation matrix
        #    (no reshape, no XLU sublane reduction).  Slices below are at multiples
        #    of DH (lane-aligned for DH % 128 == 0).
        s_mat = ssum_ref[...]
        outs = []
        for j in range(n_out):
            y = (acc[:, j * DH:(j + 1) * DH] * embn).astype(mxu_dtype)
            outs.append(jnp.dot(y, s_mat, preferred_element_type=jnp.float32))
        return outs

    def step(t, state):
        convz, convr = graph_conv(state, wsg_ref, 2)
        z = jax.nn.sigmoid(xz_ref[t] + convz)
        r = jax.nn.sigmoid(xr_ref[t] + convr)
        (convc,) = graph_conv(z * state, wsu_ref, 1)
        hc = jnp.tanh(xu_ref[t] + convc)
        h = r * state + (1.0 - r) * hc
        out_ref[t] = h.astype(out_ref.dtype)   # single (R, H) store per step
        return h

    # Fully unroll for small T (LLO scheduling visibility); partially unroll if T
    # grows to bound code size / vreg pressure — the recurrence is serial either way.
    jax.lax.fori_loop(0, T, step, h0_ref[...].astype(jnp.float32),
                      unroll=True if T <= 8 else 4)


# ------------------------------- per-layer glue ------------------------------
def _run_layer(cur, h0, supports, emb, wpool_g, bpool_g, wpool_u, bpool_u,
               *, mxu_dtype, num_programs=1):
    B, T, N, Cin = cur.shape
    K = supports.shape[0]
    D = emb.shape[1]
    H = wpool_u.shape[-1]
    DH = D * H
    assert B % num_programs == 0
    BP = B // num_programs          # batches folded into one program
    R = BP * N                      # matmul rows per program
    f32 = jnp.float32

    # ---- hoisted x-projection (all timesteps at once, plain JAX / XLA) ----------
    # Per-node effective weights fold the embedding contraction into the weights, so
    # the D-expanded (B,T,N,D,O) intermediate is never materialized.
    xg = jnp.einsum("knm,btmc->btnkc", supports, cur)                   # (B,T,N,K,Cin)
    weff_g = jnp.einsum("nd,dkco->nkco", emb, wpool_g[:, :, :Cin, :])   # (N,K,Cin,2H)
    weff_u = jnp.einsum("nd,dkco->nkco", emb, wpool_u[:, :, :Cin, :])   # (N,K,Cin,H)
    xproj_g = jnp.einsum("btnkc,nkco->btno", xg, weff_g) + emb @ bpool_g
    xproj_u = jnp.einsum("btnkc,nkco->btno", xg, weff_u) + emb @ bpool_u

    # Split gate into z / r slabs here so the kernel never slices at lane offset H,
    # and reorder to the row-stacked (T, B*N, H) layout used inside the kernel.
    def to_rows(a):                                   # (B,T,N,F) -> (T, B*N, F)
        return jnp.transpose(a, (1, 0, 2, 3)).reshape(T, B * N, a.shape[-1])

    xz = to_rows(xproj_g[..., :H]).astype(f32)
    xr = to_rows(xproj_g[..., H:]).astype(f32)
    xu = to_rows(xproj_u).astype(f32)
    h0r = h0.reshape(B * N, H).astype(f32)

    # ---- state-path operands ------------------------------------------------------
    # Block-diagonal (over the folded batches) supports, all K terms stacked on rows.
    sup_bd = jnp.concatenate(
        [jnp.kron(jnp.eye(BP, dtype=f32), supports[k]) for k in range(K)],
        axis=0).astype(mxu_dtype)                                        # (K*R, R)

    # State-column weights with d-major columns: w[k][h, d*O + o] = pool[d, k, Cin+h, o].
    def dmajor(w):                                    # (D,K,H,O) -> (K,H,D*O)
        return jnp.transpose(w, (1, 2, 0, 3)).reshape(K, H, -1)

    wpg_state = wpool_g[:, :, Cin:, :]                                   # (D,K,H,2H)
    wsg = jnp.concatenate([dmajor(wpg_state[..., :H]),                   # z slab
                           dmajor(wpg_state[..., H:])],                  # r slab
                          axis=-1).astype(mxu_dtype)                     # (K,H,2*DH)
    wsu = dmajor(wpool_u[:, :, Cin:, :]).astype(mxu_dtype)               # (K,H,DH)

    # Node embeddings broadcast to the d-major accumulator layout (shared by z/r/cand).
    embn = jnp.tile(jnp.broadcast_to(emb[:, :, None], (N, D, H)).reshape(N, DH),
                    (BP, 1)).astype(f32)                                 # (R, DH)

    # Constant 0/1 summation matrix: MXU-side reduction over D.
    ssum = jnp.tile(jnp.eye(H, dtype=f32), (D, 1)).astype(mxu_dtype)     # (DH, H)

    kernel = functools.partial(_agcrn_layer_kernel,
                               T=T, R=R, K=K, H=H, DH=DH, mxu_dtype=mxu_dtype)

    # All resident blocks total well under 1 MiB, far below every generation's scoped
    # VMEM default -> no vmem_limit_bytes / Buffered() tuning needed.
    out = pl.pallas_call(
        kernel,
        out_shape=jax.ShapeDtypeStruct((T, B * N, H), f32),
        grid=(num_programs,),
        in_specs=[
            pl.BlockSpec((T, R, H), lambda g: (0, g, 0)),         # xz
            pl.BlockSpec((T, R, H), lambda g: (0, g, 0)),         # xr
            pl.BlockSpec((T, R, H), lambda g: (0, g, 0)),         # xu
            pl.BlockSpec((R, H), lambda g: (g, 0)),               # init state
            pl.BlockSpec((K * R, R), lambda g: (0, 0)),           # block-diag supports
            pl.BlockSpec((K, H, 2 * DH), lambda g: (0, 0, 0)),    # state W, gate (z|r)
            pl.BlockSpec((K, H, DH), lambda g: (0, 0, 0)),        # state W, candidate
            pl.BlockSpec((R, DH), lambda g: (0, 0)),              # emb broadcast slab
            pl.BlockSpec((DH, H), lambda g: (0, 0)),              # summation matrix
        ],
        out_specs=pl.BlockSpec((T, R, H), lambda g: (0, g, 0)),
        compiler_params=pltpu.CompilerParams(dimension_semantics=("parallel",)),
    )(xz, xr, xu, h0r, sup_bd, wsg, wsu, embn, ssum)

    return jnp.transpose(out.reshape(T, B, N, H), (1, 0, 2, 3))          # (B,T,N,H)


# ------------------------------- JAX glue ------------------------------------
def build_supports(emb, poly_coefficients):
    n = emb.shape[0]
    a = jax.nn.softmax(jax.nn.relu(emb @ emb.T), axis=1)
    sup = [jnp.eye(n, dtype=emb.dtype), a]
    k_total = poly_coefficients.shape[0]
    for _ in range(2, k_total):
        sup.append(2.0 * a @ sup[-1] - sup[-2])
    supports = jnp.stack(sup[:k_total], axis=0)
    return supports * poly_coefficients[:, None, None]


def avwdcrnn_forward(x, init_state, node_embeddings, poly_coefficients, params,
                     *, mxu_dtype=jnp.float32, num_programs=1):
    """Pallas-backed AVWDCRNN.forward.  Returns (current_inputs, output_hidden).

    mxu_dtype=jnp.bfloat16 casts the MXU operands (supports, state, weights,
    summation matrix) for ~2-3x matmul throughput on v5e/v6e/v7x while keeping f32
    accumulation and f32 GRU gating.  num_programs=2 splits the folded batches over
    the two v7x TensorCores; leave at 1 on v5e/v6e where the grid is a serial loop.
    """
    supports = build_supports(node_embeddings, poly_coefficients)
    current = x
    output_hidden = []
    for lp, h0 in zip(params, init_state):
        current = _run_layer(current, h0, supports, node_embeddings,
                             lp["wpool_gate"], lp["bpool_gate"],
                             lp["wpool_update"], lp["bpool_update"],
                             mxu_dtype=mxu_dtype, num_programs=num_programs)
        output_hidden.append(current[:, -1])
    return current, output_hidden


# --------------------------- pure-JAX reference -------------------------------
def ref_forward(x, init_state, emb, poly_coefficients, params):
    supports = build_supports(emb, poly_coefficients)

    def gconv(inp, wpool, bpool):
        weights = jnp.einsum("nd,dkco->nkco", emb, wpool)
        bias = emb @ bpool
        xg = jnp.einsum("knm,bmc->bknc", supports, inp)
        xg = jnp.transpose(xg, (0, 2, 1, 3))
        return jnp.einsum("bnkc,nkco->bno", xg, weights) + bias

    def cell(x_t, state, lp):
        H = state.shape[-1]
        cat = jnp.concatenate([x_t, state], axis=-1)
        zr = jax.nn.sigmoid(gconv(cat, lp["wpool_gate"], lp["bpool_gate"]))
        z, r = zr[..., :H], zr[..., H:]
        cand = jnp.concatenate([x_t, z * state], axis=-1)
        hc = jnp.tanh(gconv(cand, lp["wpool_update"], lp["bpool_update"]))
        return r * state + (1.0 - r) * hc

    current = x
    output_hidden = []
    for lp, h0 in zip(params, init_state):
        state = h0
        inner = []
        for t in range(x.shape[1]):
            state = cell(current[:, t], state, lp)
            inner.append(state)
        output_hidden.append(state)
        current = jnp.stack(inner, axis=1)
    return current, output_hidden


# ----------------------------------- main -------------------------------------
if __name__ == "__main__":
    B, T, N, DIN, H, EMBED, CHEB_K, LAYERS = 2, 8, 16, 4, 32, 8, 3, 2

    key = jax.random.PRNGKey(0)
    keys = jax.random.split(key, 16)

    x = jax.random.normal(keys[0], (B, T, N, DIN), jnp.float32)
    node_embeddings = jax.random.normal(keys[1], (N, EMBED), jnp.float32)
    poly_coefficients = jnp.array([1.0, 0.8, 0.5], jnp.float32)
    init_state = tuple(jax.random.normal(keys[2 + i], (B, N, H), jnp.float32) * 0.1
                       for i in range(LAYERS))

    params = []
    kidx = 2 + LAYERS
    for layer in range(LAYERS):
        c_in = DIN if layer == 0 else H
        C = c_in + H
        params.append({
            "wpool_gate":   jax.random.normal(keys[kidx + 0], (EMBED, CHEB_K, C, 2 * H), jnp.float32) * 0.1,
            "bpool_gate":   jax.random.normal(keys[kidx + 1], (EMBED, 2 * H), jnp.float32) * 0.1,
            "wpool_update": jax.random.normal(keys[kidx + 2], (EMBED, CHEB_K, C, H), jnp.float32) * 0.1,
            "bpool_update": jax.random.normal(keys[kidx + 3], (EMBED, H), jnp.float32) * 0.1,
        })
        kidx += 4

    ref_out, ref_hidden = ref_forward(x, init_state, node_embeddings, poly_coefficients, params)

    # ---- exact-semantics check: f32 MXU operands, tight tolerance -----------------
    fwd32 = jax.jit(functools.partial(avwdcrnn_forward, mxu_dtype=jnp.float32))
    out, hidden = fwd32(x, init_state, node_embeddings, poly_coefficients, params)
    out = jax.block_until_ready(out)
    hidden = [jax.block_until_ready(h) for h in hidden]

    assert out.shape == (B, T, N, H), out.shape
    assert len(hidden) == LAYERS and hidden[0].shape == (B, N, H)
    assert jnp.allclose(out, ref_out, atol=2e-3, rtol=2e-3), float(jnp.max(jnp.abs(out - ref_out)))
    for h_p, h_r in zip(hidden, ref_hidden):
        assert jnp.allclose(h_p, h_r, atol=2e-3, rtol=2e-3)

    # ---- performance configuration: bf16 MXU operands (f32 accumulation/gating) ----
    # bf16 operand rounding accumulates across the 2-layer, T-step recurrence, so this
    # is a loose smoke test; the f32 path above is the exact correctness check.
    fwd16 = jax.jit(functools.partial(avwdcrnn_forward, mxu_dtype=jnp.bfloat16))
    out16, _ = fwd16(x, init_state, node_embeddings, poly_coefficients, params)
    out16 = jax.block_until_ready(out16)
    assert jnp.allclose(out16, ref_out, atol=1e-1, rtol=1e-1), float(jnp.max(jnp.abs(out16 - ref_out)))

    print("KERNEL_OK")
</pallas_src>

<mosaic_0001>
module attributes {stable_mosaic.version = 11 : i64} {
  func.func @_agcrn_layer_kernel(%arg0: i32, %arg1: memref<8x32x32xf32, #tpu.memory_space<vmem>>, %arg2: memref<8x32x32xf32, #tpu.memory_space<vmem>>, %arg3: memref<8x32x32xf32, #tpu.memory_space<vmem>>, %arg4: memref<32x32xf32, #tpu.memory_space<vmem>>, %arg5: memref<96x32xf32, #tpu.memory_space<vmem>>, %arg6: memref<3x32x512xf32, #tpu.memory_space<vmem>>, %arg7: memref<3x32x256xf32, #tpu.memory_space<vmem>>, %arg8: memref<32x256xf32, #tpu.memory_space<vmem>>, %arg9: memref<256x32xf32, #tpu.memory_space<vmem>>, %arg10: memref<8x32x32xf32, #tpu.memory_space<vmem>>) attributes {dimension_semantics = [#tpu.dimension_semantics<parallel>], iteration_bounds = array<i64: 1>, scalar_prefetch = 0 : i64, scratch_operands = 0 : i64, tpu.core_type = #tpu.core_type<tc>, window_params = [{transform_indices = @transform_0, window_bounds = array<i64: 8, 32, 32>}, {transform_indices = @transform_1, window_bounds = array<i64: 8, 32, 32>}, {transform_indices = @transform_2, window_bounds = array<i64: 8, 32, 32>}, {transform_indices = @transform_3, window_bounds = array<i64: 32, 32>}, {pipeline_mode = #tpu.pipeline_mode<synchronous>, transform_indices = @transform_4, window_bounds = array<i64: 96, 32>}, {pipeline_mode = #tpu.pipeline_mode<synchronous>, transform_indices = @transform_5, window_bounds = array<i64: 3, 32, 512>}, {pipeline_mode = #tpu.pipeline_mode<synchronous>, transform_indices = @transform_6, window_bounds = array<i64: 3, 32, 256>}, {pipeline_mode = #tpu.pipeline_mode<synchronous>, transform_indices = @transform_7, window_bounds = array<i64: 32, 256>}, {pipeline_mode = #tpu.pipeline_mode<synchronous>, transform_indices = @transform_8, window_bounds = array<i64: 256, 32>}, {transform_indices = @transform_9, window_bounds = array<i64: 8, 32, 32>}]} {
    %c0 = arith.constant 0 : index
    %c0_0 = arith.constant 0 : index
    %0 = vector.load %arg5[%c0, %c0_0] : memref<96x32xf32, #tpu.memory_space<vmem>>, vector<96x32xf32>
    %c0_1 = arith.constant 0 : index
    %c0_2 = arith.constant 0 : index
    %1 = vector.load %arg8[%c0_1, %c0_2] : memref<32x256xf32, #tpu.memory_space<vmem>>, vector<32x256xf32>
    %c0_3 = arith.constant 0 : index
    %c0_4 = arith.constant 0 : index
    %2 = vector.load %arg4[%c0_3, %c0_4] : memref<32x32xf32, #tpu.memory_space<vmem>>, vector<32x32xf32>
    %c0_i32 = arith.constant 0 : i32
    %cst = arith.constant dense<0.000000e+00> : vector<96x32xf32>
    %3 = tpu.matmul %0, %2, %cst {dimension_numbers = #tpu.dot_dimension_numbers<[1], [0], [0], [1], [0, 0, 1, 1], [], []>} : vector<96x32xf32>, vector<32x32xf32>, vector<96x32xf32> -> vector<96x32xf32>
    %4 = vector.extract_strided_slice %3 {offsets = [0, 0], sizes = [32, 32], strides = [1, 1]} : vector<96x32xf32> to vector<32x32xf32>
    %c0_5 = arith.constant 0 : index
    %c0_6 = arith.constant 0 : index
    %c0_7 = arith.constant 0 : index
    %5 = vector.load %arg6[%c0_5, %c0_6, %c0_7] : memref<3x32x512xf32, #tpu.memory_space<vmem>>, vector<1x32x512xf32>
    %6 = vector.shape_cast %5 : vector<1x32x512xf32> to vector<32x512xf32>
    %cst_8 = arith.constant dense<0.000000e+00> : vector<32x512xf32>
    %7 = tpu.matmul %4, %6, %cst_8 {dimension_numbers = #tpu.dot_dimension_numbers<[1], [0], [0], [1], [0, 0, 1, 1], [], []>} : vector<32x32xf32>, vector<32x512xf32>, vector<32x512xf32> -> vector<32x512xf32>
    %8 = vector.extract_strided_slice %3 {offsets = [32, 0], sizes = [32, 32], strides = [1, 1]} : vector<96x32xf32> to vector<32x32xf32>
    %c1 = arith.constant 1 : index
    %c0_9 = arith.constant 0 : index
    %c0_10 = arith.constant 0 : index
    %9 = vector.load %arg6[%c1, %c0_9, %c0_10] : memref<3x32x512xf32, #tpu.memory_space<vmem>>, vector<1x32x512xf32>
    %10 = vector.shape_cast %9 : vector<1x32x512xf32> to vector<32x512xf32>
    %cst_11 = arith.constant dense<0.000000e+00> : vector<32x512xf32>
    %11 = tpu.matmul %8, %10, %cst_11 {dimension_numbers = #tpu.dot_dimension_numbers<[1], [0], [0], [1], [0, 0, 1, 1], [], []>} : vector<32x32xf32>, vector<32x512xf32>, vector<32x512xf32> -> vector<32x512xf32>
    %12 = arith.addf %7, %11 : vector<32x512xf32>
    %13 = vector.extract_strided_slice %3 {offsets = [64, 0], sizes = [32, 32], strides = [1, 1]} : vector<96x32xf32> to vector<32x32xf32>
    %c2 = arith.constant 2 : index
    %c0_12 = arith.constant 0 : index
    %c0_13 = arith.constant 0 : index
    %14 = vector.load %arg6[%c2, %c0_12, %c0_13] : memref<3x32x512xf32, #tpu.memory_space<vmem>>, vector<1x32x512xf32>
    %15 = vector.shape_cast %14 : vector<1x32x512xf32> to vector<32x512xf32>
    %cst_14 = arith.constant dense<0.000000e+00> : vector<32x512xf32>
    %16 = tpu.matmul %13, %15, %cst_14 {dimension_numbers = #tpu.dot_dimension_numbers<[1], [0], [0], [1], [0, 0, 1, 1], [], []>} : vector<32x32xf32>, vector<32x512xf32>, vector<32x512xf32> -> vector<32x512xf32>
    %17 = arith.addf %12, %16 : vector<32x512xf32>
    %c0_15 = arith.constant 0 : index
    %c0_16 = arith.constant 0 : index
    %18 = vector.load %arg9[%c0_15, %c0_16] : memref<256x32xf32, #tpu.memory_space<vmem>>, vector<256x32xf32>
    %19 = vector.extract_strided_slice %17 {offsets = [0, 0], sizes = [32, 256], strides = [1, 1]} : vector<32x512xf32> to vector<32x256xf32>
    %20 = arith.mulf %19, %1 : vector<32x256xf32>
    %cst_17 = arith.constant dense<0.000000e+00> : vector<32x32xf32>
    %21 = tpu.matmul %20, %18, %cst_17 {dimension_numbers = #tpu.dot_dimension_numbers<[1], [0], [0], [1], [0, 0, 1, 1], [], []>} : vector<32x256xf32>, vector<256x32xf32>, vector<32x32xf32> -> vector<32x32xf32>
    %22 = vector.extract_strided_slice %17 {offsets = [0, 256], sizes = [32, 256], strides = [1, 1]} : vector<32x512xf32> to vector<32x256xf32>
    %23 = arith.mulf %22, %1 : vector<32x256xf32>
    %cst_18 = arith.constant dense<0.000000e+00> : vector<32x32xf32>
    %24 = tpu.matmul %23, %18, %cst_18 {dimension_numbers = #tpu.dot_dimension_numbers<[1], [0], [0], [1], [0, 0, 1, 1], [], []>} : vector<32x256xf32>, vector<256x32xf32>, vector<32x32xf32> -> vector<32x32xf32>
    %25 = arith.index_cast %c0_i32 : i32 to index
    %c0_19 = arith.constant 0 : index
    %c0_20 = arith.constant 0 : index
    %26 = vector.load %arg1[%25, %c0_19, %c0_20] : memref<8x32x32xf32, #tpu.memory_space<vmem>>, vector<1x32x32xf32>
    %27 = vector.shape_cast %26 : vector<1x32x32xf32> to vector<32x32xf32>
    %28 = arith.addf %27, %21 : vector<32x32xf32>
    %29 = arith.negf %28 : vector<32x32xf32>
    %30 = math.exp %29 : vector<32x32xf32>
    %cst_21 = arith.constant 1.000000e+00 : f32
    %31 = vector.broadcast %cst_21 : f32 to vector<32x32xf32>
    %32 = arith.addf %31, %30 : vector<32x32xf32>
    %33 = arith.divf %31, %32 : vector<32x32xf32>
    %34 = arith.index_cast %c0_i32 : i32 to index
    %c0_22 = arith.constant 0 : index
    %c0_23 = arith.constant 0 : index
    %35 = vector.load %arg2[%34, %c0_22, %c0_23] : memref<8x32x32xf32, #tpu.memory_space<vmem>>, vector<1x32x32xf32>
    %36 = vector.shape_cast %35 : vector<1x32x32xf32> to vector<32x32xf32>
    %37 = arith.addf %36, %24 : vector<32x32xf32>
    %38 = arith.negf %37 : vector<32x32xf32>
    %39 = math.exp %38 : vector<32x32xf32>
    %cst_24 = arith.constant 1.000000e+00 : f32
    %40 = vector.broadcast %cst_24 : f32 to vector<32x32xf32>
    %41 = arith.addf %40, %39 : vector<32x32xf32>
    %42 = arith.divf %40, %41 : vector<32x32xf32>
    %43 = arith.mulf %33, %2 : vector<32x32xf32>
    %cst_25 = arith.constant dense<0.000000e+00> : vector<96x32xf32>
    %44 = tpu.matmul %0, %43, %cst_25 {dimension_numbers = #tpu.dot_dimension_numbers<[1], [0], [0], [1], [0, 0, 1, 1], [], []>} : vector<96x32xf32>, vector<32x32xf32>, vector<96x32xf32> -> vector<96x32xf32>
    %45 = vector.extract_strided_slice %44 {offsets = [0, 0], sizes = [32, 32], strides = [1, 1]} : vector<96x32xf32> to vector<32x32xf32>
    %c0_26 = arith.constant 0 : index
    %c0_27 = arith.constant 0 : index
    %c0_28 = arith.constant 0 : index
    %46 = vector.load %arg7[%c0_26, %c0_27, %c0_28] : memref<3x32x256xf32, #tpu.memory_space<vmem>>, vector<1x32x256xf32>
    %47 = vector.shape_cast %46 : vector<1x32x256xf32> to vector<32x256xf32>
    %cst_29 = arith.constant dense<0.000000e+00> : vector<32x256xf32>
    %48 = tpu.matmul %45, %47, %cst_29 {dimension_numbers = #tpu.dot_dimension_numbers<[1], [0], [0], [1], [0, 0, 1, 1], [], []>} : vector<32x32xf32>, vector<32x256xf32>, vector<32x256xf32> -> vector<32x256xf32>
    %49 = vector.extract_strided_slice %44 {offsets = [32, 0], sizes = [32, 32], strides = [1, 1]} : vector<96x32xf32> to vector<32x32xf32>
    %c1_30 = arith.constant 1 : index
    %c0_31 = arith.constant 0 : index
    %c0_32 = arith.constant 0 : index
    %50 = vector.load %arg7[%c1_30, %c0_31, %c0_32] : memref<3x32x256xf32, #tpu.memory_space<vmem>>, vector<1x32x256xf32>
    %51 = vector.shape_cast %50 : vector<1x32x256xf32> to vector<32x256xf32>
    %cst_33 = arith.constant dense<0.000000e+00> : vector<32x256xf32>
    %52 = tpu.matmul %49, %51, %cst_33 {dimension_numbers = #tpu.dot_dimension_numbers<[1], [0], [0], [1], [0, 0, 1, 1], [], []>} : vector<32x32xf32>, vector<32x256xf32>, vector<32x256xf32> -> vector<32x256xf32>
    %53 = arith.addf %48, %52 : vector<32x256xf32>
    %54 = vector.extract_strided_slice %44 {offsets = [64, 0], sizes = [32, 32], strides = [1, 1]} : vector<96x32xf32> to vector<32x32xf32>
    %c2_34 = arith.constant 2 : index
    %c0_35 = arith.constant 0 : index
    %c0_36 = arith.constant 0 : index
    %55 = vector.load %arg7[%c2_34, %c0_35, %c0_36] : memref<3x32x256xf32, #tpu.memory_space<vmem>>, vector<1x32x256xf32>
    %56 = vector.shape_cast %55 : vector<1x32x256xf32> to vector<32x256xf32>
    %cst_37 = arith.constant dense<0.000000e+00> : vector<32x256xf32>
    %57 = tpu.matmul %54, %56, %cst_37 {dimension_numbers = #tpu.dot_dimension_numbers<[1], [0], [0], [1], [0, 0, 1, 1], [], []>} : vector<32x32xf32>, vector<32x256xf32>, vector<32x256xf32> -> vector<32x256xf32>
    %58 = arith.addf %53, %57 : vector<32x256xf32>
    %c0_38 = arith.constant 0 : index
    %c0_39 = arith.constant 0 : index
    %59 = vector.load %arg9[%c0_38, %c0_39] : memref<256x32xf32, #tpu.memory_space<vmem>>, vector<256x32xf32>
    %60 = arith.mulf %58, %1 : vector<32x256xf32>
    %cst_40 = arith.constant dense<0.000000e+00> : vector<32x32xf32>
    %61 = tpu.matmul %60, %59, %cst_40 {dimension_numbers = #tpu.dot_dimension_numbers<[1], [0], [0], [1], [0, 0, 1, 1], [], []>} : vector<32x256xf32>, vector<256x32xf32>, vector<32x32xf32> -> vector<32x32xf32>
    %62 = arith.index_cast %c0_i32 : i32 to index
    %c0_41 = arith.constant 0 : index
    %c0_42 = arith.constant 0 : index
    %63 = vector.load %arg3[%62, %c0_41, %c0_42] : memref<8x32x32xf32, #tpu.memory_space<vmem>>, vector<1x32x32xf32>
    %64 = vector.shape_cast %63 : vector<1x32x32xf32> to vector<32x32xf32>
    %65 = arith.addf %64, %61 : vector<32x32xf32>
    %66 = math.tanh %65 : vector<32x32xf32>
    %67 = arith.mulf %42, %2 : vector<32x32xf32>
    %cst_43 = arith.constant 1.000000e+00 : f32
    %68 = vector.broadcast %cst_43 : f32 to vector<32x32xf32>
    %69 = arith.subf %68, %42 : vector<32x32xf32>
    %70 = arith.mulf %69, %66 : vector<32x32xf32>
    %71 = arith.addf %67, %70 : vector<32x32xf32>
    %72 = arith.index_cast %c0_i32 : i32 to index
    %c0_44 = arith.constant 0 : index
    %c0_45 = arith.constant 0 : index
    %73 = vector.load %arg10[%72, %c0_44, %c0_45] : memref<8x32x32xf32, #tpu.memory_space<vmem>>, vector<1x32x32xf32>
    %74 = vector.shape_cast %73 : vector<1x32x32xf32> to vector<32x32xf32>
    %75 = vector.shape_cast %71 : vector<32x32xf32> to vector<1x32x32xf32>
    tpu.vector_store %arg10[%72, %c0_44, %c0_45], %75 {strides = array<i32>} : memref<8x32x32xf32, #tpu.memory_space<vmem>>, vector<1x32x32xf32>,
    %c1_i32 = arith.constant 1 : i32
    %cst_46 = arith.constant dense<0.000000e+00> : vector<96x32xf32>
    %76 = tpu.matmul %0, %71, %cst_46 {dimension_numbers = #tpu.dot_dimension_numbers<[1], [0], [0], [1], [0, 0, 1, 1], [], []>} : vector<96x32xf32>, vector<32x32xf32>, vector<96x32xf32> -> vector<96x32xf32>
    %77 = vector.extract_strided_slice %76 {offsets = [0, 0], sizes = [32, 32], strides = [1, 1]} : vector<96x32xf32> to vector<32x32xf32>
    %c0_47 = arith.constant 0 : index
    %c0_48 = arith.constant 0 : index
    %c0_49 = arith.constant 0 : index
    %78 = vector.load %arg6[%c0_47, %c0_48, %c0_49] : memref<3x32x512xf32, #tpu.memory_space<vmem>>, vector<1x32x512xf32>
    %79 = vector.shape_cast %78 : vector<1x32x512xf32> to vector<32x512xf32>
    %cst_50 = arith.constant dense<0.000000e+00> : vector<32x512xf32>
    %80 = tpu.matmul %77, %79, %cst_50 {dimension_numbers = #tpu.dot_dimension_numbers<[1], [0], [0], [1], [0, 0, 1, 1], [], []>} : vector<32x32xf32>, vector<32x512xf32>, vector<32x512xf32> -> vector<32x512xf32>
    %81 = vector.extract_strided_slice %76 {offsets = [32, 0], sizes = [32, 32], strides = [1, 1]} : vector<96x32xf32> to vector<32x32xf32>
    %c1_51 = arith.constant 1 : index
    %c0_52 = arith.constant 0 : index
    %c0_53 = arith.constant 0 : index
    %82 = vector.load %arg6[%c1_51, %c0_52, %c0_53] : memref<3x32x512xf32, #tpu.memory_space<vmem>>, vector<1x32x512xf32>
    %83 = vector.shape_cast %82 : vector<1x32x512xf32> to vector<32x512xf32>
    %cst_54 = arith.constant dense<0.000000e+00> : vector<32x512xf32>
    %84 = tpu.matmul %81, %83, %cst_54 {dimension_numbers = #tpu.dot_dimension_numbers<[1], [0], [0], [1], [0, 0, 1, 1], [], []>} : vector<32x32xf32>, vector<32x512xf32>, vector<32x512xf32> -> vector<32x512xf32>
    %85 = arith.addf %80, %84 : vector<32x512xf32>
    %86 = vector.extract_strided_slice %76 {offsets = [64, 0], sizes = [32, 32], strides = [1, 1]} : vector<96x32xf32> to vector<32x32xf32>
    %c2_55 = arith.constant 2 : index
    %c0_56 = arith.constant 0 : index
    %c0_57 = arith.constant 0 : index
    %87 = vector.load %arg6[%c2_55, %c0_56, %c0_57] : memref<3x32x512xf32, #tpu.memory_space<vmem>>, vector<1x32x512xf32>
    %88 = vector.shape_cast %87 : vector<1x32x512xf32> to vector<32x512xf32>
    %cst_58 = arith.constant dense<0.000000e+00> : vector<32x512xf32>
    %89 = tpu.matmul %86, %88, %cst_58 {dimension_numbers = #tpu.dot_dimension_numbers<[1], [0], [0], [1], [0, 0, 1, 1], [], []>} : vector<32x32xf32>, vector<32x512xf32>, vector<32x512xf32> -> vector<32x512xf32>
    %90 = arith.addf %85, %89 : vector<32x512xf32>
    %c0_59 = arith.constant 0 : index
    %c0_60 = arith.constant 0 : index
    %91 = vector.load %arg9[%c0_59, %c0_60] : memref<256x32xf32, #tpu.memory_space<vmem>>, vector<256x32xf32>
    %92 = vector.extract_strided_slice %90 {offsets = [0, 0], sizes = [32, 256], strides = [1, 1]} : vector<32x512xf32> to vector<32x256xf32>
    %93 = arith.mulf %92, %1 : vector<32x256xf32>
    %cst_61 = arith.constant dense<0.000000e+00> : vector<32x32xf32>
    %94 = tpu.matmul %93, %91, %cst_61 {dimension_numbers = #tpu.dot_dimension_numbers<[1], [0], [0], [1], [0, 0, 1, 1], [], []>} : vector<32x256xf32>, vector<256x32xf32>, vector<32x32xf32> -> vector<32x32xf32>
    %95 = vector.extract_strided_slice %90 {offsets = [0, 256], sizes = [32, 256], strides = [1, 1]} : vector<32x512xf32> to vector<32x256xf32>
    %96 = arith.mulf %95, %1 : vector<32x256xf32>
    %cst_62 = arith.constant dense<0.000000e+00> : vector<32x32xf32>
    %97 = tpu.matmul %96, %91, %cst_62 {dimension_numbers = #tpu.dot_dimension_numbers<[1], [0], [0], [1], [0, 0, 1, 1], [], []>} : vector<32x256xf32>, vector<256x32xf32>, vector<32x32xf32> -> vector<32x32xf32>
    %98 = arith.index_cast %c1_i32 : i32 to index
    %c0_63 = arith.constant 0 : index
    %c0_64 = arith.constant 0 : index
    %99 = vector.load %arg1[%98, %c0_63, %c0_64] : memref<8x32x32xf32, #tpu.memory_space<vmem>>, vector<1x32x32xf32>
    %100 = vector.shape_cast %99 : vector<1x32x32xf32> to vector<32x32xf32>
    %101 = arith.addf %100, %94 : vector<32x32xf32>
    %102 = arith.negf %101 : vector<32x32xf32>
    %103 = math.exp %102 : vector<32x32xf32>
    %cst_65 = arith.constant 1.000000e+00 : f32
    %104 = vector.broadcast %cst_65 : f32 to vector<32x32xf32>
    %105 = arith.addf %104, %103 : vector<32x32xf32>
    %106 = arith.divf %104, %105 : vector<32x32xf32>
    %107 = arith.index_cast %c1_i32 : i32 to index
    %c0_66 = arith.constant 0 : index
    %c0_67 = arith.constant 0 : index
    %108 = vector.load %arg2[%107, %c0_66, %c0_67] : memref<8x32x32xf32, #tpu.memory_space<vmem>>, vector<1x32x32xf32>
    %109 = vector.shape_cast %108 : vector<1x32x32xf32> to vector<32x32xf32>
    %110 = arith.addf %109, %97 : vector<32x32xf32>
    %111 = arith.negf %110 : vector<32x32xf32>
    %112 = math.exp %111 : vector<32x32xf32>
    %cst_68 = arith.constant 1.000000e+00 : f32
    %113 = vector.broadcast %cst_68 : f32 to vector<32x32xf32>
    %114 = arith.addf %113, %112 : vector<32x32xf32>
    %115 = arith.divf %113, %114 : vector<32x32xf32>
    %116 = arith.mulf %106, %71 : vector<32x32xf32>
    %cst_69 = arith.constant dense<0.000000e+00> : vector<96x32xf32>
    %117 = tpu.matmul %0, %116, %cst_69 {dimension_numbers = #tpu.dot_dimension_numbers<[1], [0], [0], [1], [0, 0, 1, 1], [], []>} : vector<96x32xf32>, vector<32x32xf32>, vector<96x32xf32> -> vector<96x32xf32>
    %118 = vector.extract_strided_slice %117 {offsets = [0, 0], sizes = [32, 32], strides = [1, 1]} : vector<96x32xf32> to vector<32x32xf32>
    %c0_70 = arith.constant 0 : index
    %c0_71 = arith.constant 0 : index
    %c0_72 = arith.constant 0 : index
    %119 = vector.load %arg7[%c0_70, %c0_71, %c0_72] : memref<3x32x256xf32, #tpu.memory_space<vmem>>, vector<1x32x256xf32>
    %120 = vector.shape_cast %119 : vector<1x32x256xf32> to vector<32x256xf32>
    %cst_73 = arith.constant dense<0.000000e+00> : vector<32x256xf32>
    %121 = tpu.matmul %118, %120, %cst_73 {dimension_numbers = #tpu.dot_dimension_numbers<[1], [0], [0], [1], [0, 0, 1, 1], [], []>} : vector<32x32xf32>, vector<32x256xf32>, vector<32x256xf32> -> vector<32x256xf32>
    %122 = vector.extract_strided_slice %117 {offsets = [32, 0], sizes = [32, 32], strides = [1, 1]} : vector<96x32xf32> to vector<32x32xf32>
    %c1_74 = arith.constant 1 : index
    %c0_75 = arith.constant 0 : index
    %c0_76 = arith.constant 0 : index
    %123 = vector.load %arg7[%c1_74, %c0_75, %c0_76] : memref<3x32x256xf32, #tpu.memory_space<vmem>>, vector<1x32x256xf32>
    %124 = vector.shape_cast %123 : vector<1x32x256xf32> to vector<32x256xf32>
    %cst_77 = arith.constant dense<0.000000e+00> : vector<32x256xf32>
    %125 = tpu.matmul %122, %124, %cst_77 {dimension_numbers = #tpu.dot_dimension_numbers<[1], [0], [0], [1], [0, 0, 1, 1], [], []>} : vector<32x32xf32>, vector<32x256xf32>, vector<32x256xf32> -> vector<32x256xf32>
    %126 = arith.addf %121, %125 : vector<32x256xf32>
    %127 = vector.extract_strided_slice %117 {offsets = [64, 0], sizes = [32, 32], strides = [1, 1]} : vector<96x32xf32> to vector<32x32xf32>
    %c2_78 = arith.constant 2 : index
    %c0_79 = arith.constant 0 : index
    %c0_80 = arith.constant 0 : index
    %128 = vector.load %arg7[%c2_78, %c0_79, %c0_80] : memref<3x32x256xf32, #tpu.memory_space<vmem>>, vector<1x32x256xf32>
    %129 = vector.shape_cast %128 : vector<1x32x256xf32> to vector<32x256xf32>
    %cst_81 = arith.constant dense<0.000000e+00> : vector<32x256xf32>
    %130 = tpu.matmul %127, %129, %cst_81 {dimension_numbers = #tpu.dot_dimension_numbers<[1], [0], [0], [1], [0, 0, 1, 1], [], []>} : vector<32x32xf32>, vector<32x256xf32>, vector<32x256xf32> -> vector<32x256xf32>
    %131 = arith.addf %126, %130 : vector<32x256xf32>
    %c0_82 = arith.constant 0 : index
    %c0_83 = arith.constant 0 : index
    %132 = vector.load %arg9[%c0_82, %c0_83] : memref<256x32xf32, #tpu.memory_space<vmem>>, vector<256x32xf32>
    %133 = arith.mulf %131, %1 : vector<32x256xf32>
    %cst_84 = arith.constant dense<0.000000e+00> : vector<32x32xf32>
    %134 = tpu.matmul %133, %132, %cst_84 {dimension_numbers = #tpu.dot_dimension_numbers<[1], [0], [0], [1], [0, 0, 1, 1], [], []>} : vector<32x256xf32>, vector<256x32xf32>, vector<32x32xf32> -> vector<32x32xf32>
    %135 = arith.index_cast %c1_i32 : i32 to index
    %c0_85 = arith.constant 0 : index
    %c0_86 = arith.constant 0 : index
    %136 = vector.load %arg3[%135, %c0_85, %c0_86] : memref<8x32x32xf32, #tpu.memory_space<vmem>>, vector<1x32x32xf32>
    %137 = vector.shape_cast %136 : vector<1x32x32xf32> to vector<32x32xf32>
    %138 = arith.addf %137, %134 : vector<32x32xf32>
    %139 = math.tanh %138 : vector<32x32xf32>
    %140 = arith.mulf %115, %71 : vector<32x32xf32>
    %cst_87 = arith.constant 1.000000e+00 : f32
    %141 = vector.broadcast %cst_87 : f32 to vector<32x32xf32>
    %142 = arith.subf %141, %115 : vector<32x32xf32>
    %143 = arith.mulf %142, %139 : vector<32x32xf32>
    %144 = arith.addf %140, %143 : vector<32x32xf32>
    %145 = arith.index_cast %c1_i32 : i32 to index
    %c0_88 = arith.constant 0 : index
    %c0_89 = arith.constant 0 : index
    %146 = vector.load %arg10[%145, %c0_88, %c0_89] : memref<8x32x32xf32, #tpu.memory_space<vmem>>, vector<1x32x32xf32>
    %147 = vector.shape_cast %146 : vector<1x32x32xf32> to vector<32x32xf32>
    %148 = vector.shape_cast %144 : vector<32x32xf32> to vector<1x32x32xf32>
    tpu.vector_store %arg10[%145, %c0_88, %c0_89], %148 {strides = array<i32>} : memref<8x32x32xf32, #tpu.memory_space<vmem>>, vector<1x32x32xf32>,
    %c2_i32 = arith.constant 2 : i32
    %cst_90 = arith.constant dense<0.000000e+00> : vector<96x32xf32>
    %149 = tpu.matmul %0, %144, %cst_90 {dimension_numbers = #tpu.dot_dimension_numbers<[1], [0], [0], [1], [0, 0, 1, 1], [], []>} : vector<96x32xf32>, vector<32x32xf32>, vector<96x32xf32> -> vector<96x32xf32>
    %150 = vector.extract_strided_slice %149 {offsets = [0, 0], sizes = [32, 32], strides = [1, 1]} : vector<96x32xf32> to vector<32x32xf32>
    %c0_91 = arith.constant 0 : index
    %c0_92 = arith.constant 0 : index
    %c0_93 = arith.constant 0 : index
    %151 = vector.load %arg6[%c0_91, %c0_92, %c0_93] : memref<3x32x512xf32, #tpu.memory_space<vmem>>, vector<1x32x512xf32>
    %152 = vector.shape_cast %151 : vector<1x32x512xf32> to vector<32x512xf32>
    %cst_94 = arith.constant dense<0.000000e+00> : vector<32x512xf32>
    %153 = tpu.matmul %150, %152, %cst_94 {dimension_numbers = #tpu.dot_dimension_numbers<[1], [0], [0], [1], [0, 0, 1, 1], [], []>} : vector<32x32xf32>, vector<32x512xf32>, vector<32x512xf32> -> vector<32x512xf32>
    %154 = vector.extract_strided_slice %149 {offsets = [32, 0], sizes = [32, 32], strides = [1, 1]} : vector<96x32xf32> to vector<32x32xf32>
    %c1_95 = arith.constant 1 : index
    %c0_96 = arith.constant 0 : index
    %c0_97 = arith.constant 0 : index
    %155 = vector.load %arg6[%c1_95, %c0_96, %c0_97] : memref<3x32x512xf32, #tpu.memory_space<vmem>>, vector<1x32x512xf32>
    %156 = vector.shape_cast %155 : vector<1x32x512xf32> to vector<32x512xf32>
    %cst_98 = arith.constant dense<0.000000e+00> : vector<32x512xf32>
    %157 = tpu.matmul %154, %156, %cst_98 {dimension_numbers = #tpu.dot_dimension_numbers<[1], [0], [0], [1], [0, 0, 1, 1], [], []>} : vector<32x32xf32>, vector<32x512xf32>, vector<32x512xf32> -> vector<32x512xf32>
    %158 = arith.addf %153, %157 : vector<32x512xf32>
    %159 = vector.extract_strided_slice %149 {offsets = [64, 0], sizes = [32, 32], strides = [1, 1]} : vector<96x32xf32> to vector<32x32xf32>
    %c2_99 = arith.constant 2 : index
    %c0_100 = arith.constant 0 : index
    %c0_101 = arith.constant 0 : index
    %160 = vector.load %arg6[%c2_99, %c0_100, %c0_101] : memref<3x32x512xf32, #tpu.memory_space<vmem>>, vector<1x32x512xf32>
    %161 = vector.shape_cast %160 : vector<1x32x512xf32> to vector<32x512xf32>
    %cst_102 = arith.constant dense<0.000000e+00> : vector<32x512xf32>
    %162 = tpu.matmul %159, %161, %cst_102 {dimension_numbers = #tpu.dot_dimension_numbers<[1], [0], [0], [1], [0, 0, 1, 1], [], []>} : vector<32x32xf32>, vector<32x512xf32>, vector<32x512xf32> -> vector<32x512xf32>
    %163 = arith.addf %158, %162 : vector<32x512xf32>
    %c0_103 = arith.constant 0 : index
    %c0_104 = arith.constant 0 : index
    %164 = vector.load %arg9[%c0_103, %c0_104] : memref<256x32xf32, #tpu.memory_space<vmem>>, vector<256x32xf32>
    %165 = vector.extract_strided_slice %163 {offsets = [0, 0], sizes = [32, 256], strides = [1, 1]} : vector<32x512xf32> to vector<32x256xf32>
    %166 = arith.mulf %165, %1 : vector<32x256xf32>
    %cst_105 = arith.constant dense<0.000000e+00> : vector<32x32xf32>
    %167 = tpu.matmul %166, %164, %cst_105 {dimension_numbers = #tpu.dot_dimension_numbers<[1], [0], [0], [1], [0, 0, 1, 1], [], []>} : vector<32x256xf32>, vector<256x32xf32>, vector<32x32xf32> -> vector<32x32xf32>
    %168 = vector.extract_strided_slice %163 {offsets = [0, 256], sizes = [32, 256], strides = [1, 1]} : vector<32x512xf32> to vector<32x256xf32>
    %169 = arith.mulf %168, %1 : vector<32x256xf32>
    %cst_106 = arith.constant dense<0.000000e+00> : vector<32x32xf32>
    %170 = tpu.matmul %169, %164, %cst_106 {dimension_numbers = #tpu.dot_dimension_numbers<[1], [0], [0], [1], [0, 0, 1, 1], [], []>} : vector<32x256xf32>, vector<256x32xf32>, vector<32x32xf32> -> vector<32x32xf32>
    %171 = arith.index_cast %c2_i32 : i32 to index
    %c0_107 = arith.constant 0 : index
    %c0_108 = arith.constant 0 : index
    %172 = vector.load %arg1[%171, %c0_107, %c0_108] : memref<8x32x32xf32, #tpu.memory_space<vmem>>, vector<1x32x32xf32>
    %173 = vector.shape_cast %172 : vector<1x32x32xf32> to vector<32x32xf32>
    %174 = arith.addf %173, %167 : vector<32x32xf32>
    %175 = arith.negf %174 : vector<32x32xf32>
    %176 = math.exp %175 : vector<32x32xf32>
    %cst_109 = arith.constant 1.000000e+00 : f32
    %177 = vector.broadcast %cst_109 : f32 to vector<32x32xf32>
    %178 = arith.addf %177, %176 : vector<32x32xf32>
    %179 = arith.divf %177, %178 : vector<32x32xf32>
    %180 = arith.index_cast %c2_i32 : i32 to index
    %c0_110 = arith.constant 0 : index
    %c0_111 = arith.constant 0 : index
    %181 = vector.load %arg2[%180, %c0_110, %c0_111] : memref<8x32x32xf32, #tpu.memory_space<vmem>>, vector<1x32x32xf32>
    %182 = vector.shape_cast %181 : vector<1x32x32xf32> to vector<32x32xf32>
    %183 = arith.addf %182, %170 : vector<32x32xf32>
    %184 = arith.negf %183 : vector<32x32xf32>
    %185 = math.exp %184 : vector<32x32xf32>
    %cst_112 = arith.constant 1.000000e+00 : f32
    %186 = vector.broadcast %cst_112 : f32 to vector<32x32xf32>
    %187 = arith.addf %186, %185 : vector<32x32xf32>
    %188 = arith.divf %186, %187 : vector<32x32xf32>
    %189 = arith.mulf %179, %144 : vector<32x32xf32>
    %cst_113 = arith.constant dense<0.000000e+00> : vector<96x32xf32>
    %190 = tpu.matmul %0, %189, %cst_113 {dimension_numbers = #tpu.dot_dimension_numbers<[1], [0], [0], [1], [0, 0, 1, 1], [], []>} : vector<96x32xf32>, vector<32x32xf32>, vector<96x32xf32> -> vector<96x32xf32>
    %191 = vector.extract_strided_slice %190 {offsets = [0, 0], sizes = [32, 32], strides = [1, 1]} : vector<96x32xf32> to vector<32x32xf32>
    %c0_114 = arith.constant 0 : index
    %c0_115 = arith.constant 0 : index
    %c0_116 = arith.constant 0 : index
    %192 = vector.load %arg7[%c0_114, %c0_115, %c0_116] : memref<3x32x256xf32, #tpu.memory_space<vmem>>, vector<1x32x256xf32>
    %193 = vector.shape_cast %192 : vector<1x32x256xf32> to vector<32x256xf32>
    %cst_117 = arith.constant dense<0.000000e+00> : vector<32x256xf32>
    %194 = tpu.matmul %191, %193, %cst_117 {dimension_numbers = #tpu.dot_dimension_numbers<[1], [0], [0], [1], [0, 0, 1, 1], [], []>} : vector<32x32xf32>, vector<32x256xf32>, vector<32x256xf32> -> vector<32x256xf32>
    %195 = vector.extract_strided_slice %190 {offsets = [32, 0], sizes = [32, 32], strides = [1, 1]} : vector<96x32xf32> to vector<32x32xf32>
    %c1_118 = arith.constant 1 : index
    %c0_119 = arith.constant 0 : index
    %c0_120 = arith.constant 0 : index
    %196 = vector.load %arg7[%c1_118, %c0_119, %c0_120] : memref<3x32x256xf32, #tpu.memory_space<vmem>>, vector<1x32x256xf32>
    %197 = vector.shape_cast %196 : vector<1x32x256xf32> to vector<32x256xf32>
    %cst_121 = arith.constant dense<0.000000e+00> : vector<32x256xf32>
    %198 = tpu.matmul %195, %197, %cst_121 {dimension_numbers = #tpu.dot_dimension_numbers<[1], [0], [0], [1], [0, 0, 1, 1], [], []>} : vector<32x32xf32>, vector<32x256xf32>, vector<32x256xf32> -> vector<32x256xf32>
    %199 = arith.addf %194, %198 : vector<32x256xf32>
    %200 = vector.extract_strided_slice %190 {offsets = [64, 0], sizes = [32, 32], strides = [1, 1]} : vector<96x32xf32> to vector<32x32xf32>
    %c2_122 = arith.constant 2 : index
    %c0_123 = arith.constant 0 : index
    %c0_124 = arith.constant 0 : index
    %201 = vector.load %arg7[%c2_122, %c0_123, %c0_124] : memref<3x32x256xf32, #tpu.memory_space<vmem>>, vector<1x32x256xf32>
    %202 = vector.shape_cast %201 : vector<1x32x256xf32> to vector<32x256xf32>
    %cst_125 = arith.constant dense<0.000000e+00> : vector<32x256xf32>
    %203 = tpu.matmul %200, %202, %cst_125 {dimension_numbers = #tpu.dot_dimension_numbers<[1], [0], [0], [1], [0, 0, 1, 1], [], []>} : vector<32x32xf32>, vector<32x256xf32>, vector<32x256xf32> -> vector<32x256xf32>
    %204 = arith.addf %199, %203 : vector<32x256xf32>
    %c0_126 = arith.constant 0 : index
    %c0_127 = arith.constant 0 : index
    %205 = vector.load %arg9[%c0_126, %c0_127] : memref<256x32xf32, #tpu.memory_space<vmem>>, vector<256x32xf32>
    %206 = arith.mulf %204, %1 : vector<32x256xf32>
    %cst_128 = arith.constant dense<0.000000e+00> : vector<32x32xf32>
    %207 = tpu.matmul %206, %205, %cst_128 {dimension_numbers = #tpu.dot_dimension_numbers<[1], [0], [0], [1], [0, 0, 1, 1], [], []>} : vector<32x256xf32>, vector<256x32xf32>, vector<32x32xf32> -> vector<32x32xf32>
    %208 = arith.index_cast %c2_i32 : i32 to index
    %c0_129 = arith.constant 0 : index
    %c0_130 = arith.constant 0 : index
    %209 = vector.load %arg3[%208, %c0_129, %c0_130] : memref<8x32x32xf32, #tpu.memory_space<vmem>>, vector<1x32x32xf32>
    %210 = vector.shape_cast %209 : vector<1x32x32xf32> to vector<32x32xf32>
    %211 = arith.addf %210, %207 : vector<32x32xf32>
    %212 = math.tanh %211 : vector<32x32xf32>
    %213 = arith.mulf %188, %144 : vector<32x32xf32>
    %cst_131 = arith.constant 1.000000e+00 : f32
    %214 = vector.broadcast %cst_131 : f32 to vector<32x32xf32>
    %215 = arith.subf %214, %188 : vector<32x32xf32>
    %216 = arith.mulf %215, %212 : vector<32x32xf32>
    %217 = arith.addf %213, %216 : vector<32x32xf32>
    %218 = arith.index_cast %c2_i32 : i32 to index
    %c0_132 = arith.constant 0 : index
    %c0_133 = arith.constant 0 : index
    %219 = vector.load %arg10[%218, %c0_132, %c0_133] : memref<8x32x32xf32, #tpu.memory_space<vmem>>, vector<1x32x32xf32>
    %220 = vector.shape_cast %219 : vector<1x32x32xf32> to vector<32x32xf32>
    %221 = vector.shape_cast %217 : vector<32x32xf32> to vector<1x32x32xf32>
    tpu.vector_store %arg10[%218, %c0_132, %c0_133], %221 {strides = array<i32>} : memref<8x32x32xf32, #tpu.memory_space<vmem>>, vector<1x32x32xf32>,
    %c3_i32 = arith.constant 3 : i32
    %cst_134 = arith.constant dense<0.000000e+00> : vector<96x32xf32>
    %222 = tpu.matmul %0, %217, %cst_134 {dimension_numbers = #tpu.dot_dimension_numbers<[1], [0], [0], [1], [0, 0, 1, 1], [], []>} : vector<96x32xf32>, vector<32x32xf32>, vector<96x32xf32> -> vector<96x32xf32>
    %223 = vector.extract_strided_slice %222 {offsets = [0, 0], sizes = [32, 32], strides = [1, 1]} : vector<96x32xf32> to vector<32x32xf32>
    %c0_135 = arith.constant 0 : index
    %c0_136 = arith.constant 0 : index
    %c0_137 = arith.constant 0 : index
    %224 = vector.load %arg6[%c0_135, %c0_136, %c0_137] : memref<3x32x512xf32, #tpu.memory_space<vmem>>, vector<1x32x512xf32>
    %225 = vector.shape_cast %224 : vector<1x32x512xf32> to vector<32x512xf32>
    %cst_138 = arith.constant dense<0.000000e+00> : vector<32x512xf32>
    %226 = tpu.matmul %223, %225, %cst_138 {dimension_numbers = #tpu.dot_dimension_numbers<[1], [0], [0], [1], [0, 0, 1, 1], [], []>} : vector<32x32xf32>, vector<32x512xf32>, vector<32x512xf32> -> vector<32x512xf32>
    %227 = vector.extract_strided_slice %222 {offsets = [32, 0], sizes = [32, 32], strides = [1, 1]} : vector<96x32xf32> to vector<32x32xf32>
    %c1_139 = arith.constant 1 : index
    %c0_140 = arith.constant 0 : index
    %c0_141 = arith.constant 0 : index
    %228 = vector.load %arg6[%c1_139, %c0_140, %c0_141] : memref<3x32x512xf32, #tpu.memory_space<vmem>>, vector<1x32x512xf32>
    %229 = vector.shape_cast %228 : vector<1x32x512xf32> to vector<32x512xf32>
    %cst_142 = arith.constant dense<0.000000e+00> : vector<32x512xf32>
    %230 = tpu.matmul %227, %229, %cst_142 {dimension_numbers = #tpu.dot_dimension_numbers<[1], [0], [0], [1], [0, 0, 1, 1], [], []>} : vector<32x32xf32>, vector<32x512xf32>, vector<32x512xf32> -> vector<32x512xf32>
    %231 = arith.addf %226, %230 : vector<32x512xf32>
    %232 = vector.extract_strided_slice %222 {offsets = [64, 0], sizes = [32, 32], strides = [1, 1]} : vector<96x32xf32> to vector<32x32xf32>
    %c2_143 = arith.constant 2 : index
    %c0_144 = arith.constant 0 : index
    %c0_145 = arith.constant 0 : index
    %233 = vector.load %arg6[%c2_143, %c0_144, %c0_145] : memref<3x32x512xf32, #tpu.memory_space<vmem>>, vector<1x32x512xf32>
    %234 = vector.shape_cast %233 : vector<1x32x512xf32> to vector<32x512xf32>
    %cst_146 = arith.constant dense<0.000000e+00> : vector<32x512xf32>
    %235 = tpu.matmul %232, %234, %cst_146 {dimension_numbers = #tpu.dot_dimension_numbers<[1], [0], [0], [1], [0, 0, 1, 1], [], []>} : vector<32x32xf32>, vector<32x512xf32>, vector<32x512xf32> -> vector<32x512xf32>
    %236 = arith.addf %231, %235 : vector<32x512xf32>
    %c0_147 = arith.constant 0 : index
    %c0_148 = arith.constant 0 : index
    %237 = vector.load %arg9[%c0_147, %c0_148] : memref<256x32xf32, #tpu.memory_space<vmem>>, vector<256x32xf32>
    %238 = vector.extract_strided_slice %236 {offsets = [0, 0], sizes = [32, 256], strides = [1, 1]} : vector<32x512xf32> to vector<32x256xf32>
    %239 = arith.mulf %238, %1 : vector<32x256xf32>
    %cst_149 = arith.constant dense<0.000000e+00> : vector<32x32xf32>
    %240 = tpu.matmul %239, %237, %cst_149 {dimension_numbers = #tpu.dot_dimension_numbers<[1], [0], [0], [1], [0, 0, 1, 1], [], []>} : vector<32x256xf32>, vector<256x32xf32>, vector<32x32xf32> -> vector<32x32xf32>
    %241 = vector.extract_strided_slice %236 {offsets = [0, 256], sizes = [32, 256], strides = [1, 1]} : vector<32x512xf32> to vector<32x256xf32>
    %242 = arith.mulf %241, %1 : vector<32x256xf32>
    %cst_150 = arith.constant dense<0.000000e+00> : vector<32x32xf32>
    %243 = tpu.matmul %242, %237, %cst_150 {dimension_numbers = #tpu.dot_dimension_numbers<[1], [0], [0], [1], [0, 0, 1, 1], [], []>} : vector<32x256xf32>, vector<256x32xf32>, vector<32x32xf32> -> vector<32x32xf32>
    %244 = arith.index_cast %c3_i32 : i32 to index
    %c0_151 = arith.constant 0 : index
    %c0_152 = arith.constant 0 : index
    %245 = vector.load %arg1[%244, %c0_151, %c0_152] : memref<8x32x32xf32, #tpu.memory_space<vmem>>, vector<1x32x32xf32>
    %246 = vector.shape_cast %245 : vector<1x32x32xf32> to vector<32x32xf32>
    %247 = arith.addf %246, %240 : vector<32x32xf32>
    %248 = arith.negf %247 : vector<32x32xf32>
    %249 = math.exp %248 : vector<32x32xf32>
    %cst_153 = arith.constant 1.000000e+00 : f32
    %250 = vector.broadcast %cst_153 : f32 to vector<32x32xf32>
    %251 = arith.addf %250, %249 : vector<32x32xf32>
    %252 = arith.divf %250, %251 : vector<32x32xf32>
    %253 = arith.index_cast %c3_i32 : i32 to index
    %c0_154 = arith.constant 0 : index
    %c0_155 = arith.constant 0 : index
    %254 = vector.load %arg2[%253, %c0_154, %c0_155] : memref<8x32x32xf32, #tpu.memory_space<vmem>>, vector<1x32x32xf32>
    %255 = vector.shape_cast %254 : vector<1x32x32xf32> to vector<32x32xf32>
    %256 = arith.addf %255, %243 : vector<32x32xf32>
    %257 = arith.negf %256 : vector<32x32xf32>
    %258 = math.exp %257 : vector<32x32xf32>
    %cst_156 = arith.constant 1.000000e+00 : f32
    %259 = vector.broadcast %cst_156 : f32 to vector<32x32xf32>
    %260 = arith.addf %259, %258 : vector<32x32xf32>
    %261 = arith.divf %259, %260 : vector<32x32xf32>
    %262 = arith.mulf %252, %217 : vector<32x32xf32>
    %cst_157 = arith.constant dense<0.000000e+00> : vector<96x32xf32>
    %263 = tpu.matmul %0, %262, %cst_157 {dimension_numbers = #tpu.dot_dimension_numbers<[1], [0], [0], [1], [0, 0, 1, 1], [], []>} : vector<96x32xf32>, vector<32x32xf32>, vector<96x32xf32> -> vector<96x32xf32>
    %264 = vector.extract_strided_slice %263 {offsets = [0, 0], sizes = [32, 32], strides = [1, 1]} : vector<96x32xf32> to vector<32x32xf32>
    %c0_158 = arith.constant 0 : index
    %c0_159 = arith.constant 0 : index
    %c0_160 = arith.constant 0 : index
    %265 = vector.load %arg7[%c0_158, %c0_159, %c0_160] : memref<3x32x256xf32, #tpu.memory_space<vmem>>, vector<1x32x256xf32>
    %266 = vector.shape_cast %265 : vector<1x32x256xf32> to vector<32x256xf32>
    %cst_161 = arith.constant dense<0.000000e+00> : vector<32x256xf32>
    %267 = tpu.matmul %264, %266, %cst_161 {dimension_numbers = #tpu.dot_dimension_numbers<[1], [0], [0], [1], [0, 0, 1, 1], [], []>} : vector<32x32xf32>, vector<32x256xf32>, vector<32x256xf32> -> vector<32x256xf32>
    %268 = vector.extract_strided_slice %263 {offsets = [32, 0], sizes = [32, 32], strides = [1, 1]} : vector<96x32xf32> to vector<32x32xf32>
    %c1_162 = arith.constant 1 : index
    %c0_163 = arith.constant 0 : index
    %c0_164 = arith.constant 0 : index
    %269 = vector.load %arg7[%c1_162, %c0_163, %c0_164] : memref<3x32x256xf32, #tpu.memory_space<vmem>>, vector<1x32x256xf32>
    %270 = vector.shape_cast %269 : vector<1x32x256xf32> to vector<32x256xf32>
    %cst_165 = arith.constant dense<0.000000e+00> : vector<32x256xf32>
    %271 = tpu.matmul %268, %270, %cst_165 {dimension_numbers = #tpu.dot_dimension_numbers<[1], [0], [0], [1], [0, 0, 1, 1], [], []>} : vector<32x32xf32>, vector<32x256xf32>, vector<32x256xf32> -> vector<32x256xf32>
    %272 = arith.addf %267, %271 : vector<32x256xf32>
    %273 = vector.extract_strided_slice %263 {offsets = [64, 0], sizes = [32, 32], strides = [1, 1]} : vector<96x32xf32> to vector<32x32xf32>
    %c2_166 = arith.constant 2 : index
    %c0_167 = arith.constant 0 : index
    %c0_168 = arith.constant 0 : index
    %274 = vector.load %arg7[%c2_166, %c0_167, %c0_168] : memref<3x32x256xf32, #tpu.memory_space<vmem>>, vector<1x32x256xf32>
    %275 = vector.shape_cast %274 : vector<1x32x256xf32> to vector<32x256xf32>
    %cst_169 = arith.constant dense<0.000000e+00> : vector<32x256xf32>
    %276 = tpu.matmul %273, %275, %cst_169 {dimension_numbers = #tpu.dot_dimension_numbers<[1], [0], [0], [1], [0, 0, 1, 1], [], []>} : vector<32x32xf32>, vector<32x256xf32>, vector<32x256xf32> -> vector<32x256xf32>
    %277 = arith.addf %272, %276 : vector<32x256xf32>
    %c0_170 = arith.constant 0 : index
    %c0_171 = arith.constant 0 : index
    %278 = vector.load %arg9[%c0_170, %c0_171] : memref<256x32xf32, #tpu.memory_space<vmem>>, vector<256x32xf32>
    %279 = arith.mulf %277, %1 : vector<32x256xf32>
    %cst_172 = arith.constant dense<0.000000e+00> : vector<32x32xf32>
    %280 = tpu.matmul %279, %278, %cst_172 {dimension_numbers = #tpu.dot_dimension_numbers<[1], [0], [0], [1], [0, 0, 1, 1], [], []>} : vector<32x256xf32>, vector<256x32xf32>, vector<32x32xf32> -> vector<32x32xf32>
    %281 = arith.index_cast %c3_i32 : i32 to index
    %c0_173 = arith.constant 0 : index
    %c0_174 = arith.constant 0 : index
    %282 = vector.load %arg3[%281, %c0_173, %c0_174] : memref<8x32x32xf32, #tpu.memory_space<vmem>>, vector<1x32x32xf32>
    %283 = vector.shape_cast %282 : vector<1x32x32xf32> to vector<32x32xf32>
    %284 = arith.addf %283, %280 : vector<32x32xf32>
    %285 = math.tanh %284 : vector<32x32xf32>
    %286 = arith.mulf %261, %217 : vector<32x32xf32>
    %cst_175 = arith.constant 1.000000e+00 : f32
    %287 = vector.broadcast %cst_175 : f32 to vector<32x32xf32>
    %288 = arith.subf %287, %261 : vector<32x32xf32>
    %289 = arith.mulf %288, %285 : vector<32x32xf32>
    %290 = arith.addf %286, %289 : vector<32x32xf32>
    %291 = arith.index_cast %c3_i32 : i32 to index
    %c0_176 = arith.constant 0 : index
    %c0_177 = arith.constant 0 : index
    %292 = vector.load %arg10[%291, %c0_176, %c0_177] : memref<8x32x32xf32, #tpu.memory_space<vmem>>, vector<1x32x32xf32>
    %293 = vector.shape_cast %292 : vector<1x32x32xf32> to vector<32x32xf32>
    %294 = vector.shape_cast %290 : vector<32x32xf32> to vector<1x32x32xf32>
    tpu.vector_store %arg10[%291, %c0_176, %c0_177], %294 {strides = array<i32>} : memref<8x32x32xf32, #tpu.memory_space<vmem>>, vector<1x32x32xf32>,
    %c4_i32 = arith.constant 4 : i32
    %cst_178 = arith.constant dense<0.000000e+00> : vector<96x32xf32>
    %295 = tpu.matmul %0, %290, %cst_178 {dimension_numbers = #tpu.dot_dimension_numbers<[1], [0], [0], [1], [0, 0, 1, 1], [], []>} : vector<96x32xf32>, vector<32x32xf32>, vector<96x32xf32> -> vector<96x32xf32>
    %296 = vector.extract_strided_slice %295 {offsets = [0, 0], sizes = [32, 32], strides = [1, 1]} : vector<96x32xf32> to vector<32x32xf32>
    %c0_179 = arith.constant 0 : index
    %c0_180 = arith.constant 0 : index
    %c0_181 = arith.constant 0 : index
    %297 = vector.load %arg6[%c0_179, %c0_180, %c0_181] : memref<3x32x512xf32, #tpu.memory_space<vmem>>, vector<1x32x512xf32>
    %298 = vector.shape_cast %297 : vector<1x32x512xf32> to vector<32x512xf32>
    %cst_182 = arith.constant dense<0.000000e+00> : vector<32x512xf32>
    %299 = tpu.matmul %296, %298, %cst_182 {dimension_numbers = #tpu.dot_dimension_numbers<[1], [0], [0], [1], [0, 0, 1, 1], [], []>} : vector<32x32xf32>, vector<32x512xf32>, vector<32x512xf32> -> vector<32x512xf32>
    %300 = vector.extract_strided_slice %295 {offsets = [32, 0], sizes = [32, 32], strides = [1, 1]} : vector<96x32xf32> to vector<32x32xf32>
    %c1_183 = arith.constant 1 : index
    %c0_184 = arith.constant 0 : index
    %c0_185 = arith.constant 0 : index
    %301 = vector.load %arg6[%c1_183, %c0_184, %c0_185] : memref<3x32x512xf32, #tpu.memory_space<vmem>>, vector<1x32x512xf32>
    %302 = vector.shape_cast %301 : vector<1x32x512xf32> to vector<32x512xf32>
    %cst_186 = arith.constant dense<0.000000e+00> : vector<32x512xf32>
    %303 = tpu.matmul %300, %302, %cst_186 {dimension_numbers = #tpu.dot_dimension_numbers<[1], [0], [0], [1], [0, 0, 1, 1], [], []>} : vector<32x32xf32>, vector<32x512xf32>, vector<32x512xf32> -> vector<32x512xf32>
    %304 = arith.addf %299, %303 : vector<32x512xf32>
    %305 = vector.extract_strided_slice %295 {offsets = [64, 0], sizes = [32, 32], strides = [1, 1]} : vector<96x32xf32> to vector<32x32xf32>
    %c2_187 = arith.constant 2 : index
    %c0_188 = arith.constant 0 : index
    %c0_189 = arith.constant 0 : index
    %306 = vector.load %arg6[%c2_187, %c0_188, %c0_189] : memref<3x32x512xf32, #tpu.memory_space<vmem>>, vector<1x32x512xf32>
    %307 = vector.shape_cast %306 : vector<1x32x512xf32> to vector<32x512xf32>
    %cst_190 = arith.constant dense<0.000000e+00> : vector<32x512xf32>
    %308 = tpu.matmul %305, %307, %cst_190 {dimension_numbers = #tpu.dot_dimension_numbers<[1], [0], [0], [1], [0, 0, 1, 1], [], []>} : vector<32x32xf32>, vector<32x512xf32>, vector<32x512xf32> -> vector<32x512xf32>
    %309 = arith.addf %304, %308 : vector<32x512xf32>
    %c0_191 = arith.constant 0 : index
    %c0_192 = arith.constant 0 : index
    %310 = vector.load %arg9[%c0_191, %c0_192] : memref<256x32xf32, #tpu.memory_space<vmem>>, vector<256x32xf32>
    %311 = vector.extract_strided_slice %309 {offsets = [0, 0], sizes = [32, 256], strides = [1, 1]} : vector<32x512xf32> to vector<32x256xf32>
    %312 = arith.mulf %311, %1 : vector<32x256xf32>
    %cst_193 = arith.constant dense<0.000000e+00> : vector<32x32xf32>
    %313 = tpu.matmul %312, %310, %cst_193 {dimension_numbers = #tpu.dot_dimension_numbers<[1], [0], [0], [1], [0, 0, 1, 1], [], []>} : vector<32x256xf32>, vector<256x32xf32>, vector<32x32xf32> -> vector<32x32xf32>
    %314 = vector.extract_strided_slice %309 {offsets = [0, 256], sizes = [32, 256], strides = [1, 1]} : vector<32x512xf32> to vector<32x256xf32>
    %315 = arith.mulf %314, %1 : vector<32x256xf32>
    %cst_194 = arith.constant dense<0.000000e+00> : vector<32x32xf32>
    %316 = tpu.matmul %315, %310, %cst_194 {dimension_numbers = #tpu.dot_dimension_numbers<[1], [0], [0], [1], [0, 0, 1, 1], [], []>} : vector<32x256xf32>, vector<256x32xf32>, vector<32x32xf32> -> vector<32x32xf32>
    %317 = arith.index_cast %c4_i32 : i32 to index
    %c0_195 = arith.constant 0 : index
    %c0_196 = arith.constant 0 : index
    %318 = vector.load %arg1[%317, %c0_195, %c0_196] : memref<8x32x32xf32, #tpu.memory_space<vmem>>, vector<1x32x32xf32>
    %319 = vector.shape_cast %318 : vector<1x32x32xf32> to vector<32x32xf32>
    %320 = arith.addf %319, %313 : vector<32x32xf32>
    %321 = arith.negf %320 : vector<32x32xf32>
    %322 = math.exp %321 : vector<32x32xf32>
    %cst_197 = arith.constant 1.000000e+00 : f32
    %323 = vector.broadcast %cst_197 : f32 to vector<32x32xf32>
    %324 = arith.addf %323, %322 : vector<32x32xf32>
    %325 = arith.divf %323, %324 : vector<32x32xf32>
    %326 = arith.index_cast %c4_i32 : i32 to index
    %c0_198 = arith.constant 0 : index
    %c0_199 = arith.constant 0 : index
    %327 = vector.load %arg2[%326, %c0_198, %c0_199] : memref<8x32x32xf32, #tpu.memory_space<vmem>>, vector<1x32x32xf32>
    %328 = vector.shape_cast %327 : vector<1x32x32xf32> to vector<32x32xf32>
    %329 = arith.addf %328, %316 : vector<32x32xf32>
    %330 = arith.negf %329 : vector<32x32xf32>
    %331 = math.exp %330 : vector<32x32xf32>
    %cst_200 = arith.constant 1.000000e+00 : f32
    %332 = vector.broadcast %cst_200 : f32 to vector<32x32xf32>
    %333 = arith.addf %332, %331 : vector<32x32xf32>
    %334 = arith.divf %332, %333 : vector<32x32xf32>
    %335 = arith.mulf %325, %290 : vector<32x32xf32>
    %cst_201 = arith.constant dense<0.000000e+00> : vector<96x32xf32>
    %336 = tpu.matmul %0, %335, %cst_201 {dimension_numbers = #tpu.dot_dimension_numbers<[1], [0], [0], [1], [0, 0, 1, 1], [], []>} : vector<96x32xf32>, vector<32x32xf32>, vector<96x32xf32> -> vector<96x32xf32>
    %337 = vector.extract_strided_slice %336 {offsets = [0, 0], sizes = [32, 32], strides = [1, 1]} : vector<96x32xf32> to vector<32x32xf32>
    %c0_202 = arith.constant 0 : index
    %c0_203 = arith.constant 0 : index
    %c0_204 = arith.constant 0 : index
    %338 = vector.load %arg7[%c0_202, %c0_203, %c0_204] : memref<3x32x256xf32, #tpu.memory_space<vmem>>, vector<1x32x256xf32>
    %339 = vector.shape_cast %338 : vector<1x32x256xf32> to vector<32x256xf32>
    %cst_205 = arith.constant dense<0.000000e+00> : vector<32x256xf32>
    %340 = tpu.matmul %337, %339, %cst_205 {dimension_numbers = #tpu.dot_dimension_numbers<[1], [0], [0], [1], [0, 0, 1, 1], [], []>} : vector<32x32xf32>, vector<32x256xf32>, vector<32x256xf32> -> vector<32x256xf32>
    %341 = vector.extract_strided_slice %336 {offsets = [32, 0], sizes = [32, 32], strides = [1, 1]} : vector<96x32xf32> to vector<32x32xf32>
    %c1_206 = arith.constant 1 : index
    %c0_207 = arith.constant 0 : index
    %c0_208 = arith.constant 0 : index
    %342 = vector.load %arg7[%c1_206, %c0_207, %c0_208] : memref<3x32x256xf32, #tpu.memory_space<vmem>>, vector<1x32x256xf32>
    %343 = vector.shape_cast %342 : vector<1x32x256xf32> to vector<32x256xf32>
    %cst_209 = arith.constant dense<0.000000e+00> : vector<32x256xf32>
    %344 = tpu.matmul %341, %343, %cst_209 {dimension_numbers = #tpu.dot_dimension_numbers<[1], [0], [0], [1], [0, 0, 1, 1], [], []>} : vector<32x32xf32>, vector<32x256xf32>, vector<32x256xf32> -> vector<32x256xf32>
    %345 = arith.addf %340, %344 : vector<32x256xf32>
    %346 = vector.extract_strided_slice %336 {offsets = [64, 0], sizes = [32, 32], strides = [1, 1]} : vector<96x32xf32> to vector<32x32xf32>
    %c2_210 = arith.constant 2 : index
    %c0_211 = arith.constant 0 : index
    %c0_212 = arith.constant 0 : index
    %347 = vector.load %arg7[%c2_210, %c0_211, %c0_212] : memref<3x32x256xf32, #tpu.memory_space<vmem>>, vector<1x32x256xf32>
    %348 = vector.shape_cast %347 : vector<1x32x256xf32> to vector<32x256xf32>
    %cst_213 = arith.constant dense<0.000000e+00> : vector<32x256xf32>
    %349 = tpu.matmul %346, %348, %cst_213 {dimension_numbers = #tpu.dot_dimension_numbers<[1], [0], [0], [1], [0, 0, 1, 1], [], []>} : vector<32x32xf32>, vector<32x256xf32>, vector<32x256xf32> -> vector<32x256xf32>
    %350 = arith.addf %345, %349 : vector<32x256xf32>
    %c0_214 = arith.constant 0 : index
    %c0_215 = arith.constant 0 : index
    %351 = vector.load %arg9[%c0_214, %c0_215] : memref<256x32xf32, #tpu.memory_space<vmem>>, vector<256x32xf32>
    %352 = arith.mulf %350, %1 : vector<32x256xf32>
    %cst_216 = arith.constant dense<0.000000e+00> : vector<32x32xf32>
    %353 = tpu.matmul %352, %351, %cst_216 {dimension_numbers = #tpu.dot_dimension_numbers<[1], [0], [0], [1], [0, 0, 1, 1], [], []>} : vector<32x256xf32>, vector<256x32xf32>, vector<32x32xf32> -> vector<32x32xf32>
    %354 = arith.index_cast %c4_i32 : i32 to index
    %c0_217 = arith.constant 0 : index
    %c0_218 = arith.constant 0 : index
    %355 = vector.load %arg3[%354, %c0_217, %c0_218] : memref<8x32x32xf32, #tpu.memory_space<vmem>>, vector<1x32x32xf32>
    %356 = vector.shape_cast %355 : vector<1x32x32xf32> to vector<32x32xf32>
    %357 = arith.addf %356, %353 : vector<32x32xf32>
    %358 = math.tanh %357 : vector<32x32xf32>
    %359 = arith.mulf %334, %290 : vector<32x32xf32>
    %cst_219 = arith.constant 1.000000e+00 : f32
    %360 = vector.broadcast %cst_219 : f32 to vector<32x32xf32>
    %361 = arith.subf %360, %334 : vector<32x32xf32>
    %362 = arith.mulf %361, %358 : vector<32x32xf32>
    %363 = arith.addf %359, %362 : vector<32x32xf32>
    %364 = arith.index_cast %c4_i32 : i32 to index
    %c0_220 = arith.constant 0 : index
    %c0_221 = arith.constant 0 : index
    %365 = vector.load %arg10[%364, %c0_220, %c0_221] : memref<8x32x32xf32, #tpu.memory_space<vmem>>, vector<1x32x32xf32>
    %366 = vector.shape_cast %365 : vector<1x32x32xf32> to vector<32x32xf32>
    %367 = vector.shape_cast %363 : vector<32x32xf32> to vector<1x32x32xf32>
    tpu.vector_store %arg10[%364, %c0_220, %c0_221], %367 {strides = array<i32>} : memref<8x32x32xf32, #tpu.memory_space<vmem>>, vector<1x32x32xf32>,
    %c5_i32 = arith.constant 5 : i32
    %cst_222 = arith.constant dense<0.000000e+00> : vector<96x32xf32>
    %368 = tpu.matmul %0, %363, %cst_222 {dimension_numbers = #tpu.dot_dimension_numbers<[1], [0], [0], [1], [0, 0, 1, 1], [], []>} : vector<96x32xf32>, vector<32x32xf32>, vector<96x32xf32> -> vector<96x32xf32>
    %369 = vector.extract_strided_slice %368 {offsets = [0, 0], sizes = [32, 32], strides = [1, 1]} : vector<96x32xf32> to vector<32x32xf32>
    %c0_223 = arith.constant 0 : index
    %c0_224 = arith.constant 0 : index
    %c0_225 = arith.constant 0 : index
    %370 = vector.load %arg6[%c0_223, %c0_224, %c0_225] : memref<3x32x512xf32, #tpu.memory_space<vmem>>, vector<1x32x512xf32>
    %371 = vector.shape_cast %370 : vector<1x32x512xf32> to vector<32x512xf32>
    %cst_226 = arith.constant dense<0.000000e+00> : vector<32x512xf32>
    %372 = tpu.matmul %369, %371, %cst_226 {dimension_numbers = #tpu.dot_dimension_numbers<[1], [0], [0], [1], [0, 0, 1, 1], [], []>} : vector<32x32xf32>, vector<32x512xf32>, vector<32x512xf32> -> vector<32x512xf32>
    %373 = vector.extract_strided_slice %368 {offsets = [32, 0], sizes = [32, 32], strides = [1, 1]} : vector<96x32xf32> to vector<32x32xf32>
    %c1_227 = arith.constant 1 : index
    %c0_228 = arith.constant 0 : index
    %c0_229 = arith.constant 0 : index
    %374 = vector.load %arg6[%c1_227, %c0_228, %c0_229] : memref<3x32x512xf32, #tpu.memory_space<vmem>>, vector<1x32x512xf32>
    %375 = vector.shape_cast %374 : vector<1x32x512xf32> to vector<32x512xf32>
    %cst_230 = arith.constant dense<0.000000e+00> : vector<32x512xf32>
    %376 = tpu.matmul %373, %375, %cst_230 {dimension_numbers = #tpu.dot_dimension_numbers<[1], [0], [0], [1], [0, 0, 1, 1], [], []>} : vector<32x32xf32>, vector<32x512xf32>, vector<32x512xf32> -> vector<32x512xf32>
    %377 = arith.addf %372, %376 : vector<32x512xf32>
    %378 = vector.extract_strided_slice %368 {offsets = [64, 0], sizes = [32, 32], strides = [1, 1]} : vector<96x32xf32> to vector<32x32xf32>
    %c2_231 = arith.constant 2 : index
    %c0_232 = arith.constant 0 : index
    %c0_233 = arith.constant 0 : index
    %379 = vector.load %arg6[%c2_231, %c0_232, %c0_233] : memref<3x32x512xf32, #tpu.memory_space<vmem>>, vector<1x32x512xf32>
    %380 = vector.shape_cast %379 : vector<1x32x512xf32> to vector<32x512xf32>
    %cst_234 = arith.constant dense<0.000000e+00> : vector<32x512xf32>
    %381 = tpu.matmul %378, %380, %cst_234 {dimension_numbers = #tpu.dot_dimension_numbers<[1], [0], [0], [1], [0, 0, 1, 1], [], []>} : vector<32x32xf32>, vector<32x512xf32>, vector<32x512xf32> -> vector<32x512xf32>
    %382 = arith.addf %377, %381 : vector<32x512xf32>
    %c0_235 = arith.constant 0 : index
    %c0_236 = arith.constant 0 : index
    %383 = vector.load %arg9[%c0_235, %c0_236] : memref<256x32xf32, #tpu.memory_space<vmem>>, vector<256x32xf32>
    %384 = vector.extract_strided_slice %382 {offsets = [0, 0], sizes = [32, 256], strides = [1, 1]} : vector<32x512xf32> to vector<32x256xf32>
    %385 = arith.mulf %384, %1 : vector<32x256xf32>
    %cst_237 = arith.constant dense<0.000000e+00> : vector<32x32xf32>
    %386 = tpu.matmul %385, %383, %cst_237 {dimension_numbers = #tpu.dot_dimension_numbers<[1], [0], [0], [1], [0, 0, 1, 1], [], []>} : vector<32x256xf32>, vector<256x32xf32>, vector<32x32xf32> -> vector<32x32xf32>
    %387 = vector.extract_strided_slice %382 {offsets = [0, 256], sizes = [32, 256], strides = [1, 1]} : vector<32x512xf32> to vector<32x256xf32>
    %388 = arith.mulf %387, %1 : vector<32x256xf32>
    %cst_238 = arith.constant dense<0.000000e+00> : vector<32x32xf32>
    %389 = tpu.matmul %388, %383, %cst_238 {dimension_numbers = #tpu.dot_dimension_numbers<[1], [0], [0], [1], [0, 0, 1, 1], [], []>} : vector<32x256xf32>, vector<256x32xf32>, vector<32x32xf32> -> vector<32x32xf32>
    %390 = arith.index_cast %c5_i32 : i32 to index
    %c0_239 = arith.constant 0 : index
    %c0_240 = arith.constant 0 : index
    %391 = vector.load %arg1[%390, %c0_239, %c0_240] : memref<8x32x32xf32, #tpu.memory_space<vmem>>, vector<1x32x32xf32>
    %392 = vector.shape_cast %391 : vector<1x32x32xf32> to vector<32x32xf32>
    %393 = arith.addf %392, %386 : vector<32x32xf32>
    %394 = arith.negf %393 : vector<32x32xf32>
    %395 = math.exp %394 : vector<32x32xf32>
    %cst_241 = arith.constant 1.000000e+00 : f32
    %396 = vector.broadcast %cst_241 : f32 to vector<32x32xf32>
    %397 = arith.addf %396, %395 : vector<32x32xf32>
    %398 = arith.divf %396, %397 : vector<32x32xf32>
    %399 = arith.index_cast %c5_i32 : i32 to index
    %c0_242 = arith.constant 0 : index
    %c0_243 = arith.constant 0 : index
    %400 = vector.load %arg2[%399, %c0_242, %c0_243] : memref<8x32x32xf32, #tpu.memory_space<vmem>>, vector<1x32x32xf32>
    %401 = vector.shape_cast %400 : vector<1x32x32xf32> to vector<32x32xf32>
    %402 = arith.addf %401, %389 : vector<32x32xf32>
    %403 = arith.negf %402 : vector<32x32xf32>
    %404 = math.exp %403 : vector<32x32xf32>
    %cst_244 = arith.constant 1.000000e+00 : f32
    %405 = vector.broadcast %cst_244 : f32 to vector<32x32xf32>
    %406 = arith.addf %405, %404 : vector<32x32xf32>
    %407 = arith.divf %405, %406 : vector<32x32xf32>
    %408 = arith.mulf %398, %363 : vector<32x32xf32>
    %cst_245 = arith.constant dense<0.000000e+00> : vector<96x32xf32>
    %409 = tpu.matmul %0, %408, %cst_245 {dimension_numbers = #tpu.dot_dimension_numbers<[1], [0], [0], [1], [0, 0, 1, 1], [], []>} : vector<96x32xf32>, vector<32x32xf32>, vector<96x32xf32> -> vector<96x32xf32>
    %410 = vector.extract_strided_slice %409 {offsets = [0, 0], sizes = [32, 32], strides = [1, 1]} : vector<96x32xf32> to vector<32x32xf32>
    %c0_246 = arith.constant 0 : index
    %c0_247 = arith.constant 0 : index
    %c0_248 = arith.constant 0 : index
    %411 = vector.load %arg7[%c0_246, %c0_247, %c0_248] : memref<3x32x256xf32, #tpu.memory_space<vmem>>, vector<1x32x256xf32>
    %412 = vector.shape_cast %411 : vector<1x32x256xf32> to vector<32x256xf32>
    %cst_249 = arith.constant dense<0.000000e+00> : vector<32x256xf32>
    %413 = tpu.matmul %410, %412, %cst_249 {dimension_numbers = #tpu.dot_dimension_numbers<[1], [0], [0], [1], [0, 0, 1, 1], [], []>} : vector<32x32xf32>, vector<32x256xf32>, vector<32x256xf32> -> vector<32x256xf32>
    %414 = vector.extract_strided_slice %409 {offsets = [32, 0], sizes = [32, 32], strides = [1, 1]} : vector<96x32xf32> to vector<32x32xf32>
    %c1_250 = arith.constant 1 : index
    %c0_251 = arith.constant 0 : index
    %c0_252 = arith.constant 0 : index
    %415 = vector.load %arg7[%c1_250, %c0_251, %c0_252] : memref<3x32x256xf32, #tpu.memory_space<vmem>>, vector<1x32x256xf32>
    %416 = vector.shape_cast %415 : vector<1x32x256xf32> to vector<32x256xf32>
    %cst_253 = arith.constant dense<0.000000e+00> : vector<32x256xf32>
    %417 = tpu.matmul %414, %416, %cst_253 {dimension_numbers = #tpu.dot_dimension_numbers<[1], [0], [0], [1], [0, 0, 1, 1], [], []>} : vector<32x32xf32>, vector<32x256xf32>, vector<32x256xf32> -> vector<32x256xf32>
    %418 = arith.addf %413, %417 : vector<32x256xf32>
    %419 = vector.extract_strided_slice %409 {offsets = [64, 0], sizes = [32, 32], strides = [1, 1]} : vector<96x32xf32> to vector<32x32xf32>
    %c2_254 = arith.constant 2 : index
    %c0_255 = arith.constant 0 : index
    %c0_256 = arith.constant 0 : index
    %420 = vector.load %arg7[%c2_254, %c0_255, %c0_256] : memref<3x32x256xf32, #tpu.memory_space<vmem>>, vector<1x32x256xf32>
    %421 = vector.shape_cast %420 : vector<1x32x256xf32> to vector<32x256xf32>
    %cst_257 = arith.constant dense<0.000000e+00> : vector<32x256xf32>
    %422 = tpu.matmul %419, %421, %cst_257 {dimension_numbers = #tpu.dot_dimension_numbers<[1], [0], [0], [1], [0, 0, 1, 1], [], []>} : vector<32x32xf32>, vector<32x256xf32>, vector<32x256xf32> -> vector<32x256xf32>
    %423 = arith.addf %418, %422 : vector<32x256xf32>
    %c0_258 = arith.constant 0 : index
    %c0_259 = arith.constant 0 : index
    %424 = vector.load %arg9[%c0_258, %c0_259] : memref<256x32xf32, #tpu.memory_space<vmem>>, vector<256x32xf32>
    %425 = arith.mulf %423, %1 : vector<32x256xf32>
    %cst_260 = arith.constant dense<0.000000e+00> : vector<32x32xf32>
    %426 = tpu.matmul %425, %424, %cst_260 {dimension_numbers = #tpu.dot_dimension_numbers<[1], [0], [0], [1], [0, 0, 1, 1], [], []>} : vector<32x256xf32>, vector<256x32xf32>, vector<32x32xf32> -> vector<32x32xf32>
    %427 = arith.index_cast %c5_i32 : i32 to index
    %c0_261 = arith.constant 0 : index
    %c0_262 = arith.constant 0 : index
    %428 = vector.load %arg3[%427, %c0_261, %c0_262] : memref<8x32x32xf32, #tpu.memory_space<vmem>>, vector<1x32x32xf32>
    %429 = vector.shape_cast %428 : vector<1x32x32xf32> to vector<32x32xf32>
    %430 = arith.addf %429, %426 : vector<32x32xf32>
    %431 = math.tanh %430 : vector<32x32xf32>
    %432 = arith.mulf %407, %363 : vector<32x32xf32>
    %cst_263 = arith.constant 1.000000e+00 : f32
    %433 = vector.broadcast %cst_263 : f32 to vector<32x32xf32>
    %434 = arith.subf %433, %407 : vector<32x32xf32>
    %435 = arith.mulf %434, %431 : vector<32x32xf32>
    %436 = arith.addf %432, %435 : vector<32x32xf32>
    %437 = arith.index_cast %c5_i32 : i32 to index
    %c0_264 = arith.constant 0 : index
    %c0_265 = arith.constant 0 : index
    %438 = vector.load %arg10[%437, %c0_264, %c0_265] : memref<8x32x32xf32, #tpu.memory_space<vmem>>, vector<1x32x32xf32>
    %439 = vector.shape_cast %438 : vector<1x32x32xf32> to vector<32x32xf32>
    %440 = vector.shape_cast %436 : vector<32x32xf32> to vector<1x32x32xf32>
    tpu.vector_store %arg10[%437, %c0_264, %c0_265], %440 {strides = array<i32>} : memref<8x32x32xf32, #tpu.memory_space<vmem>>, vector<1x32x32xf32>,
    %c6_i32 = arith.constant 6 : i32
    %cst_266 = arith.constant dense<0.000000e+00> : vector<96x32xf32>
    %441 = tpu.matmul %0, %436, %cst_266 {dimension_numbers = #tpu.dot_dimension_numbers<[1], [0], [0], [1], [0, 0, 1, 1], [], []>} : vector<96x32xf32>, vector<32x32xf32>, vector<96x32xf32> -> vector<96x32xf32>
    %442 = vector.extract_strided_slice %441 {offsets = [0, 0], sizes = [32, 32], strides = [1, 1]} : vector<96x32xf32> to vector<32x32xf32>
    %c0_267 = arith.constant 0 : index
    %c0_268 = arith.constant 0 : index
    %c0_269 = arith.constant 0 : index
    %443 = vector.load %arg6[%c0_267, %c0_268, %c0_269] : memref<3x32x512xf32, #tpu.memory_space<vmem>>, vector<1x32x512xf32>
    %444 = vector.shape_cast %443 : vector<1x32x512xf32> to vector<32x512xf32>
    %cst_270 = arith.constant dense<0.000000e+00> : vector<32x512xf32>
    %445 = tpu.matmul %442, %444, %cst_270 {dimension_numbers = #tpu.dot_dimension_numbers<[1], [0], [0], [1], [0, 0, 1, 1], [], []>} : vector<32x32xf32>, vector<32x512xf32>, vector<32x512xf32> -> vector<32x512xf32>
    %446 = vector.extract_strided_slice %441 {offsets = [32, 0], sizes = [32, 32], strides = [1, 1]} : vector<96x32xf32> to vector<32x32xf32>
    %c1_271 = arith.constant 1 : index
    %c0_272 = arith.constant 0 : index
    %c0_273 = arith.constant 0 : index
    %447 = vector.load %arg6[%c1_271, %c0_272, %c0_273] : memref<3x32x512xf32, #tpu.memory_space<vmem>>, vector<1x32x512xf32>
    %448 = vector.shape_cast %447 : vector<1x32x512xf32> to vector<32x512xf32>
    %cst_274 = arith.constant dense<0.000000e+00> : vector<32x512xf32>
    %449 = tpu.matmul %446, %448, %cst_274 {dimension_numbers = #tpu.dot_dimension_numbers<[1], [0], [0], [1], [0, 0, 1, 1], [], []>} : vector<32x32xf32>, vector<32x512xf32>, vector<32x512xf32> -> vector<32x512xf32>
    %450 = arith.addf %445, %449 : vector<32x512xf32>
    %451 = vector.extract_strided_slice %441 {offsets = [64, 0], sizes = [32, 32], strides = [1, 1]} : vector<96x32xf32> to vector<32x32xf32>
    %c2_275 = arith.constant 2 : index
    %c0_276 = arith.constant 0 : index
    %c0_277 = arith.constant 0 : index
    %452 = vector.load %arg6[%c2_275, %c0_276, %c0_277] : memref<3x32x512xf32, #tpu.memory_space<vmem>>, vector<1x32x512xf32>
    %453 = vector.shape_cast %452 : vector<1x32x512xf32> to vector<32x512xf32>
    %cst_278 = arith.constant dense<0.000000e+00> : vector<32x512xf32>
    %454 = tpu.matmul %451, %453, %cst_278 {dimension_numbers = #tpu.dot_dimension_numbers<[1], [0], [0], [1], [0, 0, 1, 1], [], []>} : vector<32x32xf32>, vector<32x512xf32>, vector<32x512xf32> -> vector<32x512xf32>
    %455 = arith.addf %450, %454 : vector<32x512xf32>
    %c0_279 = arith.constant 0 : index
    %c0_280 = arith.constant 0 : index
    %456 = vector.load %arg9[%c0_279, %c0_280] : memref<256x32xf32, #tpu.memory_space<vmem>>, vector<256x32xf32>
    %457 = vector.extract_strided_slice %455 {offsets = [0, 0], sizes = [32, 256], strides = [1, 1]} : vector<32x512xf32> to vector<32x256xf32>
    %458 = arith.mulf %457, %1 : vector<32x256xf32>
    %cst_281 = arith.constant dense<0.000000e+00> : vector<32x32xf32>
    %459 = tpu.matmul %458, %456, %cst_281 {dimension_numbers = #tpu.dot_dimension_numbers<[1], [0], [0], [1], [0, 0, 1, 1], [], []>} : vector<32x256xf32>, vector<256x32xf32>, vector<32x32xf32> -> vector<32x32xf32>
    %460 = vector.extract_strided_slice %455 {offsets = [0, 256], sizes = [32, 256], strides = [1, 1]} : vector<32x512xf32> to vector<32x256xf32>
    %461 = arith.mulf %460, %1 : vector<32x256xf32>
    %cst_282 = arith.constant dense<0.000000e+00> : vector<32x32xf32>
    %462 = tpu.matmul %461, %456, %cst_282 {dimension_numbers = #tpu.dot_dimension_numbers<[1], [0], [0], [1], [0, 0, 1, 1], [], []>} : vector<32x256xf32>, vector<256x32xf32>, vector<32x32xf32> -> vector<32x32xf32>
    %463 = arith.index_cast %c6_i32 : i32 to index
    %c0_283 = arith.constant 0 : index
    %c0_284 = arith.constant 0 : index
    %464 = vector.load %arg1[%463, %c0_283, %c0_284] : memref<8x32x32xf32, #tpu.memory_space<vmem>>, vector<1x32x32xf32>
    %465 = vector.shape_cast %464 : vector<1x32x32xf32> to vector<32x32xf32>
    %466 = arith.addf %465, %459 : vector<32x32xf32>
    %467 = arith.negf %466 : vector<32x32xf32>
    %468 = math.exp %467 : vector<32x32xf32>
    %cst_285 = arith.constant 1.000000e+00 : f32
    %469 = vector.broadcast %cst_285 : f32 to vector<32x32xf32>
    %470 = arith.addf %469, %468 : vector<32x32xf32>
    %471 = arith.divf %469, %470 : vector<32x32xf32>
    %472 = arith.index_cast %c6_i32 : i32 to index
    %c0_286 = arith.constant 0 : index
    %c0_287 = arith.constant 0 : index
    %473 = vector.load %arg2[%472, %c0_286, %c0_287] : memref<8x32x32xf32, #tpu.memory_space<vmem>>, vector<1x32x32xf32>
    %474 = vector.shape_cast %473 : vector<1x32x32xf32> to vector<32x32xf32>
    %475 = arith.addf %474, %462 : vector<32x32xf32>
    %476 = arith.negf %475 : vector<32x32xf32>
    %477 = math.exp %476 : vector<32x32xf32>
    %cst_288 = arith.constant 1.000000e+00 : f32
    %478 = vector.broadcast %cst_288 : f32 to vector<32x32xf32>
    %479 = arith.addf %478, %477 : vector<32x32xf32>
    %480 = arith.divf %478, %479 : vector<32x32xf32>
    %481 = arith.mulf %471, %436 : vector<32x32xf32>
    %cst_289 = arith.constant dense<0.000000e+00> : vector<96x32xf32>
    %482 = tpu.matmul %0, %481, %cst_289 {dimension_numbers = #tpu.dot_dimension_numbers<[1], [0], [0], [1], [0, 0, 1, 1], [], []>} : vector<96x32xf32>, vector<32x32xf32>, vector<96x32xf32> -> vector<96x32xf32>
    %483 = vector.extract_strided_slice %482 {offsets = [0, 0], sizes = [32, 32], strides = [1, 1]} : vector<96x32xf32> to vector<32x32xf32>
    %c0_290 = arith.constant 0 : index
    %c0_291 = arith.constant 0 : index
    %c0_292 = arith.constant 0 : index
    %484 = vector.load %arg7[%c0_290, %c0_291, %c0_292] : memref<3x32x256xf32, #tpu.memory_space<vmem>>, vector<1x32x256xf32>
    %485 = vector.shape_cast %484 : vector<1x32x256xf32> to vector<32x256xf32>
    %cst_293 = arith.constant dense<0.000000e+00> : vector<32x256xf32>
    %486 = tpu.matmul %483, %485, %cst_293 {dimension_numbers = #tpu.dot_dimension_numbers<[1], [0], [0], [1], [0, 0, 1, 1], [], []>} : vector<32x32xf32>, vector<32x256xf32>, vector<32x256xf32> -> vector<32x256xf32>
    %487 = vector.extract_strided_slice %482 {offsets = [32, 0], sizes = [32, 32], strides = [1, 1]} : vector<96x32xf32> to vector<32x32xf32>
    %c1_294 = arith.constant 1 : index
    %c0_295 = arith.constant 0 : index
    %c0_296 = arith.constant 0 : index
    %488 = vector.load %arg7[%c1_294, %c0_295, %c0_296] : memref<3x32x256xf32, #tpu.memory_space<vmem>>, vector<1x32x256xf32>
    %489 = vector.shape_cast %488 : vector<1x32x256xf32> to vector<32x256xf32>
    %cst_297 = arith.constant dense<0.000000e+00> : vector<32x256xf32>
    %490 = tpu.matmul %487, %489, %cst_297 {dimension_numbers = #tpu.dot_dimension_numbers<[1], [0], [0], [1], [0, 0, 1, 1], [], []>} : vector<32x32xf32>, vector<32x256xf32>, vector<32x256xf32> -> vector<32x256xf32>
    %491 = arith.addf %486, %490 : vector<32x256xf32>
    %492 = vector.extract_strided_slice %482 {offsets = [64, 0], sizes = [32, 32], strides = [1, 1]} : vector<96x32xf32> to vector<32x32xf32>
    %c2_298 = arith.constant 2 : index
    %c0_299 = arith.constant 0 : index
    %c0_300 = arith.constant 0 : index
    %493 = vector.load %arg7[%c2_298, %c0_299, %c0_300] : memref<3x32x256xf32, #tpu.memory_space<vmem>>, vector<1x32x256xf32>
    %494 = vector.shape_cast %493 : vector<1x32x256xf32> to vector<32x256xf32>
    %cst_301 = arith.constant dense<0.000000e+00> : vector<32x256xf32>
    %495 = tpu.matmul %492, %494, %cst_301 {dimension_numbers = #tpu.dot_dimension_numbers<[1], [0], [0], [1], [0, 0, 1, 1], [], []>} : vector<32x32xf32>, vector<32x256xf32>, vector<32x256xf32> -> vector<32x256xf32>
    %496 = arith.addf %491, %495 : vector<32x256xf32>
    %c0_302 = arith.constant 0 : index
    %c0_303 = arith.constant 0 : index
    %497 = vector.load %arg9[%c0_302, %c0_303] : memref<256x32xf32, #tpu.memory_space<vmem>>, vector<256x32xf32>
    %498 = arith.mulf %496, %1 : vector<32x256xf32>
    %cst_304 = arith.constant dense<0.000000e+00> : vector<32x32xf32>
    %499 = tpu.matmul %498, %497, %cst_304 {dimension_numbers = #tpu.dot_dimension_numbers<[1], [0], [0], [1], [0, 0, 1, 1], [], []>} : vector<32x256xf32>, vector<256x32xf32>, vector<32x32xf32> -> vector<32x32xf32>
    %500 = arith.index_cast %c6_i32 : i32 to index
    %c0_305 = arith.constant 0 : index
    %c0_306 = arith.constant 0 : index
    %501 = vector.load %arg3[%500, %c0_305, %c0_306] : memref<8x32x32xf32, #tpu.memory_space<vmem>>, vector<1x32x32xf32>
    %502 = vector.shape_cast %501 : vector<1x32x32xf32> to vector<32x32xf32>
    %503 = arith.addf %502, %499 : vector<32x32xf32>
    %504 = math.tanh %503 : vector<32x32xf32>
    %505 = arith.mulf %480, %436 : vector<32x32xf32>
    %cst_307 = arith.constant 1.000000e+00 : f32
    %506 = vector.broadcast %cst_307 : f32 to vector<32x32xf32>
    %507 = arith.subf %506, %480 : vector<32x32xf32>
    %508 = arith.mulf %507, %504 : vector<32x32xf32>
    %509 = arith.addf %505, %508 : vector<32x32xf32>
    %510 = arith.index_cast %c6_i32 : i32 to index
    %c0_308 = arith.constant 0 : index
    %c0_309 = arith.constant 0 : index
    %511 = vector.load %arg10[%510, %c0_308, %c0_309] : memref<8x32x32xf32, #tpu.memory_space<vmem>>, vector<1x32x32xf32>
    %512 = vector.shape_cast %511 : vector<1x32x32xf32> to vector<32x32xf32>
    %513 = vector.shape_cast %509 : vector<32x32xf32> to vector<1x32x32xf32>
    tpu.vector_store %arg10[%510, %c0_308, %c0_309], %513 {strides = array<i32>} : memref<8x32x32xf32, #tpu.memory_space<vmem>>, vector<1x32x32xf32>,
    %c7_i32 = arith.constant 7 : i32
    %cst_310 = arith.constant dense<0.000000e+00> : vector<96x32xf32>
    %514 = tpu.matmul %0, %509, %cst_310 {dimension_numbers = #tpu.dot_dimension_numbers<[1], [0], [0], [1], [0, 0, 1, 1], [], []>} : vector<96x32xf32>, vector<32x32xf32>, vector<96x32xf32> -> vector<96x32xf32>
    %515 = vector.extract_strided_slice %514 {offsets = [0, 0], sizes = [32, 32], strides = [1, 1]} : vector<96x32xf32> to vector<32x32xf32>
    %c0_311 = arith.constant 0 : index
    %c0_312 = arith.constant 0 : index
    %c0_313 = arith.constant 0 : index
    %516 = vector.load %arg6[%c0_311, %c0_312, %c0_313] : memref<3x32x512xf32, #tpu.memory_space<vmem>>, vector<1x32x512xf32>
    %517 = vector.shape_cast %516 : vector<1x32x512xf32> to vector<32x512xf32>
    %cst_314 = arith.constant dense<0.000000e+00> : vector<32x512xf32>
    %518 = tpu.matmul %515, %517, %cst_314 {dimension_numbers = #tpu.dot_dimension_numbers<[1], [0], [0], [1], [0, 0, 1, 1], [], []>} : vector<32x32xf32>, vector<32x512xf32>, vector<32x512xf32> -> vector<32x512xf32>
    %519 = vector.extract_strided_slice %514 {offsets = [32, 0], sizes = [32, 32], strides = [1, 1]} : vector<96x32xf32> to vector<32x32xf32>
    %c1_315 = arith.constant 1 : index
    %c0_316 = arith.constant 0 : index
    %c0_317 = arith.constant 0 : index
    %520 = vector.load %arg6[%c1_315, %c0_316, %c0_317] : memref<3x32x512xf32, #tpu.memory_space<vmem>>, vector<1x32x512xf32>
    %521 = vector.shape_cast %520 : vector<1x32x512xf32> to vector<32x512xf32>
    %cst_318 = arith.constant dense<0.000000e+00> : vector<32x512xf32>
    %522 = tpu.matmul %519, %521, %cst_318 {dimension_numbers = #tpu.dot_dimension_numbers<[1], [0], [0], [1], [0, 0, 1, 1], [], []>} : vector<32x32xf32>, vector<32x512xf32>, vector<32x512xf32> -> vector<32x512xf32>
    %523 = arith.addf %518, %522 : vector<32x512xf32>
    %524 = vector.extract_strided_slice %514 {offsets = [64, 0], sizes = [32, 32], strides = [1, 1]} : vector<96x32xf32> to vector<32x32xf32>
    %c2_319 = arith.constant 2 : index
    %c0_320 = arith.constant 0 : index
    %c0_321 = arith.constant 0 : index
    %525 = vector.load %arg6[%c2_319, %c0_320, %c0_321] : memref<3x32x512xf32, #tpu.memory_space<vmem>>, vector<1x32x512xf32>
    %526 = vector.shape_cast %525 : vector<1x32x512xf32> to vector<32x512xf32>
    %cst_322 = arith.constant dense<0.000000e+00> : vector<32x512xf32>
    %527 = tpu.matmul %524, %526, %cst_322 {dimension_numbers = #tpu.dot_dimension_numbers<[1], [0], [0], [1], [0, 0, 1, 1], [], []>} : vector<32x32xf32>, vector<32x512xf32>, vector<32x512xf32> -> vector<32x512xf32>
    %528 = arith.addf %523, %527 : vector<32x512xf32>
    %c0_323 = arith.constant 0 : index
    %c0_324 = arith.constant 0 : index
    %529 = vector.load %arg9[%c0_323, %c0_324] : memref<256x32xf32, #tpu.memory_space<vmem>>, vector<256x32xf32>
    %530 = vector.extract_strided_slice %528 {offsets = [0, 0], sizes = [32, 256], strides = [1, 1]} : vector<32x512xf32> to vector<32x256xf32>
    %531 = arith.mulf %530, %1 : vector<32x256xf32>
    %cst_325 = arith.constant dense<0.000000e+00> : vector<32x32xf32>
    %532 = tpu.matmul %531, %529, %cst_325 {dimension_numbers = #tpu.dot_dimension_numbers<[1], [0], [0], [1], [0, 0, 1, 1], [], []>} : vector<32x256xf32>, vector<256x32xf32>, vector<32x32xf32> -> vector<32x32xf32>
    %533 = vector.extract_strided_slice %528 {offsets = [0, 256], sizes = [32, 256], strides = [1, 1]} : vector<32x512xf32> to vector<32x256xf32>
    %534 = arith.mulf %533, %1 : vector<32x256xf32>
    %cst_326 = arith.constant dense<0.000000e+00> : vector<32x32xf32>
    %535 = tpu.matmul %534, %529, %cst_326 {dimension_numbers = #tpu.dot_dimension_numbers<[1], [0], [0], [1], [0, 0, 1, 1], [], []>} : vector<32x256xf32>, vector<256x32xf32>, vector<32x32xf32> -> vector<32x32xf32>
    %536 = arith.index_cast %c7_i32 : i32 to index
    %c0_327 = arith.constant 0 : index
    %c0_328 = arith.constant 0 : index
    %537 = vector.load %arg1[%536, %c0_327, %c0_328] : memref<8x32x32xf32, #tpu.memory_space<vmem>>, vector<1x32x32xf32>
    %538 = vector.shape_cast %537 : vector<1x32x32xf32> to vector<32x32xf32>
    %539 = arith.addf %538, %532 : vector<32x32xf32>
    %540 = arith.negf %539 : vector<32x32xf32>
    %541 = math.exp %540 : vector<32x32xf32>
    %cst_329 = arith.constant 1.000000e+00 : f32
    %542 = vector.broadcast %cst_329 : f32 to vector<32x32xf32>
    %543 = arith.addf %542, %541 : vector<32x32xf32>
    %544 = arith.divf %542, %543 : vector<32x32xf32>
    %545 = arith.index_cast %c7_i32 : i32 to index
    %c0_330 = arith.constant 0 : index
    %c0_331 = arith.constant 0 : index
    %546 = vector.load %arg2[%545, %c0_330, %c0_331] : memref<8x32x32xf32, #tpu.memory_space<vmem>>, vector<1x32x32xf32>
    %547 = vector.shape_cast %546 : vector<1x32x32xf32> to vector<32x32xf32>
    %548 = arith.addf %547, %535 : vector<32x32xf32>
    %549 = arith.negf %548 : vector<32x32xf32>
    %550 = math.exp %549 : vector<32x32xf32>
    %cst_332 = arith.constant 1.000000e+00 : f32
    %551 = vector.broadcast %cst_332 : f32 to vector<32x32xf32>
    %552 = arith.addf %551, %550 : vector<32x32xf32>
    %553 = arith.divf %551, %552 : vector<32x32xf32>
    %554 = arith.mulf %544, %509 : vector<32x32xf32>
    %cst_333 = arith.constant dense<0.000000e+00> : vector<96x32xf32>
    %555 = tpu.matmul %0, %554, %cst_333 {dimension_numbers = #tpu.dot_dimension_numbers<[1], [0], [0], [1], [0, 0, 1, 1], [], []>} : vector<96x32xf32>, vector<32x32xf32>, vector<96x32xf32> -> vector<96x32xf32>
    %556 = vector.extract_strided_slice %555 {offsets = [0, 0], sizes = [32, 32], strides = [1, 1]} : vector<96x32xf32> to vector<32x32xf32>
    %c0_334 = arith.constant 0 : index
    %c0_335 = arith.constant 0 : index
    %c0_336 = arith.constant 0 : index
    %557 = vector.load %arg7[%c0_334, %c0_335, %c0_336] : memref<3x32x256xf32, #tpu.memory_space<vmem>>, vector<1x32x256xf32>
    %558 = vector.shape_cast %557 : vector<1x32x256xf32> to vector<32x256xf32>
    %cst_337 = arith.constant dense<0.000000e+00> : vector<32x256xf32>
    %559 = tpu.matmul %556, %558, %cst_337 {dimension_numbers = #tpu.dot_dimension_numbers<[1], [0], [0], [1], [0, 0, 1, 1], [], []>} : vector<32x32xf32>, vector<32x256xf32>, vector<32x256xf32> -> vector<32x256xf32>
    %560 = vector.extract_strided_slice %555 {offsets = [32, 0], sizes = [32, 32], strides = [1, 1]} : vector<96x32xf32> to vector<32x32xf32>
    %c1_338 = arith.constant 1 : index
    %c0_339 = arith.constant 0 : index
    %c0_340 = arith.constant 0 : index
    %561 = vector.load %arg7[%c1_338, %c0_339, %c0_340] : memref<3x32x256xf32, #tpu.memory_space<vmem>>, vector<1x32x256xf32>
    %562 = vector.shape_cast %561 : vector<1x32x256xf32> to vector<32x256xf32>
    %cst_341 = arith.constant dense<0.000000e+00> : vector<32x256xf32>
    %563 = tpu.matmul %560, %562, %cst_341 {dimension_numbers = #tpu.dot_dimension_numbers<[1], [0], [0], [1], [0, 0, 1, 1], [], []>} : vector<32x32xf32>, vector<32x256xf32>, vector<32x256xf32> -> vector<32x256xf32>
    %564 = arith.addf %559, %563 : vector<32x256xf32>
    %565 = vector.extract_strided_slice %555 {offsets = [64, 0], sizes = [32, 32], strides = [1, 1]} : vector<96x32xf32> to vector<32x32xf32>
    %c2_342 = arith.constant 2 : index
    %c0_343 = arith.constant 0 : index
    %c0_344 = arith.constant 0 : index
    %566 = vector.load %arg7[%c2_342, %c0_343, %c0_344] : memref<3x32x256xf32, #tpu.memory_space<vmem>>, vector<1x32x256xf32>
    %567 = vector.shape_cast %566 : vector<1x32x256xf32> to vector<32x256xf32>
    %cst_345 = arith.constant dense<0.000000e+00> : vector<32x256xf32>
    %568 = tpu.matmul %565, %567, %cst_345 {dimension_numbers = #tpu.dot_dimension_numbers<[1], [0], [0], [1], [0, 0, 1, 1], [], []>} : vector<32x32xf32>, vector<32x256xf32>, vector<32x256xf32> -> vector<32x256xf32>
    %569 = arith.addf %564, %568 : vector<32x256xf32>
    %c0_346 = arith.constant 0 : index
    %c0_347 = arith.constant 0 : index
    %570 = vector.load %arg9[%c0_346, %c0_347] : memref<256x32xf32, #tpu.memory_space<vmem>>, vector<256x32xf32>
    %571 = arith.mulf %569, %1 : vector<32x256xf32>
    %cst_348 = arith.constant dense<0.000000e+00> : vector<32x32xf32>
    %572 = tpu.matmul %571, %570, %cst_348 {dimension_numbers = #tpu.dot_dimension_numbers<[1], [0], [0], [1], [0, 0, 1, 1], [], []>} : vector<32x256xf32>, vector<256x32xf32>, vector<32x32xf32> -> vector<32x32xf32>
    %573 = arith.index_cast %c7_i32 : i32 to index
    %c0_349 = arith.constant 0 : index
    %c0_350 = arith.constant 0 : index
    %574 = vector.load %arg3[%573, %c0_349, %c0_350] : memref<8x32x32xf32, #tpu.memory_space<vmem>>, vector<1x32x32xf32>
    %575 = vector.shape_cast %574 : vector<1x32x32xf32> to vector<32x32xf32>
    %576 = arith.addf %575, %572 : vector<32x32xf32>
    %577 = math.tanh %576 : vector<32x32xf32>
    %578 = arith.mulf %553, %509 : vector<32x32xf32>
    %cst_351 = arith.constant 1.000000e+00 : f32
    %579 = vector.broadcast %cst_351 : f32 to vector<32x32xf32>
    %580 = arith.subf %579, %553 : vector<32x32xf32>
    %581 = arith.mulf %580, %577 : vector<32x32xf32>
    %582 = arith.addf %578, %581 : vector<32x32xf32>
    %583 = arith.index_cast %c7_i32 : i32 to index
    %c0_352 = arith.constant 0 : index
    %c0_353 = arith.constant 0 : index
    %584 = vector.load %arg10[%583, %c0_352, %c0_353] : memref<8x32x32xf32, #tpu.memory_space<vmem>>, vector<1x32x32xf32>
    %585 = vector.shape_cast %584 : vector<1x32x32xf32> to vector<32x32xf32>
    %586 = vector.shape_cast %582 : vector<32x32xf32> to vector<1x32x32xf32>
    tpu.vector_store %arg10[%583, %c0_352, %c0_353], %586 {strides = array<i32>} : memref<8x32x32xf32, #tpu.memory_space<vmem>>, vector<1x32x32xf32>,
    %c8_i32 = arith.constant 8 : i32
    return
  }
  func.func @transform_0(%arg0: i32) -> (i32, i32, i32) {
    %c0_i32 = arith.constant 0 : i32
    %c0_i32_0 = arith.constant 0 : i32
    %c0_i32_1 = arith.constant 0 : i32
    return %c0_i32, %arg0, %c0_i32_0 : i32, i32, i32
  }
  func.func @transform_1(%arg0: i32) -> (i32, i32, i32) {
    %c0_i32 = arith.constant 0 : i32
    %c0_i32_0 = arith.constant 0 : i32
    %c0_i32_1 = arith.constant 0 : i32
    return %c0_i32, %arg0, %c0_i32_0 : i32, i32, i32
  }
  func.func @transform_2(%arg0: i32) -> (i32, i32, i32) {
    %c0_i32 = arith.constant 0 : i32
    %c0_i32_0 = arith.constant 0 : i32
    %c0_i32_1 = arith.constant 0 : i32
    return %c0_i32, %arg0, %c0_i32_0 : i32, i32, i32
  }
  func.func @transform_3(%arg0: i32) -> (i32, i32) {
    %c0_i32 = arith.constant 0 : i32
    %c0_i32_0 = arith.constant 0 : i32
    return %arg0, %c0_i32 : i32, i32
  }
  func.func @transform_4(%arg0: i32) -> (i32, i32) {
    %c0_i32 = arith.constant 0 : i32
    %c0_i32_0 = arith.constant 0 : i32
    %c0_i32_1 = arith.constant 0 : i32
    return %c0_i32, %c0_i32_0 : i32, i32
  }
  func.func @transform_5(%arg0: i32) -> (i32, i32, i32) {
    %c0_i32 = arith.constant 0 : i32
    %c0_i32_0 = arith.constant 0 : i32
    %c0_i32_1 = arith.constant 0 : i32
    %c0_i32_2 = arith.constant 0 : i32
    return %c0_i32, %c0_i32_0, %c0_i32_1 : i32, i32, i32
  }
  func.func @transform_6(%arg0: i32) -> (i32, i32, i32) {
    %c0_i32 = arith.constant 0 : i32
    %c0_i32_0 = arith.constant 0 : i32
    %c0_i32_1 = arith.constant 0 : i32
    %c0_i32_2 = arith.constant 0 : i32
    return %c0_i32, %c0_i32_0, %c0_i32_1 : i32, i32, i32
  }
  func.func @transform_7(%arg0: i32) -> (i32, i32) {
    %c0_i32 = arith.constant 0 : i32
    %c0_i32_0 = arith.constant 0 : i32
    %c0_i32_1 = arith.constant 0 : i32
    return %c0_i32, %c0_i32_0 : i32, i32
  }
  func.func @transform_8(%arg0: i32) -> (i32, i32) {
    %c0_i32 = arith.constant 0 : i32
    %c0_i32_0 = arith.constant 0 : i32
    %c0_i32_1 = arith.constant 0 : i32
    return %c0_i32, %c0_i32_0 : i32, i32
  }
  func.func @transform_9(%arg0: i32) -> (i32, i32, i32) {
    %c0_i32 = arith.constant 0 : i32
    %c0_i32_0 = arith.constant 0 : i32
    %c0_i32_1 = arith.constant 0 : i32
    return %c0_i32, %arg0, %c0_i32_0 : i32, i32, i32
  }
}

</mosaic_0001>

<bundles_post_ra>
// kernel: avwdcrnn_forward.2
= control target key start
LH: loop header
LB: loop body
LE: loop exit
PB: predicated region body
PF: predicated region fallthrough
CT: control target
= control target key end

     0   :  { %vm56_vm0 = vcmask 261120   ;;  %v23248_v32 = vmov 0.0   ;;  %s23238_s3 = inlined_call_operand.vmem [shape: f32[32,32], index: 3, kind: input, shape index: {}]   ;;  %s23239_s4 = inlined_call_operand.vmem [shape: f32[96,32], index: 4, kind: input, shape index: {}]   ;;  %s23240_s5 = inlined_call_operand.vmem [shape: f32[3,32,512], index: 5, kind: input, shape index: {}]   ;;  %s23241_s8 = inlined_call_operand.vmem [shape: f32[256,32], index: 8, kind: input, shape index: {}]   ;;  %s23242_s7 = inlined_call_operand.vmem [shape: f32[32,256], index: 7, kind: input, shape index: {}]   ;;  %s23243_s0 = inlined_call_operand.vmem [shape: f32[8,32,32], index: 0, kind: input, shape index: {}]   ;;  %s23244_s6 = inlined_call_operand.vmem [shape: f32[3,32,256], index: 6, kind: input, shape index: {}]   ;;  %s23245_s1 = inlined_call_operand.vmem [shape: f32[8,32,32], index: 1, kind: input, shape index: {}]   ;;  %s23246_s2 = inlined_call_operand.vmem [shape: f32[8,32,32], index: 2, kind: input, shape index: {}]   ;;  %s23247_s9 = inlined_call_operand.vmem [shape: f32[8,32,32], index: 9, kind: output, shape index: {}]  }
   0x1   :  { %v16465_v0 = vld [vmem:[%s23238_s3 + $0x18] sm:$0xff]  ;;  %v16470_v1 = vld [vmem:[%s23238_s3 + $0x10] sm:$0xff]  ;;  %v16479_v2 = vld [vmem:[%s23238_s3 + $0x8] sm:$0xff] }
   0x2   :  { %15521 = vmatprep.subr.mxu0 %v16465_v0  ;;  %15937 = vmatprep.subr.mxu1 %v16465_v0  ;;  %v16488_v3 = vld [vmem:[%s23238_s3] sm:$0xff]  ;;  %v16509_v6 = vld [vmem:[%s23239_s4 + $0x8] sm:$0xff]  ;;  %v16521_v8 = vld [vmem:[%s23239_s4 + $0x10] sm:$0xff] }
   0x3   :  { %15522 = vmatpush3.msra.mxu0 %v16465_v0  ;;  %15941 = vmatpush3.msra.mxu1 %v16465_v0  ;;  %v16497_v4 = vld [vmem:[%s23239_s4] sm:$0xff]  ;;  %v16514_v7 = vld [vmem:[%s23239_s4 + $0x28] sm:$0xff]  ;;  %v16526_v9 = vld [vmem:[%s23239_s4 + $0x30] sm:$0xff] }
   0x4   :  { %15523 = vmatprep.subr.mxu0 %v16470_v1  ;;  %15938 = vmatprep.subr.mxu1 %v16470_v1  ;;  %v16502_v5 = vld [vmem:[%s23239_s4 + $0x20] sm:$0xff]  ;;  %v13194_v10 = vld [vmem:[%s23240_s5 + $0xe8] sm:$0xff]  ;;  %v16553_v14 = vld [vmem:[%s23239_s4 + $0x18] sm:$0xff] }
   0x5   :  { %15524 = vmatpush3.msra.mxu0 %v16470_v1  ;;  %15942 = vmatpush3.msra.mxu1 %v16470_v1  ;;  %v231_v11 = vld [vmem:[%s23240_s5 + $0x68] sm:$0xff]  ;;  %v13193_v12 = vld [vmem:[%s23240_s5 + $0xe0] sm:$0xff]  ;;  %v16560_v15 = vld [vmem:[%s23239_s4 + $0x38] sm:$0xff] }
   0x6   :  { %15525 = vmatprep.subr.mxu0 %v16479_v2  ;;  %15939 = vmatprep.subr.mxu1 %v16479_v2  ;;  %v230_v13 = vld [vmem:[%s23240_s5 + $0x60] sm:$0xff]  ;;  %v13190_v17 = vld [vmem:[%s23240_s5 + $0xc8] sm:$0xff]  ;;  %v16599_v24 = vld [vmem:[%s23239_s4 + $0x50] sm:$0xff] }
   0x7   :  { %15526 = vmatpush3.msra.mxu0 %v16479_v2  ;;  %15943 = vmatpush3.msra.mxu1 %v16479_v2  ;;  %v16565_v16 = vld [vmem:[%s23239_s4 + $0x40] sm:$0xff]  ;;  %v227_v18 = vld [vmem:[%s23240_s5 + $0x48] sm:$0xff]  ;;  %v16608_v25 = vld [vmem:[%s23239_s4 + $0x58] sm:$0xff] }
   0x8   :  { %15527 = vmatprep.subr.mxu0 %v16488_v3  ;;  %15940 = vmatprep.subr.mxu1 %v16488_v3  ;;  %v13189_v19 = vld [vmem:[%s23240_s5 + $0xc0] sm:$0xff]  ;;  %v13186_v21 = vld [vmem:[%s23240_s5 + $0xa8] sm:$0xff]  ;;  %v13196_v33 = vld [vmem:[%s23240_s5 + $0xf8] sm:$0xff] }
   0x9   :  { %15528 = vmatpush3.msra.mxu0 %v16488_v3  ;;  %15944 = vmatpush3.msra.mxu1 %v16488_v3  ;;  %v226_v20 = vld [vmem:[%s23240_s5 + $0x40] sm:$0xff]  ;;  %v16591_v22 = vld [vmem:[%s23239_s4 + $0x48] sm:$0xff]  ;;  %v13195_v39 = vld [vmem:[%s23240_s5 + $0xf0] sm:$0xff] }
   0xa   :  { %15529 = vmatprep.mubr.msk.f32.mxu0 %vm56_vm0, %v16497_v4  ;;  %15535 = vmatprep.mubr.msk.f32.mxu1 %vm56_vm0, %v16502_v5  ;;  %v223_v23 = vld [vmem:[%s23240_s5 + $0x28] sm:$0xff]  ;;  %v13185_v26 = vld [vmem:[%s23240_s5 + $0xa0] sm:$0xff]  ;;  %v13192_v41 = vld [vmem:[%s23240_s5 + $0xd8] sm:$0xff] }
   0xb   :  { %15530 = vmatmul.mubr.msk.f32.vlgmr.msra.gmra.mxu0 %vm56_vm0, %v16509_v6  ;;  %15536 = vmatmul.mubr.msk.f32.vlgmr.msra.gmra.mxu1 %vm56_vm0, %v16514_v7  ;;  %v222_v27 = vld [vmem:[%s23240_s5 + $0x20] sm:$0xff]  ;;  %v13182_v28 = vld [vmem:[%s23240_s5 + $0x88] sm:$0xff]  ;;  %v13191_v45 = vld [vmem:[%s23240_s5 + $0xd0] sm:$0xff] }
   0xc   :  { %15532 = vmatprep.mubr.msk.f32.mxu0 %vm56_vm0, %v16521_v8  ;;  %15538 = vmatprep.mubr.msk.f32.mxu1 %vm56_vm0, %v16526_v9  ;;  %v219_v29 = vld [vmem:[%s23240_s5 + $0x8] sm:$0xff]  ;;  %v13181_v30 = vld [vmem:[%s23240_s5 + $0x80] sm:$0xff]  ;;  %v13188_v47 = vld [vmem:[%s23240_s5 + $0xb8] sm:$0xff] }
   0xd   :  { %287 = vmatprep.subr.mxu1 %v13194_v10  ;;  %477 = vmatprep.subr.mxu0 %v231_v11  ;;  %v218_v31 = vld [vmem:[%s23240_s5] sm:$0xff]  ;;  %v13226_v34 = vld [vmem:[%s23240_s5 + $0x168] sm:$0xff]  ;;  %v13187_v51 = vld [vmem:[%s23240_s5 + $0xb0] sm:$0xff] }
   0xe   :  { %288 = vmatpush1.msra.mxu1 %v13193_v12  ;;  %478 = vmatpush1.msra.mxu0 %v230_v13  ;;  %v13225_v40 = vld [vmem:[%s23240_s5 + $0x160] sm:$0xff]  ;;  %v13222_v42 = vld [vmem:[%s23240_s5 + $0x148] sm:$0xff]  ;;  %v13184_v53 = vld [vmem:[%s23240_s5 + $0x98] sm:$0xff] }
   0xf   :  { %15533 = vmatmul.mubr.msk.f32.gmra.mxu0 %vm56_vm0, %v16553_v14  ;;  %15539 = vmatmul.mubr.msk.f32.gmra.mxu1 %vm56_vm0, %v16560_v15  ;;  %v13221_v46 = vld [vmem:[%s23240_s5 + $0x140] sm:$0xff]  ;;  %v13218_v48 = vld [vmem:[%s23240_s5 + $0x128] sm:$0xff]  ;;  %v13183_v55 = vld [vmem:[%s23240_s5 + $0x90] sm:$0xff] }
  0x10   :  { %15541 = vmatprep.mubr.msk.f32.mxu1 %vm56_vm0, %v16565_v16  ;;  %289 = vmatprep.subr.mxu1 %v13190_v17  ;;  %v13217_v52 = vld [vmem:[%s23240_s5 + $0x120] sm:$0xff]  ;;  %v13214_v54 = vld [vmem:[%s23240_s5 + $0x108] sm:$0xff]  ;;  %v233_v58 = vld [vmem:[%s23240_s5 + $0x78] sm:$0xff] }
  0x11   :  { %479 = vmatprep.subr.mxu0 %v227_v18  ;;  %290 = vmatpush1.msra.mxu1 %v13189_v19  ;;  %v13213_v57 = vld [vmem:[%s23240_s5 + $0x100] sm:$0xff]  ;;  %v16723_v59 = vld [vmem:[%s23241_s8 + $0xf8] sm:$0xff]  ;;  %v232_v61 = vld [vmem:[%s23240_s5 + $0x70] sm:$0xff] }
  0x12   :  { %480 = vmatpush1.msra.mxu0 %v226_v20  ;;  %291 = vmatprep.subr.mxu1 %v13186_v21  ;;  %v16736_v62 = vld [vmem:[%s23241_s8 + $0x78] sm:$0xff]  ;;  %v16747_v10 = vld [vmem:[%s23241_s8 + $0xf0] sm:$0xff]  ;;  %v16773_v18 = vld [vmem:[%s23241_s8 + $0xe8] sm:$0xff] }
  0x13   :  { %15542 = vmatmul.mubr.msk.f32.gmra.mxu1 %vm56_vm0, %v16591_v22  ;;  %481 = vmatprep.subr.mxu0 %v223_v23  ;;  %v229_v63 = vld [vmem:[%s23240_s5 + $0x58] sm:$0xff]  ;;  %v228_v12 = vld [vmem:[%s23240_s5 + $0x50] sm:$0xff]  ;;  %v16785_v21 = vld [vmem:[%s23241_s8 + $0x68] sm:$0xff] }
  0x14   :  { %15544 = vmatprep.mubr.msk.f32.mxu1 %vm56_vm0, %v16599_v24  ;;  %292 = vmatpush1.msra.mxu1 %v13185_v26  ;;  %v16761_v13 = vld [vmem:[%s23241_s8 + $0x70] sm:$0xff]  ;;  %v225_v17 = vld [vmem:[%s23240_s5 + $0x38] sm:$0xff]  ;;  %v16796_v26 = vld [vmem:[%s23241_s8 + $0xe0] sm:$0xff] }
  0x15   :  { %482 = vmatpush1.msra.mxu0 %v222_v27  ;;  %293 = vmatprep.subr.mxu1 %v13182_v28  ;;  %v224_v20 = vld [vmem:[%s23240_s5 + $0x30] sm:$0xff]  ;;  %v221_v23 = vld [vmem:[%s23240_s5 + $0x18] sm:$0xff] }
  0x16   :  { %483 = vmatprep.subr.mxu0 %v219_v29  ;;  %294 = vmatpush1.msra.mxu1 %v13181_v30  ;;  %v220_v27 = vld [vmem:[%s23240_s5 + $0x10] sm:$0xff]  ;;  %v13228_v28 = vld [vmem:[%s23240_s5 + $0x178] sm:$0xff]  ;;  %v16811_v29 = vld [vmem:[%s23241_s8 + $0x60] sm:$0xff] }
  0x17   :  { %15545 = vmatmul.mubr.msk.f32.gmra.mxu1 %vm56_vm0, %v16608_v25  ;;  %484 = vmatpush1.msra.mxu0 %v218_v31  ;;  %v13227_v30 = vld [vmem:[%s23240_s5 + $0x170] sm:$0xff]  ;;  %v13224_v31 = vld [vmem:[%s23240_s5 + $0x158] sm:$0xff] }
  0x18   :  { %327 = vmatprep.mubr.f32.mxu1 %v23248_v32  ;;  %517 = vmatprep.mubr.f32.mxu0 %v23248_v32 }
  0x19   :  { %376 = vmatprep.subr.mxu1 %v13196_v33  ;;  %684 = vmatprep.subr.mxu0 %v13226_v34  ;;  %v13223_v33 = vld [vmem:[%s23240_s5 + $0x150] sm:$0xff]  ;;  %v13220_v34 = vld [vmem:[%s23240_s5 + $0x138] sm:$0xff] }
  0xcb   :  { %v16638_v35 = vpop.f32.mrf.mxu0  ;;  %v16640_v36 = vpop.f32.mrf.mxu1 }
  0xcd   :  { %v16642_v37 = vpop.f32.mrf.mxu0  ;;  %v179_v38 = vpop.f32.mrf.mxu1 }
  0xce   :  { %13197 = vmatmul.mubr.msk.f32.vlgmr.msra.gmra.mxu1 %vm56_vm0, %v179_v38  ;;  %13205 = vmatmul.mubr.msk.f32.vlgmr.msra.gmra.mxu0 %vm56_vm0, %v16642_v37 }
  0xcf   :  { %333 = vmatprep.mubr.f32.mxu1 %v23248_v32  ;;  %523 = vmatprep.mubr.f32.mxu0 %v23248_v32  ;;  %v16661_v43 = vpop.f32.mrf.mxu1  ;;  %v16663_v44 = vpop.f32.mrf.mxu0 }
  0xd0   :  { %377 = vmatpush1.msra.mxu1 %v13195_v39  ;;  %685 = vmatpush1.msra.mxu0 %v13225_v40  ;;  %v16879_v39 = vld [vmem:[%s23241_s8 + $0x58] sm:$0xff]  ;;  %v16886_v40 = vld [vmem:[%s23241_s8 + $0xd0] sm:$0xff] }
  0xd1   :  { %378 = vmatprep.subr.mxu1 %v13192_v41  ;;  %686 = vmatprep.subr.mxu0 %v13222_v42  ;;  %v16681_v49 = vpop.f32.mrf.mxu1  ;;  %v16685_v50 = vpop.f32.mrf.mxu0  ;;  %23511 = vst [vmem:[#allocation2_spill] sm:$0xff] %v16879_v39  ;;  %23512 = vst [vmem:[#allocation3_spill] sm:$0xff] %v16886_v40  ;;  %v16893_v41 = vld [vmem:[%s23241_s8 + $0x50] sm:$0xff]  ;;  %v16900_v42 = vld [vmem:[%s23241_s8 + $0xc8] sm:$0xff] }
  0xd2   :  { %13198 = vmatmul.mubr.msk.f32.gmra.mxu1 %vm56_vm0, %v16640_v36  ;;  %13206 = vmatmul.mubr.msk.f32.gmra.mxu0 %vm56_vm0, %v16638_v35  ;;  %23513 = vst [vmem:[#allocation4_spill] sm:$0xff] %v16893_v41  ;;  %23514 = vst [vmem:[#allocation5_spill] sm:$0xff] %v16900_v42 }
  0xd3   :  { %339 = vmatprep.mubr.f32.mxu1 %v23248_v32  ;;  %529 = vmatprep.mubr.f32.mxu0 %v23248_v32  ;;  %v16708_v56 = vpop.f32.mrf.mxu1 }
  0xd4   :  { %379 = vmatpush1.msra.mxu1 %v13191_v45  ;;  %687 = vmatpush1.msra.mxu0 %v13221_v46  ;;  %v16921_v45 = vld [vmem:[%s23241_s8 + $0x40] sm:$0xff]  ;;  %v16928_v46 = vld [vmem:[%s23241_s8 + $0xb8] sm:$0xff] }
  0xd5   :  { %380 = vmatprep.subr.mxu1 %v13188_v47  ;;  %688 = vmatprep.subr.mxu0 %v13218_v48  ;;  %v16727_v60 = vpop.f32.mrf.mxu1  ;;  %23517 = vst [vmem:[#allocation8_spill] sm:$0xff] %v16921_v45  ;;  %23518 = vst [vmem:[#allocation9_spill] sm:$0xff] %v16928_v46  ;;  %v16935_v47 = vld [vmem:[%s23241_s8 + $0x38] sm:$0xff]  ;;  %v16942_v48 = vld [vmem:[%s23241_s8 + $0xb0] sm:$0xff] }
  0xd6   :  { %13199 = vmatmul.mubr.msk.f32.gmra.mxu1 %vm56_vm0, %v16681_v49  ;;  %13207 = vmatmul.mubr.msk.f32.gmra.mxu0 %vm56_vm0, %v16685_v50  ;;  %23519 = vst [vmem:[#allocation10_spill] sm:$0xff] %v16935_v47  ;;  %23520 = vst [vmem:[#allocation11_spill] sm:$0xff] %v16942_v48 }
  0xd7   :  { %345 = vmatprep.mubr.f32.mxu1 %v23248_v32  ;;  %535 = vmatprep.mubr.f32.mxu0 %v23248_v32  ;;  %v16752_v11 = vpop.f32.mrf.mxu1 }
  0xd8   :  { %381 = vmatpush1.msra.mxu1 %v13187_v51  ;;  %689 = vmatpush1.msra.mxu0 %v13217_v52  ;;  %v16963_v51 = vld [vmem:[%s23241_s8 + $0x28] sm:$0xff]  ;;  %v16970_v52 = vld [vmem:[%s23241_s8 + $0xa0] sm:$0xff] }
  0xd9   :  { %382 = vmatprep.subr.mxu1 %v13184_v53  ;;  %690 = vmatprep.subr.mxu0 %v13214_v54  ;;  %v209_v19 = vpop.f32.mrf.mxu1  ;;  %23523 = vst [vmem:[#allocation14_spill] sm:$0xff] %v16963_v51  ;;  %23524 = vst [vmem:[#allocation15_spill] sm:$0xff] %v16970_v52  ;;  %v16977_v53 = vld [vmem:[%s23241_s8 + $0x20] sm:$0xff]  ;;  %v16984_v54 = vld [vmem:[%s23241_s8 + $0x98] sm:$0xff] }
  0xda   :  { %13200 = vmatmul.mubr.msk.f32.gmra.mxu1 %vm56_vm0, %v16661_v43  ;;  %13208 = vmatmul.mubr.msk.f32.gmra.mxu0 %vm56_vm0, %v16663_v44  ;;  %23525 = vst [vmem:[#allocation16_spill] sm:$0xff] %v16977_v53  ;;  %23526 = vst [vmem:[#allocation17_spill] sm:$0xff] %v16984_v54 }
  0xdb   :  { %383 = vmatpush1.msra.mxu1 %v13183_v55  ;;  %416 = vmatprep.mubr.f32.mxu1 %v23248_v32  ;;  %v16991_v55 = vld [vmem:[%s23241_s8 + $0x18] sm:$0xff] }
  0xdc   :  { %691 = vmatpush1.msra.mxu0 %v13213_v57  ;;  %724 = vmatprep.mubr.f32.mxu0 %v23248_v32  ;;  %23527 = vst [vmem:[#allocation18_spill] sm:$0xff] %v16991_v55  ;;  %v17005_v57 = vld [vmem:[%s23241_s8 + $0x10] sm:$0xff] }
  0xdd   :  { %566 = vmatprep.subr.mxu1 %v233_v58  ;;  %14225 = vmatprep.subr.mxu0 %v16723_v59  ;;  %23529 = vst [vmem:[#allocation20_spill] sm:$0xff] %v17005_v57  ;;  %v17012_v58 = vld [vmem:[%s23241_s8 + $0x88] sm:$0xff] }
  0xde   :  { %13201 = vmatmul.mubr.msk.f32.vlgmr.msra.gmra.mxu1 %vm56_vm0, %v179_v38  ;;  %13229 = vmatmul.mubr.msk.f32.vlgmr.msra.gmra.mxu0 %vm56_vm0, %v16727_v60  ;;  %v13215_v38 = vld [vmem:[%s23240_s5 + $0x110] sm:$0xff]  ;;  %23530 = vst [vmem:[#allocation21_spill] sm:$0xff] %v17012_v58 }
  0xdf   :  { %422 = vmatprep.mubr.f32.mxu1 %v23248_v32  ;;  %730 = vmatprep.mubr.f32.mxu0 %v23248_v32 }
  0xe0   :  { %567 = vmatpush1.msra.mxu1 %v232_v61  ;;  %14226 = vmatpush3.msra.mxu0 %v16736_v62  ;;  %v17026_v61 = vld [vmem:[%s23241_s8 + $0x80] sm:$0xff] }
  0xe1   :  { %568 = vmatprep.subr.mxu1 %v229_v63  ;;  %14227 = vmatprep.subr.mxu0 %v16747_v10  ;;  %23532 = vst [vmem:[#allocation23_spill] sm:$0xff] %v17026_v61  ;;  %v17033_v63 = vld [vmem:[%s23241_s8] sm:$0xff] }
  0xe2   :  { %13202 = vmatmul.mubr.msk.f32.gmra.mxu1 %vm56_vm0, %v16640_v36  ;;  %13230 = vmatmul.mubr.msk.f32.gmra.mxu0 %vm56_vm0, %v16708_v56  ;;  %v13219_v36 = vld [vmem:[%s23240_s5 + $0x130] sm:$0xff]  ;;  %23533 = vst [vmem:[#allocation24_spill] sm:$0xff] %v17033_v63 }
  0xe3   :  { %428 = vmatprep.mubr.f32.mxu1 %v23248_v32  ;;  %736 = vmatprep.mubr.f32.mxu0 %v23248_v32 }
  0xe4   :  { %569 = vmatpush1.msra.mxu1 %v228_v12  ;;  %14228 = vmatpush3.msra.mxu0 %v16761_v13 }
  0xe5   :  { %570 = vmatprep.subr.mxu1 %v225_v17  ;;  %14229 = vmatprep.subr.mxu0 %v16773_v18 }
  0xe6   :  { %13203 = vmatmul.mubr.msk.f32.gmra.mxu1 %vm56_vm0, %v16681_v49  ;;  %13231 = vmatmul.mubr.msk.f32.gmra.mxu0 %vm56_vm0, %v209_v19  ;;  %v16949_v49 = vld [vmem:[%s23241_s8 + $0x30] sm:$0xff] }
  0xe7   :  { %434 = vmatprep.mubr.f32.mxu1 %v23248_v32  ;;  %742 = vmatprep.mubr.f32.mxu0 %v23248_v32  ;;  %23521 = vst [vmem:[#allocation12_spill] sm:$0xff] %v16949_v49 }
  0xe8   :  { %571 = vmatpush1.msra.mxu1 %v224_v20  ;;  %14230 = vmatpush3.msra.mxu0 %v16785_v21 }
  0xe9   :  { %572 = vmatprep.subr.mxu1 %v221_v23  ;;  %14231 = vmatprep.subr.mxu0 %v16796_v26 }
  0xea   :  { %13204 = vmatmul.mubr.msk.f32.gmra.mxu1 %vm56_vm0, %v16661_v43  ;;  %13232 = vmatmul.mubr.msk.f32.gmra.mxu0 %vm56_vm0, %v16752_v11  ;;  %v16907_v43 = vld [vmem:[%s23241_s8 + $0x48] sm:$0xff] }
  0xeb   :  { %573 = vmatpush1.msra.mxu1 %v220_v27  ;;  %606 = vmatprep.mubr.f32.mxu1 %v23248_v32  ;;  %23515 = vst [vmem:[#allocation6_spill] sm:$0xff] %v16907_v43 }
  0xec   :  { %773 = vmatprep.subr.mxu1 %v13228_v28  ;;  %14232 = vmatpush3.msra.mxu0 %v16811_v29 }
  0xee   :  { %13209 = vmatmul.mubr.msk.f32.vlgmr.msra.gmra.mxu1 %vm56_vm0, %v16642_v37  ;;  %v13216_v37 = vld [vmem:[%s23240_s5 + $0x118] sm:$0xff] }
  0xef   :  { %612 = vmatprep.mubr.f32.mxu1 %v23248_v32  ;;  %774 = vmatpush1.msra.mxu1 %v13227_v30 }
  0xf0   :  { %775 = vmatprep.subr.mxu1 %v13224_v31 }
  0xf1   :  { %776 = vmatpush1.msra.mxu1 %v13223_v33 }
  0xf2   :  { %13210 = vmatmul.mubr.msk.f32.gmra.mxu1 %vm56_vm0, %v16638_v35  ;;  %777 = vmatprep.subr.mxu1 %v13220_v34  ;;  %v16873_v35 = vld [vmem:[%s23241_s8 + $0xd8] sm:$0xff] }
  0xf3   :  { %618 = vmatprep.mubr.f32.mxu1 %v23248_v32  ;;  %778 = vmatpush1.msra.mxu1 %v13219_v36 }
  0xf4   :  { %779 = vmatprep.subr.mxu1 %v13216_v37  ;;  %14233 = vmatprep.subr.mxu0 %v16873_v35 }
  0xf5   :  { %780 = vmatpush1.msra.mxu1 %v13215_v38  ;;  %14234 = vmatpush3.msra.mxu0 %v16879_v39 }
  0xf6   :  { %13211 = vmatmul.mubr.msk.f32.gmra.mxu1 %vm56_vm0, %v16685_v50  ;;  %14269 = vmatprep.subr.mxu1 %v16723_v59  ;;  %v16956_v50 = vld [vmem:[%s23241_s8 + $0xa8] sm:$0xff] }
  0xf7   :  { %624 = vmatprep.mubr.f32.mxu1 %v23248_v32  ;;  %14235 = vmatprep.subr.mxu0 %v16886_v40  ;;  %23522 = vst [vmem:[#allocation13_spill] sm:$0xff] %v16956_v50 }
  0xf8   :  { %14236 = vmatpush3.msra.mxu0 %v16893_v41 }
  0xf9   :  { %14237 = vmatprep.subr.mxu0 %v16900_v42 }
  0xfa   :  { %13212 = vmatmul.mubr.msk.f32.gmra.mxu1 %vm56_vm0, %v16663_v44  ;;  %14238 = vmatpush3.msra.mxu0 %v16907_v43  ;;  %v16914_v44 = vld [vmem:[%s23241_s8 + $0xc0] sm:$0xff] }
  0xfb   :  { %813 = vmatprep.mubr.f32.mxu1 %v23248_v32  ;;  %23516 = vst [vmem:[#allocation7_spill] sm:$0xff] %v16914_v44  ;;  %14239 = vmatprep.subr.mxu0 %v16914_v44 }
  0xfc   :  { %14240 = vmatpush3.msra.mxu0 %v16921_v45 }
  0xfd   :  { %14241 = vmatprep.subr.mxu0 %v16928_v46 }
  0xfe   :  { %13233 = vmatmul.mubr.msk.f32.vlgmr.msra.gmra.mxu1 %vm56_vm0, %v16727_v60  ;;  %14242 = vmatpush3.msra.mxu0 %v16935_v47  ;;  %v17019_v60 = vld [vmem:[%s23241_s8 + $0x8] sm:$0xff] }
  0xff   :  { %819 = vmatprep.mubr.f32.mxu1 %v23248_v32  ;;  %14270 = vmatpush3.msra.mxu1 %v16736_v62  ;;  %23531 = vst [vmem:[#allocation22_spill] sm:$0xff] %v17019_v60 }
 0x100   :  { %14271 = vmatprep.subr.mxu1 %v16747_v10  ;;  %14243 = vmatprep.subr.mxu0 %v16942_v48 }
 0x101   :  { %14272 = vmatpush3.msra.mxu1 %v16761_v13  ;;  %14244 = vmatpush3.msra.mxu0 %v16949_v49 }
 0x102   :  { %13234 = vmatmul.mubr.msk.f32.gmra.mxu1 %vm56_vm0, %v16708_v56  ;;  %14273 = vmatprep.subr.mxu1 %v16773_v18  ;;  %v16998_v56 = vld [vmem:[%s23241_s8 + $0x90] sm:$0xff] }
 0x103   :  { %825 = vmatprep.mubr.f32.mxu1 %v23248_v32  ;;  %14274 = vmatpush3.msra.mxu1 %v16785_v21  ;;  %23528 = vst [vmem:[#allocation19_spill] sm:$0xff] %v16998_v56 }
 0x104   :  { %14275 = vmatprep.subr.mxu1 %v16796_v26  ;;  %14245 = vmatprep.subr.mxu0 %v16956_v50 }
 0x105   :  { %14276 = vmatpush3.msra.mxu1 %v16811_v29  ;;  %14246 = vmatpush3.msra.mxu0 %v16963_v51 }
 0x106   :  { %13235 = vmatmul.mubr.msk.f32.gmra.mxu1 %vm56_vm0, %v209_v19  ;;  %14277 = vmatprep.subr.mxu1 %v16873_v35 }
 0x107   :  { %831 = vmatprep.mubr.f32.mxu1 %v23248_v32  ;;  %14278 = vmatpush3.msra.mxu1 %v16879_v39 }
 0x108   :  { %14279 = vmatprep.subr.mxu1 %v16886_v40  ;;  %14247 = vmatprep.subr.mxu0 %v16970_v52 }
 0x109   :  { %14280 = vmatpush3.msra.mxu1 %v16893_v41  ;;  %14248 = vmatpush3.msra.mxu0 %v16977_v53 }
 0x10a   :  { %13236 = vmatmul.mubr.msk.f32.gmra.mxu1 %vm56_vm0, %v16752_v11  ;;  %14281 = vmatprep.subr.mxu1 %v16900_v42 }
 0x10b   :  { %14282 = vmatpush3.msra.mxu1 %v16907_v43  ;;  %14249 = vmatprep.subr.mxu0 %v16984_v54 }
 0x10c   :  { %14283 = vmatprep.subr.mxu1 %v16914_v44  ;;  %14250 = vmatpush3.msra.mxu0 %v16991_v55 }
 0x10d   :  { %14284 = vmatpush3.msra.mxu1 %v16921_v45  ;;  %14251 = vmatprep.subr.mxu0 %v16998_v56 }
 0x10e   :  { %14285 = vmatprep.subr.mxu1 %v16928_v46  ;;  %14252 = vmatpush3.msra.mxu0 %v17005_v57 }
 0x10f   :  { %14286 = vmatpush3.msra.mxu1 %v16935_v47  ;;  %14253 = vmatprep.subr.mxu0 %v17012_v58  ;;  %v17067_v47 = vld [vmem:[%s23242_s7 + $0x28] sm:$0xff] }
 0x110   :  { %14287 = vmatprep.subr.mxu1 %v16942_v48  ;;  %14254 = vmatpush3.msra.mxu0 %v17019_v60 }
 0x111   :  { %14288 = vmatpush3.msra.mxu1 %v16949_v49  ;;  %14255 = vmatprep.subr.mxu0 %v17026_v61  ;;  %v17055_v49 = vld [vmem:[%s23242_s7 + $0x18] sm:$0xff] }
 0x112   :  { %14289 = vmatprep.subr.mxu1 %v16956_v50  ;;  %14256 = vmatpush3.msra.mxu0 %v17033_v63 }
 0x113   :  { %14290 = vmatpush3.msra.mxu1 %v16963_v51 }
 0x114   :  { %14291 = vmatprep.subr.mxu1 %v16970_v52 }
 0x115   :  { %14292 = vmatpush3.msra.mxu1 %v16977_v53  ;;  %v17048_v53 = vld [vmem:[%s23242_s7] sm:$0xff] }
 0x116   :  { %14293 = vmatprep.subr.mxu1 %v16984_v54 }
 0x117   :  { %14294 = vmatpush3.msra.mxu1 %v16991_v55  ;;  %v17043_v55 = vld [vmem:[%s23242_s7 + $0x8] sm:$0xff] }
 0x118   :  { %14295 = vmatprep.subr.mxu1 %v16998_v56 }
 0x119   :  { %14296 = vmatpush3.msra.mxu1 %v17005_v57 }
 0x11a   :  { %14297 = vmatprep.subr.mxu1 %v17012_v58 }
 0x11b   :  { %14298 = vmatpush3.msra.mxu1 %v17019_v60 }
 0x11c   :  { %14299 = vmatprep.subr.mxu1 %v17026_v61 }
 0x11d   :  { %14300 = vmatpush3.msra.mxu1 %v17033_v63 }
 0x18e   :  { %v329_v11 = vpop.f32.mrf.mxu1  ;;  %v519_v12 = vpop.f32.mrf.mxu0 }
 0x18f   :  { %v520_v61 = vadd.f32 %v519_v12, %v329_v11 }
 0x190   :  { %v331_v17 = vpop.f32.mrf.mxu1  ;;  %v521_v19 = vpop.f32.mrf.mxu0 }
 0x191   :  { %v522_v58 = vadd.f32 %v521_v19, %v331_v17 }
 0x192   :  { %v335_v20 = vpop.f32.mrf.mxu1  ;;  %v525_v23 = vpop.f32.mrf.mxu0 }
 0x193   :  { %v526_v51 = vadd.f32 %v525_v23, %v335_v20 }
 0x194   :  { %v337_v27 = vpop.f32.mrf.mxu1  ;;  %v527_v28 = vpop.f32.mrf.mxu0 }
 0x195   :  { %v528_v50 = vadd.f32 %v527_v28, %v337_v27 }
 0x196   :  { %v341_v30 = vpop.f32.mrf.mxu1  ;;  %v531_v31 = vpop.f32.mrf.mxu0 }
 0x197   :  { %v532_v20 = vadd.f32 %v531_v31, %v341_v30 }
 0x198   :  { %v343_v33 = vpop.f32.mrf.mxu1  ;;  %v533_v34 = vpop.f32.mrf.mxu0 }
 0x19a   :  { %v347_v36 = vpop.f32.mrf.mxu1  ;;  %v537_v37 = vpop.f32.mrf.mxu0 }
 0x19b   :  { %v538_v30 = vadd.f32 %v537_v37, %v347_v36 }
 0x19c   :  { %v349_v38 = vpop.f32.mrf.mxu1  ;;  %v539_v32 = vpop.f32.mrf.mxu0 }
 0x19e   :  { %v17038_v60 = vpop.f32.mrf.mxu1  ;;  %v726_v63 = vpop.f32.mrf.mxu0 }
 0x19f   :  { %v838_v57 = vadd.f32 %v726_v63, %v520_v61 }
 0x1a0   :  { %v420_v56 = vpop.f32.mrf.mxu1  ;;  %v728_v54 = vpop.f32.mrf.mxu0 }
 0x1a1   :  { %v839_v52 = vadd.f32 %v728_v54, %v522_v58  ;;  %v886_v61 = vmul.f32 %v838_v57, %v17048_v53  ;;  %v17060_v54 = vld [vmem:[%s23242_s7 + $0x10] sm:$0xff]  ;;  %v534_v57 = vadd.f32 %v533_v34, %v343_v33  ;;  %v540_v34 = vadd.f32 %v539_v32, %v349_v38 }
 0x1a2   :  { %v424_v11 = vpop.f32.mrf.mxu1  ;;  %v732_v12 = vpop.f32.mrf.mxu0 }
 0x1a3   :  { %v887_v17 = vmul.f32 %v839_v52, %v17043_v55  ;;  %v842_v63 = vadd.f32 %v732_v12, %v526_v51 }
 0x1a4   :  { %v426_v19 = vpop.f32.mrf.mxu1  ;;  %v734_v48 = vpop.f32.mrf.mxu0 }
 0x1a5   :  { %v843_v58 = vadd.f32 %v734_v48, %v528_v50  ;;  %958 = vmatprep.mubr.f32.mxu0 %v887_v17  ;;  %v888_v27 = vmul.f32 %v842_v63, %v17060_v54  ;;  %v17072_v48 = vld [vmem:[%s23242_s7 + $0x20] sm:$0xff] }
 0x1a6   :  { %v430_v23 = vpop.f32.mrf.mxu1  ;;  %v738_v52 = vpop.f32.mrf.mxu0  ;;  %959 = vmatmul.mubr.f32.vlgmr.msra.gmra.mxu0 %v886_v61 }
 0x1a7   :  { %v889_v51 = vmul.f32 %v843_v58, %v17055_v49  ;;  %v846_v28 = vadd.f32 %v738_v52, %v532_v20  ;;  %v17079_v20 = vld [vmem:[%s23242_s7 + $0x38] sm:$0xff] }
 0x1a8   :  { %v432_v12 = vpop.f32.mrf.mxu1  ;;  %v740_v46 = vpop.f32.mrf.mxu0 }
 0x1a9   :  { %v847_v50 = vadd.f32 %v740_v46, %v534_v57  ;;  %963 = vmatprep.mubr.f32.mxu0 %v889_v51  ;;  %v890_v61 = vmul.f32 %v846_v28, %v17072_v48  ;;  %v17084_v46 = vld [vmem:[%s23242_s7 + $0x30] sm:$0xff] }
 0x1aa   :  { %v436_v31 = vpop.f32.mrf.mxu1  ;;  %v744_v33 = vpop.f32.mrf.mxu0  ;;  %964 = vmatmul.mubr.f32.gmra.mxu0 %v888_v27 }
 0x1ab   :  { %v891_v17 = vmul.f32 %v847_v50, %v17067_v47  ;;  %v850_v63 = vadd.f32 %v744_v33, %v538_v30 }
 0x1ac   :  { %v438_v58 = vpop.f32.mrf.mxu1  ;;  %v746_v52 = vpop.f32.mrf.mxu0 }
 0x1ad   :  { %v851_v36 = vadd.f32 %v746_v52, %v540_v34  ;;  %968 = vmatprep.mubr.f32.mxu0 %v891_v17  ;;  %v892_v38 = vmul.f32 %v850_v63, %v17084_v46 }
 0x1ae   :  { %v608_v32 = vpop.f32.mrf.mxu1  ;;  %969 = vmatmul.mubr.f32.gmra.mxu0 %v890_v61 }
 0x1af   :  { %v893_v37 = vmul.f32 %v851_v36, %v17079_v20  ;;  %v609_v34 = vadd.f32 %v608_v32, %v17038_v60 }
 0x1b0   :  { %v610_v57 = vpop.f32.mrf.mxu1 }
 0x1b1   :  { %973 = vmatprep.mubr.f32.mxu0 %v893_v37  ;;  %v611_v61 = vadd.f32 %v610_v57, %v420_v56 }
 0x1b2   :  { %v614_v51 = vpop.f32.mrf.mxu1  ;;  %974 = vmatmul.mubr.f32.gmra.mxu0 %v892_v38 }
 0x1b3   :  { %15555 = vmatprep.mubr.msk.f32.mxu0 %vm56_vm0, %v16497_v4  ;;  %v615_v63 = vadd.f32 %v614_v51, %v424_v11 }
 0x1b4   :  { %v616_v27 = vpop.f32.mrf.mxu1 }
 0x1b5   :  { %v617_v37 = vadd.f32 %v616_v27, %v426_v19 }
 0x1b6   :  { %v620_v28 = vpop.f32.mrf.mxu1 }
 0x1b7   :  { %v621_v40 = vadd.f32 %v620_v28, %v430_v23 }
 0x1b8   :  { %v622_v50 = vpop.f32.mrf.mxu1 }
 0x1b9   :  { %v623_v60 = vadd.f32 %v622_v50, %v432_v12 }
 0x1ba   :  { %v626_v30 = vpop.f32.mrf.mxu1 }
 0x1bb   :  { %v627_v19 = vadd.f32 %v626_v30, %v436_v31 }
 0x1bc   :  { %v628_v33 = vpop.f32.mrf.mxu1 }
 0x1bd   :  { %v629_v27 = vadd.f32 %v628_v33, %v438_v58 }
 0x1be   :  { %v815_v17 = vpop.f32.mrf.mxu1 }
 0x1bf   :  { %v840_v52 = vadd.f32 %v815_v17, %v609_v34  ;;  %v1073_v34 = vld [vmem:[%s23243_s0 + $0x8] sm:$0xff] }
 0x1c0   :  { %v817_v36 = vpop.f32.mrf.mxu1 }
 0x1c1   :  { %v841_v45 = vadd.f32 %v817_v36, %v611_v61  ;;  %v979_v43 = vmul.f32 %v840_v52, %v17048_v53  ;;  %v1072_v61 = vld [vmem:[%s23243_s0] sm:$0xff]  ;;  %v1074_v36 = vld [vmem:[%s23243_s0 + $0x10] sm:$0xff] }
 0x1c2   :  { %v821_v44 = vpop.f32.mrf.mxu1 }
 0x1c3   :  { %v980_v38 = vmul.f32 %v841_v45, %v17043_v55  ;;  %v844_v4 = vadd.f32 %v821_v44, %v615_v63 }
 0x1c4   :  { %v823_v42 = vpop.f32.mrf.mxu1 }
 0x1c5   :  { %v845_v41 = vadd.f32 %v823_v42, %v617_v37  ;;  %1051 = vmatprep.mubr.f32.mxu1 %v980_v38  ;;  %v981_v32 = vmul.f32 %v844_v4, %v17060_v54 }
 0x1c6   :  { %v827_v39 = vpop.f32.mrf.mxu1  ;;  %1052 = vmatmul.mubr.f32.vlgmr.msra.gmra.mxu1 %v979_v43 }
 0x1c7   :  { %v982_v56 = vmul.f32 %v845_v41, %v17055_v49  ;;  %v848_v57 = vadd.f32 %v827_v39, %v621_v40  ;;  %v23534_v40 = vmov 0.0  }
 0x1c8   :  { %v829_v11 = vpop.f32.mrf.mxu1 }
 0x1c9   :  { %v849_v51 = vadd.f32 %v829_v11, %v623_v60  ;;  %1056 = vmatprep.mubr.f32.mxu1 %v982_v56  ;;  %v983_v42 = vmul.f32 %v848_v57, %v17072_v48 }
 0x1ca   :  { %v833_v45 = vpop.f32.mrf.mxu1  ;;  %1057 = vmatmul.mubr.f32.gmra.mxu1 %v981_v32  ;;  %v1075_v32 = vld [vmem:[%s23243_s0 + $0x18] sm:$0xff] }
 0x1cb   :  { %v984_v44 = vmul.f32 %v849_v51, %v17067_v47  ;;  %v852_v23 = vadd.f32 %v833_v45, %v627_v19 }
 0x1cc   :  { %v835_v28 = vpop.f32.mrf.mxu1 }
 0x1cd   :  { %v853_v43 = vadd.f32 %v835_v28, %v629_v27  ;;  %1061 = vmatprep.mubr.f32.mxu1 %v984_v44  ;;  %v985_v39 = vmul.f32 %v852_v23, %v17084_v46 }
 0x1ce   :  { %1062 = vmatmul.mubr.f32.gmra.mxu1 %v983_v42 }
 0x1cf   :  { %v986_v41 = vmul.f32 %v853_v43, %v17079_v20 }
 0x1d1   :  { %1066 = vmatprep.mubr.f32.mxu1 %v986_v41 }
 0x1d2   :  { %1067 = vmatmul.mubr.f32.gmra.mxu1 %v985_v39 }
 0x1d3   :  { %1358 = vmatprep.mubr.f32.mxu1 %v23534_v40 }
 0x266   :  { %v14257_v12 = vpop.f32.mrf.mxu0 }
 0x268   :  { %v14258_v31 = vpop.f32.mrf.mxu0 }
 0x269   :  { %v14259_v33 = vadd.f32 %v14258_v31, %v14257_v12 }
 0x26a   :  { %v14260_v58 = vpop.f32.mrf.mxu0 }
 0x26b   :  { %v1076_v38 = vadd.f32 %v14259_v33, %v1072_v61 }
 0x26c   :  { %v14261_v50 = vpop.f32.mrf.mxu0 }
 0x26d   :  { %v14262_v30 = vadd.f32 %v14261_v50, %v14260_v58  ;;  %v13237_v19 = vmul.f32 -1.442695, %v1076_v38 }
 0x26e   :  { %v14263_v17 = vpop.f32.mrf.mxu0 }
 0x26f   :  { %v1077_v63 = vadd.f32 %v14262_v30, %v1073_v34 }
 0x270   :  { %v14264_v52 = vpop.f32.mrf.mxu0 }
 0x271   :  { %v14265_v37 = vadd.f32 %v14264_v52, %v14263_v17  ;;  %v13238_v57 = vmul.f32 -1.442695, %v1077_v63  ;;  %v1272_v52 = vld [vmem:[%s23244_s6 + $0x38] sm:$0xff] }
 0x272   :  { %v14266_v4 = vpop.f32.mrf.mxu0 }
 0x273   :  { %v1078_v60 = vadd.f32 %v14265_v37, %v1074_v36 }
 0x274   :  { %v14267_v56 = vpop.f32.mrf.mxu0 }
 0x275   :  { %v13239_v11 = vmul.f32 -1.442695, %v1078_v60  ;;  %v14268_v51 = vadd.f32 %v14267_v56, %v14266_v4  ;;  %v13273_v56 = vld [vmem:[%s23244_s6 + $0x80] sm:$0xff] }
 0x277   :  { %15946 = vpow2.f32 %v13239_v11  ;;  %v1079_v45 = vadd.f32 %v14268_v51, %v1075_v32  ;;  %v23536_v32 = vld [vmem:[#allocation3_spill] sm:$0xff]  ;;  %v23537_v11 = vld [vmem:[#allocation4_spill] sm:$0xff]  ;;  %v23538_v51 = vld [vmem:[#allocation5_spill] sm:$0xff] }
 0x278   :  { %15948 = vpow2.f32 %v13238_v57 }
 0x279   :  { %v13240_v27 = vmul.f32 -1.442695, %v1079_v45  ;;  %15950 = vpow2.f32 %v13237_v19  ;;  %v23539_v45 = vld [vmem:[#allocation6_spill] sm:$0xff] }
 0x27b   :  { %15952 = vpow2.f32 %v13240_v27  ;;  %v23540_v27 = vld [vmem:[#allocation7_spill] sm:$0xff] }
 0x284   :  { %v15947_v44 = vpop.eup %15946 }
 0x285   :  { %v15949_v42 = vpop.eup %15948  ;;  %v1094_v23 = vadd.f32 1.0, %v15947_v44  ;;  %v23541_v44 = vld [vmem:[#allocation8_spill] sm:$0xff] }
 0x286   :  { %v15951_v28 = vpop.eup %15950  ;;  %v1093_v41 = vadd.f32 1.0, %v15949_v42  ;;  %v23542_v42 = vld [vmem:[#allocation9_spill] sm:$0xff] }
 0x287   :  { %15954 = vrcp.f32 %v1094_v23  ;;  %v1092_v12 = vadd.f32 1.0, %v15951_v28  ;;  %v23543_v28 = vld [vmem:[#allocation10_spill] sm:$0xff] }
 0x288   :  { %v15953_v43 = vpop.eup %15952 }
 0x289   :  { %v1095_v39 = vadd.f32 1.0, %v15953_v43  ;;  %v23544_v43 = vld [vmem:[#allocation11_spill] sm:$0xff] }
 0x28b   :  { %15956 = vrcp.f32 %v1095_v39  ;;  %v23546_v39 = vld [vmem:[#allocation13_spill] sm:$0xff] }
 0x28c   :  { %15958 = vrcp.f32 %v1093_v41  ;;  %v23545_v41 = vld [vmem:[#allocation12_spill] sm:$0xff] }
 0x28d   :  { %15960 = vrcp.f32 %v1092_v12 }
 0x294   :  { %v15955_v31 = vpop.eup %15954 }
 0x295   :  { %v1138_v33 = vmul.f32 %v15955_v31, %v16470_v1  ;;  %v1270_v1 = vld [vmem:[%s23244_s6 + $0x28] sm:$0xff]  ;;  %v23547_v31 = vld [vmem:[#allocation14_spill] sm:$0xff] }
 0x298   :  { %v15957_v58 = vpop.eup %15956 }
 0x299   :  { %v1139_v50 = vmul.f32 %v15957_v58, %v16465_v0  ;;  %v15959_v30 = vpop.eup %15958  ;;  %v1271_v0 = vld [vmem:[%s23244_s6 + $0x30] sm:$0xff]  ;;  %v23548_v58 = vld [vmem:[#allocation15_spill] sm:$0xff] }
 0x29a   :  { %v15961_v34 = vpop.eup %15960  ;;  %v1137_v17 = vmul.f32 %v15959_v30, %v16479_v2  ;;  %v1269_v2 = vld [vmem:[%s23244_s6 + $0x20] sm:$0xff]  ;;  %v23550_v30 = vld [vmem:[#allocation17_spill] sm:$0xff] }
 0x29b   :  { %15547 = vmatprep.subr.mxu0 %v1139_v50  ;;  %v1136_v61 = vmul.f32 %v15961_v34, %v16488_v3  ;;  %v1268_v3 = vld [vmem:[%s23244_s6 + $0x18] sm:$0xff]  ;;  %v23551_v34 = vld [vmem:[#allocation18_spill] sm:$0xff] }
 0x29c   :  { %15548 = vmatpush3.msra.mxu0 %v1139_v50  ;;  %v23549_v50 = vld [vmem:[#allocation16_spill] sm:$0xff] }
 0x29d   :  { %15549 = vmatprep.subr.mxu0 %v1138_v33 }
 0x29e   :  { %15550 = vmatpush3.msra.mxu0 %v1138_v33 }
 0x29f   :  { %15551 = vmatprep.subr.mxu0 %v1137_v17 }
 0x2a0   :  { %15552 = vmatpush3.msra.mxu0 %v1137_v17  ;;  %v23552_v17 = vld [vmem:[#allocation19_spill] sm:$0xff] }
 0x2a1   :  { %15553 = vmatprep.subr.mxu0 %v1136_v61 }
 0x2a2   :  { %15554 = vmatpush3.msra.mxu0 %v1136_v61  ;;  %v23553_v61 = vld [vmem:[#allocation20_spill] sm:$0xff] }
 0x2a3   :  { %15556 = vmatmul.mubr.msk.f32.vlgmr.msra.gmra.mxu0 %vm56_vm0, %v16509_v6  ;;  %1419 = vmatprep.subr.mxu0 %v1272_v52  ;;  %v1266_v6 = vld [vmem:[%s23244_s6 + $0x8] sm:$0xff]  ;;  %v23554_v52 = vld [vmem:[#allocation21_spill] sm:$0xff] }
 0x2a4   :  { %15558 = vmatprep.mubr.msk.f32.mxu0 %vm56_vm0, %v16521_v8  ;;  %1420 = vmatpush1.msra.mxu0 %v1271_v0  ;;  %v13264_v8 = vld [vmem:[%s23244_s6 + $0x78] sm:$0xff]  ;;  %v23555_v0 = vld [vmem:[#allocation22_spill] sm:$0xff] }
 0x2a5   :  { %1421 = vmatprep.subr.mxu0 %v1270_v1  ;;  %1318 = vmatprep.subr.mxu1 %v13264_v8  ;;  %v23556_v1 = vld [vmem:[#allocation23_spill] sm:$0xff] }
 0x2a6   :  { %1422 = vmatpush1.msra.mxu0 %v1269_v2  ;;  %v23557_v2 = vld [vmem:[#allocation24_spill] sm:$0xff] }
 0x2a7   :  { %15559 = vmatmul.mubr.msk.f32.gmra.mxu0 %vm56_vm0, %v16553_v14  ;;  %1423 = vmatprep.subr.mxu0 %v1268_v3  ;;  %v13262_v14 = vld [vmem:[%s23244_s6 + $0x68] sm:$0xff]  ;;  %v16266_v3 = vld [vmem:[%s23239_s4] sm:$0xff] }
 0x2a8   :  { %15561 = vmatprep.mubr.msk.f32.mxu0 %vm56_vm0, %v16502_v5  ;;  %v1267_v5 = vld [vmem:[%s23244_s6 + $0x10] sm:$0xff] }
 0x2a9   :  { %1424 = vmatpush1.msra.mxu0 %v1267_v5  ;;  %v17269_v5 = vpop.f32.mrf.mxu1 }
 0x2aa   :  { %1425 = vmatprep.subr.mxu0 %v1266_v6 }
 0x2ab   :  { %15562 = vmatmul.mubr.msk.f32.gmra.mxu0 %vm56_vm0, %v16514_v7  ;;  %v1265_v7 = vld [vmem:[%s23244_s6] sm:$0xff]  ;;  %v17271_v6 = vpop.f32.mrf.mxu1 }
 0x2ac   :  { %15564 = vmatprep.mubr.msk.f32.mxu0 %vm56_vm0, %v16526_v9  ;;  %1426 = vmatpush1.msra.mxu0 %v1265_v7  ;;  %v13263_v9 = vld [vmem:[%s23244_s6 + $0x70] sm:$0xff] }
 0x2ad   :  { %14329 = vmatprep.subr.mxu0 %v16723_v59  ;;  %1319 = vmatpush1.msra.mxu1 %v13263_v9  ;;  %v13280_v59 = vld [vmem:[%s23244_s6 + $0xb8] sm:$0xff]  ;;  %v17273_v7 = vpop.f32.mrf.mxu1 }
 0x2ae   :  { %1320 = vmatprep.subr.mxu1 %v13262_v14 }
 0x2af   :  { %15565 = vmatmul.mubr.msk.f32.gmra.mxu0 %vm56_vm0, %v16560_v15  ;;  %v13261_v15 = vld [vmem:[%s23244_s6 + $0x60] sm:$0xff]  ;;  %v17275_v8 = vpop.f32.mrf.mxu1 }
 0x2b0   :  { %15567 = vmatprep.mubr.msk.f32.mxu0 %vm56_vm0, %v16565_v16  ;;  %1321 = vmatpush1.msra.mxu1 %v13261_v15  ;;  %v13260_v16 = vld [vmem:[%s23244_s6 + $0x58] sm:$0xff] }
 0x2b1   :  { %1322 = vmatprep.subr.mxu1 %v13260_v16  ;;  %v17277_v9 = vpop.f32.mrf.mxu1 }
 0x2b3   :  { %15568 = vmatmul.mubr.msk.f32.gmra.mxu0 %vm56_vm0, %v16591_v22  ;;  %v13259_v22 = vld [vmem:[%s23244_s6 + $0x50] sm:$0xff]  ;;  %v17279_v14 = vpop.f32.mrf.mxu1 }
 0x2b4   :  { %15570 = vmatprep.mubr.msk.f32.mxu0 %vm56_vm0, %v16599_v24  ;;  %1323 = vmatpush1.msra.mxu1 %v13259_v22  ;;  %v13258_v24 = vld [vmem:[%s23244_s6 + $0x48] sm:$0xff] }
 0x2b5   :  { %1324 = vmatprep.subr.mxu1 %v13258_v24  ;;  %v17281_v15 = vpop.f32.mrf.mxu1 }
 0x2b7   :  { %15571 = vmatmul.mubr.msk.f32.gmra.mxu0 %vm56_vm0, %v16608_v25  ;;  %v13257_v25 = vld [vmem:[%s23244_s6 + $0x40] sm:$0xff]  ;;  %v17283_v16 = vpop.f32.mrf.mxu1 }
 0x2b8   :  { %1459 = vmatprep.mubr.f32.mxu0 %v23534_v40  ;;  %1325 = vmatpush1.msra.mxu1 %v13257_v25 }
 0x2b9   :  { %1529 = vmatprep.subr.mxu1 %v13280_v59 }
 0x363   :  { %v15557_v36 = vpop.f32.mrf.mxu0 }
 0x365   :  { %v1206_v63 = vpop.f32.mrf.mxu0 }
 0x366   :  { %13269 = vmatmul.mubr.msk.f32.vlgmr.msra.gmra.mxu0 %vm56_vm0, %v1206_v63 }
 0x367   :  { %v15560_v37 = vpop.f32.mrf.mxu0  ;;  %1465 = vmatprep.mubr.f32.mxu0 %v23534_v40  ;;  %14330 = vmatpush3.msra.mxu0 %v16736_v62  ;;  %v13279_v62 = vld [vmem:[%s23244_s6 + $0xb0] sm:$0xff] }
 0x368   :  { %14331 = vmatprep.subr.mxu0 %v16747_v10  ;;  %v13278_v10 = vld [vmem:[%s23244_s6 + $0xa8] sm:$0xff] }
 0x369   :  { %v1216_v38 = vpop.f32.mrf.mxu0  ;;  %14332 = vmatpush3.msra.mxu0 %v16761_v13  ;;  %v13277_v13 = vld [vmem:[%s23244_s6 + $0xa0] sm:$0xff] }
 0x36a   :  { %13270 = vmatmul.mubr.msk.f32.gmra.mxu0 %vm56_vm0, %v15557_v36  ;;  %14333 = vmatprep.subr.mxu0 %v16773_v18 }
 0x36b   :  { %v15563_v4 = vpop.f32.mrf.mxu0  ;;  %1471 = vmatprep.mubr.f32.mxu0 %v23534_v40  ;;  %14334 = vmatpush3.msra.mxu0 %v16785_v21  ;;  %v13276_v21 = vld [vmem:[%s23244_s6 + $0x98] sm:$0xff] }
 0x36c   :  { %14335 = vmatprep.subr.mxu0 %v16796_v26  ;;  %v23535_v26 = vld [vmem:[#allocation2_spill] sm:$0xff] }
 0x36d   :  { %v1226_v60 = vpop.f32.mrf.mxu0  ;;  %14336 = vmatpush3.msra.mxu0 %v16811_v29  ;;  %v13275_v29 = vld [vmem:[%s23244_s6 + $0x90] sm:$0xff] }
 0x36e   :  { %13265 = vmatmul.mubr.msk.f32.vlgmr.msra.gmra.mxu1 %vm56_vm0, %v1226_v60  ;;  %13271 = vmatmul.mubr.msk.f32.gmra.mxu0 %vm56_vm0, %v1216_v38 }
 0x36f   :  { %1364 = vmatprep.mubr.f32.mxu1 %v23534_v40  ;;  %1477 = vmatprep.mubr.f32.mxu0 %v23534_v40  ;;  %v15566_v18 = vpop.f32.mrf.mxu0 }
 0x370   :  { %1530 = vmatpush1.msra.mxu1 %v13279_v62  ;;  %14337 = vmatprep.subr.mxu0 %v16873_v35  ;;  %v13274_v35 = vld [vmem:[%s23244_s6 + $0x88] sm:$0xff] }
 0x371   :  { %1531 = vmatprep.subr.mxu1 %v13278_v10  ;;  %14338 = vmatpush3.msra.mxu0 %v23535_v26  ;;  %v1236_v57 = vpop.f32.mrf.mxu0 }
 0x372   :  { %13266 = vmatmul.mubr.msk.f32.gmra.mxu1 %vm56_vm0, %v15563_v4  ;;  %13272 = vmatmul.mubr.msk.f32.gmra.mxu0 %vm56_vm0, %v15560_v37 }
 0x373   :  { %1370 = vmatprep.mubr.f32.mxu1 %v23534_v40  ;;  %1532 = vmatpush1.msra.mxu1 %v13277_v13  ;;  %v15569_v19 = vpop.f32.mrf.mxu0 }
 0x374   :  { %1533 = vmatprep.subr.mxu1 %v13276_v21  ;;  %14339 = vmatprep.subr.mxu0 %v23536_v32 }
 0x375   :  { %1534 = vmatpush1.msra.mxu1 %v13275_v29  ;;  %14340 = vmatpush3.msra.mxu0 %v23537_v11  ;;  %v1246_v23 = vpop.f32.mrf.mxu0 }
 0x376   :  { %13267 = vmatmul.mubr.msk.f32.gmra.mxu1 %vm56_vm0, %v1236_v57  ;;  %1535 = vmatprep.subr.mxu1 %v13274_v35 }
 0x377   :  { %1376 = vmatprep.mubr.f32.mxu1 %v23534_v40  ;;  %1536 = vmatpush1.msra.mxu1 %v13273_v56  ;;  %v15572_v12 = vpop.f32.mrf.mxu0 }
 0x378   :  { %14341 = vmatprep.subr.mxu0 %v23538_v51 }
 0x379   :  { %14342 = vmatpush3.msra.mxu0 %v23539_v45  ;;  %v1256_v33 = vpop.f32.mrf.mxu0 }
 0x37a   :  { %13268 = vmatmul.mubr.msk.f32.gmra.mxu1 %vm56_vm0, %v15566_v18  ;;  %14343 = vmatprep.subr.mxu0 %v23540_v27 }
 0x37b   :  { %1569 = vmatprep.mubr.f32.mxu1 %v23534_v40  ;;  %14344 = vmatpush3.msra.mxu0 %v23541_v44 }
 0x37c   :  { %14345 = vmatprep.subr.mxu0 %v23542_v42 }
 0x37d   :  { %14346 = vmatpush3.msra.mxu0 %v23543_v28 }
 0x37e   :  { %13281 = vmatmul.mubr.msk.f32.vlgmr.msra.gmra.mxu1 %vm56_vm0, %v1246_v23  ;;  %14347 = vmatprep.subr.mxu0 %v23544_v43 }
 0x37f   :  { %1575 = vmatprep.mubr.f32.mxu1 %v23534_v40  ;;  %14348 = vmatpush3.msra.mxu0 %v23545_v41 }
 0x380   :  { %14349 = vmatprep.subr.mxu0 %v23546_v39 }
 0x381   :  { %14350 = vmatpush3.msra.mxu0 %v23547_v31 }
 0x382   :  { %13282 = vmatmul.mubr.msk.f32.gmra.mxu1 %vm56_vm0, %v15569_v19  ;;  %14351 = vmatprep.subr.mxu0 %v23548_v58 }
 0x383   :  { %1581 = vmatprep.mubr.f32.mxu1 %v23534_v40  ;;  %14352 = vmatpush3.msra.mxu0 %v23549_v50 }
 0x384   :  { %14353 = vmatprep.subr.mxu0 %v23550_v30 }
 0x385   :  { %14354 = vmatpush3.msra.mxu0 %v23551_v34 }
 0x386   :  { %13283 = vmatmul.mubr.msk.f32.gmra.mxu1 %vm56_vm0, %v1256_v33  ;;  %14355 = vmatprep.subr.mxu0 %v23552_v17 }
 0x387   :  { %1587 = vmatprep.mubr.f32.mxu1 %v23534_v40  ;;  %14356 = vmatpush3.msra.mxu0 %v23553_v61 }
 0x388   :  { %14357 = vmatprep.subr.mxu0 %v23554_v52 }
 0x389   :  { %14358 = vmatpush3.msra.mxu0 %v23555_v0 }
 0x38a   :  { %13284 = vmatmul.mubr.msk.f32.gmra.mxu1 %vm56_vm0, %v15572_v12  ;;  %14359 = vmatprep.subr.mxu0 %v23556_v1  ;;  %v14303_v1 = vadd.f32 %v17271_v6, %v17269_v5  ;;  %v1106_v5 = vld [vmem:[%s23245_s1 + $0x10] sm:$0xff] }
 0x38b   :  { %14360 = vmatpush3.msra.mxu0 %v23557_v2  ;;  %15581 = vmatprep.mubr.msk.f32.mxu1 %vm56_vm0, %v16266_v3  ;;  %v14309_v3 = vadd.f32 %v17279_v14, %v17277_v9 }
 0x426   :  { %v1461_v22 = vpop.f32.mrf.mxu0 }
 0x428   :  { %v1463_v59 = vpop.f32.mrf.mxu0 }
 0x42a   :  { %v1467_v37 = vpop.f32.mrf.mxu0 }
 0x42c   :  { %v1469_v60 = vpop.f32.mrf.mxu0 }
 0x42e   :  { %v1360_v24 = vpop.f32.mrf.mxu1  ;;  %v1473_v18 = vpop.f32.mrf.mxu0 }
 0x42f   :  { %v1462_v13 = vadd.f32 %v1461_v22, %v1360_v24  ;;  %v1110_v24 = vadd.f32 %v14309_v3, %v1106_v5 }
 0x430   :  { %v1362_v25 = vpop.f32.mrf.mxu1  ;;  %v1475_v32 = vpop.f32.mrf.mxu0 }
 0x431   :  { %v1464_v26 = vadd.f32 %v1463_v59, %v1362_v25  ;;  %v14312_v25 = vadd.f32 %v17283_v16, %v17281_v15  ;;  %v1695_v15 = vld [vmem:[%s23246_s2] sm:$0xff] }
 0x432   :  { %v1366_v36 = vpop.f32.mrf.mxu1  ;;  %v1479_v23 = vpop.f32.mrf.mxu0 }
 0x433   :  { %v1468_v57 = vadd.f32 %v1467_v37, %v1366_v36 }
 0x434   :  { %v1368_v63 = vpop.f32.mrf.mxu1 }
 0x435   :  { %v1470_v51 = vadd.f32 %v1469_v60, %v1368_v63 }
 0x436   :  { %v1372_v38 = vpop.f32.mrf.mxu1 }
 0x437   :  { %v1474_v28 = vadd.f32 %v1473_v18, %v1372_v38 }
 0x438   :  { %v1374_v4 = vpop.f32.mrf.mxu1 }
 0x439   :  { %v1476_v41 = vadd.f32 %v1475_v32, %v1374_v4 }
 0x43a   :  { %v1378_v62 = vpop.f32.mrf.mxu1 }
 0x43b   :  { %v1480_v30 = vadd.f32 %v1479_v23, %v1378_v62 }
 0x43c   :  { %v1380_v10 = vpop.f32.mrf.mxu1 }
 0x43e   :  { %v1571_v21 = vpop.f32.mrf.mxu1 }
 0x43f   :  { %v1594_v29 = vadd.f32 %v1571_v21, %v1462_v13  ;;  %v1696_v21 = vld [vmem:[%s23246_s2 + $0x8] sm:$0xff] }
 0x440   :  { %v1573_v35 = vpop.f32.mrf.mxu1 }
 0x441   :  { %v1595_v56 = vadd.f32 %v1573_v35, %v1464_v26  ;;  %v1602_v45 = vmul.f32 %v1594_v29, %v17048_v53 }
 0x442   :  { %v1577_v11 = vpop.f32.mrf.mxu1 }
 0x443   :  { %v1603_v19 = vmul.f32 %v1595_v56, %v17043_v55  ;;  %v1596_v27 = vadd.f32 %v1577_v11, %v1468_v57  ;;  %v1481_v55 = vpop.f32.mrf.mxu0  ;;  %v1697_v11 = vld [vmem:[%s23246_s2 + $0x10] sm:$0xff] }
 0x444   :  { %v1579_v44 = vpop.f32.mrf.mxu1  ;;  %v1482_v33 = vadd.f32 %v1481_v55, %v1380_v10 }
 0x445   :  { %v1597_v42 = vadd.f32 %v1579_v44, %v1470_v51  ;;  %1674 = vmatprep.mubr.f32.mxu0 %v1603_v19  ;;  %v1604_v12 = vmul.f32 %v1596_v27, %v17060_v54  ;;  %v1698_v44 = vld [vmem:[%s23246_s2 + $0x18] sm:$0xff] }
 0x446   :  { %v1583_v43 = vpop.f32.mrf.mxu1  ;;  %1675 = vmatmul.mubr.f32.vlgmr.msra.gmra.mxu0 %v1602_v45 }
 0x447   :  { %v1605_v39 = vmul.f32 %v1597_v42, %v17055_v49  ;;  %v1598_v31 = vadd.f32 %v1583_v43, %v1474_v28 }
 0x448   :  { %v1585_v58 = vpop.f32.mrf.mxu1 }
 0x449   :  { %v1599_v50 = vadd.f32 %v1585_v58, %v1476_v41  ;;  %1679 = vmatprep.mubr.f32.mxu0 %v1605_v39  ;;  %v1606_v17 = vmul.f32 %v1598_v31, %v17072_v48  ;;  %v14306_v48 = vadd.f32 %v17275_v8, %v17273_v7  ;;  %v1107_v7 = vld [vmem:[%s23245_s1 + $0x18] sm:$0xff]  ;;  %v13243_v8 = vmul.f32 -1.442695, %v1110_v24  ;;  %v13309_v24 = vld [vmem:[%s23240_s5 + $0xe0] sm:$0xff] }
 0x44a   :  { %v1589_v53 = vpop.f32.mrf.mxu1  ;;  %1680 = vmatmul.mubr.f32.gmra.mxu0 %v1604_v12  ;;  %v1111_v59 = vadd.f32 %v14312_v25, %v1107_v7  ;;  %v16267_v12 = vld [vmem:[%s23238_s3] sm:$0xff]  ;;  %v17383_v25 = vld [vmem:[%s23239_s4 + $0x8] sm:$0xff]  ;;  %v17390_v7 = vld [vmem:[%s23239_s4 + $0x10] sm:$0xff] }
 0x44b   :  { %v1607_v34 = vmul.f32 %v1599_v50, %v17067_v47  ;;  %v1600_v61 = vadd.f32 %v1589_v53, %v1480_v30  ;;  %v1104_v47 = vld [vmem:[%s23245_s1] sm:$0xff] }
 0x44c   :  { %v1591_v52 = vpop.f32.mrf.mxu1  ;;  %v1108_v2 = vadd.f32 %v14303_v1, %v1104_v47  ;;  %v13244_v9 = vmul.f32 -1.442695, %v1111_v59  ;;  %v17404_v59 = vld [vmem:[%s23239_s4 + $0x20] sm:$0xff] }
 0x44d   :  { %v1601_v0 = vadd.f32 %v1591_v52, %v1482_v33  ;;  %1684 = vmatprep.mubr.f32.mxu0 %v1607_v34  ;;  %v1608_v54 = vmul.f32 %v1600_v61, %v17084_v46  ;;  %v16268_v33 = vld [vmem:[%s23238_s3 + $0x8] sm:$0xff] }
 0x44e   :  { %1685 = vmatmul.mubr.f32.gmra.mxu0 %v1606_v17  ;;  %v13241_v22 = vmul.f32 -1.442695, %v1108_v2 }
 0x44f   :  { %v1609_v49 = vmul.f32 %v1601_v0, %v17079_v20  ;;  %v1105_v20 = vld [vmem:[%s23245_s1 + $0x8] sm:$0xff] }
 0x450   :  { %v1109_v46 = vadd.f32 %v14306_v48, %v1105_v20  ;;  %15962 = vpow2.f32 %v13241_v22 }
 0x451   :  { %1689 = vmatprep.mubr.f32.mxu0 %v1609_v49 }
 0x452   :  { %1690 = vmatmul.mubr.f32.gmra.mxu0 %v1608_v54  ;;  %v13242_v6 = vmul.f32 -1.442695, %v1109_v46  ;;  %v16269_v54 = vld [vmem:[%s23238_s3 + $0x10] sm:$0xff]  ;;  %v16270_v46 = vld [vmem:[%s23238_s3 + $0x18] sm:$0xff] }
 0x453   :  { %2049 = vmatprep.mubr.f32.mxu0 %v23534_v40 }
 0x454   :  { %15964 = vpow2.f32 %v13242_v6  ;;  %v13310_v6 = vld [vmem:[%s23240_s5 + $0xe8] sm:$0xff] }
 0x455   :  { %15966 = vpow2.f32 %v13243_v8  ;;  %v17397_v8 = vld [vmem:[%s23239_s4 + $0x18] sm:$0xff] }
 0x456   :  { %15968 = vpow2.f32 %v13244_v9  ;;  %v17411_v9 = vld [vmem:[%s23239_s4 + $0x28] sm:$0xff] }
 0x45d   :  { %v15963_v14 = vpop.eup %15962 }
 0x45e   :  { %v1124_v63 = vadd.f32 1.0, %v15963_v14  ;;  %v17418_v14 = vld [vmem:[%s23239_s4 + $0x30] sm:$0xff] }
 0x460   :  { %15970 = vrcp.f32 %v1124_v63  ;;  %v17432_v63 = vld [vmem:[%s23239_s4 + $0x40] sm:$0xff] }
 0x461   :  { %v15965_v36 = vpop.eup %15964 }
 0x462   :  { %v1125_v38 = vadd.f32 1.0, %v15965_v36  ;;  %v15967_v16 = vpop.eup %15966  ;;  %v17425_v36 = vld [vmem:[%s23239_s4 + $0x38] sm:$0xff] }
 0x463   :  { %v1126_v13 = vadd.f32 1.0, %v15967_v16  ;;  %v15969_v26 = vpop.eup %15968  ;;  %v13305_v16 = vld [vmem:[%s23240_s5 + $0xc0] sm:$0xff] }
 0x464   :  { %15972 = vrcp.f32 %v1125_v38  ;;  %v1127_v32 = vadd.f32 1.0, %v15969_v26  ;;  %v17446_v38 = vld [vmem:[%s23239_s4 + $0x50] sm:$0xff]  ;;  %v13301_v26 = vld [vmem:[%s23240_s5 + $0xa0] sm:$0xff] }
 0x465   :  { %23558 = vst [vmem:[#allocation2_spill] sm:$0xff] %v17446_v38 }
 0x46d   :  { %v15971_v23 = vpop.eup %15970 }
 0x46e   :  { %v1711_v41 = vsub.f32 1.0, %v15971_v23  ;;  %v1707_v31 = vmul.f32 %v16267_v12, %v15971_v23 }
 0x471   :  { %v15973_v43 = vpop.eup %15972 }
 0x472   :  { %v1712_v55 = vsub.f32 1.0, %v15973_v43  ;;  %v1708_v34 = vmul.f32 %v16268_v33, %v15973_v43  ;;  %v1866_v43 = vld [vmem:[%s23240_s5 + $0x70] sm:$0xff]  ;;  %v1856_v33 = vld [vmem:[%s23240_s5 + $0x20] sm:$0xff] }
 0x506   :  { %v14361_v37 = vpop.f32.mrf.mxu0 }
 0x508   :  { %v14362_v4 = vpop.f32.mrf.mxu0 }
 0x509   :  { %v14363_v60 = vadd.f32 %v14362_v4, %v14361_v37  ;;  %v17439_v37 = vld [vmem:[%s23239_s4 + $0x48] sm:$0xff]  ;;  %v17453_v4 = vld [vmem:[%s23239_s4 + $0x58] sm:$0xff] }
 0x50a   :  { %v14364_v62 = vpop.f32.mrf.mxu0  ;;  %23559 = vst [vmem:[#allocation3_spill] sm:$0xff] %v17453_v4 }
 0x50b   :  { %v1699_v10 = vadd.f32 %v14363_v60, %v1695_v15  ;;  %v13306_v15 = vld [vmem:[%s23240_s5 + $0xc8] sm:$0xff]  ;;  %v13312_v60 = vld [vmem:[%s23240_s5 + $0xf8] sm:$0xff] }
 0x50c   :  { %v14365_v18 = vpop.f32.mrf.mxu0  ;;  %2009 = vmatprep.subr.mxu0 %v13312_v60  ;;  %v13330_v60 = vld [vmem:[%s23240_s5 + $0x108] sm:$0xff] }
 0x50d   :  { %15974 = vtanh.f32 %v1699_v10  ;;  %v14366_v29 = vadd.f32 %v14365_v18, %v14364_v62  ;;  %v13311_v62 = vld [vmem:[%s23240_s5 + $0xf0] sm:$0xff]  ;;  %v13308_v10 = vld [vmem:[%s23240_s5 + $0xd8] sm:$0xff]  ;;  %v13302_v18 = vld [vmem:[%s23240_s5 + $0xa8] sm:$0xff] }
 0x50e   :  { %v14367_v35 = vpop.f32.mrf.mxu0  ;;  %15976 = vrcp.f32 %v1126_v13  ;;  %2010 = vmatpush1.msra.mxu0 %v13311_v62  ;;  %v13307_v13 = vld [vmem:[%s23240_s5 + $0xd0] sm:$0xff]  ;;  %v13332_v62 = vld [vmem:[%s23240_s5 + $0x118] sm:$0xff] }
 0x50f   :  { %v1700_v56 = vadd.f32 %v14366_v29, %v1696_v21  ;;  %2011 = vmatprep.subr.mxu0 %v13308_v10  ;;  %v13304_v21 = vld [vmem:[%s23240_s5 + $0xb8] sm:$0xff]  ;;  %v13303_v29 = vld [vmem:[%s23240_s5 + $0xb0] sm:$0xff]  ;;  %v13329_v10 = vld [vmem:[%s23240_s5 + $0x100] sm:$0xff] }
 0x510   :  { %v14368_v57 = vpop.f32.mrf.mxu0  ;;  %2012 = vmatpush1.msra.mxu0 %v13307_v13 }
 0x511   :  { %15978 = vtanh.f32 %v1700_v56  ;;  %v14369_v51 = vadd.f32 %v14368_v57, %v14367_v35  ;;  %2013 = vmatprep.subr.mxu0 %v13304_v21  ;;  %v13298_v35 = vld [vmem:[%s23240_s5 + $0x88] sm:$0xff]  ;;  %v13300_v56 = vld [vmem:[%s23240_s5 + $0x98] sm:$0xff]  ;;  %v13299_v57 = vld [vmem:[%s23240_s5 + $0x90] sm:$0xff] }
 0x512   :  { %v14370_v19 = vpop.f32.mrf.mxu0  ;;  %15980 = vrcp.f32 %v1127_v32  ;;  %2014 = vmatpush1.msra.mxu0 %v13303_v29  ;;  %v13297_v32 = vld [vmem:[%s23240_s5 + $0x80] sm:$0xff] }
 0x513   :  { %v1701_v45 = vadd.f32 %v14369_v51, %v1697_v11  ;;  %2015 = vmatprep.subr.mxu0 %v13300_v56  ;;  %v1865_v11 = vld [vmem:[%s23240_s5 + $0x68] sm:$0xff]  ;;  %v1867_v51 = vld [vmem:[%s23240_s5 + $0x78] sm:$0xff] }
 0x514   :  { %v14371_v27 = vpop.f32.mrf.mxu0  ;;  %2016 = vmatpush1.msra.mxu0 %v13299_v57  ;;  %v17664_v56 = vld [vmem:[%s23241_s8 + $0x78] sm:$0xff]  ;;  %v17678_v57 = vld [vmem:[%s23241_s8 + $0x70] sm:$0xff] }
 0x515   :  { %15982 = vtanh.f32 %v1701_v45  ;;  %v14372_v42 = vadd.f32 %v14371_v27, %v14370_v19  ;;  %2199 = vmatprep.subr.mxu0 %v1867_v51  ;;  %23561 = vst [vmem:[#allocation5_spill] sm:$0xff] %v17664_v56  ;;  %23563 = vst [vmem:[#allocation7_spill] sm:$0xff] %v17678_v57  ;;  %v17692_v51 = vld [vmem:[%s23241_s8 + $0x68] sm:$0xff] }
 0x516   :  { %23565 = vst [vmem:[#allocation9_spill] sm:$0xff] %v17692_v51 }
 0x517   :  { %v1702_v28 = vadd.f32 %v14372_v42, %v1698_v44 }
 0x519   :  { %15984 = vtanh.f32 %v1702_v28  ;;  %v1864_v28 = vld [vmem:[%s23240_s5 + $0x60] sm:$0xff] }
 0x51a   :  { %v15975_v39 = vpop.eup %15974 }
 0x51b   :  { %v1715_v58 = vmul.f32 %v15975_v39, %v1711_v41  ;;  %v15977_v50 = vpop.eup %15976  ;;  %v1861_v41 = vld [vmem:[%s23240_s5 + $0x48] sm:$0xff]  ;;  %v1863_v39 = vld [vmem:[%s23240_s5 + $0x58] sm:$0xff] }
 0x51c   :  { %v1713_v52 = vsub.f32 1.0, %v15977_v50  ;;  %v1709_v1 = vmul.f32 %v16269_v54, %v15977_v50  ;;  %v1857_v50 = vld [vmem:[%s23240_s5 + $0x28] sm:$0xff] }
 0x51d   :  { %v17329_v30 = vadd.f32 %v1715_v58, %v1707_v31  ;;  %v1860_v31 = vld [vmem:[%s23240_s5 + $0x40] sm:$0xff]  ;;  %v1862_v58 = vld [vmem:[%s23240_s5 + $0x50] sm:$0xff]  ;;  %v13342_v54 = vld [vmem:[%s23240_s5 + $0x168] sm:$0xff] }
 0x51e   :  { %v15979_v53 = vpop.eup %15978 }
 0x51f   :  { %v1716_v17 = vmul.f32 %v15979_v53, %v1712_v55  ;;  %1723 = vst.msk [vmem:[%s23247_s9] sm:$0xff] %vm56_vm0, %v17329_v30  ;;  %v15981_v61 = vpop.eup %15980  ;;  %v1859_v55 = vld [vmem:[%s23240_s5 + $0x38] sm:$0xff] }
 0x520   :  { %v1714_v48 = vsub.f32 1.0, %v15981_v61  ;;  %v1710_v3 = vmul.f32 %v16270_v46, %v15981_v61  ;;  %v1855_v61 = vld [vmem:[%s23240_s5 + $0x18] sm:$0xff] }
 0x521   :  { %v17339_v0 = vadd.f32 %v1716_v17, %v1708_v34  ;;  %v1858_v34 = vld [vmem:[%s23240_s5 + $0x30] sm:$0xff]  ;;  %v1853_v17 = vld [vmem:[%s23240_s5 + $0x8] sm:$0xff]  ;;  %v13340_v46 = vld [vmem:[%s23240_s5 + $0x158] sm:$0xff] }
 0x522   :  { %v15983_v49 = vpop.eup %15982 }
 0x523   :  { %v1717_v47 = vmul.f32 %v15983_v49, %v1713_v52  ;;  %1724 = vst.msk [vmem:[%s23247_s9 + $0x8] sm:$0xff] %vm56_vm0, %v17339_v0  ;;  %v1852_v52 = vld [vmem:[%s23240_s5] sm:$0xff]  ;;  %v1854_v49 = vld [vmem:[%s23240_s5 + $0x10] sm:$0xff] }
 0x525   :  { %v17349_v2 = vadd.f32 %v1717_v47, %v1709_v1  ;;  %v13344_v1 = vld [vmem:[%s23240_s5 + $0x178] sm:$0xff]  ;;  %v13341_v47 = vld [vmem:[%s23240_s5 + $0x160] sm:$0xff] }
 0x526   :  { %v15985_v20 = vpop.eup %15984 }
 0x527   :  { %v1718_v22 = vmul.f32 %v15985_v20, %v1714_v48  ;;  %1725 = vst.msk [vmem:[%s23247_s9 + $0x10] sm:$0xff] %vm56_vm0, %v17349_v2  ;;  %v13343_v48 = vld [vmem:[%s23240_s5 + $0x170] sm:$0xff]  ;;  %v13338_v20 = vld [vmem:[%s23240_s5 + $0x148] sm:$0xff] }
 0x529   :  { %v17359_v5 = vadd.f32 %v1718_v22, %v1710_v3  ;;  %v13337_v3 = vld [vmem:[%s23240_s5 + $0x140] sm:$0xff]  ;;  %v13339_v22 = vld [vmem:[%s23240_s5 + $0x150] sm:$0xff] }
 0x52b   :  { %1726 = vst.msk [vmem:[%s23247_s9 + $0x18] sm:$0xff] %vm56_vm0, %v17359_v5  ;;  %15573 = vmatprep.subr.mxu1 %v17359_v5 }
 0x52c   :  { %15574 = vmatpush3.msra.mxu1 %v17359_v5 }
 0x52d   :  { %15575 = vmatprep.subr.mxu1 %v17349_v2 }
 0x52e   :  { %15576 = vmatpush3.msra.mxu1 %v17349_v2 }
 0x52f   :  { %15577 = vmatprep.subr.mxu1 %v17339_v0 }
 0x530   :  { %15578 = vmatpush3.msra.mxu1 %v17339_v0 }
 0x531   :  { %15579 = vmatprep.subr.mxu1 %v17329_v30 }
 0x532   :  { %15580 = vmatpush3.msra.mxu1 %v17329_v30 }
 0x533   :  { %15582 = vmatmul.mubr.msk.f32.vlgmr.msra.gmra.mxu1 %vm56_vm0, %v17383_v25  ;;  %1920 = vmatprep.subr.mxu1 %v13310_v6  ;;  %v13334_v6 = vld [vmem:[%s23240_s5 + $0x128] sm:$0xff] }
 0x534   :  { %15584 = vmatprep.mubr.msk.f32.mxu1 %vm56_vm0, %v17390_v7  ;;  %1921 = vmatpush1.msra.mxu1 %v13309_v24  ;;  %v13336_v24 = vld [vmem:[%s23240_s5 + $0x138] sm:$0xff] }
 0x535   :  { %1922 = vmatprep.subr.mxu1 %v13306_v15  ;;  %v13333_v15 = vld [vmem:[%s23240_s5 + $0x120] sm:$0xff] }
 0x536   :  { %1923 = vmatpush1.msra.mxu1 %v13305_v16  ;;  %v13335_v16 = vld [vmem:[%s23240_s5 + $0x130] sm:$0xff] }
 0x537   :  { %15585 = vmatmul.mubr.msk.f32.gmra.mxu1 %vm56_vm0, %v17397_v8  ;;  %1924 = vmatprep.subr.mxu1 %v13302_v18  ;;  %v13331_v18 = vld [vmem:[%s23240_s5 + $0x110] sm:$0xff] }
 0x538   :  { %15587 = vmatprep.mubr.msk.f32.mxu1 %vm56_vm0, %v17404_v59  ;;  %1925 = vmatpush1.msra.mxu1 %v13301_v26 }
 0x539   :  { %1926 = vmatprep.subr.mxu1 %v13298_v35  ;;  %v17657_v35 = vld [vmem:[%s23241_s8 + $0xf8] sm:$0xff] }
 0x53a   :  { %1927 = vmatpush1.msra.mxu1 %v13297_v32  ;;  %23560 = vst [vmem:[#allocation4_spill] sm:$0xff] %v17657_v35  ;;  %v17671_v32 = vld [vmem:[%s23241_s8 + $0xf0] sm:$0xff] }
 0x53b   :  { %15588 = vmatmul.mubr.msk.f32.gmra.mxu1 %vm56_vm0, %v17411_v9  ;;  %2110 = vmatprep.subr.mxu1 %v1865_v11  ;;  %23562 = vst [vmem:[#allocation6_spill] sm:$0xff] %v17671_v32  ;;  %v17685_v11 = vld [vmem:[%s23241_s8 + $0xe8] sm:$0xff] }
 0x53c   :  { %15590 = vmatprep.mubr.msk.f32.mxu1 %vm56_vm0, %v17418_v14  ;;  %23564 = vst [vmem:[#allocation8_spill] sm:$0xff] %v17685_v11 }
 0x53f   :  { %15591 = vmatmul.mubr.msk.f32.gmra.mxu1 %vm56_vm0, %v17425_v36 }
 0x540   :  { %15593 = vmatprep.mubr.msk.f32.mxu1 %vm56_vm0, %v17432_v63 }
 0x543   :  { %15594 = vmatmul.mubr.msk.f32.gmra.mxu1 %vm56_vm0, %v17439_v37 }
 0x544   :  { %15596 = vmatprep.mubr.msk.f32.mxu1 %vm56_vm0, %v17446_v38 }
 0x547   :  { %15597 = vmatmul.mubr.msk.f32.gmra.mxu1 %vm56_vm0, %v17453_v4 }
 0x548   :  { %1960 = vmatprep.mubr.f32.mxu1 %v23534_v40 }
 0x5f3   :  { %v17506_v19 = vpop.f32.mrf.mxu1 }
 0x5f5   :  { %v1793_v45 = vpop.f32.mrf.mxu1 }
 0x5f7   :  { %v17508_v27 = vpop.f32.mrf.mxu1 }
 0x5f9   :  { %v17510_v44 = vpop.f32.mrf.mxu1 }
 0x5fb   :  { %v15589_v42 = vpop.f32.mrf.mxu1 }
 0x5fd   :  { %v1813_v23 = vpop.f32.mrf.mxu1 }
 0x5fe   :  { %13313 = vmatmul.mubr.msk.f32.vlgmr.msra.gmra.mxu1 %vm56_vm0, %v1813_v23  ;;  %13317 = vmatmul.mubr.msk.f32.vlgmr.msra.gmra.mxu0 %vm56_vm0, %v1813_v23  ;;  %v17734_v23 = vld [vmem:[%s23241_s8 + $0x50] sm:$0xff] }
 0x5ff   :  { %1966 = vmatprep.mubr.f32.mxu1 %v23534_v40  ;;  %2055 = vmatprep.mubr.f32.mxu0 %v23534_v40  ;;  %v15592_v12 = vpop.f32.mrf.mxu1  ;;  %23571 = vst [vmem:[#allocation15_spill] sm:$0xff] %v17734_v23 }
 0x600   :  { %2111 = vmatpush1.msra.mxu1 %v1864_v28  ;;  %2200 = vmatpush1.msra.mxu0 %v1866_v43  ;;  %v17741_v28 = vld [vmem:[%s23241_s8 + $0xc8] sm:$0xff] }
 0x601   :  { %2112 = vmatprep.subr.mxu1 %v1861_v41  ;;  %2201 = vmatprep.subr.mxu0 %v1863_v39  ;;  %v1823_v53 = vpop.f32.mrf.mxu1  ;;  %23572 = vst [vmem:[#allocation16_spill] sm:$0xff] %v17741_v28  ;;  %v17748_v43 = vld [vmem:[%s23241_s8 + $0x48] sm:$0xff]  ;;  %v17755_v41 = vld [vmem:[%s23241_s8 + $0xc0] sm:$0xff] }
 0x602   :  { %13314 = vmatmul.mubr.msk.f32.gmra.mxu1 %vm56_vm0, %v15589_v42  ;;  %13318 = vmatmul.mubr.msk.f32.gmra.mxu0 %vm56_vm0, %v15589_v42  ;;  %v17727_v42 = vld [vmem:[%s23241_s8 + $0xd0] sm:$0xff]  ;;  %23573 = vst [vmem:[#allocation17_spill] sm:$0xff] %v17748_v43  ;;  %23574 = vst [vmem:[#allocation18_spill] sm:$0xff] %v17755_v41  ;;  %v17762_v39 = vld [vmem:[%s23241_s8 + $0x40] sm:$0xff] }
 0x603   :  { %1972 = vmatprep.mubr.f32.mxu1 %v23534_v40  ;;  %2061 = vmatprep.mubr.f32.mxu0 %v23534_v40  ;;  %v15595_v13 = vpop.f32.mrf.mxu1  ;;  %23570 = vst [vmem:[#allocation14_spill] sm:$0xff] %v17727_v42  ;;  %23575 = vst [vmem:[#allocation19_spill] sm:$0xff] %v17762_v39 }
 0x604   :  { %2113 = vmatpush1.msra.mxu1 %v1860_v31  ;;  %2202 = vmatpush1.msra.mxu0 %v1862_v58  ;;  %v17776_v31 = vld [vmem:[%s23241_s8 + $0x38] sm:$0xff]  ;;  %v17783_v58 = vld [vmem:[%s23241_s8 + $0xb0] sm:$0xff] }
 0x605   :  { %2114 = vmatprep.subr.mxu1 %v1857_v50  ;;  %2203 = vmatprep.subr.mxu0 %v1859_v55  ;;  %v1833_v21 = vpop.f32.mrf.mxu1  ;;  %23577 = vst [vmem:[#allocation21_spill] sm:$0xff] %v17776_v31  ;;  %23578 = vst [vmem:[#allocation22_spill] sm:$0xff] %v17783_v58  ;;  %v17790_v50 = vld [vmem:[%s23241_s8 + $0x30] sm:$0xff]  ;;  %v17797_v55 = vld [vmem:[%s23241_s8 + $0xa8] sm:$0xff] }
 0x606   :  { %13315 = vmatmul.mubr.msk.f32.gmra.mxu1 %vm56_vm0, %v1823_v53  ;;  %13319 = vmatmul.mubr.msk.f32.gmra.mxu0 %vm56_vm0, %v1823_v53  ;;  %23579 = vst [vmem:[#allocation23_spill] sm:$0xff] %v17790_v50  ;;  %23580 = vst [vmem:[#allocation24_spill] sm:$0xff] %v17797_v55  ;;  %v17804_v53 = vld [vmem:[%s23241_s8 + $0x28] sm:$0xff] }
 0x607   :  { %1978 = vmatprep.mubr.f32.mxu1 %v23534_v40  ;;  %2067 = vmatprep.mubr.f32.mxu0 %v23534_v40  ;;  %v15598_v26 = vpop.f32.mrf.mxu1  ;;  %23581 = vst [vmem:[#allocation25_spill] sm:$0xff] %v17804_v53 }
 0x608   :  { %2115 = vmatpush1.msra.mxu1 %v1856_v33  ;;  %2204 = vmatpush1.msra.mxu0 %v1858_v34  ;;  %v17811_v33 = vld [vmem:[%s23241_s8 + $0xa0] sm:$0xff] }
 0x609   :  { %2116 = vmatprep.subr.mxu1 %v1853_v17  ;;  %2205 = vmatprep.subr.mxu0 %v1855_v61  ;;  %v1843_v29 = vpop.f32.mrf.mxu1  ;;  %23582 = vst [vmem:[#allocation26_spill] sm:$0xff] %v17811_v33  ;;  %v17818_v34 = vld [vmem:[%s23241_s8 + $0x20] sm:$0xff]  ;;  %v17825_v17 = vld [vmem:[%s23241_s8 + $0x98] sm:$0xff] }
 0x60a   :  { %13316 = vmatmul.mubr.msk.f32.gmra.mxu1 %vm56_vm0, %v15592_v12  ;;  %13320 = vmatmul.mubr.msk.f32.gmra.mxu0 %vm56_vm0, %v15592_v12  ;;  %v17769_v12 = vld [vmem:[%s23241_s8 + $0xb8] sm:$0xff]  ;;  %23583 = vst [vmem:[#allocation27_spill] sm:$0xff] %v17818_v34  ;;  %23584 = vst [vmem:[#allocation28_spill] sm:$0xff] %v17825_v17 }
 0x60b   :  { %2117 = vmatpush1.msra.mxu1 %v1852_v52  ;;  %2150 = vmatprep.mubr.f32.mxu1 %v23534_v40  ;;  %23576 = vst [vmem:[#allocation20_spill] sm:$0xff] %v17769_v12  ;;  %v17832_v61 = vld [vmem:[%s23241_s8 + $0x18] sm:$0xff]  ;;  %v17839_v52 = vld [vmem:[%s23241_s8 + $0x90] sm:$0xff] }
 0x60c   :  { %2206 = vmatpush1.msra.mxu0 %v1854_v49  ;;  %2239 = vmatprep.mubr.f32.mxu0 %v23534_v40  ;;  %23585 = vst [vmem:[#allocation29_spill] sm:$0xff] %v17832_v61  ;;  %23586 = vst [vmem:[#allocation30_spill] sm:$0xff] %v17839_v52  ;;  %v17846_v49 = vld [vmem:[%s23241_s8 + $0x10] sm:$0xff] }
 0x60d   :  { %2316 = vmatprep.subr.mxu1 %v13342_v54  ;;  %2405 = vmatprep.subr.mxu0 %v13344_v1  ;;  %23587 = vst [vmem:[#allocation31_spill] sm:$0xff] %v17846_v49  ;;  %v17853_v54 = vld [vmem:[%s23241_s8 + $0x88] sm:$0xff] }
 0x60e   :  { %13321 = vmatmul.mubr.msk.f32.vlgmr.msra.gmra.mxu1 %vm56_vm0, %v1793_v45  ;;  %13325 = vmatmul.mubr.msk.f32.vlgmr.msra.gmra.mxu0 %vm56_vm0, %v1793_v45  ;;  %v17706_v45 = vld [vmem:[%s23241_s8 + $0x60] sm:$0xff]  ;;  %23588 = vst [vmem:[#allocation32_spill] sm:$0xff] %v17853_v54  ;;  %v17860_v1 = vld [vmem:[%s23241_s8 + $0x8] sm:$0xff] }
 0x60f   :  { %2156 = vmatprep.mubr.f32.mxu1 %v23534_v40  ;;  %2245 = vmatprep.mubr.f32.mxu0 %v23534_v40  ;;  %23567 = vst [vmem:[#allocation11_spill] sm:$0xff] %v17706_v45  ;;  %23589 = vst [vmem:[#allocation33_spill] sm:$0xff] %v17860_v1 }
 0x610   :  { %2317 = vmatpush1.msra.mxu1 %v13341_v47  ;;  %2406 = vmatpush1.msra.mxu0 %v13343_v48  ;;  %v17867_v47 = vld [vmem:[%s23241_s8 + $0x80] sm:$0xff] }
 0x611   :  { %2318 = vmatprep.subr.mxu1 %v13338_v20  ;;  %2407 = vmatprep.subr.mxu0 %v13340_v46  ;;  %23590 = vst [vmem:[#allocation34_spill] sm:$0xff] %v17867_v47  ;;  %v17874_v48 = vld [vmem:[%s23241_s8] sm:$0xff] }
 0x612   :  { %13322 = vmatmul.mubr.msk.f32.gmra.mxu1 %vm56_vm0, %v17506_v19  ;;  %13326 = vmatmul.mubr.msk.f32.gmra.mxu0 %vm56_vm0, %v17506_v19  ;;  %v17699_v19 = vld [vmem:[%s23241_s8 + $0xe0] sm:$0xff]  ;;  %23591 = vst [vmem:[#allocation35_spill] sm:$0xff] %v17874_v48 }
 0x613   :  { %2162 = vmatprep.mubr.f32.mxu1 %v23534_v40  ;;  %2251 = vmatprep.mubr.f32.mxu0 %v23534_v40  ;;  %23566 = vst [vmem:[#allocation10_spill] sm:$0xff] %v17699_v19 }
 0x614   :  { %2319 = vmatpush1.msra.mxu1 %v13337_v3  ;;  %2408 = vmatpush1.msra.mxu0 %v13339_v22 }
 0x615   :  { %2320 = vmatprep.subr.mxu1 %v13334_v6  ;;  %2409 = vmatprep.subr.mxu0 %v13336_v24 }
 0x616   :  { %13323 = vmatmul.mubr.msk.f32.gmra.mxu1 %vm56_vm0, %v17510_v44  ;;  %13327 = vmatmul.mubr.msk.f32.gmra.mxu0 %vm56_vm0, %v17510_v44  ;;  %v17720_v44 = vld [vmem:[%s23241_s8 + $0x58] sm:$0xff] }
 0x617   :  { %2168 = vmatprep.mubr.f32.mxu1 %v23534_v40  ;;  %2257 = vmatprep.mubr.f32.mxu0 %v23534_v40  ;;  %23569 = vst [vmem:[#allocation13_spill] sm:$0xff] %v17720_v44 }
 0x618   :  { %2321 = vmatpush1.msra.mxu1 %v13333_v15  ;;  %2410 = vmatpush1.msra.mxu0 %v13335_v16 }
 0x619   :  { %2322 = vmatprep.subr.mxu1 %v13330_v60  ;;  %2411 = vmatprep.subr.mxu0 %v13332_v62 }
 0x61a   :  { %13324 = vmatmul.mubr.msk.f32.gmra.mxu1 %vm56_vm0, %v17508_v27  ;;  %13328 = vmatmul.mubr.msk.f32.gmra.mxu0 %vm56_vm0, %v17508_v27  ;;  %v17713_v27 = vld [vmem:[%s23241_s8 + $0xd8] sm:$0xff] }
 0x61b   :  { %2323 = vmatpush1.msra.mxu1 %v13329_v10  ;;  %2356 = vmatprep.mubr.f32.mxu1 %v23534_v40  ;;  %23568 = vst [vmem:[#allocation12_spill] sm:$0xff] %v17713_v27 }
 0x61c   :  { %2412 = vmatpush1.msra.mxu0 %v13331_v18  ;;  %2445 = vmatprep.mubr.f32.mxu0 %v23534_v40 }
 0x61d   :  { %14389 = vmatprep.subr.mxu1 %v17657_v35  ;;  %14433 = vmatprep.subr.mxu0 %v17657_v35 }
 0x61e   :  { %13345 = vmatmul.mubr.msk.f32.vlgmr.msra.gmra.mxu1 %vm56_vm0, %v1833_v21  ;;  %13349 = vmatmul.mubr.msk.f32.vlgmr.msra.gmra.mxu0 %vm56_vm0, %v1833_v21 }
 0x61f   :  { %2362 = vmatprep.mubr.f32.mxu1 %v23534_v40  ;;  %2451 = vmatprep.mubr.f32.mxu0 %v23534_v40 }
 0x620   :  { %14390 = vmatpush3.msra.mxu1 %v17664_v56  ;;  %14434 = vmatpush3.msra.mxu0 %v17664_v56 }
 0x621   :  { %14391 = vmatprep.subr.mxu1 %v17671_v32  ;;  %14435 = vmatprep.subr.mxu0 %v17671_v32 }
 0x622   :  { %13346 = vmatmul.mubr.msk.f32.gmra.mxu1 %vm56_vm0, %v15595_v13  ;;  %13350 = vmatmul.mubr.msk.f32.gmra.mxu0 %vm56_vm0, %v15595_v13 }
 0x623   :  { %2368 = vmatprep.mubr.f32.mxu1 %v23534_v40  ;;  %2457 = vmatprep.mubr.f32.mxu0 %v23534_v40 }
 0x624   :  { %14392 = vmatpush3.msra.mxu1 %v17678_v57  ;;  %14436 = vmatpush3.msra.mxu0 %v17678_v57 }
 0x625   :  { %14393 = vmatprep.subr.mxu1 %v17685_v11  ;;  %14437 = vmatprep.subr.mxu0 %v17685_v11 }
 0x626   :  { %13347 = vmatmul.mubr.msk.f32.gmra.mxu1 %vm56_vm0, %v1843_v29  ;;  %13351 = vmatmul.mubr.msk.f32.gmra.mxu0 %vm56_vm0, %v1843_v29 }
 0x627   :  { %2374 = vmatprep.mubr.f32.mxu1 %v23534_v40  ;;  %2463 = vmatprep.mubr.f32.mxu0 %v23534_v40 }
 0x628   :  { %14394 = vmatpush3.msra.mxu1 %v17692_v51  ;;  %14438 = vmatpush3.msra.mxu0 %v17692_v51 }
 0x629   :  { %14395 = vmatprep.subr.mxu1 %v17699_v19  ;;  %14439 = vmatprep.subr.mxu0 %v17699_v19 }
 0x62a   :  { %13348 = vmatmul.mubr.msk.f32.gmra.mxu1 %vm56_vm0, %v15598_v26  ;;  %13352 = vmatmul.mubr.msk.f32.gmra.mxu0 %vm56_vm0, %v15598_v26 }
 0x62b   :  { %14396 = vmatpush3.msra.mxu1 %v17706_v45  ;;  %14440 = vmatpush3.msra.mxu0 %v17706_v45 }
 0x62c   :  { %14397 = vmatprep.subr.mxu1 %v17713_v27  ;;  %14441 = vmatprep.subr.mxu0 %v17713_v27 }
 0x62d   :  { %14398 = vmatpush3.msra.mxu1 %v17720_v44  ;;  %14442 = vmatpush3.msra.mxu0 %v17720_v44 }
 0x62e   :  { %14399 = vmatprep.subr.mxu1 %v17727_v42  ;;  %14443 = vmatprep.subr.mxu0 %v17727_v42 }
 0x62f   :  { %14400 = vmatpush3.msra.mxu1 %v17734_v23  ;;  %14444 = vmatpush3.msra.mxu0 %v17734_v23 }
 0x630   :  { %14401 = vmatprep.subr.mxu1 %v17741_v28  ;;  %14445 = vmatprep.subr.mxu0 %v17741_v28 }
 0x631   :  { %14402 = vmatpush3.msra.mxu1 %v17748_v43  ;;  %14446 = vmatpush3.msra.mxu0 %v17748_v43 }
 0x632   :  { %14403 = vmatprep.subr.mxu1 %v17755_v41  ;;  %14447 = vmatprep.subr.mxu0 %v17755_v41 }
 0x633   :  { %14404 = vmatpush3.msra.mxu1 %v17762_v39  ;;  %14448 = vmatpush3.msra.mxu0 %v17762_v39 }
 0x634   :  { %14405 = vmatprep.subr.mxu1 %v17769_v12  ;;  %14449 = vmatprep.subr.mxu0 %v17769_v12 }
 0x635   :  { %14406 = vmatpush3.msra.mxu1 %v17776_v31  ;;  %14450 = vmatpush3.msra.mxu0 %v17776_v31 }
 0x636   :  { %14407 = vmatprep.subr.mxu1 %v17783_v58  ;;  %14451 = vmatprep.subr.mxu0 %v17783_v58 }
 0x637   :  { %14408 = vmatpush3.msra.mxu1 %v17790_v50  ;;  %14452 = vmatpush3.msra.mxu0 %v17790_v50 }
 0x638   :  { %14409 = vmatprep.subr.mxu1 %v17797_v55  ;;  %14453 = vmatprep.subr.mxu0 %v17797_v55 }
 0x639   :  { %14410 = vmatpush3.msra.mxu1 %v17804_v53  ;;  %14454 = vmatpush3.msra.mxu0 %v17804_v53 }
 0x63a   :  { %14411 = vmatprep.subr.mxu1 %v17811_v33  ;;  %14455 = vmatprep.subr.mxu0 %v17811_v33 }
 0x63b   :  { %14412 = vmatpush3.msra.mxu1 %v17818_v34  ;;  %14456 = vmatpush3.msra.mxu0 %v17818_v34 }
 0x63c   :  { %14413 = vmatprep.subr.mxu1 %v17825_v17  ;;  %14457 = vmatprep.subr.mxu0 %v17825_v17 }
 0x63d   :  { %14414 = vmatpush3.msra.mxu1 %v17832_v61  ;;  %14458 = vmatpush3.msra.mxu0 %v17832_v61 }
 0x63e   :  { %14415 = vmatprep.subr.mxu1 %v17839_v52  ;;  %14459 = vmatprep.subr.mxu0 %v17839_v52 }
 0x63f   :  { %14416 = vmatpush3.msra.mxu1 %v17846_v49  ;;  %14460 = vmatpush3.msra.mxu0 %v17846_v49 }
 0x640   :  { %14417 = vmatprep.subr.mxu1 %v17853_v54  ;;  %14461 = vmatprep.subr.mxu0 %v17853_v54 }
 0x641   :  { %14418 = vmatpush3.msra.mxu1 %v17860_v1  ;;  %14462 = vmatpush3.msra.mxu0 %v17860_v1 }
 0x642   :  { %14419 = vmatprep.subr.mxu1 %v17867_v47  ;;  %14463 = vmatprep.subr.mxu0 %v17867_v47 }
 0x643   :  { %14420 = vmatpush3.msra.mxu1 %v17874_v48  ;;  %14464 = vmatpush3.msra.mxu0 %v17874_v48 }
 0x6be   :  { %v1962_v20 = vpop.f32.mrf.mxu1  ;;  %v2051_v46 = vpop.f32.mrf.mxu0 }
 0x6c0   :  { %v1964_v3 = vpop.f32.mrf.mxu1  ;;  %v2053_v22 = vpop.f32.mrf.mxu0 }
 0x6c2   :  { %v1968_v6 = vpop.f32.mrf.mxu1  ;;  %v2057_v24 = vpop.f32.mrf.mxu0 }
 0x6c4   :  { %v1970_v15 = vpop.f32.mrf.mxu1  ;;  %v2059_v16 = vpop.f32.mrf.mxu0 }
 0x6c6   :  { %v1974_v60 = vpop.f32.mrf.mxu1  ;;  %v2063_v62 = vpop.f32.mrf.mxu0 }
 0x6c8   :  { %v1976_v10 = vpop.f32.mrf.mxu1  ;;  %v2065_v13 = vpop.f32.mrf.mxu0 }
 0x6ca   :  { %v17878_v18 = vpop.f32.mrf.mxu1  ;;  %v17880_v21 = vpop.f32.mrf.mxu0 }
 0x6cc   :  { %v17882_v26 = vpop.f32.mrf.mxu1  ;;  %v17884_v29 = vpop.f32.mrf.mxu0 }
 0x6ce   :  { %v2152_v48 = vpop.f32.mrf.mxu1  ;;  %v2241_v47 = vpop.f32.mrf.mxu0 }
 0x6cf   :  { %v2153_v39 = vadd.f32 %v2152_v48, %v1962_v20  ;;  %v2242_v28 = vadd.f32 %v2241_v47, %v2051_v46  ;;  %v17889_v48 = vld [vmem:[%s23242_s7 + $0x8] sm:$0xff] }
 0x6d0   :  { %v2154_v1 = vpop.f32.mrf.mxu1  ;;  %v2243_v54 = vpop.f32.mrf.mxu0 }
 0x6d1   :  { %v2155_v23 = vadd.f32 %v2154_v1, %v1964_v3  ;;  %v2244_v42 = vadd.f32 %v2243_v54, %v2053_v22 }
 0x6d2   :  { %v2158_v49 = vpop.f32.mrf.mxu1  ;;  %v2247_v52 = vpop.f32.mrf.mxu0 }
 0x6d3   :  { %v2159_v57 = vadd.f32 %v2158_v49, %v1968_v6  ;;  %v2248_v32 = vadd.f32 %v2247_v52, %v2057_v24 }
 0x6d4   :  { %v2160_v61 = vpop.f32.mrf.mxu1  ;;  %v2249_v17 = vpop.f32.mrf.mxu0 }
 0x6d5   :  { %v2161_v4 = vadd.f32 %v2160_v61, %v1970_v15  ;;  %v2250_v38 = vadd.f32 %v2249_v17, %v2059_v16  ;;  %v17921_v15 = vld [vmem:[%s23242_s7 + $0x28] sm:$0xff] }
 0x6d6   :  { %v2164_v34 = vpop.f32.mrf.mxu1  ;;  %v2253_v33 = vpop.f32.mrf.mxu0 }
 0x6d7   :  { %v2165_v52 = vadd.f32 %v2164_v34, %v1974_v60 }
 0x6d8   :  { %v2166_v53 = vpop.f32.mrf.mxu1  ;;  %v2255_v55 = vpop.f32.mrf.mxu0 }
 0x6d9   :  { %v2167_v54 = vadd.f32 %v2166_v53, %v1976_v10  ;;  %v2256_v47 = vadd.f32 %v2255_v55, %v2065_v13 }
 0x6da   :  { %v2170_v50 = vpop.f32.mrf.mxu1  ;;  %v2259_v58 = vpop.f32.mrf.mxu0 }
 0x6db   :  { %v2171_v20 = vadd.f32 %v2170_v50, %v17878_v18  ;;  %v2260_v46 = vadd.f32 %v2259_v58, %v17880_v21  ;;  %v17928_v58 = vld [vmem:[%s23242_s7 + $0x20] sm:$0xff] }
 0x6dc   :  { %v2172_v31 = vpop.f32.mrf.mxu1  ;;  %v2261_v12 = vpop.f32.mrf.mxu0 }
 0x6dd   :  { %v2173_v6 = vadd.f32 %v2172_v31, %v17882_v26  ;;  %v2262_v24 = vadd.f32 %v2261_v12, %v17884_v29  ;;  %v17935_v26 = vld [vmem:[%s23242_s7 + $0x38] sm:$0xff] }
 0x6de   :  { %v2358_v41 = vpop.f32.mrf.mxu1  ;;  %v2447_v43 = vpop.f32.mrf.mxu0 }
 0x6df   :  { %v2470_v44 = vadd.f32 %v2358_v41, %v2153_v39  ;;  %v2472_v19 = vadd.f32 %v2447_v43, %v2242_v28 }
 0x6e0   :  { %v2360_v27 = vpop.f32.mrf.mxu1  ;;  %v2449_v45 = vpop.f32.mrf.mxu0 }
 0x6e1   :  { %v2471_v51 = vadd.f32 %v2360_v27, %v2155_v23  ;;  %v2473_v11 = vadd.f32 %v2449_v45, %v2244_v42  ;;  %v17896_v27 = vld [vmem:[%s23242_s7] sm:$0xff] }
 0x6e2   :  { %v2364_v56 = vpop.f32.mrf.mxu1  ;;  %v2453_v35 = vpop.f32.mrf.mxu0  ;;  %v2518_v45 = vmul.f32 %v17896_v27, %v2470_v44  ;;  %v2611_v43 = vmul.f32 %v17896_v27, %v2472_v19 }
 0x6e3   :  { %v2519_v1 = vmul.f32 %v17889_v48, %v2471_v51  ;;  %v2612_v41 = vmul.f32 %v17889_v48, %v2473_v11  ;;  %v2474_v42 = vadd.f32 %v2364_v56, %v2159_v57  ;;  %v2476_v39 = vadd.f32 %v2453_v35, %v2248_v32  ;;  %v17903_v56 = vld [vmem:[%s23242_s7 + $0x18] sm:$0xff] }
 0x6e4   :  { %v2366_v23 = vpop.f32.mrf.mxu1  ;;  %v2455_v28 = vpop.f32.mrf.mxu0  ;;  %v2254_v51 = vadd.f32 %v2253_v33, %v2063_v62 }
 0x6e5   :  { %v2475_v17 = vadd.f32 %v2366_v23, %v2161_v4  ;;  %v2477_v61 = vadd.f32 %v2455_v28, %v2250_v38  ;;  %2590 = vmatprep.mubr.f32.mxu1 %v2519_v1  ;;  %2683 = vmatprep.mubr.f32.mxu0 %v2612_v41  ;;  %v17910_v38 = vld [vmem:[%s23242_s7 + $0x10] sm:$0xff]  ;;  %v17949_v23 = vld [vmem:[%s23239_s4] sm:$0xff] }
 0x6e6   :  { %v2370_v11 = vpop.f32.mrf.mxu1  ;;  %v2459_v49 = vpop.f32.mrf.mxu0  ;;  %2591 = vmatmul.mubr.f32.vlgmr.msra.gmra.mxu1 %v2518_v45  ;;  %2684 = vmatmul.mubr.f32.vlgmr.msra.gmra.mxu0 %v2611_v43  ;;  %v2520_v4 = vmul.f32 %v17910_v38, %v2474_v42  ;;  %v2613_v55 = vmul.f32 %v17910_v38, %v2476_v39  ;;  %v17942_v41 = vld [vmem:[%s23242_s7 + $0x30] sm:$0xff] }
 0x6e7   :  { %v2521_v57 = vmul.f32 %v17903_v56, %v2475_v17  ;;  %v2614_v35 = vmul.f32 %v17903_v56, %v2477_v61  ;;  %v2478_v32 = vadd.f32 %v2370_v11, %v2165_v52  ;;  %v2480_v53 = vadd.f32 %v2459_v49, %v2254_v51  ;;  %v13354_v51 = vld [vmem:[%s23243_s0 + $0x28] sm:$0xff]  ;;  %v13353_v49 = vld [vmem:[%s23243_s0 + $0x20] sm:$0xff] }
 0x6e8   :  { %v2372_v19 = vpop.f32.mrf.mxu1  ;;  %v2461_v44 = vpop.f32.mrf.mxu0 }
 0x6e9   :  { %v2479_v33 = vadd.f32 %v2372_v19, %v2167_v54  ;;  %v2481_v34 = vadd.f32 %v2461_v44, %v2256_v47  ;;  %2595 = vmatprep.mubr.f32.mxu1 %v2521_v57  ;;  %2688 = vmatprep.mubr.f32.mxu0 %v2614_v35  ;;  %v2522_v50 = vmul.f32 %v17928_v58, %v2478_v32  ;;  %v13355_v47 = vld [vmem:[%s23243_s0 + $0x30] sm:$0xff] }
 0x6ea   :  { %v2376_v3 = vpop.f32.mrf.mxu1  ;;  %v2465_v22 = vpop.f32.mrf.mxu0  ;;  %2596 = vmatmul.mubr.f32.gmra.mxu1 %v2520_v4  ;;  %2689 = vmatmul.mubr.f32.gmra.mxu0 %v2613_v55  ;;  %v2615_v10 = vmul.f32 %v17928_v58, %v2480_v53  ;;  %v13356_v55 = vld [vmem:[%s23243_s0 + $0x38] sm:$0xff] }
 0x6eb   :  { %v2523_v16 = vmul.f32 %v17921_v15, %v2479_v33  ;;  %v2616_v60 = vmul.f32 %v17921_v15, %v2481_v34  ;;  %v2482_v31 = vadd.f32 %v2376_v3, %v2171_v20  ;;  %v2484_v13 = vadd.f32 %v2465_v22, %v2260_v46 }
 0x6ec   :  { %v2378_v62 = vpop.f32.mrf.mxu1  ;;  %v2467_v12 = vpop.f32.mrf.mxu0 }
 0x6ed   :  { %v2483_v18 = vadd.f32 %v2378_v62, %v2173_v6  ;;  %v2485_v21 = vadd.f32 %v2467_v12, %v2262_v24  ;;  %2600 = vmatprep.mubr.f32.mxu1 %v2523_v16  ;;  %2693 = vmatprep.mubr.f32.mxu0 %v2616_v60  ;;  %v2524_v45 = vmul.f32 %v17942_v41, %v2482_v31 }
 0x6ee   :  { %2601 = vmatmul.mubr.f32.gmra.mxu1 %v2522_v50  ;;  %2694 = vmatmul.mubr.f32.gmra.mxu0 %v2615_v10  ;;  %v2617_v42 = vmul.f32 %v17942_v41, %v2484_v13 }
 0x6ef   :  { %v2525_v29 = vmul.f32 %v17935_v26, %v2483_v18  ;;  %v2618_v1 = vmul.f32 %v17935_v26, %v2485_v21 }
 0x6f1   :  { %2605 = vmatprep.mubr.f32.mxu1 %v2525_v29  ;;  %2698 = vmatprep.mubr.f32.mxu0 %v2618_v1 }
 0x6f2   :  { %2606 = vmatmul.mubr.f32.gmra.mxu1 %v2524_v45  ;;  %2699 = vmatmul.mubr.f32.gmra.mxu0 %v2617_v42  ;;  %v13381_v42 = vld [vmem:[%s23244_s6 + $0x40] sm:$0xff] }
 0x6f3   :  { %15607 = vmatprep.mubr.msk.f32.mxu1 %vm56_vm0, %v17949_v23  ;;  %2991 = vmatprep.mubr.f32.mxu0 %v23534_v40 }
 0x7a6   :  { %v14421_v28 = vpop.f32.mrf.mxu1 }
 0x7a8   :  { %v14422_v43 = vpop.f32.mrf.mxu1 }
 0x7a9   :  { %v14423_v52 = vadd.f32 %v14422_v43, %v14421_v28  ;;  %v13404_v28 = vld [vmem:[%s23244_s6 + $0xb8] sm:$0xff]  ;;  %v13403_v43 = vld [vmem:[%s23244_s6 + $0xb0] sm:$0xff] }
 0x7aa   :  { %v14424_v39 = vpop.f32.mrf.mxu1 }
 0x7ab   :  { %v2709_v4 = vadd.f32 %v14423_v52, %v13353_v49  ;;  %v13399_v52 = vld [vmem:[%s23244_s6 + $0x90] sm:$0xff]  ;;  %v13397_v49 = vld [vmem:[%s23244_s6 + $0x80] sm:$0xff] }
 0x7ac   :  { %v14425_v17 = vpop.f32.mrf.mxu1 }
 0x7ad   :  { %v14426_v61 = vadd.f32 %v14425_v17, %v14424_v39  ;;  %v13357_v20 = vmul.f32 -1.442695, %v2709_v4  ;;  %v13402_v39 = vld [vmem:[%s23244_s6 + $0xa8] sm:$0xff]  ;;  %v13401_v17 = vld [vmem:[%s23244_s6 + $0xa0] sm:$0xff] }
 0x7ae   :  { %v14427_v11 = vpop.f32.mrf.mxu1 }
 0x7af   :  { %v2710_v57 = vadd.f32 %v14426_v61, %v13354_v51  ;;  %v13400_v61 = vld [vmem:[%s23244_s6 + $0x98] sm:$0xff] }
 0x7b0   :  { %v14428_v54 = vpop.f32.mrf.mxu1  ;;  %v2906_v51 = vld [vmem:[%s23244_s6 + $0x38] sm:$0xff] }
 0x7b1   :  { %v14429_v35 = vadd.f32 %v14428_v54, %v14427_v11  ;;  %v13358_v53 = vmul.f32 -1.442695, %v2710_v57  ;;  %v13398_v11 = vld [vmem:[%s23244_s6 + $0x88] sm:$0xff] }
 0x7b2   :  { %v14430_v32 = vpop.f32.mrf.mxu1 }
 0x7b3   :  { %v2711_v19 = vadd.f32 %v14429_v35, %v13355_v47 }
 0x7b4   :  { %v14431_v44 = vpop.f32.mrf.mxu1 }
 0x7b5   :  { %v13359_v33 = vmul.f32 -1.442695, %v2711_v19  ;;  %v14432_v34 = vadd.f32 %v14431_v44, %v14430_v32  ;;  %v2905_v32 = vld [vmem:[%s23244_s6 + $0x30] sm:$0xff]  ;;  %v2904_v44 = vld [vmem:[%s23244_s6 + $0x28] sm:$0xff] }
 0x7b7   :  { %15986 = vpow2.f32 %v13359_v33  ;;  %v2712_v46 = vadd.f32 %v14432_v34, %v13356_v55  ;;  %v2903_v55 = vld [vmem:[%s23244_s6 + $0x20] sm:$0xff]  ;;  %v2902_v33 = vld [vmem:[%s23244_s6 + $0x18] sm:$0xff]  ;;  %v2901_v34 = vld [vmem:[%s23244_s6 + $0x10] sm:$0xff] }
 0x7b8   :  { %15988 = vpow2.f32 %v13358_v53 }
 0x7b9   :  { %v13360_v3 = vmul.f32 -1.442695, %v2712_v46  ;;  %15990 = vpow2.f32 %v13357_v20  ;;  %v2900_v46 = vld [vmem:[%s23244_s6 + $0x8] sm:$0xff] }
 0x7bb   :  { %15992 = vpow2.f32 %v13360_v3  ;;  %v2899_v3 = vld [vmem:[%s23244_s6] sm:$0xff] }
 0x7c4   :  { %v15987_v22 = vpop.eup %15986 }
 0x7c5   :  { %v15989_v6 = vpop.eup %15988  ;;  %v2727_v24 = vadd.f32 1.0, %v15987_v22 }
 0x7c6   :  { %v15991_v16 = vpop.eup %15990  ;;  %v2726_v50 = vadd.f32 1.0, %v15989_v6 }
 0x7c7   :  { %15994 = vrcp.f32 %v2727_v24  ;;  %v2725_v62 = vadd.f32 1.0, %v15991_v16  ;;  %v23594_v16 = vld [vmem:[#allocation4_spill] sm:$0xff] }
 0x7c8   :  { %v15993_v60 = vpop.eup %15992 }
 0x7c9   :  { %v2728_v31 = vadd.f32 1.0, %v15993_v60 }
 0x7cb   :  { %15996 = vrcp.f32 %v2728_v31  ;;  %v23596_v31 = vld [vmem:[#allocation6_spill] sm:$0xff] }
 0x7cc   :  { %15998 = vrcp.f32 %v2726_v50  ;;  %v23595_v50 = vld [vmem:[#allocation5_spill] sm:$0xff] }
 0x7cd   :  { %16000 = vrcp.f32 %v2725_v62  ;;  %v23597_v62 = vld [vmem:[#allocation7_spill] sm:$0xff] }
 0x7d4   :  { %v15995_v12 = vpop.eup %15994 }
 0x7d5   :  { %v2772_v21 = vmul.f32 %v15995_v12, %v17349_v2  ;;  %v23598_v12 = vld [vmem:[#allocation8_spill] sm:$0xff] }
 0x7d8   :  { %v15997_v10 = vpop.eup %15996 }
 0x7d9   :  { %v2773_v13 = vmul.f32 %v15997_v10, %v17359_v5  ;;  %v15999_v18 = vpop.eup %15998  ;;  %v23599_v10 = vld [vmem:[#allocation9_spill] sm:$0xff] }
 0x7da   :  { %v16001_v29 = vpop.eup %16000  ;;  %v2771_v1 = vmul.f32 %v15999_v18, %v17339_v0  ;;  %v23601_v18 = vld [vmem:[#allocation11_spill] sm:$0xff] }
 0x7db   :  { %15599 = vmatprep.subr.mxu1 %v2773_v13  ;;  %v2770_v45 = vmul.f32 %v16001_v29, %v17329_v30  ;;  %v23603_v29 = vld [vmem:[#allocation13_spill] sm:$0xff] }
 0x7dc   :  { %15600 = vmatpush3.msra.mxu1 %v2773_v13  ;;  %v23600_v13 = vld [vmem:[#allocation10_spill] sm:$0xff] }
 0x7dd   :  { %15601 = vmatprep.subr.mxu1 %v2772_v21 }
 0x7de   :  { %15602 = vmatpush3.msra.mxu1 %v2772_v21  ;;  %v23602_v21 = vld [vmem:[#allocation12_spill] sm:$0xff] }
 0x7df   :  { %15603 = vmatprep.subr.mxu1 %v2771_v1 }
 0x7e0   :  { %15604 = vmatpush3.msra.mxu1 %v2771_v1  ;;  %v23604_v1 = vld [vmem:[#allocation14_spill] sm:$0xff] }
 0x7e1   :  { %15605 = vmatprep.subr.mxu1 %v2770_v45 }
 0x7e2   :  { %15606 = vmatpush3.msra.mxu1 %v2770_v45  ;;  %v23605_v45 = vld [vmem:[#allocation15_spill] sm:$0xff] }
 0x7e3   :  { %15608 = vmatmul.mubr.msk.f32.vlgmr.msra.gmra.mxu1 %vm56_vm0, %v17383_v25  ;;  %v23592_v25 = vld [vmem:[#allocation2_spill] sm:$0xff]  ;;  %3161 = vmatprep.subr.mxu1 %v13404_v28  ;;  %v23617_v28 = vld [vmem:[#allocation27_spill] sm:$0xff] }
 0x7e4   :  { %15610 = vmatprep.mubr.msk.f32.mxu1 %vm56_vm0, %v17390_v7  ;;  %v23593_v7 = vld [vmem:[#allocation3_spill] sm:$0xff]  ;;  %3162 = vmatpush1.msra.mxu1 %v13403_v43  ;;  %v23618_v43 = vld [vmem:[#allocation28_spill] sm:$0xff] }
 0x7e5   :  { %3163 = vmatprep.subr.mxu1 %v13402_v39  ;;  %v23619_v39 = vld [vmem:[#allocation29_spill] sm:$0xff] }
 0x7e6   :  { %3164 = vmatpush1.msra.mxu1 %v13401_v17  ;;  %v23620_v17 = vld [vmem:[#allocation30_spill] sm:$0xff] }
 0x7e7   :  { %15611 = vmatmul.mubr.msk.f32.gmra.mxu1 %vm56_vm0, %v17397_v8  ;;  %v13388_v8 = vld [vmem:[%s23244_s6 + $0x78] sm:$0xff]  ;;  %3165 = vmatprep.subr.mxu1 %v13400_v61  ;;  %v23621_v61 = vld [vmem:[#allocation31_spill] sm:$0xff] }
 0x7e8   :  { %15613 = vmatprep.mubr.msk.f32.mxu1 %vm56_vm0, %v17404_v59  ;;  %2951 = vmatprep.subr.mxu0 %v13388_v8  ;;  %v13387_v59 = vld [vmem:[%s23244_s6 + $0x70] sm:$0xff]  ;;  %v23609_v8 = vld [vmem:[#allocation19_spill] sm:$0xff] }
 0x7e9   :  { %2952 = vmatpush1.msra.mxu0 %v13387_v59  ;;  %3166 = vmatpush1.msra.mxu1 %v13399_v52  ;;  %v23610_v59 = vld [vmem:[#allocation20_spill] sm:$0xff] }
 0x7ea   :  { %3167 = vmatprep.subr.mxu1 %v13398_v11  ;;  %v23622_v52 = vld [vmem:[#allocation32_spill] sm:$0xff]  ;;  %v23624_v11 = vld [vmem:[#allocation34_spill] sm:$0xff] }
 0x7eb   :  { %15614 = vmatmul.mubr.msk.f32.gmra.mxu1 %vm56_vm0, %v17411_v9  ;;  %v13386_v9 = vld [vmem:[%s23244_s6 + $0x68] sm:$0xff] }
 0x7ec   :  { %15616 = vmatprep.mubr.msk.f32.mxu1 %vm56_vm0, %v17418_v14  ;;  %2953 = vmatprep.subr.mxu0 %v13386_v9  ;;  %v13385_v14 = vld [vmem:[%s23244_s6 + $0x60] sm:$0xff]  ;;  %v23611_v9 = vld [vmem:[#allocation21_spill] sm:$0xff] }
 0x7ed   :  { %2954 = vmatpush1.msra.mxu0 %v13385_v14  ;;  %3168 = vmatpush1.msra.mxu1 %v13397_v49  ;;  %v23612_v14 = vld [vmem:[#allocation22_spill] sm:$0xff]  ;;  %v23625_v49 = vld [vmem:[#allocation35_spill] sm:$0xff] }
 0x7ef   :  { %15617 = vmatmul.mubr.msk.f32.gmra.mxu1 %vm56_vm0, %v17425_v36  ;;  %v13384_v36 = vld [vmem:[%s23244_s6 + $0x58] sm:$0xff] }
 0x7f0   :  { %15619 = vmatprep.mubr.msk.f32.mxu1 %vm56_vm0, %v17432_v63  ;;  %2955 = vmatprep.subr.mxu0 %v13384_v36  ;;  %v13383_v63 = vld [vmem:[%s23244_s6 + $0x50] sm:$0xff]  ;;  %v23613_v36 = vld [vmem:[#allocation23_spill] sm:$0xff] }
 0x7f1   :  { %2956 = vmatpush1.msra.mxu0 %v13383_v63  ;;  %v23614_v63 = vld [vmem:[#allocation24_spill] sm:$0xff] }
 0x7f3   :  { %15620 = vmatmul.mubr.msk.f32.gmra.mxu1 %vm56_vm0, %v17439_v37  ;;  %v13382_v37 = vld [vmem:[%s23244_s6 + $0x48] sm:$0xff] }
 0x7f4   :  { %15622 = vmatprep.mubr.msk.f32.mxu1 %vm56_vm0, %v23592_v25  ;;  %2957 = vmatprep.subr.mxu0 %v13382_v37  ;;  %v23607_v25 = vld [vmem:[#allocation17_spill] sm:$0xff] }
 0x7f5   :  { %2958 = vmatpush1.msra.mxu0 %v13381_v42  ;;  %v23615_v37 = vld [vmem:[#allocation25_spill] sm:$0xff]  ;;  %v23616_v42 = vld [vmem:[#allocation26_spill] sm:$0xff] }
 0x7f6   :  { %3052 = vmatprep.subr.mxu0 %v2906_v51  ;;  %v23623_v51 = vld [vmem:[#allocation33_spill] sm:$0xff] }
 0x7f7   :  { %15623 = vmatmul.mubr.msk.f32.gmra.mxu1 %vm56_vm0, %v23593_v7  ;;  %v23608_v7 = vld [vmem:[#allocation18_spill] sm:$0xff] }
 0x7f8   :  { %3201 = vmatprep.mubr.f32.mxu1 %v23534_v40 }
 0x8a3   :  { %v15609_v54 = vpop.f32.mrf.mxu1 }
 0x8a5   :  { %v2840_v47 = vpop.f32.mrf.mxu1 }
 0x8a7   :  { %v15612_v57 = vpop.f32.mrf.mxu1 }
 0x8a9   :  { %v2850_v35 = vpop.f32.mrf.mxu1 }
 0x8ab   :  { %v15615_v4 = vpop.f32.mrf.mxu1 }
 0x8ad   :  { %v2860_v19 = vpop.f32.mrf.mxu1 }
 0x8ae   :  { %13389 = vmatmul.mubr.msk.f32.vlgmr.msra.gmra.mxu0 %vm56_vm0, %v2860_v19 }
 0x8af   :  { %v15618_v53 = vpop.f32.mrf.mxu1  ;;  %2997 = vmatprep.mubr.f32.mxu0 %v23534_v40  ;;  %3053 = vmatpush1.msra.mxu0 %v2905_v32 }
 0x8b0   :  { %3054 = vmatprep.subr.mxu0 %v2904_v44 }
 0x8b1   :  { %v2870_v20 = vpop.f32.mrf.mxu1  ;;  %3055 = vmatpush1.msra.mxu0 %v2903_v55 }
 0x8b2   :  { %13390 = vmatmul.mubr.msk.f32.gmra.mxu0 %vm56_vm0, %v15615_v4  ;;  %3056 = vmatprep.subr.mxu0 %v2902_v33 }
 0x8b3   :  { %v15621_v22 = vpop.f32.mrf.mxu1  ;;  %3003 = vmatprep.mubr.f32.mxu0 %v23534_v40  ;;  %3057 = vmatpush1.msra.mxu0 %v2901_v34 }
 0x8b4   :  { %3058 = vmatprep.subr.mxu0 %v2900_v46 }
 0x8b5   :  { %v2880_v6 = vpop.f32.mrf.mxu1  ;;  %3059 = vmatpush1.msra.mxu0 %v2899_v3 }
 0x8b6   :  { %13391 = vmatmul.mubr.msk.f32.gmra.mxu0 %vm56_vm0, %v2870_v20  ;;  %13405 = vmatmul.mubr.msk.f32.vlgmr.msra.gmra.mxu1 %vm56_vm0, %v2880_v6 }
 0x8b7   :  { %3009 = vmatprep.mubr.f32.mxu0 %v23534_v40  ;;  %3207 = vmatprep.mubr.f32.mxu1 %v23534_v40  ;;  %v15624_v24 = vpop.f32.mrf.mxu1 }
 0x8b8   :  { %14493 = vmatprep.subr.mxu0 %v23594_v16 }
 0x8b9   :  { %v2890_v60 = vpop.f32.mrf.mxu1 }
 0x8ba   :  { %13392 = vmatmul.mubr.msk.f32.gmra.mxu0 %vm56_vm0, %v15618_v53  ;;  %13406 = vmatmul.mubr.msk.f32.gmra.mxu1 %vm56_vm0, %v15621_v22 }
 0x8bb   :  { %3092 = vmatprep.mubr.f32.mxu0 %v23534_v40  ;;  %3213 = vmatprep.mubr.f32.mxu1 %v23534_v40 }
 0x8be   :  { %13393 = vmatmul.mubr.msk.f32.vlgmr.msra.gmra.mxu0 %vm56_vm0, %v2840_v47  ;;  %13407 = vmatmul.mubr.msk.f32.gmra.mxu1 %vm56_vm0, %v2890_v60 }
 0x8bf   :  { %3098 = vmatprep.mubr.f32.mxu0 %v23534_v40  ;;  %3219 = vmatprep.mubr.f32.mxu1 %v23534_v40 }
 0x8c0   :  { %14494 = vmatpush3.msra.mxu0 %v23595_v50 }
 0x8c1   :  { %14495 = vmatprep.subr.mxu0 %v23596_v31 }
 0x8c2   :  { %13394 = vmatmul.mubr.msk.f32.gmra.mxu0 %vm56_vm0, %v15609_v54  ;;  %13408 = vmatmul.mubr.msk.f32.gmra.mxu1 %vm56_vm0, %v15624_v24  ;;  %v18121_v54 = vpop.f32.mrf.mxu0 }
 0x8c3   :  { %3104 = vmatprep.mubr.f32.mxu0 %v23534_v40  ;;  %14496 = vmatpush3.msra.mxu0 %v23597_v62 }
 0x8c4   :  { %14497 = vmatprep.subr.mxu0 %v23598_v12  ;;  %15633 = vmatprep.mubr.msk.f32.mxu1 %vm56_vm0, %v17949_v23  ;;  %v23606_v23 = vld [vmem:[#allocation16_spill] sm:$0xff]  ;;  %v18123_v47 = vpop.f32.mrf.mxu0 }
 0x8c5   :  { %14498 = vmatpush3.msra.mxu0 %v23599_v10 }
 0x8c6   :  { %13395 = vmatmul.mubr.msk.f32.gmra.mxu0 %vm56_vm0, %v2850_v35  ;;  %14499 = vmatprep.subr.mxu0 %v23600_v13 }
 0x8c7   :  { %3110 = vmatprep.mubr.f32.mxu0 %v23534_v40  ;;  %14500 = vmatpush3.msra.mxu0 %v23601_v18 }
 0x8c8   :  { %14501 = vmatprep.subr.mxu0 %v23602_v21 }
 0x8c9   :  { %14502 = vmatpush3.msra.mxu0 %v23603_v29 }
 0x8ca   :  { %13396 = vmatmul.mubr.msk.f32.gmra.mxu0 %vm56_vm0, %v15612_v57  ;;  %14503 = vmatprep.subr.mxu0 %v23604_v1  ;;  %v18125_v57 = vpop.f32.mrf.mxu0 }
 0x8cb   :  { %14504 = vmatpush3.msra.mxu0 %v23605_v45 }
 0x8cc   :  { %14505 = vmatprep.subr.mxu0 %v23606_v23  ;;  %v18127_v35 = vpop.f32.mrf.mxu0 }
 0x8cd   :  { %14506 = vmatpush3.msra.mxu0 %v23607_v25 }
 0x8ce   :  { %14507 = vmatprep.subr.mxu0 %v23608_v7  ;;  %v18129_v4 = vpop.f32.mrf.mxu0 }
 0x8cf   :  { %14508 = vmatpush3.msra.mxu0 %v23609_v8 }
 0x8d0   :  { %14509 = vmatprep.subr.mxu0 %v23610_v59  ;;  %v18131_v32 = vpop.f32.mrf.mxu0 }
 0x8d1   :  { %14510 = vmatpush3.msra.mxu0 %v23611_v9 }
 0x8d2   :  { %14511 = vmatprep.subr.mxu0 %v23612_v14  ;;  %v18133_v19 = vpop.f32.mrf.mxu0 }
 0x8d3   :  { %14512 = vmatpush3.msra.mxu0 %v23613_v36 }
 0x8d4   :  { %14513 = vmatprep.subr.mxu0 %v23614_v63  ;;  %v18135_v44 = vpop.f32.mrf.mxu0 }
 0x8d5   :  { %14514 = vmatpush3.msra.mxu0 %v23615_v37 }
 0x8d6   :  { %14515 = vmatprep.subr.mxu0 %v23616_v42 }
 0x8d7   :  { %14516 = vmatpush3.msra.mxu0 %v23617_v28 }
 0x8d8   :  { %14517 = vmatprep.subr.mxu0 %v23618_v43 }
 0x8d9   :  { %14518 = vmatpush3.msra.mxu0 %v23619_v39 }
 0x8da   :  { %14519 = vmatprep.subr.mxu0 %v23620_v17 }
 0x8db   :  { %14520 = vmatpush3.msra.mxu0 %v23621_v61 }
 0x8dc   :  { %14521 = vmatprep.subr.mxu0 %v23622_v52 }
 0x8dd   :  { %14522 = vmatpush3.msra.mxu0 %v23623_v51 }
 0x8de   :  { %14523 = vmatprep.subr.mxu0 %v23624_v11 }
 0x8df   :  { %14524 = vmatpush3.msra.mxu0 %v23625_v49 }
 0x96e   :  { %v2993_v55 = vpop.f32.mrf.mxu0 }
 0x970   :  { %v2995_v53 = vpop.f32.mrf.mxu0 }
 0x972   :  { %v2999_v33 = vpop.f32.mrf.mxu0 }
 0x974   :  { %v3001_v34 = vpop.f32.mrf.mxu0 }
 0x976   :  { %v3005_v20 = vpop.f32.mrf.mxu0  ;;  %v3203_v46 = vpop.f32.mrf.mxu1 }
 0x978   :  { %v3007_v3 = vpop.f32.mrf.mxu0  ;;  %v3205_v22 = vpop.f32.mrf.mxu1 }
 0x97a   :  { %v3011_v6 = vpop.f32.mrf.mxu0  ;;  %v3209_v24 = vpop.f32.mrf.mxu1 }
 0x97c   :  { %v3013_v16 = vpop.f32.mrf.mxu0  ;;  %v3211_v50 = vpop.f32.mrf.mxu1 }
 0x97e   :  { %v3094_v60 = vpop.f32.mrf.mxu0  ;;  %v3215_v13 = vpop.f32.mrf.mxu1 }
 0x97f   :  { %v3095_v31 = vadd.f32 %v3094_v60, %v2993_v55 }
 0x980   :  { %v3096_v62 = vpop.f32.mrf.mxu0  ;;  %v3217_v8 = vpop.f32.mrf.mxu1 }
 0x981   :  { %v3097_v12 = vadd.f32 %v3096_v62, %v2995_v53  ;;  %v3226_v10 = vadd.f32 %v3203_v46, %v3095_v31 }
 0x982   :  { %v3100_v18 = vpop.f32.mrf.mxu0  ;;  %v3221_v42 = vpop.f32.mrf.mxu1 }
 0x983   :  { %v3227_v21 = vadd.f32 %v3205_v22, %v3097_v12  ;;  %v3101_v29 = vadd.f32 %v3100_v18, %v2999_v33  ;;  %v3234_v25 = vmul.f32 %v17896_v27, %v3226_v10  ;;  %v13410_v18 = vld [vmem:[%s23246_s2 + $0x28] sm:$0xff] }
 0x984   :  { %v3102_v1 = vpop.f32.mrf.mxu0  ;;  %v3223_v51 = vpop.f32.mrf.mxu1 }
 0x985   :  { %v3103_v45 = vadd.f32 %v3102_v1, %v3001_v34  ;;  %v3235_v23 = vmul.f32 %v17889_v48, %v3227_v21  ;;  %v3228_v7 = vadd.f32 %v3209_v24, %v3101_v29  ;;  %v14473_v34 = vadd.f32 %v18131_v32, %v18129_v4 }
 0x986   :  { %v3106_v59 = vpop.f32.mrf.mxu0 }
 0x987   :  { %v3229_v9 = vadd.f32 %v3211_v50, %v3103_v45  ;;  %v3107_v14 = vadd.f32 %v3106_v59, %v3005_v20  ;;  %3306 = vmatprep.mubr.f32.mxu0 %v3235_v23  ;;  %v3236_v39 = vmul.f32 %v17910_v38, %v3228_v7  ;;  %v14467_v38 = vadd.f32 %v18123_v47, %v18121_v54  ;;  %v13363_v54 = vld [vmem:[%s23245_s1 + $0x30] sm:$0xff] }
 0x988   :  { %v3108_v36 = vpop.f32.mrf.mxu0  ;;  %3307 = vmatmul.mubr.f32.vlgmr.msra.gmra.mxu0 %v3234_v25  ;;  %v2744_v46 = vadd.f32 %v14473_v34, %v13363_v54  ;;  %v13411_v7 = vld [vmem:[%s23246_s2 + $0x30] sm:$0xff]  ;;  %v13441_v34 = vld [vmem:[%s23240_s5 + $0xe0] sm:$0xff] }
 0x989   :  { %v3109_v63 = vadd.f32 %v3108_v36, %v3007_v3  ;;  %v3237_v37 = vmul.f32 %v17903_v56, %v3229_v9  ;;  %v3230_v28 = vadd.f32 %v3215_v13, %v3107_v14  ;;  %v14476_v3 = vadd.f32 %v18135_v44, %v18133_v19  ;;  %v13409_v19 = vld [vmem:[%s23246_s2 + $0x20] sm:$0xff]  ;;  %v13412_v36 = vld [vmem:[%s23246_s2 + $0x38] sm:$0xff]  ;;  %v18234_v54 = vld [vmem:[%s23239_s4 + $0x10] sm:$0xff] }
 0x98a   :  { %v3112_v43 = vpop.f32.mrf.mxu0 }
 0x98b   :  { %v3231_v17 = vadd.f32 %v3217_v8, %v3109_v63  ;;  %v3113_v48 = vadd.f32 %v3112_v43, %v3011_v6  ;;  %3311 = vmatprep.mubr.f32.mxu0 %v3237_v37  ;;  %v3238_v49 = vmul.f32 %v17928_v58, %v3230_v28  ;;  %v14470_v58 = vadd.f32 %v18127_v35, %v18125_v57  ;;  %v13364_v57 = vld [vmem:[%s23245_s1 + $0x38] sm:$0xff] }
 0x98c   :  { %v3114_v27 = vpop.f32.mrf.mxu0  ;;  %3312 = vmatmul.mubr.f32.gmra.mxu0 %v3236_v39  ;;  %v13367_v35 = vmul.f32 -1.442695, %v2744_v46  ;;  %v2745_v22 = vadd.f32 %v14476_v3, %v13364_v57  ;;  %v18248_v46 = vld [vmem:[%s23239_s4 + $0x20] sm:$0xff]  ;;  %v18255_v3 = vld [vmem:[%s23239_s4 + $0x28] sm:$0xff]  ;;  %v18262_v57 = vld [vmem:[%s23239_s4 + $0x30] sm:$0xff] }
 0x98d   :  { %v3115_v61 = vadd.f32 %v3114_v27, %v3013_v16  ;;  %v3239_v52 = vmul.f32 %v17921_v15, %v3231_v17  ;;  %v3232_v11 = vadd.f32 %v3221_v42, %v3113_v48  ;;  %v13361_v15 = vld [vmem:[%s23245_s1 + $0x20] sm:$0xff] }
 0x98e   :  { %v2742_v33 = vadd.f32 %v14467_v38, %v13361_v15  ;;  %v13368_v4 = vmul.f32 -1.442695, %v2745_v22  ;;  %v18276_v22 = vld [vmem:[%s23239_s4 + $0x40] sm:$0xff] }
 0x98f   :  { %v3233_v55 = vadd.f32 %v3223_v51, %v3115_v61  ;;  %3316 = vmatprep.mubr.f32.mxu0 %v3239_v52  ;;  %v3240_v53 = vmul.f32 %v17942_v41, %v3232_v11 }
 0x990   :  { %3317 = vmatmul.mubr.f32.gmra.mxu0 %v3238_v49  ;;  %v13365_v20 = vmul.f32 -1.442695, %v2742_v33 }
 0x991   :  { %v3241_v56 = vmul.f32 %v17935_v26, %v3233_v55  ;;  %v13362_v26 = vld [vmem:[%s23245_s1 + $0x28] sm:$0xff] }
 0x992   :  { %v2743_v41 = vadd.f32 %v14470_v58, %v13362_v26  ;;  %16002 = vpow2.f32 %v13365_v20  ;;  %v18227_v20 = vld [vmem:[%s23239_s4 + $0x8] sm:$0xff] }
 0x993   :  { %3321 = vmatprep.mubr.f32.mxu0 %v3241_v56 }
 0x994   :  { %3322 = vmatmul.mubr.f32.gmra.mxu0 %v3240_v53  ;;  %v13366_v47 = vmul.f32 -1.442695, %v2743_v41 }
 0x995   :  { %3683 = vmatprep.mubr.f32.mxu0 %v23534_v40 }
 0x996   :  { %16004 = vpow2.f32 %v13366_v47  ;;  %v18241_v47 = vld [vmem:[%s23239_s4 + $0x18] sm:$0xff] }
 0x997   :  { %16006 = vpow2.f32 %v13367_v35  ;;  %v18269_v35 = vld [vmem:[%s23239_s4 + $0x38] sm:$0xff] }
 0x998   :  { %16008 = vpow2.f32 %v13368_v4  ;;  %v18283_v4 = vld [vmem:[%s23239_s4 + $0x48] sm:$0xff] }
 0x99f   :  { %v16003_v32 = vpop.eup %16002 }
 0x9a0   :  { %v2758_v24 = vadd.f32 1.0, %v16003_v32  ;;  %v18290_v32 = vld [vmem:[%s23239_s4 + $0x50] sm:$0xff] }
 0x9a1   :  { %23626 = vst [vmem:[#allocation2_spill] sm:$0xff] %v18290_v32 }
 0x9a2   :  { %16010 = vrcp.f32 %v2758_v24  ;;  %v13438_v24 = vld [vmem:[%s23240_s5 + $0xc8] sm:$0xff] }
 0x9a3   :  { %v16005_v6 = vpop.eup %16004 }
 0x9a4   :  { %v2759_v60 = vadd.f32 1.0, %v16005_v6  ;;  %v16007_v44 = vpop.eup %16006  ;;  %v18297_v6 = vld [vmem:[%s23239_s4 + $0x58] sm:$0xff] }
 0x9a5   :  { %v2760_v10 = vadd.f32 1.0, %v16007_v44  ;;  %v16009_v21 = vpop.eup %16008  ;;  %23627 = vst [vmem:[#allocation3_spill] sm:$0xff] %v18297_v6  ;;  %v13439_v44 = vld [vmem:[%s23240_s5 + $0xd0] sm:$0xff] }
 0x9a6   :  { %16012 = vrcp.f32 %v2759_v60  ;;  %v2761_v23 = vadd.f32 1.0, %v16009_v21  ;;  %v13444_v60 = vld [vmem:[%s23240_s5 + $0xf8] sm:$0xff]  ;;  %v13429_v21 = vld [vmem:[%s23240_s5 + $0x80] sm:$0xff] }
 0x9a7   :  { %3643 = vmatprep.subr.mxu0 %v13444_v60  ;;  %v13462_v60 = vld [vmem:[%s23240_s5 + $0x108] sm:$0xff] }
 0x9af   :  { %v16011_v37 = vpop.eup %16010 }
 0x9b0   :  { %v3344_v43 = vsub.f32 1.0, %v16011_v37  ;;  %v3340_v17 = vmul.f32 %v16011_v37, %v17329_v30  ;;  %v3497_v37 = vld [vmem:[%s23240_s5 + $0x58] sm:$0xff] }
 0x9b3   :  { %v16013_v28 = vpop.eup %16012 }
 0x9b4   :  { %v3345_v61 = vsub.f32 1.0, %v16013_v28  ;;  %v3341_v11 = vmul.f32 %v16013_v28, %v17339_v0  ;;  %v3494_v28 = vld [vmem:[%s23240_s5 + $0x40] sm:$0xff] }
 0xa48   :  { %v14525_v16 = vpop.f32.mrf.mxu0 }
 0xa4a   :  { %v14526_v50 = vpop.f32.mrf.mxu0 }
 0xa4b   :  { %v14527_v31 = vadd.f32 %v14526_v50, %v14525_v16  ;;  %v13437_v16 = vld [vmem:[%s23240_s5 + $0xc0] sm:$0xff]  ;;  %v13443_v50 = vld [vmem:[%s23240_s5 + $0xf0] sm:$0xff] }
 0xa4c   :  { %v14528_v62 = vpop.f32.mrf.mxu0  ;;  %3644 = vmatpush1.msra.mxu0 %v13443_v50  ;;  %v13464_v50 = vld [vmem:[%s23240_s5 + $0x118] sm:$0xff] }
 0xa4d   :  { %v3332_v12 = vadd.f32 %v14527_v31, %v13409_v19  ;;  %v13440_v19 = vld [vmem:[%s23240_s5 + $0xd8] sm:$0xff]  ;;  %v13434_v31 = vld [vmem:[%s23240_s5 + $0xa8] sm:$0xff] }
 0xa4e   :  { %v14529_v13 = vpop.f32.mrf.mxu0  ;;  %3645 = vmatprep.subr.mxu0 %v13440_v19  ;;  %v13461_v19 = vld [vmem:[%s23240_s5 + $0x100] sm:$0xff] }
 0xa4f   :  { %16014 = vtanh.f32 %v3332_v12  ;;  %v14530_v29 = vadd.f32 %v14529_v13, %v14528_v62  ;;  %v13436_v62 = vld [vmem:[%s23240_s5 + $0xb8] sm:$0xff]  ;;  %3646 = vmatpush1.msra.mxu0 %v13439_v44  ;;  %v13433_v12 = vld [vmem:[%s23240_s5 + $0xa0] sm:$0xff]  ;;  %v13430_v13 = vld [vmem:[%s23240_s5 + $0x88] sm:$0xff] }
 0xa50   :  { %v14531_v1 = vpop.f32.mrf.mxu0  ;;  %16016 = vrcp.f32 %v2760_v10  ;;  %3647 = vmatprep.subr.mxu0 %v13436_v62  ;;  %v13435_v10 = vld [vmem:[%s23240_s5 + $0xb0] sm:$0xff] }
 0xa51   :  { %v3333_v45 = vadd.f32 %v14530_v29, %v13410_v18  ;;  %3648 = vmatpush1.msra.mxu0 %v13435_v10  ;;  %v13432_v18 = vld [vmem:[%s23240_s5 + $0x98] sm:$0xff]  ;;  %v13431_v29 = vld [vmem:[%s23240_s5 + $0x90] sm:$0xff] }
 0xa52   :  { %v14532_v25 = vpop.f32.mrf.mxu0  ;;  %3649 = vmatprep.subr.mxu0 %v13432_v18  ;;  %v18506_v18 = vld [vmem:[%s23241_s8 + $0x78] sm:$0xff] }
 0xa53   :  { %16018 = vtanh.f32 %v3333_v45  ;;  %v14533_v8 = vadd.f32 %v14532_v25, %v14531_v1  ;;  %3650 = vmatpush1.msra.mxu0 %v13431_v29  ;;  %v3499_v1 = vld [vmem:[%s23240_s5 + $0x68] sm:$0xff]  ;;  %v3501_v45 = vld [vmem:[%s23240_s5 + $0x78] sm:$0xff]  ;;  %23629 = vst [vmem:[#allocation5_spill] sm:$0xff] %v18506_v18  ;;  %v18520_v29 = vld [vmem:[%s23241_s8 + $0x70] sm:$0xff] }
 0xa54   :  { %v14534_v59 = vpop.f32.mrf.mxu0  ;;  %16020 = vrcp.f32 %v2761_v23  ;;  %3833 = vmatprep.subr.mxu0 %v3501_v45  ;;  %23631 = vst [vmem:[#allocation7_spill] sm:$0xff] %v18520_v29  ;;  %v18534_v45 = vld [vmem:[%s23241_s8 + $0x68] sm:$0xff] }
 0xa55   :  { %v3334_v9 = vadd.f32 %v14533_v8, %v13411_v7  ;;  %23633 = vst [vmem:[#allocation9_spill] sm:$0xff] %v18534_v45 }
 0xa56   :  { %v14535_v14 = vpop.f32.mrf.mxu0 }
 0xa57   :  { %16022 = vtanh.f32 %v3334_v9  ;;  %v14536_v63 = vadd.f32 %v14535_v14, %v14534_v59  ;;  %v3498_v14 = vld [vmem:[%s23240_s5 + $0x60] sm:$0xff] }
 0xa59   :  { %v3335_v42 = vadd.f32 %v14536_v63, %v13412_v36  ;;  %v3500_v36 = vld [vmem:[%s23240_s5 + $0x70] sm:$0xff]  ;;  %v3495_v63 = vld [vmem:[%s23240_s5 + $0x48] sm:$0xff] }
 0xa5b   :  { %16024 = vtanh.f32 %v3335_v42 }
 0xa5c   :  { %v16015_v39 = vpop.eup %16014 }
 0xa5d   :  { %v3348_v48 = vmul.f32 %v16015_v39, %v3344_v43  ;;  %v16017_v27 = vpop.eup %16016  ;;  %v3496_v43 = vld [vmem:[%s23240_s5 + $0x50] sm:$0xff]  ;;  %v3491_v39 = vld [vmem:[%s23240_s5 + $0x28] sm:$0xff] }
 0xa5e   :  { %v3346_v56 = vsub.f32 1.0, %v16017_v27  ;;  %v3342_v38 = vmul.f32 %v16017_v27, %v17349_v2  ;;  %v3490_v27 = vld [vmem:[%s23240_s5 + $0x20] sm:$0xff] }
 0xa5f   :  { %v18179_v52 = vadd.f32 %v3348_v48, %v3340_v17  ;;  %v3493_v17 = vld [vmem:[%s23240_s5 + $0x38] sm:$0xff] }
 0xa60   :  { %v16019_v51 = vpop.eup %16018 }
 0xa61   :  { %v3349_v49 = vmul.f32 %v16019_v51, %v3345_v61  ;;  %13413 = vst.msk [vmem:[%s23247_s9 + $0x20] sm:$0xff] %vm56_vm0, %v18179_v52  ;;  %v16021_v55 = vpop.eup %16020  ;;  %v3492_v61 = vld [vmem:[%s23240_s5 + $0x30] sm:$0xff]  ;;  %v3487_v51 = vld [vmem:[%s23240_s5 + $0x8] sm:$0xff] }
 0xa62   :  { %v3347_v0 = vsub.f32 1.0, %v16021_v55  ;;  %v3343_v26 = vmul.f32 %v16021_v55, %v17359_v5  ;;  %v13442_v5 = vld [vmem:[%s23240_s5 + $0xe8] sm:$0xff]  ;;  %v3488_v55 = vld [vmem:[%s23240_s5 + $0x10] sm:$0xff] }
 0xa63   :  { %v18187_v53 = vadd.f32 %v3349_v49, %v3341_v11  ;;  %v3489_v11 = vld [vmem:[%s23240_s5 + $0x18] sm:$0xff]  ;;  %v3486_v49 = vld [vmem:[%s23240_s5] sm:$0xff] }
 0xa64   :  { %v16023_v30 = vpop.eup %16022 }
 0xa65   :  { %v3350_v15 = vmul.f32 %v16023_v30, %v3346_v56  ;;  %13414 = vst.msk [vmem:[%s23247_s9 + $0x28] sm:$0xff] %vm56_vm0, %v18187_v53  ;;  %v13474_v56 = vld [vmem:[%s23240_s5 + $0x168] sm:$0xff]  ;;  %v13476_v30 = vld [vmem:[%s23240_s5 + $0x178] sm:$0xff] }
 0xa67   :  { %v18195_v58 = vadd.f32 %v3350_v15, %v3342_v38  ;;  %v13473_v38 = vld [vmem:[%s23240_s5 + $0x160] sm:$0xff]  ;;  %v13475_v15 = vld [vmem:[%s23240_s5 + $0x170] sm:$0xff] }
 0xa68   :  { %v16025_v33 = vpop.eup %16024 }
 0xa69   :  { %v3351_v41 = vmul.f32 %v16025_v33, %v3347_v0  ;;  %13415 = vst.msk [vmem:[%s23247_s9 + $0x30] sm:$0xff] %vm56_vm0, %v18195_v58  ;;  %v13470_v0 = vld [vmem:[%s23240_s5 + $0x148] sm:$0xff]  ;;  %v13472_v33 = vld [vmem:[%s23240_s5 + $0x158] sm:$0xff] }
 0xa6b   :  { %v18203_v2 = vadd.f32 %v3351_v41, %v3343_v26  ;;  %v13469_v26 = vld [vmem:[%s23240_s5 + $0x140] sm:$0xff]  ;;  %v13471_v41 = vld [vmem:[%s23240_s5 + $0x150] sm:$0xff] }
 0xa6d   :  { %13416 = vst.msk [vmem:[%s23247_s9 + $0x38] sm:$0xff] %vm56_vm0, %v18203_v2  ;;  %15625 = vmatprep.subr.mxu1 %v18203_v2 }
 0xa6e   :  { %15626 = vmatpush3.msra.mxu1 %v18203_v2 }
 0xa6f   :  { %15627 = vmatprep.subr.mxu1 %v18195_v58 }
 0xa70   :  { %15628 = vmatpush3.msra.mxu1 %v18195_v58 }
 0xa71   :  { %15629 = vmatprep.subr.mxu1 %v18187_v53 }
 0xa72   :  { %15630 = vmatpush3.msra.mxu1 %v18187_v53 }
 0xa73   :  { %15631 = vmatprep.subr.mxu1 %v18179_v52 }
 0xa74   :  { %15632 = vmatpush3.msra.mxu1 %v18179_v52 }
 0xa75   :  { %15634 = vmatmul.mubr.msk.f32.vlgmr.msra.gmra.mxu1 %vm56_vm0, %v18227_v20  ;;  %3554 = vmatprep.subr.mxu1 %v13442_v5  ;;  %v13466_v5 = vld [vmem:[%s23240_s5 + $0x128] sm:$0xff] }
 0xa76   :  { %15636 = vmatprep.mubr.msk.f32.mxu1 %vm56_vm0, %v18234_v54  ;;  %3555 = vmatpush1.msra.mxu1 %v13441_v34  ;;  %v13468_v34 = vld [vmem:[%s23240_s5 + $0x138] sm:$0xff] }
 0xa77   :  { %3556 = vmatprep.subr.mxu1 %v13438_v24  ;;  %v13465_v24 = vld [vmem:[%s23240_s5 + $0x120] sm:$0xff] }
 0xa78   :  { %3557 = vmatpush1.msra.mxu1 %v13437_v16  ;;  %v13467_v16 = vld [vmem:[%s23240_s5 + $0x130] sm:$0xff] }
 0xa79   :  { %15637 = vmatmul.mubr.msk.f32.gmra.mxu1 %vm56_vm0, %v18241_v47  ;;  %3558 = vmatprep.subr.mxu1 %v13434_v31  ;;  %v13463_v31 = vld [vmem:[%s23240_s5 + $0x110] sm:$0xff] }
 0xa7a   :  { %15639 = vmatprep.mubr.msk.f32.mxu1 %vm56_vm0, %v18248_v46  ;;  %3559 = vmatpush1.msra.mxu1 %v13433_v12 }
 0xa7b   :  { %3560 = vmatprep.subr.mxu1 %v13430_v13  ;;  %v18501_v13 = vld [vmem:[%s23241_s8 + $0xf8] sm:$0xff] }
 0xa7c   :  { %3561 = vmatpush1.msra.mxu1 %v13429_v21  ;;  %23628 = vst [vmem:[#allocation4_spill] sm:$0xff] %v18501_v13  ;;  %v18515_v21 = vld [vmem:[%s23241_s8 + $0xf0] sm:$0xff] }
 0xa7d   :  { %15640 = vmatmul.mubr.msk.f32.gmra.mxu1 %vm56_vm0, %v18255_v3  ;;  %3744 = vmatprep.subr.mxu1 %v3499_v1  ;;  %23630 = vst [vmem:[#allocation6_spill] sm:$0xff] %v18515_v21  ;;  %v18529_v1 = vld [vmem:[%s23241_s8 + $0xe8] sm:$0xff] }
 0xa7e   :  { %15642 = vmatprep.mubr.msk.f32.mxu1 %vm56_vm0, %v18262_v57  ;;  %23632 = vst [vmem:[#allocation8_spill] sm:$0xff] %v18529_v1 }
 0xa81   :  { %15643 = vmatmul.mubr.msk.f32.gmra.mxu1 %vm56_vm0, %v18269_v35 }
 0xa82   :  { %15645 = vmatprep.mubr.msk.f32.mxu1 %vm56_vm0, %v18276_v22 }
 0xa85   :  { %15646 = vmatmul.mubr.msk.f32.gmra.mxu1 %vm56_vm0, %v18283_v4 }
 0xa86   :  { %15648 = vmatprep.mubr.msk.f32.mxu1 %vm56_vm0, %v18290_v32 }
 0xa89   :  { %15649 = vmatmul.mubr.msk.f32.gmra.mxu1 %vm56_vm0, %v18297_v6 }
 0xa8a   :  { %3594 = vmatprep.mubr.f32.mxu1 %v23534_v40 }
 0xb35   :  { %v18350_v23 = vpop.f32.mrf.mxu1 }
 0xb37   :  { %v3427_v25 = vpop.f32.mrf.mxu1 }
 0xb39   :  { %v18352_v7 = vpop.f32.mrf.mxu1 }
 0xb3b   :  { %v18354_v8 = vpop.f32.mrf.mxu1 }
 0xb3d   :  { %v15641_v59 = vpop.f32.mrf.mxu1 }
 0xb3f   :  { %v3447_v9 = vpop.f32.mrf.mxu1 }
 0xb40   :  { %13445 = vmatmul.mubr.msk.f32.vlgmr.msra.gmra.mxu1 %vm56_vm0, %v3447_v9  ;;  %13449 = vmatmul.mubr.msk.f32.vlgmr.msra.gmra.mxu0 %vm56_vm0, %v3447_v9  ;;  %v18578_v9 = vld [vmem:[%s23241_s8 + $0x50] sm:$0xff] }
 0xb41   :  { %3600 = vmatprep.mubr.f32.mxu1 %v23534_v40  ;;  %3689 = vmatprep.mubr.f32.mxu0 %v23534_v40  ;;  %v15644_v42 = vpop.f32.mrf.mxu1  ;;  %23639 = vst [vmem:[#allocation15_spill] sm:$0xff] %v18578_v9 }
 0xb42   :  { %3745 = vmatpush1.msra.mxu1 %v3498_v14  ;;  %3834 = vmatpush1.msra.mxu0 %v3500_v36  ;;  %v18585_v14 = vld [vmem:[%s23241_s8 + $0xc8] sm:$0xff] }
 0xb43   :  { %3746 = vmatprep.subr.mxu1 %v3495_v63  ;;  %3835 = vmatprep.subr.mxu0 %v3497_v37  ;;  %v3457_v48 = vpop.f32.mrf.mxu1  ;;  %23640 = vst [vmem:[#allocation16_spill] sm:$0xff] %v18585_v14  ;;  %v18592_v36 = vld [vmem:[%s23241_s8 + $0x48] sm:$0xff]  ;;  %v18599_v63 = vld [vmem:[%s23241_s8 + $0xc0] sm:$0xff] }
 0xb44   :  { %13446 = vmatmul.mubr.msk.f32.gmra.mxu1 %vm56_vm0, %v15641_v59  ;;  %13450 = vmatmul.mubr.msk.f32.gmra.mxu0 %vm56_vm0, %v15641_v59  ;;  %v18571_v59 = vld [vmem:[%s23241_s8 + $0xd0] sm:$0xff]  ;;  %23641 = vst [vmem:[#allocation17_spill] sm:$0xff] %v18592_v36  ;;  %23642 = vst [vmem:[#allocation18_spill] sm:$0xff] %v18599_v63  ;;  %v18606_v37 = vld [vmem:[%s23241_s8 + $0x40] sm:$0xff] }
 0xb45   :  { %3606 = vmatprep.mubr.f32.mxu1 %v23534_v40  ;;  %3695 = vmatprep.mubr.f32.mxu0 %v23534_v40  ;;  %v15647_v44 = vpop.f32.mrf.mxu1  ;;  %23638 = vst [vmem:[#allocation14_spill] sm:$0xff] %v18571_v59  ;;  %23643 = vst [vmem:[#allocation19_spill] sm:$0xff] %v18606_v37 }
 0xb46   :  { %3747 = vmatpush1.msra.mxu1 %v3494_v28  ;;  %3836 = vmatpush1.msra.mxu0 %v3496_v43  ;;  %v18620_v28 = vld [vmem:[%s23241_s8 + $0x38] sm:$0xff]  ;;  %v18627_v43 = vld [vmem:[%s23241_s8 + $0xb0] sm:$0xff] }
 0xb47   :  { %3748 = vmatprep.subr.mxu1 %v3491_v39  ;;  %3837 = vmatprep.subr.mxu0 %v3493_v17  ;;  %v3467_v62 = vpop.f32.mrf.mxu1  ;;  %23645 = vst [vmem:[#allocation21_spill] sm:$0xff] %v18620_v28  ;;  %23646 = vst [vmem:[#allocation22_spill] sm:$0xff] %v18627_v43  ;;  %v18634_v39 = vld [vmem:[%s23241_s8 + $0x30] sm:$0xff]  ;;  %v18641_v17 = vld [vmem:[%s23241_s8 + $0xa8] sm:$0xff] }
 0xb48   :  { %13447 = vmatmul.mubr.msk.f32.gmra.mxu1 %vm56_vm0, %v3457_v48  ;;  %13451 = vmatmul.mubr.msk.f32.gmra.mxu0 %vm56_vm0, %v3457_v48  ;;  %23647 = vst [vmem:[#allocation23_spill] sm:$0xff] %v18634_v39  ;;  %23648 = vst [vmem:[#allocation24_spill] sm:$0xff] %v18641_v17  ;;  %v18648_v48 = vld [vmem:[%s23241_s8 + $0x28] sm:$0xff] }
 0xb49   :  { %3612 = vmatprep.mubr.f32.mxu1 %v23534_v40  ;;  %3701 = vmatprep.mubr.f32.mxu0 %v23534_v40  ;;  %v15650_v12 = vpop.f32.mrf.mxu1  ;;  %23649 = vst [vmem:[#allocation25_spill] sm:$0xff] %v18648_v48 }
 0xb4a   :  { %3749 = vmatpush1.msra.mxu1 %v3490_v27  ;;  %3838 = vmatpush1.msra.mxu0 %v3492_v61  ;;  %v18655_v27 = vld [vmem:[%s23241_s8 + $0xa0] sm:$0xff] }
 0xb4b   :  { %3750 = vmatprep.subr.mxu1 %v3487_v51  ;;  %3839 = vmatprep.subr.mxu0 %v3489_v11  ;;  %v3477_v10 = vpop.f32.mrf.mxu1  ;;  %23650 = vst [vmem:[#allocation26_spill] sm:$0xff] %v18655_v27  ;;  %v18662_v61 = vld [vmem:[%s23241_s8 + $0x20] sm:$0xff]  ;;  %v18669_v51 = vld [vmem:[%s23241_s8 + $0x98] sm:$0xff] }
 0xb4c   :  { %13448 = vmatmul.mubr.msk.f32.gmra.mxu1 %vm56_vm0, %v15644_v42  ;;  %13452 = vmatmul.mubr.msk.f32.gmra.mxu0 %vm56_vm0, %v15644_v42  ;;  %v18613_v42 = vld [vmem:[%s23241_s8 + $0xb8] sm:$0xff]  ;;  %23651 = vst [vmem:[#allocation27_spill] sm:$0xff] %v18662_v61  ;;  %23652 = vst [vmem:[#allocation28_spill] sm:$0xff] %v18669_v51 }
 0xb4d   :  { %3751 = vmatpush1.msra.mxu1 %v3486_v49  ;;  %3784 = vmatprep.mubr.f32.mxu1 %v23534_v40  ;;  %23644 = vst [vmem:[#allocation20_spill] sm:$0xff] %v18613_v42  ;;  %v18676_v11 = vld [vmem:[%s23241_s8 + $0x18] sm:$0xff]  ;;  %v18683_v49 = vld [vmem:[%s23241_s8 + $0x90] sm:$0xff] }
 0xb4e   :  { %3840 = vmatpush1.msra.mxu0 %v3488_v55  ;;  %3873 = vmatprep.mubr.f32.mxu0 %v23534_v40  ;;  %23653 = vst [vmem:[#allocation29_spill] sm:$0xff] %v18676_v11  ;;  %23654 = vst [vmem:[#allocation30_spill] sm:$0xff] %v18683_v49  ;;  %v18690_v55 = vld [vmem:[%s23241_s8 + $0x10] sm:$0xff] }
 0xb4f   :  { %3950 = vmatprep.subr.mxu1 %v13474_v56  ;;  %4039 = vmatprep.subr.mxu0 %v13476_v30  ;;  %23655 = vst [vmem:[#allocation31_spill] sm:$0xff] %v18690_v55  ;;  %v18697_v56 = vld [vmem:[%s23241_s8 + $0x88] sm:$0xff] }
 0xb50   :  { %13453 = vmatmul.mubr.msk.f32.vlgmr.msra.gmra.mxu1 %vm56_vm0, %v3427_v25  ;;  %13457 = vmatmul.mubr.msk.f32.vlgmr.msra.gmra.mxu0 %vm56_vm0, %v3427_v25  ;;  %v18548_v25 = vld [vmem:[%s23241_s8 + $0x60] sm:$0xff]  ;;  %23656 = vst [vmem:[#allocation32_spill] sm:$0xff] %v18697_v56  ;;  %v18704_v30 = vld [vmem:[%s23241_s8 + $0x8] sm:$0xff] }
 0xb51   :  { %3790 = vmatprep.mubr.f32.mxu1 %v23534_v40  ;;  %3879 = vmatprep.mubr.f32.mxu0 %v23534_v40  ;;  %23635 = vst [vmem:[#allocation11_spill] sm:$0xff] %v18548_v25  ;;  %23657 = vst [vmem:[#allocation33_spill] sm:$0xff] %v18704_v30 }
 0xb52   :  { %3951 = vmatpush1.msra.mxu1 %v13473_v38  ;;  %4040 = vmatpush1.msra.mxu0 %v13475_v15  ;;  %v18711_v38 = vld [vmem:[%s23241_s8 + $0x80] sm:$0xff] }
 0xb53   :  { %3952 = vmatprep.subr.mxu1 %v13470_v0  ;;  %4041 = vmatprep.subr.mxu0 %v13472_v33  ;;  %23658 = vst [vmem:[#allocation34_spill] sm:$0xff] %v18711_v38  ;;  %v18718_v15 = vld [vmem:[%s23241_s8] sm:$0xff] }
 0xb54   :  { %13454 = vmatmul.mubr.msk.f32.gmra.mxu1 %vm56_vm0, %v18350_v23  ;;  %13458 = vmatmul.mubr.msk.f32.gmra.mxu0 %vm56_vm0, %v18350_v23  ;;  %v18543_v23 = vld [vmem:[%s23241_s8 + $0xe0] sm:$0xff]  ;;  %23659 = vst [vmem:[#allocation35_spill] sm:$0xff] %v18718_v15 }
 0xb55   :  { %3796 = vmatprep.mubr.f32.mxu1 %v23534_v40  ;;  %3885 = vmatprep.mubr.f32.mxu0 %v23534_v40  ;;  %23634 = vst [vmem:[#allocation10_spill] sm:$0xff] %v18543_v23 }
 0xb56   :  { %3953 = vmatpush1.msra.mxu1 %v13469_v26  ;;  %4042 = vmatpush1.msra.mxu0 %v13471_v41 }
 0xb57   :  { %3954 = vmatprep.subr.mxu1 %v13466_v5  ;;  %4043 = vmatprep.subr.mxu0 %v13468_v34 }
 0xb58   :  { %13455 = vmatmul.mubr.msk.f32.gmra.mxu1 %vm56_vm0, %v18354_v8  ;;  %13459 = vmatmul.mubr.msk.f32.gmra.mxu0 %vm56_vm0, %v18354_v8  ;;  %v18564_v8 = vld [vmem:[%s23241_s8 + $0x58] sm:$0xff] }
 0xb59   :  { %3802 = vmatprep.mubr.f32.mxu1 %v23534_v40  ;;  %3891 = vmatprep.mubr.f32.mxu0 %v23534_v40  ;;  %23637 = vst [vmem:[#allocation13_spill] sm:$0xff] %v18564_v8 }
 0xb5a   :  { %3955 = vmatpush1.msra.mxu1 %v13465_v24  ;;  %4044 = vmatpush1.msra.mxu0 %v13467_v16 }
 0xb5b   :  { %3956 = vmatprep.subr.mxu1 %v13462_v60  ;;  %4045 = vmatprep.subr.mxu0 %v13464_v50 }
 0xb5c   :  { %13456 = vmatmul.mubr.msk.f32.gmra.mxu1 %vm56_vm0, %v18352_v7  ;;  %13460 = vmatmul.mubr.msk.f32.gmra.mxu0 %vm56_vm0, %v18352_v7  ;;  %v18557_v7 = vld [vmem:[%s23241_s8 + $0xd8] sm:$0xff] }
 0xb5d   :  { %3957 = vmatpush1.msra.mxu1 %v13461_v19  ;;  %3990 = vmatprep.mubr.f32.mxu1 %v23534_v40  ;;  %23636 = vst [vmem:[#allocation12_spill] sm:$0xff] %v18557_v7 }
 0xb5e   :  { %4046 = vmatpush1.msra.mxu0 %v13463_v31  ;;  %4079 = vmatprep.mubr.f32.mxu0 %v23534_v40 }
 0xb5f   :  { %14553 = vmatprep.subr.mxu1 %v18501_v13  ;;  %14597 = vmatprep.subr.mxu0 %v18501_v13 }
 0xb60   :  { %13477 = vmatmul.mubr.msk.f32.vlgmr.msra.gmra.mxu1 %vm56_vm0, %v3467_v62  ;;  %13481 = vmatmul.mubr.msk.f32.vlgmr.msra.gmra.mxu0 %vm56_vm0, %v3467_v62 }
 0xb61   :  { %3996 = vmatprep.mubr.f32.mxu1 %v23534_v40  ;;  %4085 = vmatprep.mubr.f32.mxu0 %v23534_v40 }
 0xb62   :  { %14554 = vmatpush3.msra.mxu1 %v18506_v18  ;;  %14598 = vmatpush3.msra.mxu0 %v18506_v18 }
 0xb63   :  { %14555 = vmatprep.subr.mxu1 %v18515_v21  ;;  %14599 = vmatprep.subr.mxu0 %v18515_v21 }
 0xb64   :  { %13478 = vmatmul.mubr.msk.f32.gmra.mxu1 %vm56_vm0, %v15647_v44  ;;  %13482 = vmatmul.mubr.msk.f32.gmra.mxu0 %vm56_vm0, %v15647_v44 }
 0xb65   :  { %4002 = vmatprep.mubr.f32.mxu1 %v23534_v40  ;;  %4091 = vmatprep.mubr.f32.mxu0 %v23534_v40 }
 0xb66   :  { %14556 = vmatpush3.msra.mxu1 %v18520_v29  ;;  %14600 = vmatpush3.msra.mxu0 %v18520_v29 }
 0xb67   :  { %14557 = vmatprep.subr.mxu1 %v18529_v1  ;;  %14601 = vmatprep.subr.mxu0 %v18529_v1 }
 0xb68   :  { %13479 = vmatmul.mubr.msk.f32.gmra.mxu1 %vm56_vm0, %v3477_v10  ;;  %13483 = vmatmul.mubr.msk.f32.gmra.mxu0 %vm56_vm0, %v3477_v10 }
 0xb69   :  { %4008 = vmatprep.mubr.f32.mxu1 %v23534_v40  ;;  %4097 = vmatprep.mubr.f32.mxu0 %v23534_v40 }
 0xb6a   :  { %14558 = vmatpush3.msra.mxu1 %v18534_v45  ;;  %14602 = vmatpush3.msra.mxu0 %v18534_v45 }
 0xb6b   :  { %14559 = vmatprep.subr.mxu1 %v18543_v23  ;;  %14603 = vmatprep.subr.mxu0 %v18543_v23 }
 0xb6c   :  { %13480 = vmatmul.mubr.msk.f32.gmra.mxu1 %vm56_vm0, %v15650_v12  ;;  %13484 = vmatmul.mubr.msk.f32.gmra.mxu0 %vm56_vm0, %v15650_v12 }
 0xb6d   :  { %14560 = vmatpush3.msra.mxu1 %v18548_v25  ;;  %14604 = vmatpush3.msra.mxu0 %v18548_v25 }
 0xb6e   :  { %14561 = vmatprep.subr.mxu1 %v18557_v7  ;;  %14605 = vmatprep.subr.mxu0 %v18557_v7 }
 0xb6f   :  { %14562 = vmatpush3.msra.mxu1 %v18564_v8  ;;  %14606 = vmatpush3.msra.mxu0 %v18564_v8 }
 0xb70   :  { %14563 = vmatprep.subr.mxu1 %v18571_v59  ;;  %14607 = vmatprep.subr.mxu0 %v18571_v59 }
 0xb71   :  { %14564 = vmatpush3.msra.mxu1 %v18578_v9  ;;  %14608 = vmatpush3.msra.mxu0 %v18578_v9 }
 0xb72   :  { %14565 = vmatprep.subr.mxu1 %v18585_v14  ;;  %14609 = vmatprep.subr.mxu0 %v18585_v14 }
 0xb73   :  { %14566 = vmatpush3.msra.mxu1 %v18592_v36  ;;  %14610 = vmatpush3.msra.mxu0 %v18592_v36 }
 0xb74   :  { %14567 = vmatprep.subr.mxu1 %v18599_v63  ;;  %14611 = vmatprep.subr.mxu0 %v18599_v63 }
 0xb75   :  { %14568 = vmatpush3.msra.mxu1 %v18606_v37  ;;  %14612 = vmatpush3.msra.mxu0 %v18606_v37 }
 0xb76   :  { %14569 = vmatprep.subr.mxu1 %v18613_v42  ;;  %14613 = vmatprep.subr.mxu0 %v18613_v42 }
 0xb77   :  { %14570 = vmatpush3.msra.mxu1 %v18620_v28  ;;  %14614 = vmatpush3.msra.mxu0 %v18620_v28 }
 0xb78   :  { %14571 = vmatprep.subr.mxu1 %v18627_v43  ;;  %14615 = vmatprep.subr.mxu0 %v18627_v43 }
 0xb79   :  { %14572 = vmatpush3.msra.mxu1 %v18634_v39  ;;  %14616 = vmatpush3.msra.mxu0 %v18634_v39 }
 0xb7a   :  { %14573 = vmatprep.subr.mxu1 %v18641_v17  ;;  %14617 = vmatprep.subr.mxu0 %v18641_v17 }
 0xb7b   :  { %14574 = vmatpush3.msra.mxu1 %v18648_v48  ;;  %14618 = vmatpush3.msra.mxu0 %v18648_v48 }
 0xb7c   :  { %14575 = vmatprep.subr.mxu1 %v18655_v27  ;;  %14619 = vmatprep.subr.mxu0 %v18655_v27 }
 0xb7d   :  { %14576 = vmatpush3.msra.mxu1 %v18662_v61  ;;  %14620 = vmatpush3.msra.mxu0 %v18662_v61 }
 0xb7e   :  { %14577 = vmatprep.subr.mxu1 %v18669_v51  ;;  %14621 = vmatprep.subr.mxu0 %v18669_v51 }
 0xb7f   :  { %14578 = vmatpush3.msra.mxu1 %v18676_v11  ;;  %14622 = vmatpush3.msra.mxu0 %v18676_v11 }
 0xb80   :  { %14579 = vmatprep.subr.mxu1 %v18683_v49  ;;  %14623 = vmatprep.subr.mxu0 %v18683_v49 }
 0xb81   :  { %14580 = vmatpush3.msra.mxu1 %v18690_v55  ;;  %14624 = vmatpush3.msra.mxu0 %v18690_v55 }
 0xb82   :  { %14581 = vmatprep.subr.mxu1 %v18697_v56  ;;  %14625 = vmatprep.subr.mxu0 %v18697_v56 }
 0xb83   :  { %14582 = vmatpush3.msra.mxu1 %v18704_v30  ;;  %14626 = vmatpush3.msra.mxu0 %v18704_v30 }
 0xb84   :  { %14583 = vmatprep.subr.mxu1 %v18711_v38  ;;  %14627 = vmatprep.subr.mxu0 %v18711_v38 }
 0xb85   :  { %14584 = vmatpush3.msra.mxu1 %v18718_v15  ;;  %14628 = vmatpush3.msra.mxu0 %v18718_v15 }
 0xc00   :  { %v3596_v0 = vpop.f32.mrf.mxu1  ;;  %v3685_v33 = vpop.f32.mrf.mxu0 }
 0xc02   :  { %v3598_v26 = vpop.f32.mrf.mxu1  ;;  %v3687_v41 = vpop.f32.mrf.mxu0 }
 0xc04   :  { %v3602_v5 = vpop.f32.mrf.mxu1  ;;  %v3691_v34 = vpop.f32.mrf.mxu0 }
 0xc06   :  { %v3604_v24 = vpop.f32.mrf.mxu1  ;;  %v3693_v16 = vpop.f32.mrf.mxu0 }
 0xc08   :  { %v3608_v60 = vpop.f32.mrf.mxu1  ;;  %v3697_v50 = vpop.f32.mrf.mxu0 }
 0xc0a   :  { %v3610_v19 = vpop.f32.mrf.mxu1  ;;  %v3699_v44 = vpop.f32.mrf.mxu0 }
 0xc0c   :  { %v18722_v31 = vpop.f32.mrf.mxu1  ;;  %v18724_v62 = vpop.f32.mrf.mxu0 }
 0xc0e   :  { %v18726_v12 = vpop.f32.mrf.mxu1  ;;  %v18728_v10 = vpop.f32.mrf.mxu0 }
 0xc10   :  { %v3786_v15 = vpop.f32.mrf.mxu1  ;;  %v3875_v38 = vpop.f32.mrf.mxu0 }
 0xc11   :  { %v3787_v37 = vadd.f32 %v3786_v15, %v3596_v0  ;;  %v3876_v14 = vadd.f32 %v3875_v38, %v3685_v33  ;;  %v18733_v15 = vld [vmem:[%s23242_s7 + $0x8] sm:$0xff] }
 0xc12   :  { %v3788_v30 = vpop.f32.mrf.mxu1  ;;  %v3877_v56 = vpop.f32.mrf.mxu0 }
 0xc13   :  { %v3789_v9 = vadd.f32 %v3788_v30, %v3598_v26  ;;  %v3878_v59 = vadd.f32 %v3877_v56, %v3687_v41 }
 0xc14   :  { %v3792_v55 = vpop.f32.mrf.mxu1  ;;  %v3881_v49 = vpop.f32.mrf.mxu0 }
 0xc15   :  { %v3793_v29 = vadd.f32 %v3792_v55, %v3602_v5  ;;  %v3882_v21 = vadd.f32 %v3881_v49, %v3691_v34 }
 0xc16   :  { %v3794_v11 = vpop.f32.mrf.mxu1  ;;  %v3883_v51 = vpop.f32.mrf.mxu0 }
 0xc17   :  { %v3795_v6 = vadd.f32 %v3794_v11, %v3604_v24  ;;  %v3884_v32 = vadd.f32 %v3883_v51, %v3693_v16  ;;  %v18765_v24 = vld [vmem:[%s23242_s7 + $0x28] sm:$0xff] }
 0xc18   :  { %v3798_v61 = vpop.f32.mrf.mxu1  ;;  %v3887_v27 = vpop.f32.mrf.mxu0 }
 0xc19   :  { %v3799_v49 = vadd.f32 %v3798_v61, %v3608_v60 }
 0xc1a   :  { %v3800_v48 = vpop.f32.mrf.mxu1  ;;  %v3889_v17 = vpop.f32.mrf.mxu0 }
 0xc1b   :  { %v3801_v56 = vadd.f32 %v3800_v48, %v3610_v19  ;;  %v3890_v38 = vadd.f32 %v3889_v17, %v3699_v44 }
 0xc1c   :  { %v3804_v39 = vpop.f32.mrf.mxu1  ;;  %v3893_v43 = vpop.f32.mrf.mxu0 }
 0xc1d   :  { %v3805_v0 = vadd.f32 %v3804_v39, %v18722_v31  ;;  %v3894_v33 = vadd.f32 %v3893_v43, %v18724_v62  ;;  %v18772_v43 = vld [vmem:[%s23242_s7 + $0x20] sm:$0xff] }
 0xc1e   :  { %v3806_v28 = vpop.f32.mrf.mxu1  ;;  %v3895_v42 = vpop.f32.mrf.mxu0 }
 0xc1f   :  { %v3807_v5 = vadd.f32 %v3806_v28, %v18726_v12  ;;  %v3896_v34 = vadd.f32 %v3895_v42, %v18728_v10  ;;  %v18779_v12 = vld [vmem:[%s23242_s7 + $0x38] sm:$0xff] }
 0xc20   :  { %v3992_v63 = vpop.f32.mrf.mxu1  ;;  %v4081_v36 = vpop.f32.mrf.mxu0 }
 0xc21   :  { %v4104_v8 = vadd.f32 %v3992_v63, %v3787_v37  ;;  %v4106_v23 = vadd.f32 %v4081_v36, %v3876_v14 }
 0xc22   :  { %v3994_v7 = vpop.f32.mrf.mxu1  ;;  %v4083_v25 = vpop.f32.mrf.mxu0 }
 0xc23   :  { %v4105_v45 = vadd.f32 %v3994_v7, %v3789_v9  ;;  %v4107_v1 = vadd.f32 %v4083_v25, %v3878_v59  ;;  %v18740_v7 = vld [vmem:[%s23242_s7] sm:$0xff] }
 0xc24   :  { %v3998_v18 = vpop.f32.mrf.mxu1  ;;  %v4087_v13 = vpop.f32.mrf.mxu0  ;;  %v4152_v25 = vmul.f32 %v18740_v7, %v4104_v8  ;;  %v4245_v36 = vmul.f32 %v18740_v7, %v4106_v23 }
 0xc25   :  { %v4153_v30 = vmul.f32 %v18733_v15, %v4105_v45  ;;  %v4246_v63 = vmul.f32 %v18733_v15, %v4107_v1  ;;  %v4108_v59 = vadd.f32 %v3998_v18, %v3793_v29  ;;  %v4110_v37 = vadd.f32 %v4087_v13, %v3882_v21  ;;  %v18747_v18 = vld [vmem:[%s23242_s7 + $0x18] sm:$0xff] }
 0xc26   :  { %v4000_v9 = vpop.f32.mrf.mxu1  ;;  %v4089_v14 = vpop.f32.mrf.mxu0  ;;  %v3888_v45 = vadd.f32 %v3887_v27, %v3697_v50 }
 0xc27   :  { %v4109_v51 = vadd.f32 %v4000_v9, %v3795_v6  ;;  %v4111_v11 = vadd.f32 %v4089_v14, %v3884_v32  ;;  %4224 = vmatprep.mubr.f32.mxu1 %v4153_v30  ;;  %4317 = vmatprep.mubr.f32.mxu0 %v4246_v63  ;;  %v18754_v32 = vld [vmem:[%s23242_s7 + $0x10] sm:$0xff]  ;;  %v18793_v9 = vld [vmem:[%s23239_s4] sm:$0xff] }
 0xc28   :  { %v4004_v1 = vpop.f32.mrf.mxu1  ;;  %v4093_v55 = vpop.f32.mrf.mxu0  ;;  %4225 = vmatmul.mubr.f32.vlgmr.msra.gmra.mxu1 %v4152_v25  ;;  %4318 = vmatmul.mubr.f32.vlgmr.msra.gmra.mxu0 %v4245_v36  ;;  %v4154_v6 = vmul.f32 %v18754_v32, %v4108_v59  ;;  %v4247_v17 = vmul.f32 %v18754_v32, %v4110_v37  ;;  %v18786_v63 = vld [vmem:[%s23242_s7 + $0x30] sm:$0xff] }
 0xc29   :  { %v4155_v29 = vmul.f32 %v18747_v18, %v4109_v51  ;;  %v4248_v13 = vmul.f32 %v18747_v18, %v4111_v11  ;;  %v4112_v21 = vadd.f32 %v4004_v1, %v3799_v49  ;;  %v4114_v48 = vadd.f32 %v4093_v55, %v3888_v45  ;;  %v13486_v45 = vld [vmem:[%s23243_s0 + $0x48] sm:$0xff]  ;;  %v13485_v55 = vld [vmem:[%s23243_s0 + $0x40] sm:$0xff] }
 0xc2a   :  { %v4006_v23 = vpop.f32.mrf.mxu1  ;;  %v4095_v8 = vpop.f32.mrf.mxu0 }
 0xc2b   :  { %v4113_v27 = vadd.f32 %v4006_v23, %v3801_v56  ;;  %v4115_v61 = vadd.f32 %v4095_v8, %v3890_v38  ;;  %4229 = vmatprep.mubr.f32.mxu1 %v4155_v29  ;;  %4322 = vmatprep.mubr.f32.mxu0 %v4248_v13  ;;  %v4156_v39 = vmul.f32 %v18772_v43, %v4112_v21  ;;  %v13487_v38 = vld [vmem:[%s23243_s0 + $0x50] sm:$0xff] }
 0xc2c   :  { %v4010_v26 = vpop.f32.mrf.mxu1  ;;  %v4099_v41 = vpop.f32.mrf.mxu0  ;;  %4230 = vmatmul.mubr.f32.gmra.mxu1 %v4154_v6  ;;  %4323 = vmatmul.mubr.f32.gmra.mxu0 %v4247_v17  ;;  %v4249_v19 = vmul.f32 %v18772_v43, %v4114_v48  ;;  %v13488_v17 = vld [vmem:[%s23243_s0 + $0x58] sm:$0xff] }
 0xc2d   :  { %v4157_v16 = vmul.f32 %v18765_v24, %v4113_v27  ;;  %v4250_v60 = vmul.f32 %v18765_v24, %v4115_v61  ;;  %v4116_v28 = vadd.f32 %v4010_v26, %v3805_v0  ;;  %v4118_v44 = vadd.f32 %v4099_v41, %v3894_v33 }
 0xc2e   :  { %v4012_v50 = vpop.f32.mrf.mxu1  ;;  %v4101_v42 = vpop.f32.mrf.mxu0 }
 0xc2f   :  { %v4117_v31 = vadd.f32 %v4012_v50, %v3807_v5  ;;  %v4119_v62 = vadd.f32 %v4101_v42, %v3896_v34  ;;  %4234 = vmatprep.mubr.f32.mxu1 %v4157_v16  ;;  %4327 = vmatprep.mubr.f32.mxu0 %v4250_v60  ;;  %v4158_v25 = vmul.f32 %v18786_v63, %v4116_v28 }
 0xc30   :  { %4235 = vmatmul.mubr.f32.gmra.mxu1 %v4156_v39  ;;  %4328 = vmatmul.mubr.f32.gmra.mxu0 %v4249_v19  ;;  %v4251_v59 = vmul.f32 %v18786_v63, %v4118_v44 }
 0xc31   :  { %v4159_v10 = vmul.f32 %v18779_v12, %v4117_v31  ;;  %v4252_v30 = vmul.f32 %v18779_v12, %v4119_v62 }
 0xc33   :  { %4239 = vmatprep.mubr.f32.mxu1 %v4159_v10  ;;  %4332 = vmatprep.mubr.f32.mxu0 %v4252_v30 }
 0xc34   :  { %4240 = vmatmul.mubr.f32.gmra.mxu1 %v4158_v25  ;;  %4333 = vmatmul.mubr.f32.gmra.mxu0 %v4251_v59  ;;  %v13513_v59 = vld [vmem:[%s23244_s6 + $0x40] sm:$0xff] }
 0xc35   :  { %15659 = vmatprep.mubr.msk.f32.mxu1 %vm56_vm0, %v18793_v9  ;;  %4625 = vmatprep.mubr.f32.mxu0 %v23534_v40 }
 0xce8   :  { %v14585_v14 = vpop.f32.mrf.mxu1 }
 0xcea   :  { %v14586_v36 = vpop.f32.mrf.mxu1 }
 0xceb   :  { %v14587_v49 = vadd.f32 %v14586_v36, %v14585_v14  ;;  %v13536_v14 = vld [vmem:[%s23244_s6 + $0xb8] sm:$0xff]  ;;  %v13535_v36 = vld [vmem:[%s23244_s6 + $0xb0] sm:$0xff] }
 0xcec   :  { %v14588_v37 = vpop.f32.mrf.mxu1 }
 0xced   :  { %v4343_v6 = vadd.f32 %v14587_v49, %v13485_v55  ;;  %v13531_v49 = vld [vmem:[%s23244_s6 + $0x90] sm:$0xff]  ;;  %v13529_v55 = vld [vmem:[%s23244_s6 + $0x80] sm:$0xff] }
 0xcee   :  { %v14589_v51 = vpop.f32.mrf.mxu1 }
 0xcef   :  { %v14590_v11 = vadd.f32 %v14589_v51, %v14588_v37  ;;  %v13489_v0 = vmul.f32 -1.442695, %v4343_v6  ;;  %v13534_v37 = vld [vmem:[%s23244_s6 + $0xa8] sm:$0xff]  ;;  %v13533_v51 = vld [vmem:[%s23244_s6 + $0xa0] sm:$0xff] }
 0xcf0   :  { %v14591_v1 = vpop.f32.mrf.mxu1 }
 0xcf1   :  { %v4344_v29 = vadd.f32 %v14590_v11, %v13486_v45  ;;  %v13532_v11 = vld [vmem:[%s23244_s6 + $0x98] sm:$0xff] }
 0xcf2   :  { %v14592_v56 = vpop.f32.mrf.mxu1  ;;  %v4540_v45 = vld [vmem:[%s23244_s6 + $0x38] sm:$0xff] }
 0xcf3   :  { %v14593_v13 = vadd.f32 %v14592_v56, %v14591_v1  ;;  %v13490_v48 = vmul.f32 -1.442695, %v4344_v29  ;;  %v13530_v1 = vld [vmem:[%s23244_s6 + $0x88] sm:$0xff] }
 0xcf4   :  { %v14594_v21 = vpop.f32.mrf.mxu1 }
 0xcf5   :  { %v4345_v23 = vadd.f32 %v14593_v13, %v13487_v38 }
 0xcf6   :  { %v14595_v8 = vpop.f32.mrf.mxu1 }
 0xcf7   :  { %v13491_v27 = vmul.f32 -1.442695, %v4345_v23  ;;  %v14596_v61 = vadd.f32 %v14595_v8, %v14594_v21  ;;  %v4539_v21 = vld [vmem:[%s23244_s6 + $0x30] sm:$0xff]  ;;  %v4538_v8 = vld [vmem:[%s23244_s6 + $0x28] sm:$0xff] }
 0xcf9   :  { %16026 = vpow2.f32 %v13491_v27  ;;  %v4346_v33 = vadd.f32 %v14596_v61, %v13488_v17  ;;  %v4537_v17 = vld [vmem:[%s23244_s6 + $0x20] sm:$0xff]  ;;  %v4536_v27 = vld [vmem:[%s23244_s6 + $0x18] sm:$0xff]  ;;  %v4535_v61 = vld [vmem:[%s23244_s6 + $0x10] sm:$0xff] }
 0xcfa   :  { %16028 = vpow2.f32 %v13490_v48 }
 0xcfb   :  { %v13492_v26 = vmul.f32 -1.442695, %v4346_v33  ;;  %16030 = vpow2.f32 %v13489_v0  ;;  %v4534_v33 = vld [vmem:[%s23244_s6 + $0x8] sm:$0xff] }
 0xcfd   :  { %16032 = vpow2.f32 %v13492_v26  ;;  %v4533_v26 = vld [vmem:[%s23244_s6] sm:$0xff] }
 0xd06   :  { %v16027_v41 = vpop.eup %16026 }
 0xd07   :  { %v16029_v5 = vpop.eup %16028  ;;  %v4361_v34 = vadd.f32 1.0, %v16027_v41 }
 0xd08   :  { %v16031_v16 = vpop.eup %16030  ;;  %v4360_v39 = vadd.f32 1.0, %v16029_v5 }
 0xd09   :  { %16034 = vrcp.f32 %v4361_v34  ;;  %v4359_v50 = vadd.f32 1.0, %v16031_v16  ;;  %v23662_v16 = vld [vmem:[#allocation4_spill] sm:$0xff] }
 0xd0a   :  { %v16033_v60 = vpop.eup %16032 }
 0xd0b   :  { %v4362_v28 = vadd.f32 1.0, %v16033_v60 }
 0xd0d   :  { %16036 = vrcp.f32 %v4362_v28  ;;  %v23664_v28 = vld [vmem:[#allocation6_spill] sm:$0xff] }
 0xd0e   :  { %16038 = vrcp.f32 %v4360_v39  ;;  %v23663_v39 = vld [vmem:[#allocation5_spill] sm:$0xff] }
 0xd0f   :  { %16040 = vrcp.f32 %v4359_v50  ;;  %v23665_v50 = vld [vmem:[#allocation7_spill] sm:$0xff] }
 0xd16   :  { %v16035_v42 = vpop.eup %16034 }
 0xd17   :  { %v4406_v62 = vmul.f32 %v16035_v42, %v18195_v58  ;;  %v23666_v42 = vld [vmem:[#allocation8_spill] sm:$0xff] }
 0xd1a   :  { %v16037_v19 = vpop.eup %16036 }
 0xd1b   :  { %v4407_v44 = vmul.f32 %v16037_v19, %v18203_v2  ;;  %v16039_v31 = vpop.eup %16038  ;;  %v23667_v19 = vld [vmem:[#allocation9_spill] sm:$0xff] }
 0xd1c   :  { %v16041_v10 = vpop.eup %16040  ;;  %v4405_v30 = vmul.f32 %v16039_v31, %v18187_v53  ;;  %v23669_v31 = vld [vmem:[#allocation11_spill] sm:$0xff] }
 0xd1d   :  { %15651 = vmatprep.subr.mxu1 %v4407_v44  ;;  %v4404_v25 = vmul.f32 %v16041_v10, %v18179_v52  ;;  %v23671_v10 = vld [vmem:[#allocation13_spill] sm:$0xff] }
 0xd1e   :  { %15652 = vmatpush3.msra.mxu1 %v4407_v44  ;;  %v23668_v44 = vld [vmem:[#allocation10_spill] sm:$0xff] }
 0xd1f   :  { %15653 = vmatprep.subr.mxu1 %v4406_v62 }
 0xd20   :  { %15654 = vmatpush3.msra.mxu1 %v4406_v62  ;;  %v23670_v62 = vld [vmem:[#allocation12_spill] sm:$0xff] }
 0xd21   :  { %15655 = vmatprep.subr.mxu1 %v4405_v30 }
 0xd22   :  { %15656 = vmatpush3.msra.mxu1 %v4405_v30  ;;  %v23672_v30 = vld [vmem:[#allocation14_spill] sm:$0xff] }
 0xd23   :  { %15657 = vmatprep.subr.mxu1 %v4404_v25 }
 0xd24   :  { %15658 = vmatpush3.msra.mxu1 %v4404_v25  ;;  %v23673_v25 = vld [vmem:[#allocation15_spill] sm:$0xff] }
 0xd25   :  { %15660 = vmatmul.mubr.msk.f32.vlgmr.msra.gmra.mxu1 %vm56_vm0, %v18227_v20  ;;  %v23660_v20 = vld [vmem:[#allocation2_spill] sm:$0xff]  ;;  %4795 = vmatprep.subr.mxu1 %v13536_v14  ;;  %v23685_v14 = vld [vmem:[#allocation27_spill] sm:$0xff] }
 0xd26   :  { %15662 = vmatprep.mubr.msk.f32.mxu1 %vm56_vm0, %v18234_v54  ;;  %v23661_v54 = vld [vmem:[#allocation3_spill] sm:$0xff]  ;;  %4796 = vmatpush1.msra.mxu1 %v13535_v36  ;;  %v23686_v36 = vld [vmem:[#allocation28_spill] sm:$0xff] }
 0xd27   :  { %4797 = vmatprep.subr.mxu1 %v13534_v37  ;;  %v23687_v37 = vld [vmem:[#allocation29_spill] sm:$0xff] }
 0xd28   :  { %4798 = vmatpush1.msra.mxu1 %v13533_v51  ;;  %v23688_v51 = vld [vmem:[#allocation30_spill] sm:$0xff] }
 0xd29   :  { %15663 = vmatmul.mubr.msk.f32.gmra.mxu1 %vm56_vm0, %v18241_v47  ;;  %v13520_v47 = vld [vmem:[%s23244_s6 + $0x78] sm:$0xff]  ;;  %4799 = vmatprep.subr.mxu1 %v13532_v11  ;;  %v23689_v11 = vld [vmem:[#allocation31_spill] sm:$0xff] }
 0xd2a   :  { %15665 = vmatprep.mubr.msk.f32.mxu1 %vm56_vm0, %v18248_v46  ;;  %4585 = vmatprep.subr.mxu0 %v13520_v47  ;;  %v13519_v46 = vld [vmem:[%s23244_s6 + $0x70] sm:$0xff]  ;;  %v23677_v47 = vld [vmem:[#allocation19_spill] sm:$0xff] }
 0xd2b   :  { %4586 = vmatpush1.msra.mxu0 %v13519_v46  ;;  %4800 = vmatpush1.msra.mxu1 %v13531_v49  ;;  %v23678_v46 = vld [vmem:[#allocation20_spill] sm:$0xff] }
 0xd2c   :  { %4801 = vmatprep.subr.mxu1 %v13530_v1  ;;  %v23690_v49 = vld [vmem:[#allocation32_spill] sm:$0xff]  ;;  %v23692_v1 = vld [vmem:[#allocation34_spill] sm:$0xff] }
 0xd2d   :  { %15666 = vmatmul.mubr.msk.f32.gmra.mxu1 %vm56_vm0, %v18255_v3  ;;  %v13518_v3 = vld [vmem:[%s23244_s6 + $0x68] sm:$0xff] }
 0xd2e   :  { %15668 = vmatprep.mubr.msk.f32.mxu1 %vm56_vm0, %v18262_v57  ;;  %4587 = vmatprep.subr.mxu0 %v13518_v3  ;;  %v13517_v57 = vld [vmem:[%s23244_s6 + $0x60] sm:$0xff]  ;;  %v23679_v3 = vld [vmem:[#allocation21_spill] sm:$0xff] }
 0xd2f   :  { %4588 = vmatpush1.msra.mxu0 %v13517_v57  ;;  %4802 = vmatpush1.msra.mxu1 %v13529_v55  ;;  %v23680_v57 = vld [vmem:[#allocation22_spill] sm:$0xff]  ;;  %v23693_v55 = vld [vmem:[#allocation35_spill] sm:$0xff] }
 0xd31   :  { %15669 = vmatmul.mubr.msk.f32.gmra.mxu1 %vm56_vm0, %v18269_v35  ;;  %v13516_v35 = vld [vmem:[%s23244_s6 + $0x58] sm:$0xff] }
 0xd32   :  { %15671 = vmatprep.mubr.msk.f32.mxu1 %vm56_vm0, %v18276_v22  ;;  %4589 = vmatprep.subr.mxu0 %v13516_v35  ;;  %v13515_v22 = vld [vmem:[%s23244_s6 + $0x50] sm:$0xff]  ;;  %v23681_v35 = vld [vmem:[#allocation23_spill] sm:$0xff] }
 0xd33   :  { %4590 = vmatpush1.msra.mxu0 %v13515_v22  ;;  %v23682_v22 = vld [vmem:[#allocation24_spill] sm:$0xff] }
 0xd35   :  { %15672 = vmatmul.mubr.msk.f32.gmra.mxu1 %vm56_vm0, %v18283_v4  ;;  %v13514_v4 = vld [vmem:[%s23244_s6 + $0x48] sm:$0xff] }
 0xd36   :  { %15674 = vmatprep.mubr.msk.f32.mxu1 %vm56_vm0, %v23660_v20  ;;  %4591 = vmatprep.subr.mxu0 %v13514_v4  ;;  %v23675_v20 = vld [vmem:[#allocation17_spill] sm:$0xff] }
 0xd37   :  { %4592 = vmatpush1.msra.mxu0 %v13513_v59  ;;  %v23683_v4 = vld [vmem:[#allocation25_spill] sm:$0xff]  ;;  %v23684_v59 = vld [vmem:[#allocation26_spill] sm:$0xff] }
 0xd38   :  { %4686 = vmatprep.subr.mxu0 %v4540_v45  ;;  %v23691_v45 = vld [vmem:[#allocation33_spill] sm:$0xff] }
 0xd39   :  { %15675 = vmatmul.mubr.msk.f32.gmra.mxu1 %vm56_vm0, %v23661_v54  ;;  %v23676_v54 = vld [vmem:[#allocation18_spill] sm:$0xff] }
 0xd3a   :  { %4835 = vmatprep.mubr.f32.mxu1 %v23534_v40 }
 0xde5   :  { %v15661_v56 = vpop.f32.mrf.mxu1 }
 0xde7   :  { %v4474_v38 = vpop.f32.mrf.mxu1 }
 0xde9   :  { %v15664_v29 = vpop.f32.mrf.mxu1 }
 0xdeb   :  { %v4484_v13 = vpop.f32.mrf.mxu1 }
 0xded   :  { %v15667_v6 = vpop.f32.mrf.mxu1 }
 0xdef   :  { %v4494_v23 = vpop.f32.mrf.mxu1 }
 0xdf0   :  { %13521 = vmatmul.mubr.msk.f32.vlgmr.msra.gmra.mxu0 %vm56_vm0, %v4494_v23 }
 0xdf1   :  { %v15670_v48 = vpop.f32.mrf.mxu1  ;;  %4631 = vmatprep.mubr.f32.mxu0 %v23534_v40  ;;  %4687 = vmatpush1.msra.mxu0 %v4539_v21 }
 0xdf2   :  { %4688 = vmatprep.subr.mxu0 %v4538_v8 }
 0xdf3   :  { %v4504_v0 = vpop.f32.mrf.mxu1  ;;  %4689 = vmatpush1.msra.mxu0 %v4537_v17 }
 0xdf4   :  { %13522 = vmatmul.mubr.msk.f32.gmra.mxu0 %vm56_vm0, %v15667_v6  ;;  %4690 = vmatprep.subr.mxu0 %v4536_v27 }
 0xdf5   :  { %v15673_v41 = vpop.f32.mrf.mxu1  ;;  %4637 = vmatprep.mubr.f32.mxu0 %v23534_v40  ;;  %4691 = vmatpush1.msra.mxu0 %v4535_v61 }
 0xdf6   :  { %4692 = vmatprep.subr.mxu0 %v4534_v33 }
 0xdf7   :  { %v4514_v5 = vpop.f32.mrf.mxu1  ;;  %4693 = vmatpush1.msra.mxu0 %v4533_v26 }
 0xdf8   :  { %13523 = vmatmul.mubr.msk.f32.gmra.mxu0 %vm56_vm0, %v4504_v0  ;;  %13537 = vmatmul.mubr.msk.f32.vlgmr.msra.gmra.mxu1 %vm56_vm0, %v4514_v5 }
 0xdf9   :  { %4643 = vmatprep.mubr.f32.mxu0 %v23534_v40  ;;  %4841 = vmatprep.mubr.f32.mxu1 %v23534_v40  ;;  %v15676_v34 = vpop.f32.mrf.mxu1 }
 0xdfa   :  { %14657 = vmatprep.subr.mxu0 %v23662_v16 }
 0xdfb   :  { %v4524_v60 = vpop.f32.mrf.mxu1 }
 0xdfc   :  { %13524 = vmatmul.mubr.msk.f32.gmra.mxu0 %vm56_vm0, %v15670_v48  ;;  %13538 = vmatmul.mubr.msk.f32.gmra.mxu1 %vm56_vm0, %v15673_v41 }
 0xdfd   :  { %4726 = vmatprep.mubr.f32.mxu0 %v23534_v40  ;;  %4847 = vmatprep.mubr.f32.mxu1 %v23534_v40 }
 0xe00   :  { %13525 = vmatmul.mubr.msk.f32.vlgmr.msra.gmra.mxu0 %vm56_vm0, %v4474_v38  ;;  %13539 = vmatmul.mubr.msk.f32.gmra.mxu1 %vm56_vm0, %v4524_v60 }
 0xe01   :  { %4732 = vmatprep.mubr.f32.mxu0 %v23534_v40  ;;  %4853 = vmatprep.mubr.f32.mxu1 %v23534_v40 }
 0xe02   :  { %14658 = vmatpush3.msra.mxu0 %v23663_v39 }
 0xe03   :  { %14659 = vmatprep.subr.mxu0 %v23664_v28 }
 0xe04   :  { %13526 = vmatmul.mubr.msk.f32.gmra.mxu0 %vm56_vm0, %v15661_v56  ;;  %13540 = vmatmul.mubr.msk.f32.gmra.mxu1 %vm56_vm0, %v15676_v34  ;;  %v18965_v56 = vpop.f32.mrf.mxu0 }
 0xe05   :  { %4738 = vmatprep.mubr.f32.mxu0 %v23534_v40  ;;  %14660 = vmatpush3.msra.mxu0 %v23665_v50 }
 0xe06   :  { %14661 = vmatprep.subr.mxu0 %v23666_v42  ;;  %15685 = vmatprep.mubr.msk.f32.mxu1 %vm56_vm0, %v18793_v9  ;;  %v23674_v9 = vld [vmem:[#allocation16_spill] sm:$0xff]  ;;  %v18967_v38 = vpop.f32.mrf.mxu0 }
 0xe07   :  { %14662 = vmatpush3.msra.mxu0 %v23667_v19 }
 0xe08   :  { %13527 = vmatmul.mubr.msk.f32.gmra.mxu0 %vm56_vm0, %v4484_v13  ;;  %14663 = vmatprep.subr.mxu0 %v23668_v44 }
 0xe09   :  { %4744 = vmatprep.mubr.f32.mxu0 %v23534_v40  ;;  %14664 = vmatpush3.msra.mxu0 %v23669_v31 }
 0xe0a   :  { %14665 = vmatprep.subr.mxu0 %v23670_v62 }
 0xe0b   :  { %14666 = vmatpush3.msra.mxu0 %v23671_v10 }
 0xe0c   :  { %13528 = vmatmul.mubr.msk.f32.gmra.mxu0 %vm56_vm0, %v15664_v29  ;;  %14667 = vmatprep.subr.mxu0 %v23672_v30  ;;  %v18969_v29 = vpop.f32.mrf.mxu0 }
 0xe0d   :  { %14668 = vmatpush3.msra.mxu0 %v23673_v25 }
 0xe0e   :  { %14669 = vmatprep.subr.mxu0 %v23674_v9  ;;  %v18971_v13 = vpop.f32.mrf.mxu0 }
 0xe0f   :  { %14670 = vmatpush3.msra.mxu0 %v23675_v20 }
 0xe10   :  { %14671 = vmatprep.subr.mxu0 %v23676_v54  ;;  %v18973_v6 = vpop.f32.mrf.mxu0 }
 0xe11   :  { %14672 = vmatpush3.msra.mxu0 %v23677_v47 }
 0xe12   :  { %14673 = vmatprep.subr.mxu0 %v23678_v46  ;;  %v18975_v21 = vpop.f32.mrf.mxu0 }
 0xe13   :  { %14674 = vmatpush3.msra.mxu0 %v23679_v3 }
 0xe14   :  { %14675 = vmatprep.subr.mxu0 %v23680_v57  ;;  %v18977_v23 = vpop.f32.mrf.mxu0 }
 0xe15   :  { %14676 = vmatpush3.msra.mxu0 %v23681_v35 }
 0xe16   :  { %14677 = vmatprep.subr.mxu0 %v23682_v22  ;;  %v18979_v8 = vpop.f32.mrf.mxu0 }
 0xe17   :  { %14678 = vmatpush3.msra.mxu0 %v23683_v4 }
 0xe18   :  { %14679 = vmatprep.subr.mxu0 %v23684_v59 }
 0xe19   :  { %14680 = vmatpush3.msra.mxu0 %v23685_v14 }
 0xe1a   :  { %14681 = vmatprep.subr.mxu0 %v23686_v36 }
 0xe1b   :  { %14682 = vmatpush3.msra.mxu0 %v23687_v37 }
 0xe1c   :  { %14683 = vmatprep.subr.mxu0 %v23688_v51 }
 0xe1d   :  { %14684 = vmatpush3.msra.mxu0 %v23689_v11 }
 0xe1e   :  { %14685 = vmatprep.subr.mxu0 %v23690_v49 }
 0xe1f   :  { %14686 = vmatpush3.msra.mxu0 %v23691_v45 }
 0xe20   :  { %14687 = vmatprep.subr.mxu0 %v23692_v1 }
 0xe21   :  { %14688 = vmatpush3.msra.mxu0 %v23693_v55 }
 0xeb0   :  { %v4627_v17 = vpop.f32.mrf.mxu0 }
 0xeb2   :  { %v4629_v48 = vpop.f32.mrf.mxu0 }
 0xeb4   :  { %v4633_v27 = vpop.f32.mrf.mxu0 }
 0xeb6   :  { %v4635_v61 = vpop.f32.mrf.mxu0 }
 0xeb8   :  { %v4639_v0 = vpop.f32.mrf.mxu0  ;;  %v4837_v33 = vpop.f32.mrf.mxu1 }
 0xeba   :  { %v4641_v26 = vpop.f32.mrf.mxu0  ;;  %v4839_v41 = vpop.f32.mrf.mxu1 }
 0xebc   :  { %v4645_v5 = vpop.f32.mrf.mxu0  ;;  %v4843_v34 = vpop.f32.mrf.mxu1 }
 0xebe   :  { %v4647_v16 = vpop.f32.mrf.mxu0  ;;  %v4845_v39 = vpop.f32.mrf.mxu1 }
 0xec0   :  { %v4728_v60 = vpop.f32.mrf.mxu0  ;;  %v4849_v44 = vpop.f32.mrf.mxu1 }
 0xec1   :  { %v4729_v28 = vadd.f32 %v4728_v60, %v4627_v17 }
 0xec2   :  { %v4730_v50 = vpop.f32.mrf.mxu0  ;;  %v4851_v47 = vpop.f32.mrf.mxu1 }
 0xec3   :  { %v4731_v42 = vadd.f32 %v4730_v50, %v4629_v48  ;;  %v4860_v19 = vadd.f32 %v4837_v33, %v4729_v28  ;;  %v14631_v48 = vadd.f32 %v18967_v38, %v18965_v56  ;;  %v13495_v56 = vld [vmem:[%s23245_s1 + $0x50] sm:$0xff] }
 0xec4   :  { %v4734_v31 = vpop.f32.mrf.mxu0  ;;  %v4855_v14 = vpop.f32.mrf.mxu1 }
 0xec5   :  { %v4861_v62 = vadd.f32 %v4839_v41, %v4731_v42  ;;  %v4735_v10 = vadd.f32 %v4734_v31, %v4633_v27  ;;  %v4868_v20 = vmul.f32 %v18740_v7, %v4860_v19  ;;  %v13542_v31 = vld [vmem:[%s23246_s2 + $0x48] sm:$0xff] }
 0xec6   :  { %v4736_v30 = vpop.f32.mrf.mxu0  ;;  %v4857_v1 = vpop.f32.mrf.mxu1 }
 0xec7   :  { %v4737_v25 = vadd.f32 %v4736_v30, %v4635_v61  ;;  %v4869_v9 = vmul.f32 %v18733_v15, %v4861_v62  ;;  %v4862_v54 = vadd.f32 %v4843_v34, %v4735_v10  ;;  %v14637_v61 = vadd.f32 %v18975_v21, %v18973_v6 }
 0xec8   :  { %v4740_v46 = vpop.f32.mrf.mxu0 }
 0xec9   :  { %v4863_v3 = vadd.f32 %v4845_v39, %v4737_v25  ;;  %v4741_v57 = vadd.f32 %v4740_v46, %v4639_v0  ;;  %4940 = vmatprep.mubr.f32.mxu0 %v4869_v9  ;;  %v4870_v59 = vmul.f32 %v18754_v32, %v4862_v54  ;;  %v4378_v33 = vadd.f32 %v14637_v61, %v13495_v56  ;;  %v13543_v54 = vld [vmem:[%s23246_s2 + $0x50] sm:$0xff]  ;;  %v13573_v61 = vld [vmem:[%s23240_s5 + $0xe0] sm:$0xff] }
 0xeca   :  { %v4742_v35 = vpop.f32.mrf.mxu0  ;;  %4941 = vmatmul.mubr.f32.vlgmr.msra.gmra.mxu0 %v4868_v20  ;;  %v19078_v56 = vld [vmem:[%s23239_s4 + $0x10] sm:$0xff] }
 0xecb   :  { %v4743_v22 = vadd.f32 %v4742_v35, %v4641_v26  ;;  %v4871_v4 = vmul.f32 %v18747_v18, %v4863_v3  ;;  %v4864_v36 = vadd.f32 %v4849_v44, %v4741_v57  ;;  %v14640_v26 = vadd.f32 %v18979_v8, %v18977_v23  ;;  %v13541_v23 = vld [vmem:[%s23246_s2 + $0x40] sm:$0xff]  ;;  %v13544_v35 = vld [vmem:[%s23246_s2 + $0x58] sm:$0xff] }
 0xecc   :  { %v4746_v37 = vpop.f32.mrf.mxu0 }
 0xecd   :  { %v4865_v51 = vadd.f32 %v4851_v47, %v4743_v22  ;;  %v4747_v15 = vadd.f32 %v4746_v37, %v4645_v5  ;;  %4945 = vmatprep.mubr.f32.mxu0 %v4871_v4  ;;  %v4872_v45 = vmul.f32 %v18772_v43, %v4864_v36  ;;  %v14634_v43 = vadd.f32 %v18971_v13, %v18969_v29  ;;  %v13496_v29 = vld [vmem:[%s23245_s1 + $0x58] sm:$0xff] }
 0xece   :  { %v4748_v7 = vpop.f32.mrf.mxu0  ;;  %4946 = vmatmul.mubr.f32.gmra.mxu0 %v4870_v59  ;;  %v13499_v13 = vmul.f32 -1.442695, %v4378_v33  ;;  %v4379_v41 = vadd.f32 %v14640_v26, %v13496_v29  ;;  %v19092_v33 = vld [vmem:[%s23239_s4 + $0x20] sm:$0xff]  ;;  %v19099_v26 = vld [vmem:[%s23239_s4 + $0x28] sm:$0xff]  ;;  %v19106_v29 = vld [vmem:[%s23239_s4 + $0x30] sm:$0xff] }
 0xecf   :  { %v4749_v11 = vadd.f32 %v4748_v7, %v4647_v16  ;;  %v4873_v49 = vmul.f32 %v18765_v24, %v4865_v51  ;;  %v4866_v55 = vadd.f32 %v4855_v14, %v4747_v15  ;;  %v13493_v24 = vld [vmem:[%s23245_s1 + $0x40] sm:$0xff] }
 0xed0   :  { %v4376_v27 = vadd.f32 %v14631_v48, %v13493_v24  ;;  %v13500_v6 = vmul.f32 -1.442695, %v4379_v41  ;;  %v19120_v41 = vld [vmem:[%s23239_s4 + $0x40] sm:$0xff] }
 0xed1   :  { %v4867_v17 = vadd.f32 %v4857_v1, %v4749_v11  ;;  %4950 = vmatprep.mubr.f32.mxu0 %v4873_v49  ;;  %v4874_v32 = vmul.f32 %v18786_v63, %v4866_v55 }
 0xed2   :  { %4951 = vmatmul.mubr.f32.gmra.mxu0 %v4872_v45  ;;  %v13497_v0 = vmul.f32 -1.442695, %v4376_v27 }
 0xed3   :  { %v4875_v18 = vmul.f32 %v18779_v12, %v4867_v17  ;;  %v13494_v12 = vld [vmem:[%s23245_s1 + $0x48] sm:$0xff] }
 0xed4   :  { %v4377_v63 = vadd.f32 %v14634_v43, %v13494_v12  ;;  %16042 = vpow2.f32 %v13497_v0  ;;  %v19071_v0 = vld [vmem:[%s23239_s4 + $0x8] sm:$0xff] }
 0xed5   :  { %4955 = vmatprep.mubr.f32.mxu0 %v4875_v18 }
 0xed6   :  { %4956 = vmatmul.mubr.f32.gmra.mxu0 %v4874_v32  ;;  %v13498_v38 = vmul.f32 -1.442695, %v4377_v63 }
 0xed7   :  { %5317 = vmatprep.mubr.f32.mxu0 %v23534_v40 }
 0xed8   :  { %16044 = vpow2.f32 %v13498_v38  ;;  %v19085_v38 = vld [vmem:[%s23239_s4 + $0x18] sm:$0xff] }
 0xed9   :  { %16046 = vpow2.f32 %v13499_v13  ;;  %v19113_v13 = vld [vmem:[%s23239_s4 + $0x38] sm:$0xff] }
 0xeda   :  { %16048 = vpow2.f32 %v13500_v6  ;;  %v19127_v6 = vld [vmem:[%s23239_s4 + $0x48] sm:$0xff] }
 0xee1   :  { %v16043_v21 = vpop.eup %16042 }
 0xee2   :  { %v4392_v34 = vadd.f32 1.0, %v16043_v21  ;;  %v19134_v21 = vld [vmem:[%s23239_s4 + $0x50] sm:$0xff] }
 0xee3   :  { %23694 = vst [vmem:[#allocation2_spill] sm:$0xff] %v19134_v21 }
 0xee4   :  { %16050 = vrcp.f32 %v4392_v34  ;;  %v13570_v34 = vld [vmem:[%s23240_s5 + $0xc8] sm:$0xff] }
 0xee5   :  { %v16045_v5 = vpop.eup %16044 }
 0xee6   :  { %v4393_v60 = vadd.f32 1.0, %v16045_v5  ;;  %v16047_v8 = vpop.eup %16046  ;;  %v19141_v5 = vld [vmem:[%s23239_s4 + $0x58] sm:$0xff] }
 0xee7   :  { %v4394_v19 = vadd.f32 1.0, %v16047_v8  ;;  %v16049_v62 = vpop.eup %16048  ;;  %23695 = vst [vmem:[#allocation3_spill] sm:$0xff] %v19141_v5  ;;  %v13571_v8 = vld [vmem:[%s23240_s5 + $0xd0] sm:$0xff] }
 0xee8   :  { %16052 = vrcp.f32 %v4393_v60  ;;  %v4395_v9 = vadd.f32 1.0, %v16049_v62  ;;  %v13576_v60 = vld [vmem:[%s23240_s5 + $0xf8] sm:$0xff]  ;;  %v13561_v62 = vld [vmem:[%s23240_s5 + $0x80] sm:$0xff] }
 0xee9   :  { %5277 = vmatprep.subr.mxu0 %v13576_v60  ;;  %v13594_v60 = vld [vmem:[%s23240_s5 + $0x108] sm:$0xff] }
 0xef1   :  { %v16051_v4 = vpop.eup %16050 }
 0xef2   :  { %v4978_v36 = vsub.f32 1.0, %v16051_v4  ;;  %v4974_v51 = vmul.f32 %v16051_v4, %v18179_v52  ;;  %v5131_v4 = vld [vmem:[%s23240_s5 + $0x58] sm:$0xff] }
 0xef5   :  { %v16053_v14 = vpop.eup %16052 }
 0xef6   :  { %v4979_v11 = vsub.f32 1.0, %v16053_v14  ;;  %v4975_v1 = vmul.f32 %v16053_v14, %v18187_v53  ;;  %v5128_v14 = vld [vmem:[%s23240_s5 + $0x40] sm:$0xff] }
 0xf8a   :  { %v14689_v16 = vpop.f32.mrf.mxu0 }
 0xf8c   :  { %v14690_v39 = vpop.f32.mrf.mxu0 }
 0xf8d   :  { %v14691_v28 = vadd.f32 %v14690_v39, %v14689_v16  ;;  %v13569_v16 = vld [vmem:[%s23240_s5 + $0xc0] sm:$0xff]  ;;  %v13575_v39 = vld [vmem:[%s23240_s5 + $0xf0] sm:$0xff] }
 0xf8e   :  { %v14692_v50 = vpop.f32.mrf.mxu0  ;;  %5278 = vmatpush1.msra.mxu0 %v13575_v39  ;;  %v13596_v39 = vld [vmem:[%s23240_s5 + $0x118] sm:$0xff] }
 0xf8f   :  { %v4966_v42 = vadd.f32 %v14691_v28, %v13541_v23  ;;  %v13572_v23 = vld [vmem:[%s23240_s5 + $0xd8] sm:$0xff]  ;;  %v13566_v28 = vld [vmem:[%s23240_s5 + $0xa8] sm:$0xff] }
 0xf90   :  { %v14693_v44 = vpop.f32.mrf.mxu0  ;;  %5279 = vmatprep.subr.mxu0 %v13572_v23  ;;  %v13593_v23 = vld [vmem:[%s23240_s5 + $0x100] sm:$0xff] }
 0xf91   :  { %16054 = vtanh.f32 %v4966_v42  ;;  %v14694_v10 = vadd.f32 %v14693_v44, %v14692_v50  ;;  %v13568_v50 = vld [vmem:[%s23240_s5 + $0xb8] sm:$0xff]  ;;  %5280 = vmatpush1.msra.mxu0 %v13571_v8  ;;  %v13565_v42 = vld [vmem:[%s23240_s5 + $0xa0] sm:$0xff]  ;;  %v13562_v44 = vld [vmem:[%s23240_s5 + $0x88] sm:$0xff] }
 0xf92   :  { %v14695_v30 = vpop.f32.mrf.mxu0  ;;  %16056 = vrcp.f32 %v4394_v19  ;;  %5281 = vmatprep.subr.mxu0 %v13568_v50  ;;  %v13567_v19 = vld [vmem:[%s23240_s5 + $0xb0] sm:$0xff] }
 0xf93   :  { %v4967_v25 = vadd.f32 %v14694_v10, %v13542_v31  ;;  %5282 = vmatpush1.msra.mxu0 %v13567_v19  ;;  %v13564_v31 = vld [vmem:[%s23240_s5 + $0x98] sm:$0xff]  ;;  %v13563_v10 = vld [vmem:[%s23240_s5 + $0x90] sm:$0xff] }
 0xf94   :  { %v14696_v20 = vpop.f32.mrf.mxu0  ;;  %5283 = vmatprep.subr.mxu0 %v13564_v31  ;;  %v19350_v31 = vld [vmem:[%s23241_s8 + $0x78] sm:$0xff] }
 0xf95   :  { %16058 = vtanh.f32 %v4967_v25  ;;  %v14697_v47 = vadd.f32 %v14696_v20, %v14695_v30  ;;  %5284 = vmatpush1.msra.mxu0 %v13563_v10  ;;  %v5133_v30 = vld [vmem:[%s23240_s5 + $0x68] sm:$0xff]  ;;  %v5135_v25 = vld [vmem:[%s23240_s5 + $0x78] sm:$0xff]  ;;  %23697 = vst [vmem:[#allocation5_spill] sm:$0xff] %v19350_v31  ;;  %v19364_v10 = vld [vmem:[%s23241_s8 + $0x70] sm:$0xff] }
 0xf96   :  { %v14698_v46 = vpop.f32.mrf.mxu0  ;;  %16060 = vrcp.f32 %v4395_v9  ;;  %5467 = vmatprep.subr.mxu0 %v5135_v25  ;;  %23699 = vst [vmem:[#allocation7_spill] sm:$0xff] %v19364_v10  ;;  %v19378_v25 = vld [vmem:[%s23241_s8 + $0x68] sm:$0xff] }
 0xf97   :  { %v4968_v3 = vadd.f32 %v14697_v47, %v13543_v54  ;;  %23701 = vst [vmem:[#allocation9_spill] sm:$0xff] %v19378_v25 }
 0xf98   :  { %v14699_v57 = vpop.f32.mrf.mxu0 }
 0xf99   :  { %16062 = vtanh.f32 %v4968_v3  ;;  %v14700_v22 = vadd.f32 %v14699_v57, %v14698_v46  ;;  %v5132_v57 = vld [vmem:[%s23240_s5 + $0x60] sm:$0xff] }
 0xf9b   :  { %v4969_v59 = vadd.f32 %v14700_v22, %v13544_v35  ;;  %v5134_v35 = vld [vmem:[%s23240_s5 + $0x70] sm:$0xff]  ;;  %v5129_v22 = vld [vmem:[%s23240_s5 + $0x48] sm:$0xff] }
 0xf9d   :  { %16064 = vtanh.f32 %v4969_v59 }
 0xf9e   :  { %v16055_v37 = vpop.eup %16054 }
 0xf9f   :  { %v4982_v15 = vmul.f32 %v16055_v37, %v4978_v36  ;;  %v16057_v7 = vpop.eup %16056  ;;  %v5130_v36 = vld [vmem:[%s23240_s5 + $0x50] sm:$0xff]  ;;  %v5125_v37 = vld [vmem:[%s23240_s5 + $0x28] sm:$0xff] }
 0xfa0   :  { %v4980_v18 = vsub.f32 1.0, %v16057_v7  ;;  %v4976_v48 = vmul.f32 %v16057_v7, %v18195_v58  ;;  %v5124_v7 = vld [vmem:[%s23240_s5 + $0x20] sm:$0xff] }
 0xfa1   :  { %v19023_v49 = vadd.f32 %v4982_v15, %v4974_v51  ;;  %v5127_v51 = vld [vmem:[%s23240_s5 + $0x38] sm:$0xff] }
 0xfa2   :  { %v16059_v45 = vpop.eup %16058 }
 0xfa3   :  { %v4983_v55 = vmul.f32 %v16059_v45, %v4979_v11  ;;  %13545 = vst.msk [vmem:[%s23247_s9 + $0x40] sm:$0xff] %vm56_vm0, %v19023_v49  ;;  %v16061_v17 = vpop.eup %16060  ;;  %v5126_v11 = vld [vmem:[%s23240_s5 + $0x30] sm:$0xff]  ;;  %v5121_v45 = vld [vmem:[%s23240_s5 + $0x8] sm:$0xff] }
 0xfa4   :  { %v4981_v53 = vsub.f32 1.0, %v16061_v17  ;;  %v4977_v12 = vmul.f32 %v16061_v17, %v18203_v2  ;;  %v13574_v2 = vld [vmem:[%s23240_s5 + $0xe8] sm:$0xff]  ;;  %v5122_v17 = vld [vmem:[%s23240_s5 + $0x10] sm:$0xff] }
 0xfa5   :  { %v19031_v32 = vadd.f32 %v4983_v55, %v4975_v1  ;;  %v5123_v1 = vld [vmem:[%s23240_s5 + $0x18] sm:$0xff]  ;;  %v5120_v55 = vld [vmem:[%s23240_s5] sm:$0xff] }
 0xfa6   :  { %v16063_v52 = vpop.eup %16062 }
 0xfa7   :  { %v4984_v24 = vmul.f32 %v16063_v52, %v4980_v18  ;;  %13546 = vst.msk [vmem:[%s23247_s9 + $0x48] sm:$0xff] %vm56_vm0, %v19031_v32  ;;  %v13606_v18 = vld [vmem:[%s23240_s5 + $0x168] sm:$0xff]  ;;  %v13608_v52 = vld [vmem:[%s23240_s5 + $0x178] sm:$0xff] }
 0xfa9   :  { %v19039_v43 = vadd.f32 %v4984_v24, %v4976_v48  ;;  %v13605_v48 = vld [vmem:[%s23240_s5 + $0x160] sm:$0xff]  ;;  %v13607_v24 = vld [vmem:[%s23240_s5 + $0x170] sm:$0xff] }
 0xfaa   :  { %v16065_v27 = vpop.eup %16064 }
 0xfab   :  { %v4985_v63 = vmul.f32 %v16065_v27, %v4981_v53  ;;  %13547 = vst.msk [vmem:[%s23247_s9 + $0x50] sm:$0xff] %vm56_vm0, %v19039_v43  ;;  %v13602_v53 = vld [vmem:[%s23240_s5 + $0x148] sm:$0xff]  ;;  %v13604_v27 = vld [vmem:[%s23240_s5 + $0x158] sm:$0xff] }
 0xfad   :  { %v19047_v58 = vadd.f32 %v4985_v63, %v4977_v12  ;;  %v13601_v12 = vld [vmem:[%s23240_s5 + $0x140] sm:$0xff]  ;;  %v13603_v63 = vld [vmem:[%s23240_s5 + $0x150] sm:$0xff] }
 0xfaf   :  { %13548 = vst.msk [vmem:[%s23247_s9 + $0x58] sm:$0xff] %vm56_vm0, %v19047_v58  ;;  %15677 = vmatprep.subr.mxu1 %v19047_v58 }
 0xfb0   :  { %15678 = vmatpush3.msra.mxu1 %v19047_v58 }
 0xfb1   :  { %15679 = vmatprep.subr.mxu1 %v19039_v43 }
 0xfb2   :  { %15680 = vmatpush3.msra.mxu1 %v19039_v43 }
 0xfb3   :  { %15681 = vmatprep.subr.mxu1 %v19031_v32 }
 0xfb4   :  { %15682 = vmatpush3.msra.mxu1 %v19031_v32 }
 0xfb5   :  { %15683 = vmatprep.subr.mxu1 %v19023_v49 }
 0xfb6   :  { %15684 = vmatpush3.msra.mxu1 %v19023_v49 }
 0xfb7   :  { %15686 = vmatmul.mubr.msk.f32.vlgmr.msra.gmra.mxu1 %vm56_vm0, %v19071_v0  ;;  %5188 = vmatprep.subr.mxu1 %v13574_v2  ;;  %v13598_v2 = vld [vmem:[%s23240_s5 + $0x128] sm:$0xff] }
 0xfb8   :  { %15688 = vmatprep.mubr.msk.f32.mxu1 %vm56_vm0, %v19078_v56  ;;  %5189 = vmatpush1.msra.mxu1 %v13573_v61  ;;  %v13600_v61 = vld [vmem:[%s23240_s5 + $0x138] sm:$0xff] }
 0xfb9   :  { %5190 = vmatprep.subr.mxu1 %v13570_v34  ;;  %v13597_v34 = vld [vmem:[%s23240_s5 + $0x120] sm:$0xff] }
 0xfba   :  { %5191 = vmatpush1.msra.mxu1 %v13569_v16  ;;  %v13599_v16 = vld [vmem:[%s23240_s5 + $0x130] sm:$0xff] }
 0xfbb   :  { %15689 = vmatmul.mubr.msk.f32.gmra.mxu1 %vm56_vm0, %v19085_v38  ;;  %5192 = vmatprep.subr.mxu1 %v13566_v28  ;;  %v13595_v28 = vld [vmem:[%s23240_s5 + $0x110] sm:$0xff] }
 0xfbc   :  { %15691 = vmatprep.mubr.msk.f32.mxu1 %vm56_vm0, %v19092_v33  ;;  %5193 = vmatpush1.msra.mxu1 %v13565_v42 }
 0xfbd   :  { %5194 = vmatprep.subr.mxu1 %v13562_v44  ;;  %v19345_v44 = vld [vmem:[%s23241_s8 + $0xf8] sm:$0xff] }
 0xfbe   :  { %5195 = vmatpush1.msra.mxu1 %v13561_v62  ;;  %23696 = vst [vmem:[#allocation4_spill] sm:$0xff] %v19345_v44  ;;  %v19359_v62 = vld [vmem:[%s23241_s8 + $0xf0] sm:$0xff] }
 0xfbf   :  { %15692 = vmatmul.mubr.msk.f32.gmra.mxu1 %vm56_vm0, %v19099_v26  ;;  %5378 = vmatprep.subr.mxu1 %v5133_v30  ;;  %23698 = vst [vmem:[#allocation6_spill] sm:$0xff] %v19359_v62  ;;  %v19373_v30 = vld [vmem:[%s23241_s8 + $0xe8] sm:$0xff] }
 0xfc0   :  { %15694 = vmatprep.mubr.msk.f32.mxu1 %vm56_vm0, %v19106_v29  ;;  %23700 = vst [vmem:[#allocation8_spill] sm:$0xff] %v19373_v30 }
 0xfc3   :  { %15695 = vmatmul.mubr.msk.f32.gmra.mxu1 %vm56_vm0, %v19113_v13 }
 0xfc4   :  { %15697 = vmatprep.mubr.msk.f32.mxu1 %vm56_vm0, %v19120_v41 }
 0xfc7   :  { %15698 = vmatmul.mubr.msk.f32.gmra.mxu1 %vm56_vm0, %v19127_v6 }
 0xfc8   :  { %15700 = vmatprep.mubr.msk.f32.mxu1 %vm56_vm0, %v19134_v21 }
 0xfcb   :  { %15701 = vmatmul.mubr.msk.f32.gmra.mxu1 %vm56_vm0, %v19141_v5 }
 0xfcc   :  { %5228 = vmatprep.mubr.f32.mxu1 %v23534_v40 }
0x1077   :  { %v19194_v9 = vpop.f32.mrf.mxu1 }
0x1079   :  { %v5061_v20 = vpop.f32.mrf.mxu1 }
0x107b   :  { %v19196_v54 = vpop.f32.mrf.mxu1 }
0x107d   :  { %v19198_v47 = vpop.f32.mrf.mxu1 }
0x107f   :  { %v15693_v46 = vpop.f32.mrf.mxu1 }
0x1081   :  { %v5081_v3 = vpop.f32.mrf.mxu1 }
0x1082   :  { %13577 = vmatmul.mubr.msk.f32.vlgmr.msra.gmra.mxu1 %vm56_vm0, %v5081_v3  ;;  %13581 = vmatmul.mubr.msk.f32.vlgmr.msra.gmra.mxu0 %vm56_vm0, %v5081_v3  ;;  %v19422_v3 = vld [vmem:[%s23241_s8 + $0x50] sm:$0xff] }
0x1083   :  { %5234 = vmatprep.mubr.f32.mxu1 %v23534_v40  ;;  %5323 = vmatprep.mubr.f32.mxu0 %v23534_v40  ;;  %v15696_v59 = vpop.f32.mrf.mxu1  ;;  %23707 = vst [vmem:[#allocation15_spill] sm:$0xff] %v19422_v3 }
0x1084   :  { %5379 = vmatpush1.msra.mxu1 %v5132_v57  ;;  %5468 = vmatpush1.msra.mxu0 %v5134_v35  ;;  %v19429_v57 = vld [vmem:[%s23241_s8 + $0xc8] sm:$0xff] }
0x1085   :  { %5380 = vmatprep.subr.mxu1 %v5129_v22  ;;  %5469 = vmatprep.subr.mxu0 %v5131_v4  ;;  %v5091_v15 = vpop.f32.mrf.mxu1  ;;  %23708 = vst [vmem:[#allocation16_spill] sm:$0xff] %v19429_v57  ;;  %v19436_v35 = vld [vmem:[%s23241_s8 + $0x48] sm:$0xff]  ;;  %v19443_v22 = vld [vmem:[%s23241_s8 + $0xc0] sm:$0xff] }
0x1086   :  { %13578 = vmatmul.mubr.msk.f32.gmra.mxu1 %vm56_vm0, %v15693_v46  ;;  %13582 = vmatmul.mubr.msk.f32.gmra.mxu0 %vm56_vm0, %v15693_v46  ;;  %v19415_v46 = vld [vmem:[%s23241_s8 + $0xd0] sm:$0xff]  ;;  %23709 = vst [vmem:[#allocation17_spill] sm:$0xff] %v19436_v35  ;;  %23710 = vst [vmem:[#allocation18_spill] sm:$0xff] %v19443_v22  ;;  %v19450_v4 = vld [vmem:[%s23241_s8 + $0x40] sm:$0xff] }
0x1087   :  { %5240 = vmatprep.mubr.f32.mxu1 %v23534_v40  ;;  %5329 = vmatprep.mubr.f32.mxu0 %v23534_v40  ;;  %v15699_v8 = vpop.f32.mrf.mxu1  ;;  %23706 = vst [vmem:[#allocation14_spill] sm:$0xff] %v19415_v46  ;;  %23711 = vst [vmem:[#allocation19_spill] sm:$0xff] %v19450_v4 }
0x1088   :  { %5381 = vmatpush1.msra.mxu1 %v5128_v14  ;;  %5470 = vmatpush1.msra.mxu0 %v5130_v36  ;;  %v19464_v14 = vld [vmem:[%s23241_s8 + $0x38] sm:$0xff]  ;;  %v19471_v36 = vld [vmem:[%s23241_s8 + $0xb0] sm:$0xff] }
0x1089   :  { %5382 = vmatprep.subr.mxu1 %v5125_v37  ;;  %5471 = vmatprep.subr.mxu0 %v5127_v51  ;;  %v5101_v50 = vpop.f32.mrf.mxu1  ;;  %23713 = vst [vmem:[#allocation21_spill] sm:$0xff] %v19464_v14  ;;  %23714 = vst [vmem:[#allocation22_spill] sm:$0xff] %v19471_v36  ;;  %v19478_v37 = vld [vmem:[%s23241_s8 + $0x30] sm:$0xff]  ;;  %v19485_v51 = vld [vmem:[%s23241_s8 + $0xa8] sm:$0xff] }
0x108a   :  { %13579 = vmatmul.mubr.msk.f32.gmra.mxu1 %vm56_vm0, %v5091_v15  ;;  %13583 = vmatmul.mubr.msk.f32.gmra.mxu0 %vm56_vm0, %v5091_v15  ;;  %23715 = vst [vmem:[#allocation23_spill] sm:$0xff] %v19478_v37  ;;  %23716 = vst [vmem:[#allocation24_spill] sm:$0xff] %v19485_v51  ;;  %v19492_v15 = vld [vmem:[%s23241_s8 + $0x28] sm:$0xff] }
0x108b   :  { %5246 = vmatprep.mubr.f32.mxu1 %v23534_v40  ;;  %5335 = vmatprep.mubr.f32.mxu0 %v23534_v40  ;;  %v15702_v42 = vpop.f32.mrf.mxu1  ;;  %23717 = vst [vmem:[#allocation25_spill] sm:$0xff] %v19492_v15 }
0x108c   :  { %5383 = vmatpush1.msra.mxu1 %v5124_v7  ;;  %5472 = vmatpush1.msra.mxu0 %v5126_v11  ;;  %v19499_v7 = vld [vmem:[%s23241_s8 + $0xa0] sm:$0xff] }
0x108d   :  { %5384 = vmatprep.subr.mxu1 %v5121_v45  ;;  %5473 = vmatprep.subr.mxu0 %v5123_v1  ;;  %v5111_v19 = vpop.f32.mrf.mxu1  ;;  %23718 = vst [vmem:[#allocation26_spill] sm:$0xff] %v19499_v7  ;;  %v19506_v11 = vld [vmem:[%s23241_s8 + $0x20] sm:$0xff]  ;;  %v19513_v45 = vld [vmem:[%s23241_s8 + $0x98] sm:$0xff] }
0x108e   :  { %13580 = vmatmul.mubr.msk.f32.gmra.mxu1 %vm56_vm0, %v15696_v59  ;;  %13584 = vmatmul.mubr.msk.f32.gmra.mxu0 %vm56_vm0, %v15696_v59  ;;  %v19457_v59 = vld [vmem:[%s23241_s8 + $0xb8] sm:$0xff]  ;;  %23719 = vst [vmem:[#allocation27_spill] sm:$0xff] %v19506_v11  ;;  %23720 = vst [vmem:[#allocation28_spill] sm:$0xff] %v19513_v45 }
0x108f   :  { %5385 = vmatpush1.msra.mxu1 %v5120_v55  ;;  %5418 = vmatprep.mubr.f32.mxu1 %v23534_v40  ;;  %23712 = vst [vmem:[#allocation20_spill] sm:$0xff] %v19457_v59  ;;  %v19520_v1 = vld [vmem:[%s23241_s8 + $0x18] sm:$0xff]  ;;  %v19527_v55 = vld [vmem:[%s23241_s8 + $0x90] sm:$0xff] }
0x1090   :  { %5474 = vmatpush1.msra.mxu0 %v5122_v17  ;;  %5507 = vmatprep.mubr.f32.mxu0 %v23534_v40  ;;  %23721 = vst [vmem:[#allocation29_spill] sm:$0xff] %v19520_v1  ;;  %23722 = vst [vmem:[#allocation30_spill] sm:$0xff] %v19527_v55  ;;  %v19534_v17 = vld [vmem:[%s23241_s8 + $0x10] sm:$0xff] }
0x1091   :  { %5584 = vmatprep.subr.mxu1 %v13606_v18  ;;  %5673 = vmatprep.subr.mxu0 %v13608_v52  ;;  %23723 = vst [vmem:[#allocation31_spill] sm:$0xff] %v19534_v17  ;;  %v19541_v18 = vld [vmem:[%s23241_s8 + $0x88] sm:$0xff] }
0x1092   :  { %13585 = vmatmul.mubr.msk.f32.vlgmr.msra.gmra.mxu1 %vm56_vm0, %v5061_v20  ;;  %13589 = vmatmul.mubr.msk.f32.vlgmr.msra.gmra.mxu0 %vm56_vm0, %v5061_v20  ;;  %v19392_v20 = vld [vmem:[%s23241_s8 + $0x60] sm:$0xff]  ;;  %23724 = vst [vmem:[#allocation32_spill] sm:$0xff] %v19541_v18  ;;  %v19548_v52 = vld [vmem:[%s23241_s8 + $0x8] sm:$0xff] }
0x1093   :  { %5424 = vmatprep.mubr.f32.mxu1 %v23534_v40  ;;  %5513 = vmatprep.mubr.f32.mxu0 %v23534_v40  ;;  %23703 = vst [vmem:[#allocation11_spill] sm:$0xff] %v19392_v20  ;;  %23725 = vst [vmem:[#allocation33_spill] sm:$0xff] %v19548_v52 }
0x1094   :  { %5585 = vmatpush1.msra.mxu1 %v13605_v48  ;;  %5674 = vmatpush1.msra.mxu0 %v13607_v24  ;;  %v19555_v48 = vld [vmem:[%s23241_s8 + $0x80] sm:$0xff] }
0x1095   :  { %5586 = vmatprep.subr.mxu1 %v13602_v53  ;;  %5675 = vmatprep.subr.mxu0 %v13604_v27  ;;  %23726 = vst [vmem:[#allocation34_spill] sm:$0xff] %v19555_v48  ;;  %v19562_v24 = vld [vmem:[%s23241_s8] sm:$0xff] }
0x1096   :  { %13586 = vmatmul.mubr.msk.f32.gmra.mxu1 %vm56_vm0, %v19194_v9  ;;  %13590 = vmatmul.mubr.msk.f32.gmra.mxu0 %vm56_vm0, %v19194_v9  ;;  %v19387_v9 = vld [vmem:[%s23241_s8 + $0xe0] sm:$0xff]  ;;  %23727 = vst [vmem:[#allocation35_spill] sm:$0xff] %v19562_v24 }
0x1097   :  { %5430 = vmatprep.mubr.f32.mxu1 %v23534_v40  ;;  %5519 = vmatprep.mubr.f32.mxu0 %v23534_v40  ;;  %23702 = vst [vmem:[#allocation10_spill] sm:$0xff] %v19387_v9 }
0x1098   :  { %5587 = vmatpush1.msra.mxu1 %v13601_v12  ;;  %5676 = vmatpush1.msra.mxu0 %v13603_v63 }
0x1099   :  { %5588 = vmatprep.subr.mxu1 %v13598_v2  ;;  %5677 = vmatprep.subr.mxu0 %v13600_v61 }
0x109a   :  { %13587 = vmatmul.mubr.msk.f32.gmra.mxu1 %vm56_vm0, %v19198_v47  ;;  %13591 = vmatmul.mubr.msk.f32.gmra.mxu0 %vm56_vm0, %v19198_v47  ;;  %v19408_v47 = vld [vmem:[%s23241_s8 + $0x58] sm:$0xff] }
0x109b   :  { %5436 = vmatprep.mubr.f32.mxu1 %v23534_v40  ;;  %5525 = vmatprep.mubr.f32.mxu0 %v23534_v40  ;;  %23705 = vst [vmem:[#allocation13_spill] sm:$0xff] %v19408_v47 }
0x109c   :  { %5589 = vmatpush1.msra.mxu1 %v13597_v34  ;;  %5678 = vmatpush1.msra.mxu0 %v13599_v16 }
0x109d   :  { %5590 = vmatprep.subr.mxu1 %v13594_v60  ;;  %5679 = vmatprep.subr.mxu0 %v13596_v39 }
0x109e   :  { %13588 = vmatmul.mubr.msk.f32.gmra.mxu1 %vm56_vm0, %v19196_v54  ;;  %13592 = vmatmul.mubr.msk.f32.gmra.mxu0 %vm56_vm0, %v19196_v54  ;;  %v19401_v54 = vld [vmem:[%s23241_s8 + $0xd8] sm:$0xff] }
0x109f   :  { %5591 = vmatpush1.msra.mxu1 %v13593_v23  ;;  %5624 = vmatprep.mubr.f32.mxu1 %v23534_v40  ;;  %23704 = vst [vmem:[#allocation12_spill] sm:$0xff] %v19401_v54 }
0x10a0   :  { %5680 = vmatpush1.msra.mxu0 %v13595_v28  ;;  %5713 = vmatprep.mubr.f32.mxu0 %v23534_v40 }
0x10a1   :  { %14717 = vmatprep.subr.mxu1 %v19345_v44  ;;  %14761 = vmatprep.subr.mxu0 %v19345_v44 }
0x10a2   :  { %13609 = vmatmul.mubr.msk.f32.vlgmr.msra.gmra.mxu1 %vm56_vm0, %v5101_v50  ;;  %13613 = vmatmul.mubr.msk.f32.vlgmr.msra.gmra.mxu0 %vm56_vm0, %v5101_v50 }
0x10a3   :  { %5630 = vmatprep.mubr.f32.mxu1 %v23534_v40  ;;  %5719 = vmatprep.mubr.f32.mxu0 %v23534_v40 }
0x10a4   :  { %14718 = vmatpush3.msra.mxu1 %v19350_v31  ;;  %14762 = vmatpush3.msra.mxu0 %v19350_v31 }
0x10a5   :  { %14719 = vmatprep.subr.mxu1 %v19359_v62  ;;  %14763 = vmatprep.subr.mxu0 %v19359_v62 }
0x10a6   :  { %13610 = vmatmul.mubr.msk.f32.gmra.mxu1 %vm56_vm0, %v15699_v8  ;;  %13614 = vmatmul.mubr.msk.f32.gmra.mxu0 %vm56_vm0, %v15699_v8 }
0x10a7   :  { %5636 = vmatprep.mubr.f32.mxu1 %v23534_v40  ;;  %5725 = vmatprep.mubr.f32.mxu0 %v23534_v40 }
0x10a8   :  { %14720 = vmatpush3.msra.mxu1 %v19364_v10  ;;  %14764 = vmatpush3.msra.mxu0 %v19364_v10 }
0x10a9   :  { %14721 = vmatprep.subr.mxu1 %v19373_v30  ;;  %14765 = vmatprep.subr.mxu0 %v19373_v30 }
0x10aa   :  { %13611 = vmatmul.mubr.msk.f32.gmra.mxu1 %vm56_vm0, %v5111_v19  ;;  %13615 = vmatmul.mubr.msk.f32.gmra.mxu0 %vm56_vm0, %v5111_v19 }
0x10ab   :  { %5642 = vmatprep.mubr.f32.mxu1 %v23534_v40  ;;  %5731 = vmatprep.mubr.f32.mxu0 %v23534_v40 }
0x10ac   :  { %14722 = vmatpush3.msra.mxu1 %v19378_v25  ;;  %14766 = vmatpush3.msra.mxu0 %v19378_v25 }
0x10ad   :  { %14723 = vmatprep.subr.mxu1 %v19387_v9  ;;  %14767 = vmatprep.subr.mxu0 %v19387_v9 }
0x10ae   :  { %13612 = vmatmul.mubr.msk.f32.gmra.mxu1 %vm56_vm0, %v15702_v42  ;;  %13616 = vmatmul.mubr.msk.f32.gmra.mxu0 %vm56_vm0, %v15702_v42 }
0x10af   :  { %14724 = vmatpush3.msra.mxu1 %v19392_v20  ;;  %14768 = vmatpush3.msra.mxu0 %v19392_v20 }
0x10b0   :  { %14725 = vmatprep.subr.mxu1 %v19401_v54  ;;  %14769 = vmatprep.subr.mxu0 %v19401_v54 }
0x10b1   :  { %14726 = vmatpush3.msra.mxu1 %v19408_v47  ;;  %14770 = vmatpush3.msra.mxu0 %v19408_v47 }
0x10b2   :  { %14727 = vmatprep.subr.mxu1 %v19415_v46  ;;  %14771 = vmatprep.subr.mxu0 %v19415_v46 }
0x10b3   :  { %14728 = vmatpush3.msra.mxu1 %v19422_v3  ;;  %14772 = vmatpush3.msra.mxu0 %v19422_v3 }
0x10b4   :  { %14729 = vmatprep.subr.mxu1 %v19429_v57  ;;  %14773 = vmatprep.subr.mxu0 %v19429_v57 }
0x10b5   :  { %14730 = vmatpush3.msra.mxu1 %v19436_v35  ;;  %14774 = vmatpush3.msra.mxu0 %v19436_v35 }
0x10b6   :  { %14731 = vmatprep.subr.mxu1 %v19443_v22  ;;  %14775 = vmatprep.subr.mxu0 %v19443_v22 }
0x10b7   :  { %14732 = vmatpush3.msra.mxu1 %v19450_v4  ;;  %14776 = vmatpush3.msra.mxu0 %v19450_v4 }
0x10b8   :  { %14733 = vmatprep.subr.mxu1 %v19457_v59  ;;  %14777 = vmatprep.subr.mxu0 %v19457_v59 }
0x10b9   :  { %14734 = vmatpush3.msra.mxu1 %v19464_v14  ;;  %14778 = vmatpush3.msra.mxu0 %v19464_v14 }
0x10ba   :  { %14735 = vmatprep.subr.mxu1 %v19471_v36  ;;  %14779 = vmatprep.subr.mxu0 %v19471_v36 }
0x10bb   :  { %14736 = vmatpush3.msra.mxu1 %v19478_v37  ;;  %14780 = vmatpush3.msra.mxu0 %v19478_v37 }
0x10bc   :  { %14737 = vmatprep.subr.mxu1 %v19485_v51  ;;  %14781 = vmatprep.subr.mxu0 %v19485_v51 }
0x10bd   :  { %14738 = vmatpush3.msra.mxu1 %v19492_v15  ;;  %14782 = vmatpush3.msra.mxu0 %v19492_v15 }
0x10be   :  { %14739 = vmatprep.subr.mxu1 %v19499_v7  ;;  %14783 = vmatprep.subr.mxu0 %v19499_v7 }
0x10bf   :  { %14740 = vmatpush3.msra.mxu1 %v19506_v11  ;;  %14784 = vmatpush3.msra.mxu0 %v19506_v11 }
0x10c0   :  { %14741 = vmatprep.subr.mxu1 %v19513_v45  ;;  %14785 = vmatprep.subr.mxu0 %v19513_v45 }
0x10c1   :  { %14742 = vmatpush3.msra.mxu1 %v19520_v1  ;;  %14786 = vmatpush3.msra.mxu0 %v19520_v1 }
0x10c2   :  { %14743 = vmatprep.subr.mxu1 %v19527_v55  ;;  %14787 = vmatprep.subr.mxu0 %v19527_v55 }
0x10c3   :  { %14744 = vmatpush3.msra.mxu1 %v19534_v17  ;;  %14788 = vmatpush3.msra.mxu0 %v19534_v17 }
0x10c4   :  { %14745 = vmatprep.subr.mxu1 %v19541_v18  ;;  %14789 = vmatprep.subr.mxu0 %v19541_v18 }
0x10c5   :  { %14746 = vmatpush3.msra.mxu1 %v19548_v52  ;;  %14790 = vmatpush3.msra.mxu0 %v19548_v52 }
0x10c6   :  { %14747 = vmatprep.subr.mxu1 %v19555_v48  ;;  %14791 = vmatprep.subr.mxu0 %v19555_v48 }
0x10c7   :  { %14748 = vmatpush3.msra.mxu1 %v19562_v24  ;;  %14792 = vmatpush3.msra.mxu0 %v19562_v24 }
0x1142   :  { %v5230_v53 = vpop.f32.mrf.mxu1  ;;  %v5319_v27 = vpop.f32.mrf.mxu0 }
0x1144   :  { %v5232_v12 = vpop.f32.mrf.mxu1  ;;  %v5321_v63 = vpop.f32.mrf.mxu0 }
0x1146   :  { %v5236_v2 = vpop.f32.mrf.mxu1  ;;  %v5325_v61 = vpop.f32.mrf.mxu0 }
0x1148   :  { %v5238_v34 = vpop.f32.mrf.mxu1  ;;  %v5327_v16 = vpop.f32.mrf.mxu0 }
0x114a   :  { %v5242_v60 = vpop.f32.mrf.mxu1  ;;  %v5331_v39 = vpop.f32.mrf.mxu0 }
0x114c   :  { %v5244_v23 = vpop.f32.mrf.mxu1  ;;  %v5333_v8 = vpop.f32.mrf.mxu0 }
0x114e   :  { %v19566_v28 = vpop.f32.mrf.mxu1  ;;  %v19568_v50 = vpop.f32.mrf.mxu0 }
0x1150   :  { %v19570_v42 = vpop.f32.mrf.mxu1  ;;  %v19572_v19 = vpop.f32.mrf.mxu0 }
0x1152   :  { %v5420_v24 = vpop.f32.mrf.mxu1  ;;  %v5509_v48 = vpop.f32.mrf.mxu0 }
0x1153   :  { %v5421_v4 = vadd.f32 %v5420_v24, %v5230_v53  ;;  %v5510_v57 = vadd.f32 %v5509_v48, %v5319_v27  ;;  %v19577_v24 = vld [vmem:[%s23242_s7 + $0x8] sm:$0xff] }
0x1154   :  { %v5422_v52 = vpop.f32.mrf.mxu1  ;;  %v5511_v18 = vpop.f32.mrf.mxu0 }
0x1155   :  { %v5423_v3 = vadd.f32 %v5422_v52, %v5232_v12  ;;  %v5512_v46 = vadd.f32 %v5511_v18, %v5321_v63 }
0x1156   :  { %v5426_v17 = vpop.f32.mrf.mxu1  ;;  %v5515_v55 = vpop.f32.mrf.mxu0 }
0x1157   :  { %v5427_v10 = vadd.f32 %v5426_v17, %v5236_v2  ;;  %v5516_v62 = vadd.f32 %v5515_v55, %v5325_v61 }
0x1158   :  { %v5428_v1 = vpop.f32.mrf.mxu1  ;;  %v5517_v45 = vpop.f32.mrf.mxu0 }
0x1159   :  { %v5429_v5 = vadd.f32 %v5428_v1, %v5238_v34  ;;  %v5518_v21 = vadd.f32 %v5517_v45, %v5327_v16  ;;  %v19609_v34 = vld [vmem:[%s23242_s7 + $0x28] sm:$0xff] }
0x115a   :  { %v5432_v11 = vpop.f32.mrf.mxu1  ;;  %v5521_v7 = vpop.f32.mrf.mxu0 }
0x115b   :  { %v5433_v55 = vadd.f32 %v5432_v11, %v5242_v60 }
0x115c   :  { %v5434_v15 = vpop.f32.mrf.mxu1  ;;  %v5523_v51 = vpop.f32.mrf.mxu0 }
0x115d   :  { %v5435_v18 = vadd.f32 %v5434_v15, %v5244_v23  ;;  %v5524_v48 = vadd.f32 %v5523_v51, %v5333_v8 }
0x115e   :  { %v5438_v37 = vpop.f32.mrf.mxu1  ;;  %v5527_v36 = vpop.f32.mrf.mxu0 }
0x115f   :  { %v5439_v53 = vadd.f32 %v5438_v37, %v19566_v28  ;;  %v5528_v27 = vadd.f32 %v5527_v36, %v19568_v50  ;;  %v19616_v36 = vld [vmem:[%s23242_s7 + $0x20] sm:$0xff] }
0x1160   :  { %v5440_v14 = vpop.f32.mrf.mxu1  ;;  %v5529_v59 = vpop.f32.mrf.mxu0 }
0x1161   :  { %v5441_v2 = vadd.f32 %v5440_v14, %v19570_v42  ;;  %v5530_v61 = vadd.f32 %v5529_v59, %v19572_v19  ;;  %v19623_v42 = vld [vmem:[%s23242_s7 + $0x38] sm:$0xff] }
0x1162   :  { %v5626_v22 = vpop.f32.mrf.mxu1  ;;  %v5715_v35 = vpop.f32.mrf.mxu0 }
0x1163   :  { %v5738_v47 = vadd.f32 %v5626_v22, %v5421_v4  ;;  %v5740_v9 = vadd.f32 %v5715_v35, %v5510_v57 }
0x1164   :  { %v5628_v54 = vpop.f32.mrf.mxu1  ;;  %v5717_v20 = vpop.f32.mrf.mxu0 }
0x1165   :  { %v5739_v25 = vadd.f32 %v5628_v54, %v5423_v3  ;;  %v5741_v30 = vadd.f32 %v5717_v20, %v5512_v46  ;;  %v19584_v54 = vld [vmem:[%s23242_s7] sm:$0xff] }
0x1166   :  { %v5632_v31 = vpop.f32.mrf.mxu1  ;;  %v5721_v44 = vpop.f32.mrf.mxu0  ;;  %v5786_v20 = vmul.f32 %v19584_v54, %v5738_v47  ;;  %v5879_v35 = vmul.f32 %v19584_v54, %v5740_v9 }
0x1167   :  { %v5787_v52 = vmul.f32 %v19577_v24, %v5739_v25  ;;  %v5880_v22 = vmul.f32 %v19577_v24, %v5741_v30  ;;  %v5742_v46 = vadd.f32 %v5632_v31, %v5427_v10  ;;  %v5744_v4 = vadd.f32 %v5721_v44, %v5516_v62  ;;  %v19591_v31 = vld [vmem:[%s23242_s7 + $0x18] sm:$0xff] }
0x1168   :  { %v5634_v3 = vpop.f32.mrf.mxu1  ;;  %v5723_v57 = vpop.f32.mrf.mxu0  ;;  %v5522_v25 = vadd.f32 %v5521_v7, %v5331_v39 }
0x1169   :  { %v5743_v45 = vadd.f32 %v5634_v3, %v5429_v5  ;;  %v5745_v1 = vadd.f32 %v5723_v57, %v5518_v21  ;;  %5858 = vmatprep.mubr.f32.mxu1 %v5787_v52  ;;  %5951 = vmatprep.mubr.f32.mxu0 %v5880_v22  ;;  %v19598_v21 = vld [vmem:[%s23242_s7 + $0x10] sm:$0xff]  ;;  %v19637_v3 = vld [vmem:[%s23239_s4] sm:$0xff] }
0x116a   :  { %v5638_v30 = vpop.f32.mrf.mxu1  ;;  %v5727_v17 = vpop.f32.mrf.mxu0  ;;  %5859 = vmatmul.mubr.f32.vlgmr.msra.gmra.mxu1 %v5786_v20  ;;  %5952 = vmatmul.mubr.f32.vlgmr.msra.gmra.mxu0 %v5879_v35  ;;  %v5788_v5 = vmul.f32 %v19598_v21, %v5742_v46  ;;  %v5881_v51 = vmul.f32 %v19598_v21, %v5744_v4  ;;  %v19630_v22 = vld [vmem:[%s23242_s7 + $0x30] sm:$0xff] }
0x116b   :  { %v5789_v10 = vmul.f32 %v19591_v31, %v5743_v45  ;;  %v5882_v44 = vmul.f32 %v19591_v31, %v5745_v1  ;;  %v5746_v62 = vadd.f32 %v5638_v30, %v5433_v55  ;;  %v5748_v15 = vadd.f32 %v5727_v17, %v5522_v25  ;;  %v13618_v25 = vld [vmem:[%s23243_s0 + $0x68] sm:$0xff]  ;;  %v13617_v17 = vld [vmem:[%s23243_s0 + $0x60] sm:$0xff] }
0x116c   :  { %v5640_v9 = vpop.f32.mrf.mxu1  ;;  %v5729_v47 = vpop.f32.mrf.mxu0 }
0x116d   :  { %v5747_v7 = vadd.f32 %v5640_v9, %v5435_v18  ;;  %v5749_v11 = vadd.f32 %v5729_v47, %v5524_v48  ;;  %5863 = vmatprep.mubr.f32.mxu1 %v5789_v10  ;;  %5956 = vmatprep.mubr.f32.mxu0 %v5882_v44  ;;  %v5790_v37 = vmul.f32 %v19616_v36, %v5746_v62  ;;  %v13619_v48 = vld [vmem:[%s23243_s0 + $0x70] sm:$0xff] }
0x116e   :  { %v5644_v12 = vpop.f32.mrf.mxu1  ;;  %v5733_v63 = vpop.f32.mrf.mxu0  ;;  %5864 = vmatmul.mubr.f32.gmra.mxu1 %v5788_v5  ;;  %5957 = vmatmul.mubr.f32.gmra.mxu0 %v5881_v51  ;;  %v5883_v23 = vmul.f32 %v19616_v36, %v5748_v15  ;;  %v13620_v51 = vld [vmem:[%s23243_s0 + $0x78] sm:$0xff] }
0x116f   :  { %v5791_v16 = vmul.f32 %v19609_v34, %v5747_v7  ;;  %v5884_v60 = vmul.f32 %v19609_v34, %v5749_v11  ;;  %v5750_v14 = vadd.f32 %v5644_v12, %v5439_v53  ;;  %v5752_v8 = vadd.f32 %v5733_v63, %v5528_v27 }
0x1170   :  { %v5646_v39 = vpop.f32.mrf.mxu1  ;;  %v5735_v59 = vpop.f32.mrf.mxu0 }
0x1171   :  { %v5751_v28 = vadd.f32 %v5646_v39, %v5441_v2  ;;  %v5753_v50 = vadd.f32 %v5735_v59, %v5530_v61  ;;  %5868 = vmatprep.mubr.f32.mxu1 %v5791_v16  ;;  %5961 = vmatprep.mubr.f32.mxu0 %v5884_v60  ;;  %v5792_v20 = vmul.f32 %v19630_v22, %v5750_v14 }
0x1172   :  { %5869 = vmatmul.mubr.f32.gmra.mxu1 %v5790_v37  ;;  %5962 = vmatmul.mubr.f32.gmra.mxu0 %v5883_v23  ;;  %v5885_v46 = vmul.f32 %v19630_v22, %v5752_v8 }
0x1173   :  { %v5793_v19 = vmul.f32 %v19623_v42, %v5751_v28  ;;  %v5886_v52 = vmul.f32 %v19623_v42, %v5753_v50 }
0x1175   :  { %5873 = vmatprep.mubr.f32.mxu1 %v5793_v19  ;;  %5966 = vmatprep.mubr.f32.mxu0 %v5886_v52 }
0x1176   :  { %5874 = vmatmul.mubr.f32.gmra.mxu1 %v5792_v20  ;;  %5967 = vmatmul.mubr.f32.gmra.mxu0 %v5885_v46  ;;  %v13645_v46 = vld [vmem:[%s23244_s6 + $0x40] sm:$0xff] }
0x1177   :  { %15711 = vmatprep.mubr.msk.f32.mxu1 %vm56_vm0, %v19637_v3  ;;  %6259 = vmatprep.mubr.f32.mxu0 %v23534_v40 }
0x122a   :  { %v14749_v57 = vpop.f32.mrf.mxu1 }
0x122c   :  { %v14750_v35 = vpop.f32.mrf.mxu1 }
0x122d   :  { %v14751_v55 = vadd.f32 %v14750_v35, %v14749_v57  ;;  %v13668_v57 = vld [vmem:[%s23244_s6 + $0xb8] sm:$0xff]  ;;  %v13667_v35 = vld [vmem:[%s23244_s6 + $0xb0] sm:$0xff] }
0x122e   :  { %v14752_v4 = vpop.f32.mrf.mxu1 }
0x122f   :  { %v5977_v5 = vadd.f32 %v14751_v55, %v13617_v17  ;;  %v13663_v55 = vld [vmem:[%s23244_s6 + $0x90] sm:$0xff]  ;;  %v13661_v17 = vld [vmem:[%s23244_s6 + $0x80] sm:$0xff] }
0x1230   :  { %v14753_v45 = vpop.f32.mrf.mxu1 }
0x1231   :  { %v14754_v1 = vadd.f32 %v14753_v45, %v14752_v4  ;;  %v13621_v53 = vmul.f32 -1.442695, %v5977_v5  ;;  %v13666_v4 = vld [vmem:[%s23244_s6 + $0xa8] sm:$0xff]  ;;  %v13665_v45 = vld [vmem:[%s23244_s6 + $0xa0] sm:$0xff] }
0x1232   :  { %v14755_v30 = vpop.f32.mrf.mxu1 }
0x1233   :  { %v5978_v10 = vadd.f32 %v14754_v1, %v13618_v25  ;;  %v13664_v1 = vld [vmem:[%s23244_s6 + $0x98] sm:$0xff] }
0x1234   :  { %v14756_v18 = vpop.f32.mrf.mxu1  ;;  %v6174_v25 = vld [vmem:[%s23244_s6 + $0x38] sm:$0xff] }
0x1235   :  { %v14757_v44 = vadd.f32 %v14756_v18, %v14755_v30  ;;  %v13622_v15 = vmul.f32 -1.442695, %v5978_v10  ;;  %v13662_v30 = vld [vmem:[%s23244_s6 + $0x88] sm:$0xff] }
0x1236   :  { %v14758_v62 = vpop.f32.mrf.mxu1 }
0x1237   :  { %v5979_v9 = vadd.f32 %v14757_v44, %v13619_v48 }
0x1238   :  { %v14759_v47 = vpop.f32.mrf.mxu1 }
0x1239   :  { %v13623_v7 = vmul.f32 -1.442695, %v5979_v9  ;;  %v14760_v11 = vadd.f32 %v14759_v47, %v14758_v62  ;;  %v6173_v62 = vld [vmem:[%s23244_s6 + $0x30] sm:$0xff]  ;;  %v6172_v47 = vld [vmem:[%s23244_s6 + $0x28] sm:$0xff] }
0x123b   :  { %16066 = vpow2.f32 %v13623_v7  ;;  %v5980_v27 = vadd.f32 %v14760_v11, %v13620_v51  ;;  %v6171_v51 = vld [vmem:[%s23244_s6 + $0x20] sm:$0xff]  ;;  %v6170_v7 = vld [vmem:[%s23244_s6 + $0x18] sm:$0xff]  ;;  %v6169_v11 = vld [vmem:[%s23244_s6 + $0x10] sm:$0xff] }
0x123c   :  { %16068 = vpow2.f32 %v13622_v15 }
0x123d   :  { %v13624_v12 = vmul.f32 -1.442695, %v5980_v27  ;;  %16070 = vpow2.f32 %v13621_v53  ;;  %v6168_v27 = vld [vmem:[%s23244_s6 + $0x8] sm:$0xff] }
0x123f   :  { %16072 = vpow2.f32 %v13624_v12  ;;  %v6167_v12 = vld [vmem:[%s23244_s6] sm:$0xff] }
0x1248   :  { %v16067_v63 = vpop.eup %16066 }
0x1249   :  { %v16069_v2 = vpop.eup %16068  ;;  %v5995_v61 = vadd.f32 1.0, %v16067_v63 }
0x124a   :  { %v16071_v16 = vpop.eup %16070  ;;  %v5994_v37 = vadd.f32 1.0, %v16069_v2 }
0x124b   :  { %16074 = vrcp.f32 %v5995_v61  ;;  %v5993_v39 = vadd.f32 1.0, %v16071_v16  ;;  %v23730_v16 = vld [vmem:[#allocation4_spill] sm:$0xff] }
0x124c   :  { %v16073_v60 = vpop.eup %16072 }
0x124d   :  { %v5996_v14 = vadd.f32 1.0, %v16073_v60 }
0x124f   :  { %16076 = vrcp.f32 %v5996_v14  ;;  %v23732_v14 = vld [vmem:[#allocation6_spill] sm:$0xff] }
0x1250   :  { %16078 = vrcp.f32 %v5994_v37  ;;  %v23731_v37 = vld [vmem:[#allocation5_spill] sm:$0xff] }
0x1251   :  { %16080 = vrcp.f32 %v5993_v39  ;;  %v23733_v39 = vld [vmem:[#allocation7_spill] sm:$0xff] }
0x1258   :  { %v16075_v59 = vpop.eup %16074 }
0x1259   :  { %v6040_v50 = vmul.f32 %v16075_v59, %v19039_v43  ;;  %v23734_v59 = vld [vmem:[#allocation8_spill] sm:$0xff] }
0x125c   :  { %v16077_v23 = vpop.eup %16076 }
0x125d   :  { %v6041_v8 = vmul.f32 %v16077_v23, %v19047_v58  ;;  %v16079_v28 = vpop.eup %16078  ;;  %v23735_v23 = vld [vmem:[#allocation9_spill] sm:$0xff] }
0x125e   :  { %v16081_v19 = vpop.eup %16080  ;;  %v6039_v52 = vmul.f32 %v16079_v28, %v19031_v32  ;;  %v23737_v28 = vld [vmem:[#allocation11_spill] sm:$0xff] }
0x125f   :  { %15703 = vmatprep.subr.mxu1 %v6041_v8  ;;  %v6038_v20 = vmul.f32 %v16081_v19, %v19023_v49  ;;  %v23739_v19 = vld [vmem:[#allocation13_spill] sm:$0xff] }
0x1260   :  { %15704 = vmatpush3.msra.mxu1 %v6041_v8  ;;  %v23736_v8 = vld [vmem:[#allocation10_spill] sm:$0xff] }
0x1261   :  { %15705 = vmatprep.subr.mxu1 %v6040_v50 }
0x1262   :  { %15706 = vmatpush3.msra.mxu1 %v6040_v50  ;;  %v23738_v50 = vld [vmem:[#allocation12_spill] sm:$0xff] }
0x1263   :  { %15707 = vmatprep.subr.mxu1 %v6039_v52 }
0x1264   :  { %15708 = vmatpush3.msra.mxu1 %v6039_v52  ;;  %v23740_v52 = vld [vmem:[#allocation14_spill] sm:$0xff] }
0x1265   :  { %15709 = vmatprep.subr.mxu1 %v6038_v20 }
0x1266   :  { %15710 = vmatpush3.msra.mxu1 %v6038_v20  ;;  %v23741_v20 = vld [vmem:[#allocation15_spill] sm:$0xff] }
0x1267   :  { %15712 = vmatmul.mubr.msk.f32.vlgmr.msra.gmra.mxu1 %vm56_vm0, %v19071_v0  ;;  %v23728_v0 = vld [vmem:[#allocation2_spill] sm:$0xff]  ;;  %6429 = vmatprep.subr.mxu1 %v13668_v57  ;;  %v23753_v57 = vld [vmem:[#allocation27_spill] sm:$0xff] }
0x1268   :  { %15714 = vmatprep.mubr.msk.f32.mxu1 %vm56_vm0, %v19078_v56  ;;  %v23729_v56 = vld [vmem:[#allocation3_spill] sm:$0xff]  ;;  %6430 = vmatpush1.msra.mxu1 %v13667_v35  ;;  %v23754_v35 = vld [vmem:[#allocation28_spill] sm:$0xff] }
0x1269   :  { %6431 = vmatprep.subr.mxu1 %v13666_v4  ;;  %v23755_v4 = vld [vmem:[#allocation29_spill] sm:$0xff] }
0x126a   :  { %6432 = vmatpush1.msra.mxu1 %v13665_v45  ;;  %v23756_v45 = vld [vmem:[#allocation30_spill] sm:$0xff] }
0x126b   :  { %15715 = vmatmul.mubr.msk.f32.gmra.mxu1 %vm56_vm0, %v19085_v38  ;;  %v13652_v38 = vld [vmem:[%s23244_s6 + $0x78] sm:$0xff]  ;;  %6433 = vmatprep.subr.mxu1 %v13664_v1  ;;  %v23757_v1 = vld [vmem:[#allocation31_spill] sm:$0xff] }
0x126c   :  { %15717 = vmatprep.mubr.msk.f32.mxu1 %vm56_vm0, %v19092_v33  ;;  %6219 = vmatprep.subr.mxu0 %v13652_v38  ;;  %v13651_v33 = vld [vmem:[%s23244_s6 + $0x70] sm:$0xff]  ;;  %v23745_v38 = vld [vmem:[#allocation19_spill] sm:$0xff] }
0x126d   :  { %6220 = vmatpush1.msra.mxu0 %v13651_v33  ;;  %6434 = vmatpush1.msra.mxu1 %v13663_v55  ;;  %v23746_v33 = vld [vmem:[#allocation20_spill] sm:$0xff] }
0x126e   :  { %6435 = vmatprep.subr.mxu1 %v13662_v30  ;;  %v23758_v55 = vld [vmem:[#allocation32_spill] sm:$0xff]  ;;  %v23760_v30 = vld [vmem:[#allocation34_spill] sm:$0xff] }
0x126f   :  { %15718 = vmatmul.mubr.msk.f32.gmra.mxu1 %vm56_vm0, %v19099_v26  ;;  %v13650_v26 = vld [vmem:[%s23244_s6 + $0x68] sm:$0xff] }
0x1270   :  { %15720 = vmatprep.mubr.msk.f32.mxu1 %vm56_vm0, %v19106_v29  ;;  %6221 = vmatprep.subr.mxu0 %v13650_v26  ;;  %v13649_v29 = vld [vmem:[%s23244_s6 + $0x60] sm:$0xff]  ;;  %v23747_v26 = vld [vmem:[#allocation21_spill] sm:$0xff] }
0x1271   :  { %6222 = vmatpush1.msra.mxu0 %v13649_v29  ;;  %6436 = vmatpush1.msra.mxu1 %v13661_v17  ;;  %v23748_v29 = vld [vmem:[#allocation22_spill] sm:$0xff]  ;;  %v23761_v17 = vld [vmem:[#allocation35_spill] sm:$0xff] }
0x1273   :  { %15721 = vmatmul.mubr.msk.f32.gmra.mxu1 %vm56_vm0, %v19113_v13  ;;  %v13648_v13 = vld [vmem:[%s23244_s6 + $0x58] sm:$0xff] }
0x1274   :  { %15723 = vmatprep.mubr.msk.f32.mxu1 %vm56_vm0, %v19120_v41  ;;  %6223 = vmatprep.subr.mxu0 %v13648_v13  ;;  %v13647_v41 = vld [vmem:[%s23244_s6 + $0x50] sm:$0xff]  ;;  %v23749_v13 = vld [vmem:[#allocation23_spill] sm:$0xff] }
0x1275   :  { %6224 = vmatpush1.msra.mxu0 %v13647_v41  ;;  %v23750_v41 = vld [vmem:[#allocation24_spill] sm:$0xff] }
0x1277   :  { %15724 = vmatmul.mubr.msk.f32.gmra.mxu1 %vm56_vm0, %v19127_v6  ;;  %v13646_v6 = vld [vmem:[%s23244_s6 + $0x48] sm:$0xff] }
0x1278   :  { %15726 = vmatprep.mubr.msk.f32.mxu1 %vm56_vm0, %v23728_v0  ;;  %6225 = vmatprep.subr.mxu0 %v13646_v6  ;;  %v23743_v0 = vld [vmem:[#allocation17_spill] sm:$0xff] }
0x1279   :  { %6226 = vmatpush1.msra.mxu0 %v13645_v46  ;;  %v23751_v6 = vld [vmem:[#allocation25_spill] sm:$0xff]  ;;  %v23752_v46 = vld [vmem:[#allocation26_spill] sm:$0xff] }
0x127a   :  { %6320 = vmatprep.subr.mxu0 %v6174_v25  ;;  %v23759_v25 = vld [vmem:[#allocation33_spill] sm:$0xff] }
0x127b   :  { %15727 = vmatmul.mubr.msk.f32.gmra.mxu1 %vm56_vm0, %v23729_v56  ;;  %v23744_v56 = vld [vmem:[#allocation18_spill] sm:$0xff] }
0x127c   :  { %6469 = vmatprep.mubr.f32.mxu1 %v23534_v40 }
0x1327   :  { %v15713_v18 = vpop.f32.mrf.mxu1 }
0x1329   :  { %v6108_v48 = vpop.f32.mrf.mxu1 }
0x132b   :  { %v15716_v10 = vpop.f32.mrf.mxu1 }
0x132d   :  { %v6118_v44 = vpop.f32.mrf.mxu1 }
0x132f   :  { %v15719_v5 = vpop.f32.mrf.mxu1 }
0x1331   :  { %v6128_v9 = vpop.f32.mrf.mxu1 }
0x1332   :  { %13653 = vmatmul.mubr.msk.f32.vlgmr.msra.gmra.mxu0 %vm56_vm0, %v6128_v9 }
0x1333   :  { %v15722_v15 = vpop.f32.mrf.mxu1  ;;  %6265 = vmatprep.mubr.f32.mxu0 %v23534_v40  ;;  %6321 = vmatpush1.msra.mxu0 %v6173_v62 }
0x1334   :  { %6322 = vmatprep.subr.mxu0 %v6172_v47 }
0x1335   :  { %v6138_v53 = vpop.f32.mrf.mxu1  ;;  %6323 = vmatpush1.msra.mxu0 %v6171_v51 }
0x1336   :  { %13654 = vmatmul.mubr.msk.f32.gmra.mxu0 %vm56_vm0, %v15719_v5  ;;  %6324 = vmatprep.subr.mxu0 %v6170_v7 }
0x1337   :  { %v15725_v63 = vpop.f32.mrf.mxu1  ;;  %6271 = vmatprep.mubr.f32.mxu0 %v23534_v40  ;;  %6325 = vmatpush1.msra.mxu0 %v6169_v11 }
0x1338   :  { %6326 = vmatprep.subr.mxu0 %v6168_v27 }
0x1339   :  { %v6148_v2 = vpop.f32.mrf.mxu1  ;;  %6327 = vmatpush1.msra.mxu0 %v6167_v12 }
0x133a   :  { %13655 = vmatmul.mubr.msk.f32.gmra.mxu0 %vm56_vm0, %v6138_v53  ;;  %13669 = vmatmul.mubr.msk.f32.vlgmr.msra.gmra.mxu1 %vm56_vm0, %v6148_v2 }
0x133b   :  { %6277 = vmatprep.mubr.f32.mxu0 %v23534_v40  ;;  %6475 = vmatprep.mubr.f32.mxu1 %v23534_v40  ;;  %v15728_v61 = vpop.f32.mrf.mxu1 }
0x133c   :  { %14821 = vmatprep.subr.mxu0 %v23730_v16 }
0x133d   :  { %v6158_v60 = vpop.f32.mrf.mxu1 }
0x133e   :  { %13656 = vmatmul.mubr.msk.f32.gmra.mxu0 %vm56_vm0, %v15722_v15  ;;  %13670 = vmatmul.mubr.msk.f32.gmra.mxu1 %vm56_vm0, %v15725_v63 }
0x133f   :  { %6360 = vmatprep.mubr.f32.mxu0 %v23534_v40  ;;  %6481 = vmatprep.mubr.f32.mxu1 %v23534_v40 }
0x1342   :  { %13657 = vmatmul.mubr.msk.f32.vlgmr.msra.gmra.mxu0 %vm56_vm0, %v6108_v48  ;;  %13671 = vmatmul.mubr.msk.f32.gmra.mxu1 %vm56_vm0, %v6158_v60 }
0x1343   :  { %6366 = vmatprep.mubr.f32.mxu0 %v23534_v40  ;;  %6487 = vmatprep.mubr.f32.mxu1 %v23534_v40 }
0x1344   :  { %14822 = vmatpush3.msra.mxu0 %v23731_v37 }
0x1345   :  { %14823 = vmatprep.subr.mxu0 %v23732_v14 }
0x1346   :  { %13658 = vmatmul.mubr.msk.f32.gmra.mxu0 %vm56_vm0, %v15713_v18  ;;  %13672 = vmatmul.mubr.msk.f32.gmra.mxu1 %vm56_vm0, %v15728_v61  ;;  %v19809_v18 = vpop.f32.mrf.mxu0 }
0x1347   :  { %6372 = vmatprep.mubr.f32.mxu0 %v23534_v40  ;;  %14824 = vmatpush3.msra.mxu0 %v23733_v39 }
0x1348   :  { %14825 = vmatprep.subr.mxu0 %v23734_v59  ;;  %15737 = vmatprep.mubr.msk.f32.mxu1 %vm56_vm0, %v19637_v3  ;;  %v23742_v3 = vld [vmem:[#allocation16_spill] sm:$0xff]  ;;  %v19811_v48 = vpop.f32.mrf.mxu0 }
0x1349   :  { %14826 = vmatpush3.msra.mxu0 %v23735_v23 }
0x134a   :  { %13659 = vmatmul.mubr.msk.f32.gmra.mxu0 %vm56_vm0, %v6118_v44  ;;  %14827 = vmatprep.subr.mxu0 %v23736_v8 }
0x134b   :  { %6378 = vmatprep.mubr.f32.mxu0 %v23534_v40  ;;  %14828 = vmatpush3.msra.mxu0 %v23737_v28 }
0x134c   :  { %14829 = vmatprep.subr.mxu0 %v23738_v50 }
0x134d   :  { %14830 = vmatpush3.msra.mxu0 %v23739_v19 }
0x134e   :  { %13660 = vmatmul.mubr.msk.f32.gmra.mxu0 %vm56_vm0, %v15716_v10  ;;  %14831 = vmatprep.subr.mxu0 %v23740_v52  ;;  %v19813_v10 = vpop.f32.mrf.mxu0 }
0x134f   :  { %14832 = vmatpush3.msra.mxu0 %v23741_v20 }
0x1350   :  { %14833 = vmatprep.subr.mxu0 %v23742_v3  ;;  %v19815_v44 = vpop.f32.mrf.mxu0 }
0x1351   :  { %14834 = vmatpush3.msra.mxu0 %v23743_v0 }
0x1352   :  { %14835 = vmatprep.subr.mxu0 %v23744_v56  ;;  %v19817_v5 = vpop.f32.mrf.mxu0 }
0x1353   :  { %14836 = vmatpush3.msra.mxu0 %v23745_v38 }
0x1354   :  { %14837 = vmatprep.subr.mxu0 %v23746_v33  ;;  %v19819_v62 = vpop.f32.mrf.mxu0 }
0x1355   :  { %14838 = vmatpush3.msra.mxu0 %v23747_v26 }
0x1356   :  { %14839 = vmatprep.subr.mxu0 %v23748_v29  ;;  %v19821_v9 = vpop.f32.mrf.mxu0 }
0x1357   :  { %14840 = vmatpush3.msra.mxu0 %v23749_v13 }
0x1358   :  { %14841 = vmatprep.subr.mxu0 %v23750_v41  ;;  %v19823_v47 = vpop.f32.mrf.mxu0 }
0x1359   :  { %14842 = vmatpush3.msra.mxu0 %v23751_v6 }
0x135a   :  { %14843 = vmatprep.subr.mxu0 %v23752_v46 }
0x135b   :  { %14844 = vmatpush3.msra.mxu0 %v23753_v57 }
0x135c   :  { %14845 = vmatprep.subr.mxu0 %v23754_v35 }
0x135d   :  { %14846 = vmatpush3.msra.mxu0 %v23755_v4 }
0x135e   :  { %14847 = vmatprep.subr.mxu0 %v23756_v45 }
0x135f   :  { %14848 = vmatpush3.msra.mxu0 %v23757_v1 }
0x1360   :  { %14849 = vmatprep.subr.mxu0 %v23758_v55 }
0x1361   :  { %14850 = vmatpush3.msra.mxu0 %v23759_v25 }
0x1362   :  { %14851 = vmatprep.subr.mxu0 %v23760_v30 }
0x1363   :  { %14852 = vmatpush3.msra.mxu0 %v23761_v17 }
0x13f2   :  { %v6261_v51 = vpop.f32.mrf.mxu0 }
0x13f4   :  { %v6263_v15 = vpop.f32.mrf.mxu0 }
0x13f6   :  { %v6267_v7 = vpop.f32.mrf.mxu0 }
0x13f8   :  { %v6269_v11 = vpop.f32.mrf.mxu0 }
0x13fa   :  { %v6273_v53 = vpop.f32.mrf.mxu0  ;;  %v6471_v27 = vpop.f32.mrf.mxu1 }
0x13fc   :  { %v6275_v12 = vpop.f32.mrf.mxu0  ;;  %v6473_v63 = vpop.f32.mrf.mxu1 }
0x13fe   :  { %v6279_v2 = vpop.f32.mrf.mxu0  ;;  %v6477_v61 = vpop.f32.mrf.mxu1 }
0x1400   :  { %v6281_v16 = vpop.f32.mrf.mxu0  ;;  %v6479_v37 = vpop.f32.mrf.mxu1 }
0x1402   :  { %v6362_v60 = vpop.f32.mrf.mxu0  ;;  %v6483_v8 = vpop.f32.mrf.mxu1 }
0x1403   :  { %v6363_v14 = vadd.f32 %v6362_v60, %v6261_v51 }
0x1404   :  { %v6364_v39 = vpop.f32.mrf.mxu0  ;;  %v6485_v38 = vpop.f32.mrf.mxu1 }
0x1405   :  { %v6365_v59 = vadd.f32 %v6364_v39, %v6263_v15  ;;  %v6494_v23 = vadd.f32 %v6471_v27, %v6363_v14  ;;  %v14795_v15 = vadd.f32 %v19811_v48, %v19809_v18  ;;  %v13627_v18 = vld [vmem:[%s23245_s1 + $0x70] sm:$0xff] }
0x1406   :  { %v6368_v28 = vpop.f32.mrf.mxu0  ;;  %v6489_v57 = vpop.f32.mrf.mxu1 }
0x1407   :  { %v6495_v50 = vadd.f32 %v6473_v63, %v6365_v59  ;;  %v6369_v19 = vadd.f32 %v6368_v28, %v6267_v7  ;;  %v6502_v0 = vmul.f32 %v19584_v54, %v6494_v23  ;;  %v13674_v28 = vld [vmem:[%s23246_s2 + $0x68] sm:$0xff] }
0x1408   :  { %v6370_v52 = vpop.f32.mrf.mxu0  ;;  %v6491_v30 = vpop.f32.mrf.mxu1 }
0x1409   :  { %v6371_v20 = vadd.f32 %v6370_v52, %v6269_v11  ;;  %v6503_v3 = vmul.f32 %v19577_v24, %v6495_v50  ;;  %v6496_v56 = vadd.f32 %v6477_v61, %v6369_v19  ;;  %v14801_v11 = vadd.f32 %v19819_v62, %v19817_v5 }
0x140a   :  { %v6374_v33 = vpop.f32.mrf.mxu0 }
0x140b   :  { %v6497_v26 = vadd.f32 %v6479_v37, %v6371_v20  ;;  %v6375_v29 = vadd.f32 %v6374_v33, %v6273_v53  ;;  %6574 = vmatprep.mubr.f32.mxu0 %v6503_v3  ;;  %v6504_v46 = vmul.f32 %v19598_v21, %v6496_v56  ;;  %v6012_v27 = vadd.f32 %v14801_v11, %v13627_v18  ;;  %v13675_v56 = vld [vmem:[%s23246_s2 + $0x70] sm:$0xff]  ;;  %v13705_v11 = vld [vmem:[%s23240_s5 + $0xe0] sm:$0xff] }
0x140c   :  { %v6376_v13 = vpop.f32.mrf.mxu0  ;;  %6575 = vmatmul.mubr.f32.vlgmr.msra.gmra.mxu0 %v6502_v0  ;;  %v19922_v18 = vld [vmem:[%s23239_s4 + $0x10] sm:$0xff] }
0x140d   :  { %v6377_v41 = vadd.f32 %v6376_v13, %v6275_v12  ;;  %v6505_v6 = vmul.f32 %v19591_v31, %v6497_v26  ;;  %v6498_v35 = vadd.f32 %v6483_v8, %v6375_v29  ;;  %v14804_v12 = vadd.f32 %v19823_v47, %v19821_v9  ;;  %v13673_v9 = vld [vmem:[%s23246_s2 + $0x60] sm:$0xff]  ;;  %v13676_v13 = vld [vmem:[%s23246_s2 + $0x78] sm:$0xff] }
0x140e   :  { %v6380_v4 = vpop.f32.mrf.mxu0 }
0x140f   :  { %v6499_v45 = vadd.f32 %v6485_v38, %v6377_v41  ;;  %v6381_v24 = vadd.f32 %v6380_v4, %v6279_v2  ;;  %6579 = vmatprep.mubr.f32.mxu0 %v6505_v6  ;;  %v6506_v25 = vmul.f32 %v19616_v36, %v6498_v35  ;;  %v14798_v36 = vadd.f32 %v19815_v44, %v19813_v10  ;;  %v13628_v10 = vld [vmem:[%s23245_s1 + $0x78] sm:$0xff] }
0x1410   :  { %v6382_v54 = vpop.f32.mrf.mxu0  ;;  %6580 = vmatmul.mubr.f32.gmra.mxu0 %v6504_v46  ;;  %v13631_v44 = vmul.f32 -1.442695, %v6012_v27  ;;  %v6013_v63 = vadd.f32 %v14804_v12, %v13628_v10  ;;  %v19936_v27 = vld [vmem:[%s23239_s4 + $0x20] sm:$0xff]  ;;  %v19943_v12 = vld [vmem:[%s23239_s4 + $0x28] sm:$0xff]  ;;  %v19950_v10 = vld [vmem:[%s23239_s4 + $0x30] sm:$0xff] }
0x1411   :  { %v6383_v1 = vadd.f32 %v6382_v54, %v6281_v16  ;;  %v6507_v55 = vmul.f32 %v19609_v34, %v6499_v45  ;;  %v6500_v17 = vadd.f32 %v6489_v57, %v6381_v24  ;;  %v13625_v34 = vld [vmem:[%s23245_s1 + $0x60] sm:$0xff] }
0x1412   :  { %v6010_v7 = vadd.f32 %v14795_v15, %v13625_v34  ;;  %v13632_v5 = vmul.f32 -1.442695, %v6013_v63  ;;  %v19964_v63 = vld [vmem:[%s23239_s4 + $0x40] sm:$0xff] }
0x1413   :  { %v6501_v51 = vadd.f32 %v6491_v30, %v6383_v1  ;;  %6584 = vmatprep.mubr.f32.mxu0 %v6507_v55  ;;  %v6508_v21 = vmul.f32 %v19630_v22, %v6500_v17 }
0x1414   :  { %6585 = vmatmul.mubr.f32.gmra.mxu0 %v6506_v25  ;;  %v13629_v53 = vmul.f32 -1.442695, %v6010_v7 }
0x1415   :  { %v6509_v31 = vmul.f32 %v19623_v42, %v6501_v51  ;;  %v13626_v42 = vld [vmem:[%s23245_s1 + $0x68] sm:$0xff] }
0x1416   :  { %v6011_v22 = vadd.f32 %v14798_v36, %v13626_v42  ;;  %16082 = vpow2.f32 %v13629_v53  ;;  %v19915_v53 = vld [vmem:[%s23239_s4 + $0x8] sm:$0xff] }
0x1417   :  { %6589 = vmatprep.mubr.f32.mxu0 %v6509_v31 }
0x1418   :  { %6590 = vmatmul.mubr.f32.gmra.mxu0 %v6508_v21  ;;  %v13630_v48 = vmul.f32 -1.442695, %v6011_v22 }
0x1419   :  { %6951 = vmatprep.mubr.f32.mxu0 %v23534_v40 }
0x141a   :  { %16084 = vpow2.f32 %v13630_v48  ;;  %v19929_v48 = vld [vmem:[%s23239_s4 + $0x18] sm:$0xff] }
0x141b   :  { %16086 = vpow2.f32 %v13631_v44  ;;  %v19957_v44 = vld [vmem:[%s23239_s4 + $0x38] sm:$0xff] }
0x141c   :  { %16088 = vpow2.f32 %v13632_v5  ;;  %v19971_v5 = vld [vmem:[%s23239_s4 + $0x48] sm:$0xff] }
0x1423   :  { %v16083_v62 = vpop.eup %16082 }
0x1424   :  { %v6026_v61 = vadd.f32 1.0, %v16083_v62  ;;  %v19978_v62 = vld [vmem:[%s23239_s4 + $0x50] sm:$0xff] }
0x1425   :  { %23762 = vst [vmem:[#allocation2_spill] sm:$0xff] %v19978_v62 }
0x1426   :  { %16090 = vrcp.f32 %v6026_v61  ;;  %v13702_v61 = vld [vmem:[%s23240_s5 + $0xc8] sm:$0xff] }
0x1427   :  { %v16085_v2 = vpop.eup %16084 }
0x1428   :  { %v6027_v60 = vadd.f32 1.0, %v16085_v2  ;;  %v16087_v47 = vpop.eup %16086  ;;  %v19985_v2 = vld [vmem:[%s23239_s4 + $0x58] sm:$0xff] }
0x1429   :  { %v6028_v23 = vadd.f32 1.0, %v16087_v47  ;;  %v16089_v50 = vpop.eup %16088  ;;  %23763 = vst [vmem:[#allocation3_spill] sm:$0xff] %v19985_v2  ;;  %v13703_v47 = vld [vmem:[%s23240_s5 + $0xd0] sm:$0xff] }
0x142a   :  { %16092 = vrcp.f32 %v6027_v60  ;;  %v6029_v3 = vadd.f32 1.0, %v16089_v50  ;;  %v13708_v60 = vld [vmem:[%s23240_s5 + $0xf8] sm:$0xff]  ;;  %v13693_v50 = vld [vmem:[%s23240_s5 + $0x80] sm:$0xff] }
0x142b   :  { %6911 = vmatprep.subr.mxu0 %v13708_v60  ;;  %v13726_v60 = vld [vmem:[%s23240_s5 + $0x108] sm:$0xff] }
0x1433   :  { %v16091_v6 = vpop.eup %16090 }
0x1434   :  { %v6612_v35 = vsub.f32 1.0, %v16091_v6  ;;  %v6608_v45 = vmul.f32 %v16091_v6, %v19023_v49  ;;  %v6765_v6 = vld [vmem:[%s23240_s5 + $0x58] sm:$0xff] }
0x1437   :  { %v16093_v57 = vpop.eup %16092 }
0x1438   :  { %v6613_v1 = vsub.f32 1.0, %v16093_v57  ;;  %v6609_v30 = vmul.f32 %v16093_v57, %v19031_v32  ;;  %v6762_v57 = vld [vmem:[%s23240_s5 + $0x40] sm:$0xff] }
0x14cc   :  { %v14853_v16 = vpop.f32.mrf.mxu0 }
0x14ce   :  { %v14854_v37 = vpop.f32.mrf.mxu0 }
0x14cf   :  { %v14855_v14 = vadd.f32 %v14854_v37, %v14853_v16  ;;  %v13701_v16 = vld [vmem:[%s23240_s5 + $0xc0] sm:$0xff]  ;;  %v13707_v37 = vld [vmem:[%s23240_s5 + $0xf0] sm:$0xff] }
0x14d0   :  { %v14856_v39 = vpop.f32.mrf.mxu0  ;;  %6912 = vmatpush1.msra.mxu0 %v13707_v37  ;;  %v13728_v37 = vld [vmem:[%s23240_s5 + $0x118] sm:$0xff] }
0x14d1   :  { %v6600_v59 = vadd.f32 %v14855_v14, %v13673_v9  ;;  %v13704_v9 = vld [vmem:[%s23240_s5 + $0xd8] sm:$0xff]  ;;  %v13698_v14 = vld [vmem:[%s23240_s5 + $0xa8] sm:$0xff] }
0x14d2   :  { %v14857_v8 = vpop.f32.mrf.mxu0  ;;  %6913 = vmatprep.subr.mxu0 %v13704_v9  ;;  %v13725_v9 = vld [vmem:[%s23240_s5 + $0x100] sm:$0xff] }
0x14d3   :  { %16094 = vtanh.f32 %v6600_v59  ;;  %v14858_v19 = vadd.f32 %v14857_v8, %v14856_v39  ;;  %v13700_v39 = vld [vmem:[%s23240_s5 + $0xb8] sm:$0xff]  ;;  %6914 = vmatpush1.msra.mxu0 %v13703_v47  ;;  %v13697_v59 = vld [vmem:[%s23240_s5 + $0xa0] sm:$0xff]  ;;  %v13694_v8 = vld [vmem:[%s23240_s5 + $0x88] sm:$0xff] }
0x14d4   :  { %v14859_v52 = vpop.f32.mrf.mxu0  ;;  %16096 = vrcp.f32 %v6028_v23  ;;  %6915 = vmatprep.subr.mxu0 %v13700_v39  ;;  %v13699_v23 = vld [vmem:[%s23240_s5 + $0xb0] sm:$0xff] }
0x14d5   :  { %v6601_v20 = vadd.f32 %v14858_v19, %v13674_v28  ;;  %6916 = vmatpush1.msra.mxu0 %v13699_v23  ;;  %v13696_v28 = vld [vmem:[%s23240_s5 + $0x98] sm:$0xff]  ;;  %v13695_v19 = vld [vmem:[%s23240_s5 + $0x90] sm:$0xff] }
0x14d6   :  { %v14860_v0 = vpop.f32.mrf.mxu0  ;;  %6917 = vmatprep.subr.mxu0 %v13696_v28  ;;  %v20194_v28 = vld [vmem:[%s23241_s8 + $0x78] sm:$0xff] }
0x14d7   :  { %16098 = vtanh.f32 %v6601_v20  ;;  %v14861_v38 = vadd.f32 %v14860_v0, %v14859_v52  ;;  %6918 = vmatpush1.msra.mxu0 %v13695_v19  ;;  %v6767_v52 = vld [vmem:[%s23240_s5 + $0x68] sm:$0xff]  ;;  %v6769_v20 = vld [vmem:[%s23240_s5 + $0x78] sm:$0xff]  ;;  %23765 = vst [vmem:[#allocation5_spill] sm:$0xff] %v20194_v28  ;;  %v20208_v19 = vld [vmem:[%s23241_s8 + $0x70] sm:$0xff] }
0x14d8   :  { %v14862_v33 = vpop.f32.mrf.mxu0  ;;  %16100 = vrcp.f32 %v6029_v3  ;;  %7101 = vmatprep.subr.mxu0 %v6769_v20  ;;  %23767 = vst [vmem:[#allocation7_spill] sm:$0xff] %v20208_v19  ;;  %v20222_v20 = vld [vmem:[%s23241_s8 + $0x68] sm:$0xff] }
0x14d9   :  { %v6602_v26 = vadd.f32 %v14861_v38, %v13675_v56  ;;  %23769 = vst [vmem:[#allocation9_spill] sm:$0xff] %v20222_v20 }
0x14da   :  { %v14863_v29 = vpop.f32.mrf.mxu0 }
0x14db   :  { %16102 = vtanh.f32 %v6602_v26  ;;  %v14864_v41 = vadd.f32 %v14863_v29, %v14862_v33  ;;  %v6766_v29 = vld [vmem:[%s23240_s5 + $0x60] sm:$0xff] }
0x14dd   :  { %v6603_v46 = vadd.f32 %v14864_v41, %v13676_v13  ;;  %v6768_v13 = vld [vmem:[%s23240_s5 + $0x70] sm:$0xff]  ;;  %v6763_v41 = vld [vmem:[%s23240_s5 + $0x48] sm:$0xff] }
0x14df   :  { %16104 = vtanh.f32 %v6603_v46 }
0x14e0   :  { %v16095_v4 = vpop.eup %16094 }
0x14e1   :  { %v6616_v24 = vmul.f32 %v16095_v4, %v6612_v35  ;;  %v16097_v54 = vpop.eup %16096  ;;  %v6764_v35 = vld [vmem:[%s23240_s5 + $0x50] sm:$0xff]  ;;  %v6759_v4 = vld [vmem:[%s23240_s5 + $0x28] sm:$0xff] }
0x14e2   :  { %v6614_v31 = vsub.f32 1.0, %v16097_v54  ;;  %v6610_v15 = vmul.f32 %v16097_v54, %v19039_v43  ;;  %v6758_v54 = vld [vmem:[%s23240_s5 + $0x20] sm:$0xff] }
0x14e3   :  { %v19867_v55 = vadd.f32 %v6616_v24, %v6608_v45  ;;  %v6761_v45 = vld [vmem:[%s23240_s5 + $0x38] sm:$0xff] }
0x14e4   :  { %v16099_v25 = vpop.eup %16098 }
0x14e5   :  { %v6617_v17 = vmul.f32 %v16099_v25, %v6613_v1  ;;  %13677 = vst.msk [vmem:[%s23247_s9 + $0x60] sm:$0xff] %vm56_vm0, %v19867_v55  ;;  %v16101_v51 = vpop.eup %16100  ;;  %v6760_v1 = vld [vmem:[%s23240_s5 + $0x30] sm:$0xff]  ;;  %v6755_v25 = vld [vmem:[%s23240_s5 + $0x8] sm:$0xff] }
0x14e6   :  { %v6615_v32 = vsub.f32 1.0, %v16101_v51  ;;  %v6611_v42 = vmul.f32 %v16101_v51, %v19047_v58  ;;  %v13706_v58 = vld [vmem:[%s23240_s5 + $0xe8] sm:$0xff]  ;;  %v6756_v51 = vld [vmem:[%s23240_s5 + $0x10] sm:$0xff] }
0x14e7   :  { %v19875_v21 = vadd.f32 %v6617_v17, %v6609_v30  ;;  %v6757_v30 = vld [vmem:[%s23240_s5 + $0x18] sm:$0xff]  ;;  %v6754_v17 = vld [vmem:[%s23240_s5] sm:$0xff] }
0x14e8   :  { %v16103_v49 = vpop.eup %16102 }
0x14e9   :  { %v6618_v34 = vmul.f32 %v16103_v49, %v6614_v31  ;;  %13678 = vst.msk [vmem:[%s23247_s9 + $0x68] sm:$0xff] %vm56_vm0, %v19875_v21  ;;  %v13738_v31 = vld [vmem:[%s23240_s5 + $0x168] sm:$0xff]  ;;  %v13740_v49 = vld [vmem:[%s23240_s5 + $0x178] sm:$0xff] }
0x14eb   :  { %v19883_v36 = vadd.f32 %v6618_v34, %v6610_v15  ;;  %v13737_v15 = vld [vmem:[%s23240_s5 + $0x160] sm:$0xff]  ;;  %v13739_v34 = vld [vmem:[%s23240_s5 + $0x170] sm:$0xff] }
0x14ec   :  { %v16105_v7 = vpop.eup %16104 }
0x14ed   :  { %v6619_v22 = vmul.f32 %v16105_v7, %v6615_v32  ;;  %13679 = vst.msk [vmem:[%s23247_s9 + $0x70] sm:$0xff] %vm56_vm0, %v19883_v36  ;;  %v13734_v32 = vld [vmem:[%s23240_s5 + $0x148] sm:$0xff]  ;;  %v13736_v7 = vld [vmem:[%s23240_s5 + $0x158] sm:$0xff] }
0x14ef   :  { %v19891_v43 = vadd.f32 %v6619_v22, %v6611_v42  ;;  %v13733_v42 = vld [vmem:[%s23240_s5 + $0x140] sm:$0xff]  ;;  %v13735_v22 = vld [vmem:[%s23240_s5 + $0x150] sm:$0xff] }
0x14f1   :  { %13680 = vst.msk [vmem:[%s23247_s9 + $0x78] sm:$0xff] %vm56_vm0, %v19891_v43  ;;  %15729 = vmatprep.subr.mxu1 %v19891_v43 }
0x14f2   :  { %15730 = vmatpush3.msra.mxu1 %v19891_v43 }
0x14f3   :  { %15731 = vmatprep.subr.mxu1 %v19883_v36 }
0x14f4   :  { %15732 = vmatpush3.msra.mxu1 %v19883_v36 }
0x14f5   :  { %15733 = vmatprep.subr.mxu1 %v19875_v21 }
0x14f6   :  { %15734 = vmatpush3.msra.mxu1 %v19875_v21 }
0x14f7   :  { %15735 = vmatprep.subr.mxu1 %v19867_v55 }
0x14f8   :  { %15736 = vmatpush3.msra.mxu1 %v19867_v55 }
0x14f9   :  { %15738 = vmatmul.mubr.msk.f32.vlgmr.msra.gmra.mxu1 %vm56_vm0, %v19915_v53  ;;  %6822 = vmatprep.subr.mxu1 %v13706_v58  ;;  %v13730_v58 = vld [vmem:[%s23240_s5 + $0x128] sm:$0xff] }
0x14fa   :  { %15740 = vmatprep.mubr.msk.f32.mxu1 %vm56_vm0, %v19922_v18  ;;  %6823 = vmatpush1.msra.mxu1 %v13705_v11  ;;  %v13732_v11 = vld [vmem:[%s23240_s5 + $0x138] sm:$0xff] }
0x14fb   :  { %6824 = vmatprep.subr.mxu1 %v13702_v61  ;;  %v13729_v61 = vld [vmem:[%s23240_s5 + $0x120] sm:$0xff] }
0x14fc   :  { %6825 = vmatpush1.msra.mxu1 %v13701_v16  ;;  %v13731_v16 = vld [vmem:[%s23240_s5 + $0x130] sm:$0xff] }
0x14fd   :  { %15741 = vmatmul.mubr.msk.f32.gmra.mxu1 %vm56_vm0, %v19929_v48  ;;  %6826 = vmatprep.subr.mxu1 %v13698_v14  ;;  %v13727_v14 = vld [vmem:[%s23240_s5 + $0x110] sm:$0xff] }
0x14fe   :  { %15743 = vmatprep.mubr.msk.f32.mxu1 %vm56_vm0, %v19936_v27  ;;  %6827 = vmatpush1.msra.mxu1 %v13697_v59 }
0x14ff   :  { %6828 = vmatprep.subr.mxu1 %v13694_v8  ;;  %v20189_v8 = vld [vmem:[%s23241_s8 + $0xf8] sm:$0xff] }
0x1500   :  { %6829 = vmatpush1.msra.mxu1 %v13693_v50  ;;  %23764 = vst [vmem:[#allocation4_spill] sm:$0xff] %v20189_v8  ;;  %v20203_v50 = vld [vmem:[%s23241_s8 + $0xf0] sm:$0xff] }
0x1501   :  { %15744 = vmatmul.mubr.msk.f32.gmra.mxu1 %vm56_vm0, %v19943_v12  ;;  %7012 = vmatprep.subr.mxu1 %v6767_v52  ;;  %23766 = vst [vmem:[#allocation6_spill] sm:$0xff] %v20203_v50  ;;  %v20217_v52 = vld [vmem:[%s23241_s8 + $0xe8] sm:$0xff] }
0x1502   :  { %15746 = vmatprep.mubr.msk.f32.mxu1 %vm56_vm0, %v19950_v10  ;;  %23768 = vst [vmem:[#allocation8_spill] sm:$0xff] %v20217_v52 }
0x1505   :  { %15747 = vmatmul.mubr.msk.f32.gmra.mxu1 %vm56_vm0, %v19957_v44 }
0x1506   :  { %15749 = vmatprep.mubr.msk.f32.mxu1 %vm56_vm0, %v19964_v63 }
0x1509   :  { %15750 = vmatmul.mubr.msk.f32.gmra.mxu1 %vm56_vm0, %v19971_v5 }
0x150a   :  { %15752 = vmatprep.mubr.msk.f32.mxu1 %vm56_vm0, %v19978_v62 }
0x150d   :  { %15753 = vmatmul.mubr.msk.f32.gmra.mxu1 %vm56_vm0, %v19985_v2 }
0x150e   :  { %6862 = vmatprep.mubr.f32.mxu1 %v23534_v40 }
0x15b9   :  { %v20038_v3 = vpop.f32.mrf.mxu1 }
0x15bb   :  { %v6695_v0 = vpop.f32.mrf.mxu1 }
0x15bd   :  { %v20040_v56 = vpop.f32.mrf.mxu1 }
0x15bf   :  { %v20042_v38 = vpop.f32.mrf.mxu1 }
0x15c1   :  { %v15745_v33 = vpop.f32.mrf.mxu1 }
0x15c3   :  { %v6715_v26 = vpop.f32.mrf.mxu1 }
0x15c4   :  { %13709 = vmatmul.mubr.msk.f32.vlgmr.msra.gmra.mxu1 %vm56_vm0, %v6715_v26  ;;  %13713 = vmatmul.mubr.msk.f32.vlgmr.msra.gmra.mxu0 %vm56_vm0, %v6715_v26  ;;  %v20266_v26 = vld [vmem:[%s23241_s8 + $0x50] sm:$0xff] }
0x15c5   :  { %6868 = vmatprep.mubr.f32.mxu1 %v23534_v40  ;;  %6957 = vmatprep.mubr.f32.mxu0 %v23534_v40  ;;  %v15748_v46 = vpop.f32.mrf.mxu1  ;;  %23775 = vst [vmem:[#allocation15_spill] sm:$0xff] %v20266_v26 }
0x15c6   :  { %7013 = vmatpush1.msra.mxu1 %v6766_v29  ;;  %7102 = vmatpush1.msra.mxu0 %v6768_v13  ;;  %v20273_v29 = vld [vmem:[%s23241_s8 + $0xc8] sm:$0xff] }
0x15c7   :  { %7014 = vmatprep.subr.mxu1 %v6763_v41  ;;  %7103 = vmatprep.subr.mxu0 %v6765_v6  ;;  %v6725_v24 = vpop.f32.mrf.mxu1  ;;  %23776 = vst [vmem:[#allocation16_spill] sm:$0xff] %v20273_v29  ;;  %v20280_v13 = vld [vmem:[%s23241_s8 + $0x48] sm:$0xff]  ;;  %v20287_v41 = vld [vmem:[%s23241_s8 + $0xc0] sm:$0xff] }
0x15c8   :  { %13710 = vmatmul.mubr.msk.f32.gmra.mxu1 %vm56_vm0, %v15745_v33  ;;  %13714 = vmatmul.mubr.msk.f32.gmra.mxu0 %vm56_vm0, %v15745_v33  ;;  %v20259_v33 = vld [vmem:[%s23241_s8 + $0xd0] sm:$0xff]  ;;  %23777 = vst [vmem:[#allocation17_spill] sm:$0xff] %v20280_v13  ;;  %23778 = vst [vmem:[#allocation18_spill] sm:$0xff] %v20287_v41  ;;  %v20294_v6 = vld [vmem:[%s23241_s8 + $0x40] sm:$0xff] }
0x15c9   :  { %6874 = vmatprep.mubr.f32.mxu1 %v23534_v40  ;;  %6963 = vmatprep.mubr.f32.mxu0 %v23534_v40  ;;  %v15751_v47 = vpop.f32.mrf.mxu1  ;;  %23774 = vst [vmem:[#allocation14_spill] sm:$0xff] %v20259_v33  ;;  %23779 = vst [vmem:[#allocation19_spill] sm:$0xff] %v20294_v6 }
0x15ca   :  { %7015 = vmatpush1.msra.mxu1 %v6762_v57  ;;  %7104 = vmatpush1.msra.mxu0 %v6764_v35  ;;  %v20308_v57 = vld [vmem:[%s23241_s8 + $0x38] sm:$0xff]  ;;  %v20315_v35 = vld [vmem:[%s23241_s8 + $0xb0] sm:$0xff] }
0x15cb   :  { %7016 = vmatprep.subr.mxu1 %v6759_v4  ;;  %7105 = vmatprep.subr.mxu0 %v6761_v45  ;;  %v6735_v39 = vpop.f32.mrf.mxu1  ;;  %23781 = vst [vmem:[#allocation21_spill] sm:$0xff] %v20308_v57  ;;  %23782 = vst [vmem:[#allocation22_spill] sm:$0xff] %v20315_v35  ;;  %v20322_v4 = vld [vmem:[%s23241_s8 + $0x30] sm:$0xff]  ;;  %v20329_v45 = vld [vmem:[%s23241_s8 + $0xa8] sm:$0xff] }
0x15cc   :  { %13711 = vmatmul.mubr.msk.f32.gmra.mxu1 %vm56_vm0, %v6725_v24  ;;  %13715 = vmatmul.mubr.msk.f32.gmra.mxu0 %vm56_vm0, %v6725_v24  ;;  %23783 = vst [vmem:[#allocation23_spill] sm:$0xff] %v20322_v4  ;;  %23784 = vst [vmem:[#allocation24_spill] sm:$0xff] %v20329_v45  ;;  %v20336_v24 = vld [vmem:[%s23241_s8 + $0x28] sm:$0xff] }
0x15cd   :  { %6880 = vmatprep.mubr.f32.mxu1 %v23534_v40  ;;  %6969 = vmatprep.mubr.f32.mxu0 %v23534_v40  ;;  %v15754_v59 = vpop.f32.mrf.mxu1  ;;  %23785 = vst [vmem:[#allocation25_spill] sm:$0xff] %v20336_v24 }
0x15ce   :  { %7017 = vmatpush1.msra.mxu1 %v6758_v54  ;;  %7106 = vmatpush1.msra.mxu0 %v6760_v1  ;;  %v20343_v54 = vld [vmem:[%s23241_s8 + $0xa0] sm:$0xff] }
0x15cf   :  { %7018 = vmatprep.subr.mxu1 %v6755_v25  ;;  %7107 = vmatprep.subr.mxu0 %v6757_v30  ;;  %v6745_v23 = vpop.f32.mrf.mxu1  ;;  %23786 = vst [vmem:[#allocation26_spill] sm:$0xff] %v20343_v54  ;;  %v20350_v1 = vld [vmem:[%s23241_s8 + $0x20] sm:$0xff]  ;;  %v20357_v25 = vld [vmem:[%s23241_s8 + $0x98] sm:$0xff] }
0x15d0   :  { %13712 = vmatmul.mubr.msk.f32.gmra.mxu1 %vm56_vm0, %v15748_v46  ;;  %13716 = vmatmul.mubr.msk.f32.gmra.mxu0 %vm56_vm0, %v15748_v46  ;;  %v20301_v46 = vld [vmem:[%s23241_s8 + $0xb8] sm:$0xff]  ;;  %23787 = vst [vmem:[#allocation27_spill] sm:$0xff] %v20350_v1  ;;  %23788 = vst [vmem:[#allocation28_spill] sm:$0xff] %v20357_v25 }
0x15d1   :  { %7019 = vmatpush1.msra.mxu1 %v6754_v17  ;;  %7052 = vmatprep.mubr.f32.mxu1 %v23534_v40  ;;  %23780 = vst [vmem:[#allocation20_spill] sm:$0xff] %v20301_v46  ;;  %v20364_v30 = vld [vmem:[%s23241_s8 + $0x18] sm:$0xff]  ;;  %v20371_v17 = vld [vmem:[%s23241_s8 + $0x90] sm:$0xff] }
0x15d2   :  { %7108 = vmatpush1.msra.mxu0 %v6756_v51  ;;  %7141 = vmatprep.mubr.f32.mxu0 %v23534_v40  ;;  %23789 = vst [vmem:[#allocation29_spill] sm:$0xff] %v20364_v30  ;;  %23790 = vst [vmem:[#allocation30_spill] sm:$0xff] %v20371_v17  ;;  %v20378_v51 = vld [vmem:[%s23241_s8 + $0x10] sm:$0xff] }
0x15d3   :  { %7218 = vmatprep.subr.mxu1 %v13738_v31  ;;  %7307 = vmatprep.subr.mxu0 %v13740_v49  ;;  %23791 = vst [vmem:[#allocation31_spill] sm:$0xff] %v20378_v51  ;;  %v20385_v31 = vld [vmem:[%s23241_s8 + $0x88] sm:$0xff] }
0x15d4   :  { %13717 = vmatmul.mubr.msk.f32.vlgmr.msra.gmra.mxu1 %vm56_vm0, %v6695_v0  ;;  %13721 = vmatmul.mubr.msk.f32.vlgmr.msra.gmra.mxu0 %vm56_vm0, %v6695_v0  ;;  %v20236_v0 = vld [vmem:[%s23241_s8 + $0x60] sm:$0xff]  ;;  %23792 = vst [vmem:[#allocation32_spill] sm:$0xff] %v20385_v31  ;;  %v20392_v49 = vld [vmem:[%s23241_s8 + $0x8] sm:$0xff] }
0x15d5   :  { %7058 = vmatprep.mubr.f32.mxu1 %v23534_v40  ;;  %7147 = vmatprep.mubr.f32.mxu0 %v23534_v40  ;;  %23771 = vst [vmem:[#allocation11_spill] sm:$0xff] %v20236_v0  ;;  %23793 = vst [vmem:[#allocation33_spill] sm:$0xff] %v20392_v49 }
0x15d6   :  { %7219 = vmatpush1.msra.mxu1 %v13737_v15  ;;  %7308 = vmatpush1.msra.mxu0 %v13739_v34  ;;  %v20399_v15 = vld [vmem:[%s23241_s8 + $0x80] sm:$0xff] }
0x15d7   :  { %7220 = vmatprep.subr.mxu1 %v13734_v32  ;;  %7309 = vmatprep.subr.mxu0 %v13736_v7  ;;  %23794 = vst [vmem:[#allocation34_spill] sm:$0xff] %v20399_v15  ;;  %v20406_v34 = vld [vmem:[%s23241_s8] sm:$0xff] }
0x15d8   :  { %13718 = vmatmul.mubr.msk.f32.gmra.mxu1 %vm56_vm0, %v20038_v3  ;;  %13722 = vmatmul.mubr.msk.f32.gmra.mxu0 %vm56_vm0, %v20038_v3  ;;  %v20231_v3 = vld [vmem:[%s23241_s8 + $0xe0] sm:$0xff]  ;;  %23795 = vst [vmem:[#allocation35_spill] sm:$0xff] %v20406_v34 }
0x15d9   :  { %7064 = vmatprep.mubr.f32.mxu1 %v23534_v40  ;;  %7153 = vmatprep.mubr.f32.mxu0 %v23534_v40  ;;  %23770 = vst [vmem:[#allocation10_spill] sm:$0xff] %v20231_v3 }
0x15da   :  { %7221 = vmatpush1.msra.mxu1 %v13733_v42  ;;  %7310 = vmatpush1.msra.mxu0 %v13735_v22 }
0x15db   :  { %7222 = vmatprep.subr.mxu1 %v13730_v58  ;;  %7311 = vmatprep.subr.mxu0 %v13732_v11 }
0x15dc   :  { %13719 = vmatmul.mubr.msk.f32.gmra.mxu1 %vm56_vm0, %v20042_v38  ;;  %13723 = vmatmul.mubr.msk.f32.gmra.mxu0 %vm56_vm0, %v20042_v38  ;;  %v20252_v38 = vld [vmem:[%s23241_s8 + $0x58] sm:$0xff] }
0x15dd   :  { %7070 = vmatprep.mubr.f32.mxu1 %v23534_v40  ;;  %7159 = vmatprep.mubr.f32.mxu0 %v23534_v40  ;;  %23773 = vst [vmem:[#allocation13_spill] sm:$0xff] %v20252_v38 }
0x15de   :  { %7223 = vmatpush1.msra.mxu1 %v13729_v61  ;;  %7312 = vmatpush1.msra.mxu0 %v13731_v16 }
0x15df   :  { %7224 = vmatprep.subr.mxu1 %v13726_v60  ;;  %7313 = vmatprep.subr.mxu0 %v13728_v37 }
0x15e0   :  { %13720 = vmatmul.mubr.msk.f32.gmra.mxu1 %vm56_vm0, %v20040_v56  ;;  %13724 = vmatmul.mubr.msk.f32.gmra.mxu0 %vm56_vm0, %v20040_v56  ;;  %v20245_v56 = vld [vmem:[%s23241_s8 + $0xd8] sm:$0xff] }
0x15e1   :  { %7225 = vmatpush1.msra.mxu1 %v13725_v9  ;;  %7258 = vmatprep.mubr.f32.mxu1 %v23534_v40  ;;  %23772 = vst [vmem:[#allocation12_spill] sm:$0xff] %v20245_v56 }
0x15e2   :  { %7314 = vmatpush1.msra.mxu0 %v13727_v14  ;;  %7347 = vmatprep.mubr.f32.mxu0 %v23534_v40 }
0x15e3   :  { %14881 = vmatprep.subr.mxu1 %v20189_v8  ;;  %14925 = vmatprep.subr.mxu0 %v20189_v8 }
0x15e4   :  { %13741 = vmatmul.mubr.msk.f32.vlgmr.msra.gmra.mxu1 %vm56_vm0, %v6735_v39  ;;  %13745 = vmatmul.mubr.msk.f32.vlgmr.msra.gmra.mxu0 %vm56_vm0, %v6735_v39 }
0x15e5   :  { %7264 = vmatprep.mubr.f32.mxu1 %v23534_v40  ;;  %7353 = vmatprep.mubr.f32.mxu0 %v23534_v40 }
0x15e6   :  { %14882 = vmatpush3.msra.mxu1 %v20194_v28  ;;  %14926 = vmatpush3.msra.mxu0 %v20194_v28 }
0x15e7   :  { %14883 = vmatprep.subr.mxu1 %v20203_v50  ;;  %14927 = vmatprep.subr.mxu0 %v20203_v50 }
0x15e8   :  { %13742 = vmatmul.mubr.msk.f32.gmra.mxu1 %vm56_vm0, %v15751_v47  ;;  %13746 = vmatmul.mubr.msk.f32.gmra.mxu0 %vm56_vm0, %v15751_v47 }
0x15e9   :  { %7270 = vmatprep.mubr.f32.mxu1 %v23534_v40  ;;  %7359 = vmatprep.mubr.f32.mxu0 %v23534_v40 }
0x15ea   :  { %14884 = vmatpush3.msra.mxu1 %v20208_v19  ;;  %14928 = vmatpush3.msra.mxu0 %v20208_v19 }
0x15eb   :  { %14885 = vmatprep.subr.mxu1 %v20217_v52  ;;  %14929 = vmatprep.subr.mxu0 %v20217_v52 }
0x15ec   :  { %13743 = vmatmul.mubr.msk.f32.gmra.mxu1 %vm56_vm0, %v6745_v23  ;;  %13747 = vmatmul.mubr.msk.f32.gmra.mxu0 %vm56_vm0, %v6745_v23 }
0x15ed   :  { %7276 = vmatprep.mubr.f32.mxu1 %v23534_v40  ;;  %7365 = vmatprep.mubr.f32.mxu0 %v23534_v40 }
0x15ee   :  { %14886 = vmatpush3.msra.mxu1 %v20222_v20  ;;  %14930 = vmatpush3.msra.mxu0 %v20222_v20 }
0x15ef   :  { %14887 = vmatprep.subr.mxu1 %v20231_v3  ;;  %14931 = vmatprep.subr.mxu0 %v20231_v3 }
0x15f0   :  { %13744 = vmatmul.mubr.msk.f32.gmra.mxu1 %vm56_vm0, %v15754_v59  ;;  %13748 = vmatmul.mubr.msk.f32.gmra.mxu0 %vm56_vm0, %v15754_v59 }
0x15f1   :  { %14888 = vmatpush3.msra.mxu1 %v20236_v0  ;;  %14932 = vmatpush3.msra.mxu0 %v20236_v0 }
0x15f2   :  { %14889 = vmatprep.subr.mxu1 %v20245_v56  ;;  %14933 = vmatprep.subr.mxu0 %v20245_v56 }
0x15f3   :  { %14890 = vmatpush3.msra.mxu1 %v20252_v38  ;;  %14934 = vmatpush3.msra.mxu0 %v20252_v38 }
0x15f4   :  { %14891 = vmatprep.subr.mxu1 %v20259_v33  ;;  %14935 = vmatprep.subr.mxu0 %v20259_v33 }
0x15f5   :  { %14892 = vmatpush3.msra.mxu1 %v20266_v26  ;;  %14936 = vmatpush3.msra.mxu0 %v20266_v26 }
0x15f6   :  { %14893 = vmatprep.subr.mxu1 %v20273_v29  ;;  %14937 = vmatprep.subr.mxu0 %v20273_v29 }
0x15f7   :  { %14894 = vmatpush3.msra.mxu1 %v20280_v13  ;;  %14938 = vmatpush3.msra.mxu0 %v20280_v13 }
0x15f8   :  { %14895 = vmatprep.subr.mxu1 %v20287_v41  ;;  %14939 = vmatprep.subr.mxu0 %v20287_v41 }
0x15f9   :  { %14896 = vmatpush3.msra.mxu1 %v20294_v6  ;;  %14940 = vmatpush3.msra.mxu0 %v20294_v6 }
0x15fa   :  { %14897 = vmatprep.subr.mxu1 %v20301_v46  ;;  %14941 = vmatprep.subr.mxu0 %v20301_v46 }
0x15fb   :  { %14898 = vmatpush3.msra.mxu1 %v20308_v57  ;;  %14942 = vmatpush3.msra.mxu0 %v20308_v57 }
0x15fc   :  { %14899 = vmatprep.subr.mxu1 %v20315_v35  ;;  %14943 = vmatprep.subr.mxu0 %v20315_v35 }
0x15fd   :  { %14900 = vmatpush3.msra.mxu1 %v20322_v4  ;;  %14944 = vmatpush3.msra.mxu0 %v20322_v4 }
0x15fe   :  { %14901 = vmatprep.subr.mxu1 %v20329_v45  ;;  %14945 = vmatprep.subr.mxu0 %v20329_v45 }
0x15ff   :  { %14902 = vmatpush3.msra.mxu1 %v20336_v24  ;;  %14946 = vmatpush3.msra.mxu0 %v20336_v24 }
0x1600   :  { %14903 = vmatprep.subr.mxu1 %v20343_v54  ;;  %14947 = vmatprep.subr.mxu0 %v20343_v54 }
0x1601   :  { %14904 = vmatpush3.msra.mxu1 %v20350_v1  ;;  %14948 = vmatpush3.msra.mxu0 %v20350_v1 }
0x1602   :  { %14905 = vmatprep.subr.mxu1 %v20357_v25  ;;  %14949 = vmatprep.subr.mxu0 %v20357_v25 }
0x1603   :  { %14906 = vmatpush3.msra.mxu1 %v20364_v30  ;;  %14950 = vmatpush3.msra.mxu0 %v20364_v30 }
0x1604   :  { %14907 = vmatprep.subr.mxu1 %v20371_v17  ;;  %14951 = vmatprep.subr.mxu0 %v20371_v17 }
0x1605   :  { %14908 = vmatpush3.msra.mxu1 %v20378_v51  ;;  %14952 = vmatpush3.msra.mxu0 %v20378_v51 }
0x1606   :  { %14909 = vmatprep.subr.mxu1 %v20385_v31  ;;  %14953 = vmatprep.subr.mxu0 %v20385_v31 }
0x1607   :  { %14910 = vmatpush3.msra.mxu1 %v20392_v49  ;;  %14954 = vmatpush3.msra.mxu0 %v20392_v49 }
0x1608   :  { %14911 = vmatprep.subr.mxu1 %v20399_v15  ;;  %14955 = vmatprep.subr.mxu0 %v20399_v15 }
0x1609   :  { %14912 = vmatpush3.msra.mxu1 %v20406_v34  ;;  %14956 = vmatpush3.msra.mxu0 %v20406_v34 }
0x1684   :  { %v6864_v32 = vpop.f32.mrf.mxu1  ;;  %v6953_v7 = vpop.f32.mrf.mxu0 }
0x1686   :  { %v6866_v42 = vpop.f32.mrf.mxu1  ;;  %v6955_v22 = vpop.f32.mrf.mxu0 }
0x1688   :  { %v6870_v58 = vpop.f32.mrf.mxu1  ;;  %v6959_v11 = vpop.f32.mrf.mxu0 }
0x168a   :  { %v6872_v61 = vpop.f32.mrf.mxu1  ;;  %v6961_v16 = vpop.f32.mrf.mxu0 }
0x168c   :  { %v6876_v60 = vpop.f32.mrf.mxu1  ;;  %v6965_v37 = vpop.f32.mrf.mxu0 }
0x168e   :  { %v6878_v9 = vpop.f32.mrf.mxu1  ;;  %v6967_v47 = vpop.f32.mrf.mxu0 }
0x1690   :  { %v20410_v14 = vpop.f32.mrf.mxu1  ;;  %v20412_v39 = vpop.f32.mrf.mxu0 }
0x1692   :  { %v20414_v59 = vpop.f32.mrf.mxu1  ;;  %v20416_v23 = vpop.f32.mrf.mxu0 }
0x1694   :  { %v7054_v34 = vpop.f32.mrf.mxu1  ;;  %v7143_v15 = vpop.f32.mrf.mxu0 }
0x1695   :  { %v7055_v6 = vadd.f32 %v7054_v34, %v6864_v32  ;;  %v7144_v29 = vadd.f32 %v7143_v15, %v6953_v7  ;;  %v20421_v34 = vld [vmem:[%s23242_s7 + $0x8] sm:$0xff] }
0x1696   :  { %v7056_v49 = vpop.f32.mrf.mxu1  ;;  %v7145_v31 = vpop.f32.mrf.mxu0 }
0x1697   :  { %v7057_v26 = vadd.f32 %v7056_v49, %v6866_v42  ;;  %v7146_v33 = vadd.f32 %v7145_v31, %v6955_v22 }
0x1698   :  { %v7060_v51 = vpop.f32.mrf.mxu1  ;;  %v7149_v17 = vpop.f32.mrf.mxu0 }
0x1699   :  { %v7061_v19 = vadd.f32 %v7060_v51, %v6870_v58  ;;  %v7150_v50 = vadd.f32 %v7149_v17, %v6959_v11 }
0x169a   :  { %v7062_v30 = vpop.f32.mrf.mxu1  ;;  %v7151_v25 = vpop.f32.mrf.mxu0 }
0x169b   :  { %v7063_v2 = vadd.f32 %v7062_v30, %v6872_v61  ;;  %v7152_v62 = vadd.f32 %v7151_v25, %v6961_v16  ;;  %v20453_v61 = vld [vmem:[%s23242_s7 + $0x28] sm:$0xff] }
0x169c   :  { %v7066_v1 = vpop.f32.mrf.mxu1  ;;  %v7155_v54 = vpop.f32.mrf.mxu0 }
0x169d   :  { %v7067_v17 = vadd.f32 %v7066_v1, %v6876_v60 }
0x169e   :  { %v7068_v24 = vpop.f32.mrf.mxu1  ;;  %v7157_v45 = vpop.f32.mrf.mxu0 }
0x169f   :  { %v7069_v31 = vadd.f32 %v7068_v24, %v6878_v9  ;;  %v7158_v15 = vadd.f32 %v7157_v45, %v6967_v47 }
0x16a0   :  { %v7072_v4 = vpop.f32.mrf.mxu1  ;;  %v7161_v35 = vpop.f32.mrf.mxu0 }
0x16a1   :  { %v7073_v32 = vadd.f32 %v7072_v4, %v20410_v14  ;;  %v7162_v7 = vadd.f32 %v7161_v35, %v20412_v39  ;;  %v20460_v35 = vld [vmem:[%s23242_s7 + $0x20] sm:$0xff] }
0x16a2   :  { %v7074_v57 = vpop.f32.mrf.mxu1  ;;  %v7163_v46 = vpop.f32.mrf.mxu0 }
0x16a3   :  { %v7075_v58 = vadd.f32 %v7074_v57, %v20414_v59  ;;  %v7164_v11 = vadd.f32 %v7163_v46, %v20416_v23  ;;  %v20467_v59 = vld [vmem:[%s23242_s7 + $0x38] sm:$0xff] }
0x16a4   :  { %v7260_v41 = vpop.f32.mrf.mxu1  ;;  %v7349_v13 = vpop.f32.mrf.mxu0 }
0x16a5   :  { %v7372_v38 = vadd.f32 %v7260_v41, %v7055_v6  ;;  %v7374_v3 = vadd.f32 %v7349_v13, %v7144_v29 }
0x16a6   :  { %v7262_v56 = vpop.f32.mrf.mxu1  ;;  %v7351_v0 = vpop.f32.mrf.mxu0 }
0x16a7   :  { %v7373_v20 = vadd.f32 %v7262_v56, %v7057_v26  ;;  %v7375_v52 = vadd.f32 %v7351_v0, %v7146_v33  ;;  %v20428_v56 = vld [vmem:[%s23242_s7] sm:$0xff] }
0x16a8   :  { %v7266_v28 = vpop.f32.mrf.mxu1  ;;  %v7355_v8 = vpop.f32.mrf.mxu0  ;;  %v7420_v0 = vmul.f32 %v20428_v56, %v7372_v38  ;;  %v7513_v13 = vmul.f32 %v20428_v56, %v7374_v3 }
0x16a9   :  { %v7421_v49 = vmul.f32 %v20421_v34, %v7373_v20  ;;  %v7514_v41 = vmul.f32 %v20421_v34, %v7375_v52  ;;  %v7376_v33 = vadd.f32 %v7266_v28, %v7061_v19  ;;  %v7378_v6 = vadd.f32 %v7355_v8, %v7150_v50  ;;  %v20435_v28 = vld [vmem:[%s23242_s7 + $0x18] sm:$0xff] }
0x16aa   :  { %v7268_v26 = vpop.f32.mrf.mxu1  ;;  %v7357_v29 = vpop.f32.mrf.mxu0  ;;  %v7156_v20 = vadd.f32 %v7155_v54, %v6965_v37 }
0x16ab   :  { %v7377_v25 = vadd.f32 %v7268_v26, %v7063_v2  ;;  %v7379_v30 = vadd.f32 %v7357_v29, %v7152_v62  ;;  %7492 = vmatprep.mubr.f32.mxu1 %v7421_v49  ;;  %7585 = vmatprep.mubr.f32.mxu0 %v7514_v41  ;;  %v20442_v62 = vld [vmem:[%s23242_s7 + $0x10] sm:$0xff]  ;;  %v20481_v26 = vld [vmem:[%s23239_s4] sm:$0xff] }
0x16ac   :  { %v7272_v52 = vpop.f32.mrf.mxu1  ;;  %v7361_v51 = vpop.f32.mrf.mxu0  ;;  %7493 = vmatmul.mubr.f32.vlgmr.msra.gmra.mxu1 %v7420_v0  ;;  %7586 = vmatmul.mubr.f32.vlgmr.msra.gmra.mxu0 %v7513_v13  ;;  %v7422_v2 = vmul.f32 %v20442_v62, %v7376_v33  ;;  %v7515_v45 = vmul.f32 %v20442_v62, %v7378_v6  ;;  %v20474_v41 = vld [vmem:[%s23242_s7 + $0x30] sm:$0xff] }
0x16ad   :  { %v7423_v19 = vmul.f32 %v20435_v28, %v7377_v25  ;;  %v7516_v8 = vmul.f32 %v20435_v28, %v7379_v30  ;;  %v7380_v50 = vadd.f32 %v7272_v52, %v7067_v17  ;;  %v7382_v24 = vadd.f32 %v7361_v51, %v7156_v20  ;;  %v13750_v20 = vld [vmem:[%s23243_s0 + $0x88] sm:$0xff]  ;;  %v13749_v51 = vld [vmem:[%s23243_s0 + $0x80] sm:$0xff] }
0x16ae   :  { %v7274_v3 = vpop.f32.mrf.mxu1  ;;  %v7363_v38 = vpop.f32.mrf.mxu0 }
0x16af   :  { %v7381_v54 = vadd.f32 %v7274_v3, %v7069_v31  ;;  %v7383_v1 = vadd.f32 %v7363_v38, %v7158_v15  ;;  %7497 = vmatprep.mubr.f32.mxu1 %v7423_v19  ;;  %7590 = vmatprep.mubr.f32.mxu0 %v7516_v8  ;;  %v7424_v4 = vmul.f32 %v20460_v35, %v7380_v50  ;;  %v13751_v15 = vld [vmem:[%s23243_s0 + $0x90] sm:$0xff] }
0x16b0   :  { %v7278_v42 = vpop.f32.mrf.mxu1  ;;  %v7367_v22 = vpop.f32.mrf.mxu0  ;;  %7498 = vmatmul.mubr.f32.gmra.mxu1 %v7422_v2  ;;  %7591 = vmatmul.mubr.f32.gmra.mxu0 %v7515_v45  ;;  %v7517_v9 = vmul.f32 %v20460_v35, %v7382_v24  ;;  %v13752_v45 = vld [vmem:[%s23243_s0 + $0x98] sm:$0xff] }
0x16b1   :  { %v7425_v16 = vmul.f32 %v20453_v61, %v7381_v54  ;;  %v7518_v60 = vmul.f32 %v20453_v61, %v7383_v1  ;;  %v7384_v57 = vadd.f32 %v7278_v42, %v7073_v32  ;;  %v7386_v47 = vadd.f32 %v7367_v22, %v7162_v7 }
0x16b2   :  { %v7280_v37 = vpop.f32.mrf.mxu1  ;;  %v7369_v46 = vpop.f32.mrf.mxu0 }
0x16b3   :  { %v7385_v14 = vadd.f32 %v7280_v37, %v7075_v58  ;;  %v7387_v39 = vadd.f32 %v7369_v46, %v7164_v11  ;;  %7502 = vmatprep.mubr.f32.mxu1 %v7425_v16  ;;  %7595 = vmatprep.mubr.f32.mxu0 %v7518_v60  ;;  %v7426_v0 = vmul.f32 %v20474_v41, %v7384_v57 }
0x16b4   :  { %7503 = vmatmul.mubr.f32.gmra.mxu1 %v7424_v4  ;;  %7596 = vmatmul.mubr.f32.gmra.mxu0 %v7517_v9  ;;  %v7519_v33 = vmul.f32 %v20474_v41, %v7386_v47 }
0x16b5   :  { %v7427_v23 = vmul.f32 %v20467_v59, %v7385_v14  ;;  %v7520_v49 = vmul.f32 %v20467_v59, %v7387_v39 }
0x16b7   :  { %7507 = vmatprep.mubr.f32.mxu1 %v7427_v23  ;;  %7600 = vmatprep.mubr.f32.mxu0 %v7520_v49 }
0x16b8   :  { %7508 = vmatmul.mubr.f32.gmra.mxu1 %v7426_v0  ;;  %7601 = vmatmul.mubr.f32.gmra.mxu0 %v7519_v33  ;;  %v13777_v33 = vld [vmem:[%s23244_s6 + $0x40] sm:$0xff] }
0x16b9   :  { %15763 = vmatprep.mubr.msk.f32.mxu1 %vm56_vm0, %v20481_v26  ;;  %7893 = vmatprep.mubr.f32.mxu0 %v23534_v40 }
0x176c   :  { %v14913_v29 = vpop.f32.mrf.mxu1 }
0x176e   :  { %v14914_v13 = vpop.f32.mrf.mxu1 }
0x176f   :  { %v14915_v17 = vadd.f32 %v14914_v13, %v14913_v29  ;;  %v13800_v29 = vld [vmem:[%s23244_s6 + $0xb8] sm:$0xff]  ;;  %v13799_v13 = vld [vmem:[%s23244_s6 + $0xb0] sm:$0xff] }
0x1770   :  { %v14916_v6 = vpop.f32.mrf.mxu1 }
0x1771   :  { %v7611_v2 = vadd.f32 %v14915_v17, %v13749_v51  ;;  %v13795_v17 = vld [vmem:[%s23244_s6 + $0x90] sm:$0xff]  ;;  %v13793_v51 = vld [vmem:[%s23244_s6 + $0x80] sm:$0xff] }
0x1772   :  { %v14917_v25 = vpop.f32.mrf.mxu1 }
0x1773   :  { %v14918_v30 = vadd.f32 %v14917_v25, %v14916_v6  ;;  %v13753_v32 = vmul.f32 -1.442695, %v7611_v2  ;;  %v13798_v6 = vld [vmem:[%s23244_s6 + $0xa8] sm:$0xff]  ;;  %v13797_v25 = vld [vmem:[%s23244_s6 + $0xa0] sm:$0xff] }
0x1774   :  { %v14919_v52 = vpop.f32.mrf.mxu1 }
0x1775   :  { %v7612_v19 = vadd.f32 %v14918_v30, %v13750_v20  ;;  %v13796_v30 = vld [vmem:[%s23244_s6 + $0x98] sm:$0xff] }
0x1776   :  { %v14920_v31 = vpop.f32.mrf.mxu1  ;;  %v7808_v20 = vld [vmem:[%s23244_s6 + $0x38] sm:$0xff] }
0x1777   :  { %v14921_v8 = vadd.f32 %v14920_v31, %v14919_v52  ;;  %v13754_v24 = vmul.f32 -1.442695, %v7612_v19  ;;  %v13794_v52 = vld [vmem:[%s23244_s6 + $0x88] sm:$0xff] }
0x1778   :  { %v14922_v50 = vpop.f32.mrf.mxu1 }
0x1779   :  { %v7613_v3 = vadd.f32 %v14921_v8, %v13751_v15 }
0x177a   :  { %v14923_v38 = vpop.f32.mrf.mxu1 }
0x177b   :  { %v13755_v54 = vmul.f32 -1.442695, %v7613_v3  ;;  %v14924_v1 = vadd.f32 %v14923_v38, %v14922_v50  ;;  %v7807_v50 = vld [vmem:[%s23244_s6 + $0x30] sm:$0xff]  ;;  %v7806_v38 = vld [vmem:[%s23244_s6 + $0x28] sm:$0xff] }
0x177d   :  { %16106 = vpow2.f32 %v13755_v54  ;;  %v7614_v7 = vadd.f32 %v14924_v1, %v13752_v45  ;;  %v7805_v45 = vld [vmem:[%s23244_s6 + $0x20] sm:$0xff]  ;;  %v7804_v54 = vld [vmem:[%s23244_s6 + $0x18] sm:$0xff]  ;;  %v7803_v1 = vld [vmem:[%s23244_s6 + $0x10] sm:$0xff] }
0x177e   :  { %16108 = vpow2.f32 %v13754_v24 }
0x177f   :  { %v13756_v42 = vmul.f32 -1.442695, %v7614_v7  ;;  %16110 = vpow2.f32 %v13753_v32  ;;  %v7802_v7 = vld [vmem:[%s23244_s6 + $0x8] sm:$0xff] }
0x1781   :  { %16112 = vpow2.f32 %v13756_v42  ;;  %v7801_v42 = vld [vmem:[%s23244_s6] sm:$0xff] }
0x178a   :  { %v16107_v22 = vpop.eup %16106 }
0x178b   :  { %v16109_v58 = vpop.eup %16108  ;;  %v7629_v11 = vadd.f32 1.0, %v16107_v22 }
0x178c   :  { %v16111_v16 = vpop.eup %16110  ;;  %v7628_v4 = vadd.f32 1.0, %v16109_v58 }
0x178d   :  { %16114 = vrcp.f32 %v7629_v11  ;;  %v7627_v37 = vadd.f32 1.0, %v16111_v16  ;;  %v23798_v16 = vld [vmem:[#allocation4_spill] sm:$0xff] }
0x178e   :  { %v16113_v60 = vpop.eup %16112 }
0x178f   :  { %v7630_v57 = vadd.f32 1.0, %v16113_v60 }
0x1791   :  { %16116 = vrcp.f32 %v7630_v57  ;;  %v23800_v57 = vld [vmem:[#allocation6_spill] sm:$0xff] }
0x1792   :  { %16118 = vrcp.f32 %v7628_v4  ;;  %v23799_v4 = vld [vmem:[#allocation5_spill] sm:$0xff] }
0x1793   :  { %16120 = vrcp.f32 %v7627_v37  ;;  %v23801_v37 = vld [vmem:[#allocation7_spill] sm:$0xff] }
0x179a   :  { %v16115_v46 = vpop.eup %16114 }
0x179b   :  { %v7674_v39 = vmul.f32 %v16115_v46, %v19883_v36  ;;  %v23802_v46 = vld [vmem:[#allocation8_spill] sm:$0xff] }
0x179e   :  { %v16117_v9 = vpop.eup %16116 }
0x179f   :  { %v7675_v47 = vmul.f32 %v16117_v9, %v19891_v43  ;;  %v16119_v14 = vpop.eup %16118  ;;  %v23803_v9 = vld [vmem:[#allocation9_spill] sm:$0xff] }
0x17a0   :  { %v16121_v23 = vpop.eup %16120  ;;  %v7673_v49 = vmul.f32 %v16119_v14, %v19875_v21  ;;  %v23805_v14 = vld [vmem:[#allocation11_spill] sm:$0xff] }
0x17a1   :  { %15755 = vmatprep.subr.mxu1 %v7675_v47  ;;  %v7672_v0 = vmul.f32 %v16121_v23, %v19867_v55  ;;  %v23807_v23 = vld [vmem:[#allocation13_spill] sm:$0xff] }
0x17a2   :  { %15756 = vmatpush3.msra.mxu1 %v7675_v47  ;;  %v23804_v47 = vld [vmem:[#allocation10_spill] sm:$0xff] }
0x17a3   :  { %15757 = vmatprep.subr.mxu1 %v7674_v39 }
0x17a4   :  { %15758 = vmatpush3.msra.mxu1 %v7674_v39  ;;  %v23806_v39 = vld [vmem:[#allocation12_spill] sm:$0xff] }
0x17a5   :  { %15759 = vmatprep.subr.mxu1 %v7673_v49 }
0x17a6   :  { %15760 = vmatpush3.msra.mxu1 %v7673_v49  ;;  %v23808_v49 = vld [vmem:[#allocation14_spill] sm:$0xff] }
0x17a7   :  { %15761 = vmatprep.subr.mxu1 %v7672_v0 }
0x17a8   :  { %15762 = vmatpush3.msra.mxu1 %v7672_v0  ;;  %v23809_v0 = vld [vmem:[#allocation15_spill] sm:$0xff] }
0x17a9   :  { %15764 = vmatmul.mubr.msk.f32.vlgmr.msra.gmra.mxu1 %vm56_vm0, %v19915_v53  ;;  %v23796_v53 = vld [vmem:[#allocation2_spill] sm:$0xff]  ;;  %8063 = vmatprep.subr.mxu1 %v13800_v29  ;;  %v23821_v29 = vld [vmem:[#allocation27_spill] sm:$0xff] }
0x17aa   :  { %15766 = vmatprep.mubr.msk.f32.mxu1 %vm56_vm0, %v19922_v18  ;;  %v23797_v18 = vld [vmem:[#allocation3_spill] sm:$0xff]  ;;  %8064 = vmatpush1.msra.mxu1 %v13799_v13  ;;  %v23822_v13 = vld [vmem:[#allocation28_spill] sm:$0xff] }
0x17ab   :  { %8065 = vmatprep.subr.mxu1 %v13798_v6  ;;  %v23823_v6 = vld [vmem:[#allocation29_spill] sm:$0xff] }
0x17ac   :  { %8066 = vmatpush1.msra.mxu1 %v13797_v25  ;;  %v23824_v25 = vld [vmem:[#allocation30_spill] sm:$0xff] }
0x17ad   :  { %15767 = vmatmul.mubr.msk.f32.gmra.mxu1 %vm56_vm0, %v19929_v48  ;;  %v13784_v48 = vld [vmem:[%s23244_s6 + $0x78] sm:$0xff]  ;;  %8067 = vmatprep.subr.mxu1 %v13796_v30  ;;  %v23825_v30 = vld [vmem:[#allocation31_spill] sm:$0xff] }
0x17ae   :  { %15769 = vmatprep.mubr.msk.f32.mxu1 %vm56_vm0, %v19936_v27  ;;  %7853 = vmatprep.subr.mxu0 %v13784_v48  ;;  %v13783_v27 = vld [vmem:[%s23244_s6 + $0x70] sm:$0xff]  ;;  %v23813_v48 = vld [vmem:[#allocation19_spill] sm:$0xff] }
0x17af   :  { %7854 = vmatpush1.msra.mxu0 %v13783_v27  ;;  %8068 = vmatpush1.msra.mxu1 %v13795_v17  ;;  %v23814_v27 = vld [vmem:[#allocation20_spill] sm:$0xff] }
0x17b0   :  { %8069 = vmatprep.subr.mxu1 %v13794_v52  ;;  %v23826_v17 = vld [vmem:[#allocation32_spill] sm:$0xff]  ;;  %v23828_v52 = vld [vmem:[#allocation34_spill] sm:$0xff] }
0x17b1   :  { %15770 = vmatmul.mubr.msk.f32.gmra.mxu1 %vm56_vm0, %v19943_v12  ;;  %v13782_v12 = vld [vmem:[%s23244_s6 + $0x68] sm:$0xff] }
0x17b2   :  { %15772 = vmatprep.mubr.msk.f32.mxu1 %vm56_vm0, %v19950_v10  ;;  %7855 = vmatprep.subr.mxu0 %v13782_v12  ;;  %v13781_v10 = vld [vmem:[%s23244_s6 + $0x60] sm:$0xff]  ;;  %v23815_v12 = vld [vmem:[#allocation21_spill] sm:$0xff] }
0x17b3   :  { %7856 = vmatpush1.msra.mxu0 %v13781_v10  ;;  %8070 = vmatpush1.msra.mxu1 %v13793_v51  ;;  %v23816_v10 = vld [vmem:[#allocation22_spill] sm:$0xff]  ;;  %v23829_v51 = vld [vmem:[#allocation35_spill] sm:$0xff] }
0x17b5   :  { %15773 = vmatmul.mubr.msk.f32.gmra.mxu1 %vm56_vm0, %v19957_v44  ;;  %v13780_v44 = vld [vmem:[%s23244_s6 + $0x58] sm:$0xff] }
0x17b6   :  { %15775 = vmatprep.mubr.msk.f32.mxu1 %vm56_vm0, %v19964_v63  ;;  %7857 = vmatprep.subr.mxu0 %v13780_v44  ;;  %v13779_v63 = vld [vmem:[%s23244_s6 + $0x50] sm:$0xff]  ;;  %v23817_v44 = vld [vmem:[#allocation23_spill] sm:$0xff] }
0x17b7   :  { %7858 = vmatpush1.msra.mxu0 %v13779_v63  ;;  %v23818_v63 = vld [vmem:[#allocation24_spill] sm:$0xff] }
0x17b9   :  { %15776 = vmatmul.mubr.msk.f32.gmra.mxu1 %vm56_vm0, %v19971_v5  ;;  %v13778_v5 = vld [vmem:[%s23244_s6 + $0x48] sm:$0xff] }
0x17ba   :  { %15778 = vmatprep.mubr.msk.f32.mxu1 %vm56_vm0, %v23796_v53  ;;  %7859 = vmatprep.subr.mxu0 %v13778_v5  ;;  %v23811_v53 = vld [vmem:[#allocation17_spill] sm:$0xff] }
0x17bb   :  { %7860 = vmatpush1.msra.mxu0 %v13777_v33  ;;  %v23819_v5 = vld [vmem:[#allocation25_spill] sm:$0xff]  ;;  %v23820_v33 = vld [vmem:[#allocation26_spill] sm:$0xff] }
0x17bc   :  { %7954 = vmatprep.subr.mxu0 %v7808_v20  ;;  %v23827_v20 = vld [vmem:[#allocation33_spill] sm:$0xff] }
0x17bd   :  { %15779 = vmatmul.mubr.msk.f32.gmra.mxu1 %vm56_vm0, %v23797_v18  ;;  %v23812_v18 = vld [vmem:[#allocation18_spill] sm:$0xff] }
0x17be   :  { %8103 = vmatprep.mubr.f32.mxu1 %v23534_v40 }
0x1869   :  { %v15765_v31 = vpop.f32.mrf.mxu1 }
0x186b   :  { %v7742_v15 = vpop.f32.mrf.mxu1 }
0x186d   :  { %v15768_v19 = vpop.f32.mrf.mxu1 }
0x186f   :  { %v7752_v8 = vpop.f32.mrf.mxu1 }
0x1871   :  { %v15771_v2 = vpop.f32.mrf.mxu1 }
0x1873   :  { %v7762_v3 = vpop.f32.mrf.mxu1 }
0x1874   :  { %13785 = vmatmul.mubr.msk.f32.vlgmr.msra.gmra.mxu0 %vm56_vm0, %v7762_v3 }
0x1875   :  { %v15774_v24 = vpop.f32.mrf.mxu1  ;;  %7899 = vmatprep.mubr.f32.mxu0 %v23534_v40  ;;  %7955 = vmatpush1.msra.mxu0 %v7807_v50 }
0x1876   :  { %7956 = vmatprep.subr.mxu0 %v7806_v38 }
0x1877   :  { %v7772_v32 = vpop.f32.mrf.mxu1  ;;  %7957 = vmatpush1.msra.mxu0 %v7805_v45 }
0x1878   :  { %13786 = vmatmul.mubr.msk.f32.gmra.mxu0 %vm56_vm0, %v15771_v2  ;;  %7958 = vmatprep.subr.mxu0 %v7804_v54 }
0x1879   :  { %v15777_v22 = vpop.f32.mrf.mxu1  ;;  %7905 = vmatprep.mubr.f32.mxu0 %v23534_v40  ;;  %7959 = vmatpush1.msra.mxu0 %v7803_v1 }
0x187a   :  { %7960 = vmatprep.subr.mxu0 %v7802_v7 }
0x187b   :  { %v7782_v58 = vpop.f32.mrf.mxu1  ;;  %7961 = vmatpush1.msra.mxu0 %v7801_v42 }
0x187c   :  { %13787 = vmatmul.mubr.msk.f32.gmra.mxu0 %vm56_vm0, %v7772_v32  ;;  %13801 = vmatmul.mubr.msk.f32.vlgmr.msra.gmra.mxu1 %vm56_vm0, %v7782_v58 }
0x187d   :  { %7911 = vmatprep.mubr.f32.mxu0 %v23534_v40  ;;  %8109 = vmatprep.mubr.f32.mxu1 %v23534_v40  ;;  %v15780_v11 = vpop.f32.mrf.mxu1 }
0x187e   :  { %14985 = vmatprep.subr.mxu0 %v23798_v16 }
0x187f   :  { %v7792_v60 = vpop.f32.mrf.mxu1 }
0x1880   :  { %13788 = vmatmul.mubr.msk.f32.gmra.mxu0 %vm56_vm0, %v15774_v24  ;;  %13802 = vmatmul.mubr.msk.f32.gmra.mxu1 %vm56_vm0, %v15777_v22 }
0x1881   :  { %7994 = vmatprep.mubr.f32.mxu0 %v23534_v40  ;;  %8115 = vmatprep.mubr.f32.mxu1 %v23534_v40 }
0x1884   :  { %13789 = vmatmul.mubr.msk.f32.vlgmr.msra.gmra.mxu0 %vm56_vm0, %v7742_v15  ;;  %13803 = vmatmul.mubr.msk.f32.gmra.mxu1 %vm56_vm0, %v7792_v60 }
0x1885   :  { %8000 = vmatprep.mubr.f32.mxu0 %v23534_v40  ;;  %8121 = vmatprep.mubr.f32.mxu1 %v23534_v40 }
0x1886   :  { %14986 = vmatpush3.msra.mxu0 %v23799_v4 }
0x1887   :  { %14987 = vmatprep.subr.mxu0 %v23800_v57 }
0x1888   :  { %13790 = vmatmul.mubr.msk.f32.gmra.mxu0 %vm56_vm0, %v15765_v31  ;;  %13804 = vmatmul.mubr.msk.f32.gmra.mxu1 %vm56_vm0, %v15780_v11  ;;  %v20653_v31 = vpop.f32.mrf.mxu0 }
0x1889   :  { %8006 = vmatprep.mubr.f32.mxu0 %v23534_v40  ;;  %14988 = vmatpush3.msra.mxu0 %v23801_v37 }
0x188a   :  { %14989 = vmatprep.subr.mxu0 %v23802_v46  ;;  %15789 = vmatprep.mubr.msk.f32.mxu1 %vm56_vm0, %v20481_v26  ;;  %v23810_v26 = vld [vmem:[#allocation16_spill] sm:$0xff]  ;;  %v20655_v15 = vpop.f32.mrf.mxu0 }
0x188b   :  { %14990 = vmatpush3.msra.mxu0 %v23803_v9 }
0x188c   :  { %13791 = vmatmul.mubr.msk.f32.gmra.mxu0 %vm56_vm0, %v7752_v8  ;;  %14991 = vmatprep.subr.mxu0 %v23804_v47 }
0x188d   :  { %8012 = vmatprep.mubr.f32.mxu0 %v23534_v40  ;;  %14992 = vmatpush3.msra.mxu0 %v23805_v14 }
0x188e   :  { %14993 = vmatprep.subr.mxu0 %v23806_v39 }
0x188f   :  { %14994 = vmatpush3.msra.mxu0 %v23807_v23 }
0x1890   :  { %13792 = vmatmul.mubr.msk.f32.gmra.mxu0 %vm56_vm0, %v15768_v19  ;;  %14995 = vmatprep.subr.mxu0 %v23808_v49  ;;  %v20657_v19 = vpop.f32.mrf.mxu0 }
0x1891   :  { %14996 = vmatpush3.msra.mxu0 %v23809_v0 }
0x1892   :  { %14997 = vmatprep.subr.mxu0 %v23810_v26  ;;  %v20659_v8 = vpop.f32.mrf.mxu0 }
0x1893   :  { %14998 = vmatpush3.msra.mxu0 %v23811_v53 }
0x1894   :  { %14999 = vmatprep.subr.mxu0 %v23812_v18  ;;  %v20661_v2 = vpop.f32.mrf.mxu0 }
0x1895   :  { %15000 = vmatpush3.msra.mxu0 %v23813_v48 }
0x1896   :  { %15001 = vmatprep.subr.mxu0 %v23814_v27  ;;  %v20663_v50 = vpop.f32.mrf.mxu0 }
0x1897   :  { %15002 = vmatpush3.msra.mxu0 %v23815_v12 }
0x1898   :  { %15003 = vmatprep.subr.mxu0 %v23816_v10  ;;  %v20665_v3 = vpop.f32.mrf.mxu0 }
0x1899   :  { %15004 = vmatpush3.msra.mxu0 %v23817_v44 }
0x189a   :  { %15005 = vmatprep.subr.mxu0 %v23818_v63  ;;  %v20667_v38 = vpop.f32.mrf.mxu0 }
0x189b   :  { %15006 = vmatpush3.msra.mxu0 %v23819_v5 }
0x189c   :  { %15007 = vmatprep.subr.mxu0 %v23820_v33 }
0x189d   :  { %15008 = vmatpush3.msra.mxu0 %v23821_v29 }
0x189e   :  { %15009 = vmatprep.subr.mxu0 %v23822_v13 }
0x189f   :  { %15010 = vmatpush3.msra.mxu0 %v23823_v6 }
0x18a0   :  { %15011 = vmatprep.subr.mxu0 %v23824_v25 }
0x18a1   :  { %15012 = vmatpush3.msra.mxu0 %v23825_v30 }
0x18a2   :  { %15013 = vmatprep.subr.mxu0 %v23826_v17 }
0x18a3   :  { %15014 = vmatpush3.msra.mxu0 %v23827_v20 }
0x18a4   :  { %15015 = vmatprep.subr.mxu0 %v23828_v52 }
0x18a5   :  { %15016 = vmatpush3.msra.mxu0 %v23829_v51 }
0x1934   :  { %v7895_v45 = vpop.f32.mrf.mxu0 }
0x1936   :  { %v7897_v24 = vpop.f32.mrf.mxu0 }
0x1938   :  { %v7901_v54 = vpop.f32.mrf.mxu0 }
0x193a   :  { %v7903_v1 = vpop.f32.mrf.mxu0 }
0x193c   :  { %v7907_v32 = vpop.f32.mrf.mxu0  ;;  %v8105_v7 = vpop.f32.mrf.mxu1 }
0x193e   :  { %v7909_v42 = vpop.f32.mrf.mxu0  ;;  %v8107_v22 = vpop.f32.mrf.mxu1 }
0x1940   :  { %v7913_v58 = vpop.f32.mrf.mxu0  ;;  %v8111_v11 = vpop.f32.mrf.mxu1 }
0x1942   :  { %v7915_v16 = vpop.f32.mrf.mxu0  ;;  %v8113_v4 = vpop.f32.mrf.mxu1 }
0x1944   :  { %v7996_v60 = vpop.f32.mrf.mxu0  ;;  %v8117_v47 = vpop.f32.mrf.mxu1 }
0x1945   :  { %v7997_v57 = vadd.f32 %v7996_v60, %v7895_v45 }
0x1946   :  { %v7998_v37 = vpop.f32.mrf.mxu0  ;;  %v8119_v48 = vpop.f32.mrf.mxu1 }
0x1947   :  { %v7999_v46 = vadd.f32 %v7998_v37, %v7897_v24  ;;  %v8128_v9 = vadd.f32 %v8105_v7, %v7997_v57  ;;  %v14959_v24 = vadd.f32 %v20655_v15, %v20653_v31  ;;  %v13759_v31 = vld [vmem:[%s23245_s1 + $0x90] sm:$0xff] }
0x1948   :  { %v8002_v14 = vpop.f32.mrf.mxu0  ;;  %v8123_v29 = vpop.f32.mrf.mxu1 }
0x1949   :  { %v8129_v39 = vadd.f32 %v8107_v22, %v7999_v46  ;;  %v8003_v23 = vadd.f32 %v8002_v14, %v7901_v54  ;;  %v8136_v53 = vmul.f32 %v20428_v56, %v8128_v9  ;;  %v13806_v14 = vld [vmem:[%s23246_s2 + $0x88] sm:$0xff] }
0x194a   :  { %v8004_v49 = vpop.f32.mrf.mxu0  ;;  %v8125_v52 = vpop.f32.mrf.mxu1 }
0x194b   :  { %v8005_v0 = vadd.f32 %v8004_v49, %v7903_v1  ;;  %v8137_v26 = vmul.f32 %v20421_v34, %v8129_v39  ;;  %v8130_v18 = vadd.f32 %v8111_v11, %v8003_v23  ;;  %v14965_v1 = vadd.f32 %v20663_v50, %v20661_v2 }
0x194c   :  { %v8008_v27 = vpop.f32.mrf.mxu0 }
0x194d   :  { %v8131_v12 = vadd.f32 %v8113_v4, %v8005_v0  ;;  %v8009_v10 = vadd.f32 %v8008_v27, %v7907_v32  ;;  %8208 = vmatprep.mubr.f32.mxu0 %v8137_v26  ;;  %v8138_v33 = vmul.f32 %v20442_v62, %v8130_v18  ;;  %v7646_v7 = vadd.f32 %v14965_v1, %v13759_v31  ;;  %v13807_v18 = vld [vmem:[%s23246_s2 + $0x90] sm:$0xff]  ;;  %v13837_v1 = vld [vmem:[%s23240_s5 + $0xe0] sm:$0xff] }
0x194e   :  { %v8010_v44 = vpop.f32.mrf.mxu0  ;;  %8209 = vmatmul.mubr.f32.vlgmr.msra.gmra.mxu0 %v8136_v53  ;;  %v20766_v31 = vld [vmem:[%s23239_s4 + $0x10] sm:$0xff] }
0x194f   :  { %v8011_v63 = vadd.f32 %v8010_v44, %v7909_v42  ;;  %v8139_v5 = vmul.f32 %v20435_v28, %v8131_v12  ;;  %v8132_v13 = vadd.f32 %v8117_v47, %v8009_v10  ;;  %v14968_v42 = vadd.f32 %v20667_v38, %v20665_v3  ;;  %v13805_v3 = vld [vmem:[%s23246_s2 + $0x80] sm:$0xff]  ;;  %v13808_v44 = vld [vmem:[%s23246_s2 + $0x98] sm:$0xff] }
0x1950   :  { %v8014_v6 = vpop.f32.mrf.mxu0 }
0x1951   :  { %v8133_v25 = vadd.f32 %v8119_v48, %v8011_v63  ;;  %v8015_v34 = vadd.f32 %v8014_v6, %v7913_v58  ;;  %8213 = vmatprep.mubr.f32.mxu0 %v8139_v5  ;;  %v8140_v20 = vmul.f32 %v20460_v35, %v8132_v13  ;;  %v14962_v35 = vadd.f32 %v20659_v8, %v20657_v19  ;;  %v13760_v19 = vld [vmem:[%s23245_s1 + $0x98] sm:$0xff] }
0x1952   :  { %v8016_v56 = vpop.f32.mrf.mxu0  ;;  %8214 = vmatmul.mubr.f32.gmra.mxu0 %v8138_v33  ;;  %v13763_v8 = vmul.f32 -1.442695, %v7646_v7  ;;  %v7647_v22 = vadd.f32 %v14968_v42, %v13760_v19  ;;  %v20780_v7 = vld [vmem:[%s23239_s4 + $0x20] sm:$0xff]  ;;  %v20787_v42 = vld [vmem:[%s23239_s4 + $0x28] sm:$0xff]  ;;  %v20794_v19 = vld [vmem:[%s23239_s4 + $0x30] sm:$0xff] }
0x1953   :  { %v8017_v30 = vadd.f32 %v8016_v56, %v7915_v16  ;;  %v8141_v17 = vmul.f32 %v20453_v61, %v8133_v25  ;;  %v8134_v51 = vadd.f32 %v8123_v29, %v8015_v34  ;;  %v13757_v61 = vld [vmem:[%s23245_s1 + $0x80] sm:$0xff] }
0x1954   :  { %v7644_v54 = vadd.f32 %v14959_v24, %v13757_v61  ;;  %v13764_v2 = vmul.f32 -1.442695, %v7647_v22  ;;  %v20808_v22 = vld [vmem:[%s23239_s4 + $0x40] sm:$0xff] }
0x1955   :  { %v8135_v45 = vadd.f32 %v8125_v52, %v8017_v30  ;;  %8218 = vmatprep.mubr.f32.mxu0 %v8141_v17  ;;  %v8142_v62 = vmul.f32 %v20474_v41, %v8134_v51 }
0x1956   :  { %8219 = vmatmul.mubr.f32.gmra.mxu0 %v8140_v20  ;;  %v13761_v32 = vmul.f32 -1.442695, %v7644_v54 }
0x1957   :  { %v8143_v28 = vmul.f32 %v20467_v59, %v8135_v45  ;;  %v13758_v59 = vld [vmem:[%s23245_s1 + $0x88] sm:$0xff] }
0x1958   :  { %v7645_v41 = vadd.f32 %v14962_v35, %v13758_v59  ;;  %16122 = vpow2.f32 %v13761_v32  ;;  %v20759_v32 = vld [vmem:[%s23239_s4 + $0x8] sm:$0xff] }
0x1959   :  { %8223 = vmatprep.mubr.f32.mxu0 %v8143_v28 }
0x195a   :  { %8224 = vmatmul.mubr.f32.gmra.mxu0 %v8142_v62  ;;  %v13762_v15 = vmul.f32 -1.442695, %v7645_v41 }
0x195b   :  { %8585 = vmatprep.mubr.f32.mxu0 %v23534_v40 }
0x195c   :  { %16124 = vpow2.f32 %v13762_v15  ;;  %v20773_v15 = vld [vmem:[%s23239_s4 + $0x18] sm:$0xff] }
0x195d   :  { %16126 = vpow2.f32 %v13763_v8  ;;  %v20801_v8 = vld [vmem:[%s23239_s4 + $0x38] sm:$0xff] }
0x195e   :  { %16128 = vpow2.f32 %v13764_v2  ;;  %v20815_v2 = vld [vmem:[%s23239_s4 + $0x48] sm:$0xff] }
0x1965   :  { %v16123_v50 = vpop.eup %16122 }
0x1966   :  { %v7660_v11 = vadd.f32 1.0, %v16123_v50  ;;  %v20822_v50 = vld [vmem:[%s23239_s4 + $0x50] sm:$0xff] }
0x1967   :  { %23830 = vst [vmem:[#allocation2_spill] sm:$0xff] %v20822_v50 }
0x1968   :  { %16130 = vrcp.f32 %v7660_v11  ;;  %v13834_v11 = vld [vmem:[%s23240_s5 + $0xc8] sm:$0xff] }
0x1969   :  { %v16125_v58 = vpop.eup %16124 }
0x196a   :  { %v7661_v60 = vadd.f32 1.0, %v16125_v58  ;;  %v16127_v38 = vpop.eup %16126  ;;  %v20829_v58 = vld [vmem:[%s23239_s4 + $0x58] sm:$0xff] }
0x196b   :  { %v7662_v9 = vadd.f32 1.0, %v16127_v38  ;;  %v16129_v39 = vpop.eup %16128  ;;  %23831 = vst [vmem:[#allocation3_spill] sm:$0xff] %v20829_v58  ;;  %v13835_v38 = vld [vmem:[%s23240_s5 + $0xd0] sm:$0xff] }
0x196c   :  { %16132 = vrcp.f32 %v7661_v60  ;;  %v7663_v26 = vadd.f32 1.0, %v16129_v39  ;;  %v13840_v60 = vld [vmem:[%s23240_s5 + $0xf8] sm:$0xff]  ;;  %v13825_v39 = vld [vmem:[%s23240_s5 + $0x80] sm:$0xff] }
0x196d   :  { %8545 = vmatprep.subr.mxu0 %v13840_v60  ;;  %v13858_v60 = vld [vmem:[%s23240_s5 + $0x108] sm:$0xff] }
0x1975   :  { %v16131_v5 = vpop.eup %16130 }
0x1976   :  { %v8246_v13 = vsub.f32 1.0, %v16131_v5  ;;  %v8242_v25 = vmul.f32 %v16131_v5, %v19867_v55  ;;  %v8399_v5 = vld [vmem:[%s23240_s5 + $0x58] sm:$0xff] }
0x1979   :  { %v16133_v29 = vpop.eup %16132 }
0x197a   :  { %v8247_v30 = vsub.f32 1.0, %v16133_v29  ;;  %v8243_v52 = vmul.f32 %v16133_v29, %v19875_v21  ;;  %v8396_v29 = vld [vmem:[%s23240_s5 + $0x40] sm:$0xff] }
0x1a0e   :  { %v15017_v16 = vpop.f32.mrf.mxu0 }
0x1a10   :  { %v15018_v4 = vpop.f32.mrf.mxu0 }
0x1a11   :  { %v15019_v57 = vadd.f32 %v15018_v4, %v15017_v16  ;;  %v13833_v16 = vld [vmem:[%s23240_s5 + $0xc0] sm:$0xff]  ;;  %v13839_v4 = vld [vmem:[%s23240_s5 + $0xf0] sm:$0xff] }
0x1a12   :  { %v15020_v37 = vpop.f32.mrf.mxu0  ;;  %8546 = vmatpush1.msra.mxu0 %v13839_v4  ;;  %v13860_v4 = vld [vmem:[%s23240_s5 + $0x118] sm:$0xff] }
0x1a13   :  { %v8234_v46 = vadd.f32 %v15019_v57, %v13805_v3  ;;  %v13836_v3 = vld [vmem:[%s23240_s5 + $0xd8] sm:$0xff]  ;;  %v13830_v57 = vld [vmem:[%s23240_s5 + $0xa8] sm:$0xff] }
0x1a14   :  { %v15021_v47 = vpop.f32.mrf.mxu0  ;;  %8547 = vmatprep.subr.mxu0 %v13836_v3  ;;  %v13857_v3 = vld [vmem:[%s23240_s5 + $0x100] sm:$0xff] }
0x1a15   :  { %16134 = vtanh.f32 %v8234_v46  ;;  %v15022_v23 = vadd.f32 %v15021_v47, %v15020_v37  ;;  %v13832_v37 = vld [vmem:[%s23240_s5 + $0xb8] sm:$0xff]  ;;  %8548 = vmatpush1.msra.mxu0 %v13835_v38  ;;  %v13829_v46 = vld [vmem:[%s23240_s5 + $0xa0] sm:$0xff]  ;;  %v13826_v47 = vld [vmem:[%s23240_s5 + $0x88] sm:$0xff] }
0x1a16   :  { %v15023_v49 = vpop.f32.mrf.mxu0  ;;  %16136 = vrcp.f32 %v7662_v9  ;;  %8549 = vmatprep.subr.mxu0 %v13832_v37  ;;  %v13831_v9 = vld [vmem:[%s23240_s5 + $0xb0] sm:$0xff] }
0x1a17   :  { %v8235_v0 = vadd.f32 %v15022_v23, %v13806_v14  ;;  %8550 = vmatpush1.msra.mxu0 %v13831_v9  ;;  %v13828_v14 = vld [vmem:[%s23240_s5 + $0x98] sm:$0xff]  ;;  %v13827_v23 = vld [vmem:[%s23240_s5 + $0x90] sm:$0xff] }
0x1a18   :  { %v15024_v53 = vpop.f32.mrf.mxu0  ;;  %8551 = vmatprep.subr.mxu0 %v13828_v14  ;;  %v21038_v14 = vld [vmem:[%s23241_s8 + $0x78] sm:$0xff] }
0x1a19   :  { %16138 = vtanh.f32 %v8235_v0  ;;  %v15025_v48 = vadd.f32 %v15024_v53, %v15023_v49  ;;  %8552 = vmatpush1.msra.mxu0 %v13827_v23  ;;  %v8401_v49 = vld [vmem:[%s23240_s5 + $0x68] sm:$0xff]  ;;  %v8403_v0 = vld [vmem:[%s23240_s5 + $0x78] sm:$0xff]  ;;  %23833 = vst [vmem:[#allocation5_spill] sm:$0xff] %v21038_v14  ;;  %v21052_v23 = vld [vmem:[%s23241_s8 + $0x70] sm:$0xff] }
0x1a1a   :  { %v15026_v27 = vpop.f32.mrf.mxu0  ;;  %16140 = vrcp.f32 %v7663_v26  ;;  %8735 = vmatprep.subr.mxu0 %v8403_v0  ;;  %23835 = vst [vmem:[#allocation7_spill] sm:$0xff] %v21052_v23  ;;  %v21066_v0 = vld [vmem:[%s23241_s8 + $0x68] sm:$0xff] }
0x1a1b   :  { %v8236_v12 = vadd.f32 %v15025_v48, %v13807_v18  ;;  %23837 = vst [vmem:[#allocation9_spill] sm:$0xff] %v21066_v0 }
0x1a1c   :  { %v15027_v10 = vpop.f32.mrf.mxu0 }
0x1a1d   :  { %16142 = vtanh.f32 %v8236_v12  ;;  %v15028_v63 = vadd.f32 %v15027_v10, %v15026_v27  ;;  %v8400_v10 = vld [vmem:[%s23240_s5 + $0x60] sm:$0xff] }
0x1a1f   :  { %v8237_v33 = vadd.f32 %v15028_v63, %v13808_v44  ;;  %v8402_v44 = vld [vmem:[%s23240_s5 + $0x70] sm:$0xff]  ;;  %v8397_v63 = vld [vmem:[%s23240_s5 + $0x48] sm:$0xff] }
0x1a21   :  { %16144 = vtanh.f32 %v8237_v33 }
0x1a22   :  { %v16135_v6 = vpop.eup %16134 }
0x1a23   :  { %v8250_v34 = vmul.f32 %v16135_v6, %v8246_v13  ;;  %v16137_v56 = vpop.eup %16136  ;;  %v8398_v13 = vld [vmem:[%s23240_s5 + $0x50] sm:$0xff]  ;;  %v8393_v6 = vld [vmem:[%s23240_s5 + $0x28] sm:$0xff] }
0x1a24   :  { %v8248_v28 = vsub.f32 1.0, %v16137_v56  ;;  %v8244_v24 = vmul.f32 %v16137_v56, %v19883_v36  ;;  %v8392_v56 = vld [vmem:[%s23240_s5 + $0x20] sm:$0xff] }
0x1a25   :  { %v20711_v17 = vadd.f32 %v8250_v34, %v8242_v25  ;;  %v8395_v25 = vld [vmem:[%s23240_s5 + $0x38] sm:$0xff] }
0x1a26   :  { %v16139_v20 = vpop.eup %16138 }
0x1a27   :  { %v8251_v51 = vmul.f32 %v16139_v20, %v8247_v30  ;;  %13809 = vst.msk [vmem:[%s23247_s9 + $0x80] sm:$0xff] %vm56_vm0, %v20711_v17  ;;  %v16141_v45 = vpop.eup %16140  ;;  %v8394_v30 = vld [vmem:[%s23240_s5 + $0x30] sm:$0xff]  ;;  %v8389_v20 = vld [vmem:[%s23240_s5 + $0x8] sm:$0xff] }
0x1a28   :  { %v8249_v21 = vsub.f32 1.0, %v16141_v45  ;;  %v8245_v59 = vmul.f32 %v16141_v45, %v19891_v43  ;;  %v13838_v43 = vld [vmem:[%s23240_s5 + $0xe8] sm:$0xff]  ;;  %v8390_v45 = vld [vmem:[%s23240_s5 + $0x10] sm:$0xff] }
0x1a29   :  { %v20719_v62 = vadd.f32 %v8251_v51, %v8243_v52  ;;  %v8391_v52 = vld [vmem:[%s23240_s5 + $0x18] sm:$0xff]  ;;  %v8388_v51 = vld [vmem:[%s23240_s5] sm:$0xff] }
0x1a2a   :  { %v16143_v55 = vpop.eup %16142 }
0x1a2b   :  { %v8252_v61 = vmul.f32 %v16143_v55, %v8248_v28  ;;  %13810 = vst.msk [vmem:[%s23247_s9 + $0x88] sm:$0xff] %vm56_vm0, %v20719_v62  ;;  %v13870_v28 = vld [vmem:[%s23240_s5 + $0x168] sm:$0xff]  ;;  %v13872_v55 = vld [vmem:[%s23240_s5 + $0x178] sm:$0xff] }
0x1a2d   :  { %v20727_v35 = vadd.f32 %v8252_v61, %v8244_v24  ;;  %v13869_v24 = vld [vmem:[%s23240_s5 + $0x160] sm:$0xff]  ;;  %v13871_v61 = vld [vmem:[%s23240_s5 + $0x170] sm:$0xff] }
0x1a2e   :  { %v16145_v54 = vpop.eup %16144 }
0x1a2f   :  { %v8253_v41 = vmul.f32 %v16145_v54, %v8249_v21  ;;  %13811 = vst.msk [vmem:[%s23247_s9 + $0x90] sm:$0xff] %vm56_vm0, %v20727_v35  ;;  %v13866_v21 = vld [vmem:[%s23240_s5 + $0x148] sm:$0xff]  ;;  %v13868_v54 = vld [vmem:[%s23240_s5 + $0x158] sm:$0xff] }
0x1a31   :  { %v20735_v36 = vadd.f32 %v8253_v41, %v8245_v59  ;;  %v13865_v59 = vld [vmem:[%s23240_s5 + $0x140] sm:$0xff]  ;;  %v13867_v41 = vld [vmem:[%s23240_s5 + $0x150] sm:$0xff] }
0x1a33   :  { %13812 = vst.msk [vmem:[%s23247_s9 + $0x98] sm:$0xff] %vm56_vm0, %v20735_v36  ;;  %15781 = vmatprep.subr.mxu1 %v20735_v36 }
0x1a34   :  { %15782 = vmatpush3.msra.mxu1 %v20735_v36 }
0x1a35   :  { %15783 = vmatprep.subr.mxu1 %v20727_v35 }
0x1a36   :  { %15784 = vmatpush3.msra.mxu1 %v20727_v35 }
0x1a37   :  { %15785 = vmatprep.subr.mxu1 %v20719_v62 }
0x1a38   :  { %15786 = vmatpush3.msra.mxu1 %v20719_v62 }
0x1a39   :  { %15787 = vmatprep.subr.mxu1 %v20711_v17 }
0x1a3a   :  { %15788 = vmatpush3.msra.mxu1 %v20711_v17 }
0x1a3b   :  { %15790 = vmatmul.mubr.msk.f32.vlgmr.msra.gmra.mxu1 %vm56_vm0, %v20759_v32  ;;  %8456 = vmatprep.subr.mxu1 %v13838_v43  ;;  %v13862_v43 = vld [vmem:[%s23240_s5 + $0x128] sm:$0xff] }
0x1a3c   :  { %15792 = vmatprep.mubr.msk.f32.mxu1 %vm56_vm0, %v20766_v31  ;;  %8457 = vmatpush1.msra.mxu1 %v13837_v1  ;;  %v13864_v1 = vld [vmem:[%s23240_s5 + $0x138] sm:$0xff] }
0x1a3d   :  { %8458 = vmatprep.subr.mxu1 %v13834_v11  ;;  %v13861_v11 = vld [vmem:[%s23240_s5 + $0x120] sm:$0xff] }
0x1a3e   :  { %8459 = vmatpush1.msra.mxu1 %v13833_v16  ;;  %v13863_v16 = vld [vmem:[%s23240_s5 + $0x130] sm:$0xff] }
0x1a3f   :  { %15793 = vmatmul.mubr.msk.f32.gmra.mxu1 %vm56_vm0, %v20773_v15  ;;  %8460 = vmatprep.subr.mxu1 %v13830_v57  ;;  %v13859_v57 = vld [vmem:[%s23240_s5 + $0x110] sm:$0xff] }
0x1a40   :  { %15795 = vmatprep.mubr.msk.f32.mxu1 %vm56_vm0, %v20780_v7  ;;  %8461 = vmatpush1.msra.mxu1 %v13829_v46 }
0x1a41   :  { %8462 = vmatprep.subr.mxu1 %v13826_v47  ;;  %v21033_v47 = vld [vmem:[%s23241_s8 + $0xf8] sm:$0xff] }
0x1a42   :  { %8463 = vmatpush1.msra.mxu1 %v13825_v39  ;;  %23832 = vst [vmem:[#allocation4_spill] sm:$0xff] %v21033_v47  ;;  %v21047_v39 = vld [vmem:[%s23241_s8 + $0xf0] sm:$0xff] }
0x1a43   :  { %15796 = vmatmul.mubr.msk.f32.gmra.mxu1 %vm56_vm0, %v20787_v42  ;;  %8646 = vmatprep.subr.mxu1 %v8401_v49  ;;  %23834 = vst [vmem:[#allocation6_spill] sm:$0xff] %v21047_v39  ;;  %v21061_v49 = vld [vmem:[%s23241_s8 + $0xe8] sm:$0xff] }
0x1a44   :  { %15798 = vmatprep.mubr.msk.f32.mxu1 %vm56_vm0, %v20794_v19  ;;  %23836 = vst [vmem:[#allocation8_spill] sm:$0xff] %v21061_v49 }
0x1a47   :  { %15799 = vmatmul.mubr.msk.f32.gmra.mxu1 %vm56_vm0, %v20801_v8 }
0x1a48   :  { %15801 = vmatprep.mubr.msk.f32.mxu1 %vm56_vm0, %v20808_v22 }
0x1a4b   :  { %15802 = vmatmul.mubr.msk.f32.gmra.mxu1 %vm56_vm0, %v20815_v2 }
0x1a4c   :  { %15804 = vmatprep.mubr.msk.f32.mxu1 %vm56_vm0, %v20822_v50 }
0x1a4f   :  { %15805 = vmatmul.mubr.msk.f32.gmra.mxu1 %vm56_vm0, %v20829_v58 }
0x1a50   :  { %8496 = vmatprep.mubr.f32.mxu1 %v23534_v40 }
0x1afb   :  { %v20882_v26 = vpop.f32.mrf.mxu1 }
0x1afd   :  { %v8329_v53 = vpop.f32.mrf.mxu1 }
0x1aff   :  { %v20884_v18 = vpop.f32.mrf.mxu1 }
0x1b01   :  { %v20886_v48 = vpop.f32.mrf.mxu1 }
0x1b03   :  { %v15797_v27 = vpop.f32.mrf.mxu1 }
0x1b05   :  { %v8349_v12 = vpop.f32.mrf.mxu1 }
0x1b06   :  { %13841 = vmatmul.mubr.msk.f32.vlgmr.msra.gmra.mxu1 %vm56_vm0, %v8349_v12  ;;  %13845 = vmatmul.mubr.msk.f32.vlgmr.msra.gmra.mxu0 %vm56_vm0, %v8349_v12  ;;  %v21110_v12 = vld [vmem:[%s23241_s8 + $0x50] sm:$0xff] }
0x1b07   :  { %8502 = vmatprep.mubr.f32.mxu1 %v23534_v40  ;;  %8591 = vmatprep.mubr.f32.mxu0 %v23534_v40  ;;  %v15800_v33 = vpop.f32.mrf.mxu1  ;;  %23843 = vst [vmem:[#allocation15_spill] sm:$0xff] %v21110_v12 }
0x1b08   :  { %8647 = vmatpush1.msra.mxu1 %v8400_v10  ;;  %8736 = vmatpush1.msra.mxu0 %v8402_v44  ;;  %v21117_v10 = vld [vmem:[%s23241_s8 + $0xc8] sm:$0xff] }
0x1b09   :  { %8648 = vmatprep.subr.mxu1 %v8397_v63  ;;  %8737 = vmatprep.subr.mxu0 %v8399_v5  ;;  %v8359_v34 = vpop.f32.mrf.mxu1  ;;  %23844 = vst [vmem:[#allocation16_spill] sm:$0xff] %v21117_v10  ;;  %v21124_v44 = vld [vmem:[%s23241_s8 + $0x48] sm:$0xff]  ;;  %v21131_v63 = vld [vmem:[%s23241_s8 + $0xc0] sm:$0xff] }
0x1b0a   :  { %13842 = vmatmul.mubr.msk.f32.gmra.mxu1 %vm56_vm0, %v15797_v27  ;;  %13846 = vmatmul.mubr.msk.f32.gmra.mxu0 %vm56_vm0, %v15797_v27  ;;  %v21103_v27 = vld [vmem:[%s23241_s8 + $0xd0] sm:$0xff]  ;;  %23845 = vst [vmem:[#allocation17_spill] sm:$0xff] %v21124_v44  ;;  %23846 = vst [vmem:[#allocation18_spill] sm:$0xff] %v21131_v63  ;;  %v21138_v5 = vld [vmem:[%s23241_s8 + $0x40] sm:$0xff] }
0x1b0b   :  { %8508 = vmatprep.mubr.f32.mxu1 %v23534_v40  ;;  %8597 = vmatprep.mubr.f32.mxu0 %v23534_v40  ;;  %v15803_v38 = vpop.f32.mrf.mxu1  ;;  %23842 = vst [vmem:[#allocation14_spill] sm:$0xff] %v21103_v27  ;;  %23847 = vst [vmem:[#allocation19_spill] sm:$0xff] %v21138_v5 }
0x1b0c   :  { %8649 = vmatpush1.msra.mxu1 %v8396_v29  ;;  %8738 = vmatpush1.msra.mxu0 %v8398_v13  ;;  %v21152_v29 = vld [vmem:[%s23241_s8 + $0x38] sm:$0xff]  ;;  %v21159_v13 = vld [vmem:[%s23241_s8 + $0xb0] sm:$0xff] }
0x1b0d   :  { %8650 = vmatprep.subr.mxu1 %v8393_v6  ;;  %8739 = vmatprep.subr.mxu0 %v8395_v25  ;;  %v8369_v37 = vpop.f32.mrf.mxu1  ;;  %23849 = vst [vmem:[#allocation21_spill] sm:$0xff] %v21152_v29  ;;  %23850 = vst [vmem:[#allocation22_spill] sm:$0xff] %v21159_v13  ;;  %v21166_v6 = vld [vmem:[%s23241_s8 + $0x30] sm:$0xff]  ;;  %v21173_v25 = vld [vmem:[%s23241_s8 + $0xa8] sm:$0xff] }
0x1b0e   :  { %13843 = vmatmul.mubr.msk.f32.gmra.mxu1 %vm56_vm0, %v8359_v34  ;;  %13847 = vmatmul.mubr.msk.f32.gmra.mxu0 %vm56_vm0, %v8359_v34  ;;  %23851 = vst [vmem:[#allocation23_spill] sm:$0xff] %v21166_v6  ;;  %23852 = vst [vmem:[#allocation24_spill] sm:$0xff] %v21173_v25  ;;  %v21180_v34 = vld [vmem:[%s23241_s8 + $0x28] sm:$0xff] }
0x1b0f   :  { %8514 = vmatprep.mubr.f32.mxu1 %v23534_v40  ;;  %8603 = vmatprep.mubr.f32.mxu0 %v23534_v40  ;;  %v15806_v46 = vpop.f32.mrf.mxu1  ;;  %23853 = vst [vmem:[#allocation25_spill] sm:$0xff] %v21180_v34 }
0x1b10   :  { %8651 = vmatpush1.msra.mxu1 %v8392_v56  ;;  %8740 = vmatpush1.msra.mxu0 %v8394_v30  ;;  %v21187_v56 = vld [vmem:[%s23241_s8 + $0xa0] sm:$0xff] }
0x1b11   :  { %8652 = vmatprep.subr.mxu1 %v8389_v20  ;;  %8741 = vmatprep.subr.mxu0 %v8391_v52  ;;  %v8379_v9 = vpop.f32.mrf.mxu1  ;;  %23854 = vst [vmem:[#allocation26_spill] sm:$0xff] %v21187_v56  ;;  %v21194_v30 = vld [vmem:[%s23241_s8 + $0x20] sm:$0xff]  ;;  %v21201_v20 = vld [vmem:[%s23241_s8 + $0x98] sm:$0xff] }
0x1b12   :  { %13844 = vmatmul.mubr.msk.f32.gmra.mxu1 %vm56_vm0, %v15800_v33  ;;  %13848 = vmatmul.mubr.msk.f32.gmra.mxu0 %vm56_vm0, %v15800_v33  ;;  %v21145_v33 = vld [vmem:[%s23241_s8 + $0xb8] sm:$0xff]  ;;  %23855 = vst [vmem:[#allocation27_spill] sm:$0xff] %v21194_v30  ;;  %23856 = vst [vmem:[#allocation28_spill] sm:$0xff] %v21201_v20 }
0x1b13   :  { %8653 = vmatpush1.msra.mxu1 %v8388_v51  ;;  %8686 = vmatprep.mubr.f32.mxu1 %v23534_v40  ;;  %23848 = vst [vmem:[#allocation20_spill] sm:$0xff] %v21145_v33  ;;  %v21208_v52 = vld [vmem:[%s23241_s8 + $0x18] sm:$0xff]  ;;  %v21215_v51 = vld [vmem:[%s23241_s8 + $0x90] sm:$0xff] }
0x1b14   :  { %8742 = vmatpush1.msra.mxu0 %v8390_v45  ;;  %8775 = vmatprep.mubr.f32.mxu0 %v23534_v40  ;;  %23857 = vst [vmem:[#allocation29_spill] sm:$0xff] %v21208_v52  ;;  %23858 = vst [vmem:[#allocation30_spill] sm:$0xff] %v21215_v51  ;;  %v21222_v45 = vld [vmem:[%s23241_s8 + $0x10] sm:$0xff] }
0x1b15   :  { %8852 = vmatprep.subr.mxu1 %v13870_v28  ;;  %8941 = vmatprep.subr.mxu0 %v13872_v55  ;;  %23859 = vst [vmem:[#allocation31_spill] sm:$0xff] %v21222_v45  ;;  %v21229_v28 = vld [vmem:[%s23241_s8 + $0x88] sm:$0xff] }
0x1b16   :  { %13849 = vmatmul.mubr.msk.f32.vlgmr.msra.gmra.mxu1 %vm56_vm0, %v8329_v53  ;;  %13853 = vmatmul.mubr.msk.f32.vlgmr.msra.gmra.mxu0 %vm56_vm0, %v8329_v53  ;;  %v21080_v53 = vld [vmem:[%s23241_s8 + $0x60] sm:$0xff]  ;;  %23860 = vst [vmem:[#allocation32_spill] sm:$0xff] %v21229_v28  ;;  %v21236_v55 = vld [vmem:[%s23241_s8 + $0x8] sm:$0xff] }
0x1b17   :  { %8692 = vmatprep.mubr.f32.mxu1 %v23534_v40  ;;  %8781 = vmatprep.mubr.f32.mxu0 %v23534_v40  ;;  %23839 = vst [vmem:[#allocation11_spill] sm:$0xff] %v21080_v53  ;;  %23861 = vst [vmem:[#allocation33_spill] sm:$0xff] %v21236_v55 }
0x1b18   :  { %8853 = vmatpush1.msra.mxu1 %v13869_v24  ;;  %8942 = vmatpush1.msra.mxu0 %v13871_v61  ;;  %v21243_v24 = vld [vmem:[%s23241_s8 + $0x80] sm:$0xff] }
0x1b19   :  { %8854 = vmatprep.subr.mxu1 %v13866_v21  ;;  %8943 = vmatprep.subr.mxu0 %v13868_v54  ;;  %23862 = vst [vmem:[#allocation34_spill] sm:$0xff] %v21243_v24  ;;  %v21250_v61 = vld [vmem:[%s23241_s8] sm:$0xff] }
0x1b1a   :  { %13850 = vmatmul.mubr.msk.f32.gmra.mxu1 %vm56_vm0, %v20882_v26  ;;  %13854 = vmatmul.mubr.msk.f32.gmra.mxu0 %vm56_vm0, %v20882_v26  ;;  %v21075_v26 = vld [vmem:[%s23241_s8 + $0xe0] sm:$0xff]  ;;  %23863 = vst [vmem:[#allocation35_spill] sm:$0xff] %v21250_v61 }
0x1b1b   :  { %8698 = vmatprep.mubr.f32.mxu1 %v23534_v40  ;;  %8787 = vmatprep.mubr.f32.mxu0 %v23534_v40  ;;  %23838 = vst [vmem:[#allocation10_spill] sm:$0xff] %v21075_v26 }
0x1b1c   :  { %8855 = vmatpush1.msra.mxu1 %v13865_v59  ;;  %8944 = vmatpush1.msra.mxu0 %v13867_v41 }
0x1b1d   :  { %8856 = vmatprep.subr.mxu1 %v13862_v43  ;;  %8945 = vmatprep.subr.mxu0 %v13864_v1 }
0x1b1e   :  { %13851 = vmatmul.mubr.msk.f32.gmra.mxu1 %vm56_vm0, %v20886_v48  ;;  %13855 = vmatmul.mubr.msk.f32.gmra.mxu0 %vm56_vm0, %v20886_v48  ;;  %v21096_v48 = vld [vmem:[%s23241_s8 + $0x58] sm:$0xff] }
0x1b1f   :  { %8704 = vmatprep.mubr.f32.mxu1 %v23534_v40  ;;  %8793 = vmatprep.mubr.f32.mxu0 %v23534_v40  ;;  %23841 = vst [vmem:[#allocation13_spill] sm:$0xff] %v21096_v48 }
0x1b20   :  { %8857 = vmatpush1.msra.mxu1 %v13861_v11  ;;  %8946 = vmatpush1.msra.mxu0 %v13863_v16 }
0x1b21   :  { %8858 = vmatprep.subr.mxu1 %v13858_v60  ;;  %8947 = vmatprep.subr.mxu0 %v13860_v4 }
0x1b22   :  { %13852 = vmatmul.mubr.msk.f32.gmra.mxu1 %vm56_vm0, %v20884_v18  ;;  %13856 = vmatmul.mubr.msk.f32.gmra.mxu0 %vm56_vm0, %v20884_v18  ;;  %v21089_v18 = vld [vmem:[%s23241_s8 + $0xd8] sm:$0xff] }
0x1b23   :  { %8859 = vmatpush1.msra.mxu1 %v13857_v3  ;;  %8892 = vmatprep.mubr.f32.mxu1 %v23534_v40  ;;  %23840 = vst [vmem:[#allocation12_spill] sm:$0xff] %v21089_v18 }
0x1b24   :  { %8948 = vmatpush1.msra.mxu0 %v13859_v57  ;;  %8981 = vmatprep.mubr.f32.mxu0 %v23534_v40 }
0x1b25   :  { %15045 = vmatprep.subr.mxu1 %v21033_v47  ;;  %15089 = vmatprep.subr.mxu0 %v21033_v47 }
0x1b26   :  { %13873 = vmatmul.mubr.msk.f32.vlgmr.msra.gmra.mxu1 %vm56_vm0, %v8369_v37  ;;  %13877 = vmatmul.mubr.msk.f32.vlgmr.msra.gmra.mxu0 %vm56_vm0, %v8369_v37 }
0x1b27   :  { %8898 = vmatprep.mubr.f32.mxu1 %v23534_v40  ;;  %8987 = vmatprep.mubr.f32.mxu0 %v23534_v40 }
0x1b28   :  { %15046 = vmatpush3.msra.mxu1 %v21038_v14  ;;  %15090 = vmatpush3.msra.mxu0 %v21038_v14 }
0x1b29   :  { %15047 = vmatprep.subr.mxu1 %v21047_v39  ;;  %15091 = vmatprep.subr.mxu0 %v21047_v39 }
0x1b2a   :  { %13874 = vmatmul.mubr.msk.f32.gmra.mxu1 %vm56_vm0, %v15803_v38  ;;  %13878 = vmatmul.mubr.msk.f32.gmra.mxu0 %vm56_vm0, %v15803_v38 }
0x1b2b   :  { %8904 = vmatprep.mubr.f32.mxu1 %v23534_v40  ;;  %8993 = vmatprep.mubr.f32.mxu0 %v23534_v40 }
0x1b2c   :  { %15048 = vmatpush3.msra.mxu1 %v21052_v23  ;;  %15092 = vmatpush3.msra.mxu0 %v21052_v23 }
0x1b2d   :  { %15049 = vmatprep.subr.mxu1 %v21061_v49  ;;  %15093 = vmatprep.subr.mxu0 %v21061_v49 }
0x1b2e   :  { %13875 = vmatmul.mubr.msk.f32.gmra.mxu1 %vm56_vm0, %v8379_v9  ;;  %13879 = vmatmul.mubr.msk.f32.gmra.mxu0 %vm56_vm0, %v8379_v9 }
0x1b2f   :  { %8910 = vmatprep.mubr.f32.mxu1 %v23534_v40  ;;  %8999 = vmatprep.mubr.f32.mxu0 %v23534_v40 }
0x1b30   :  { %15050 = vmatpush3.msra.mxu1 %v21066_v0  ;;  %15094 = vmatpush3.msra.mxu0 %v21066_v0 }
0x1b31   :  { %15051 = vmatprep.subr.mxu1 %v21075_v26  ;;  %15095 = vmatprep.subr.mxu0 %v21075_v26 }
0x1b32   :  { %13876 = vmatmul.mubr.msk.f32.gmra.mxu1 %vm56_vm0, %v15806_v46  ;;  %13880 = vmatmul.mubr.msk.f32.gmra.mxu0 %vm56_vm0, %v15806_v46 }
0x1b33   :  { %15052 = vmatpush3.msra.mxu1 %v21080_v53  ;;  %15096 = vmatpush3.msra.mxu0 %v21080_v53 }
0x1b34   :  { %15053 = vmatprep.subr.mxu1 %v21089_v18  ;;  %15097 = vmatprep.subr.mxu0 %v21089_v18 }
0x1b35   :  { %15054 = vmatpush3.msra.mxu1 %v21096_v48  ;;  %15098 = vmatpush3.msra.mxu0 %v21096_v48 }
0x1b36   :  { %15055 = vmatprep.subr.mxu1 %v21103_v27  ;;  %15099 = vmatprep.subr.mxu0 %v21103_v27 }
0x1b37   :  { %15056 = vmatpush3.msra.mxu1 %v21110_v12  ;;  %15100 = vmatpush3.msra.mxu0 %v21110_v12 }
0x1b38   :  { %15057 = vmatprep.subr.mxu1 %v21117_v10  ;;  %15101 = vmatprep.subr.mxu0 %v21117_v10 }
0x1b39   :  { %15058 = vmatpush3.msra.mxu1 %v21124_v44  ;;  %15102 = vmatpush3.msra.mxu0 %v21124_v44 }
0x1b3a   :  { %15059 = vmatprep.subr.mxu1 %v21131_v63  ;;  %15103 = vmatprep.subr.mxu0 %v21131_v63 }
0x1b3b   :  { %15060 = vmatpush3.msra.mxu1 %v21138_v5  ;;  %15104 = vmatpush3.msra.mxu0 %v21138_v5 }
0x1b3c   :  { %15061 = vmatprep.subr.mxu1 %v21145_v33  ;;  %15105 = vmatprep.subr.mxu0 %v21145_v33 }
0x1b3d   :  { %15062 = vmatpush3.msra.mxu1 %v21152_v29  ;;  %15106 = vmatpush3.msra.mxu0 %v21152_v29 }
0x1b3e   :  { %15063 = vmatprep.subr.mxu1 %v21159_v13  ;;  %15107 = vmatprep.subr.mxu0 %v21159_v13 }
0x1b3f   :  { %15064 = vmatpush3.msra.mxu1 %v21166_v6  ;;  %15108 = vmatpush3.msra.mxu0 %v21166_v6 }
0x1b40   :  { %15065 = vmatprep.subr.mxu1 %v21173_v25  ;;  %15109 = vmatprep.subr.mxu0 %v21173_v25 }
0x1b41   :  { %15066 = vmatpush3.msra.mxu1 %v21180_v34  ;;  %15110 = vmatpush3.msra.mxu0 %v21180_v34 }
0x1b42   :  { %15067 = vmatprep.subr.mxu1 %v21187_v56  ;;  %15111 = vmatprep.subr.mxu0 %v21187_v56 }
0x1b43   :  { %15068 = vmatpush3.msra.mxu1 %v21194_v30  ;;  %15112 = vmatpush3.msra.mxu0 %v21194_v30 }
0x1b44   :  { %15069 = vmatprep.subr.mxu1 %v21201_v20  ;;  %15113 = vmatprep.subr.mxu0 %v21201_v20 }
0x1b45   :  { %15070 = vmatpush3.msra.mxu1 %v21208_v52  ;;  %15114 = vmatpush3.msra.mxu0 %v21208_v52 }
0x1b46   :  { %15071 = vmatprep.subr.mxu1 %v21215_v51  ;;  %15115 = vmatprep.subr.mxu0 %v21215_v51 }
0x1b47   :  { %15072 = vmatpush3.msra.mxu1 %v21222_v45  ;;  %15116 = vmatpush3.msra.mxu0 %v21222_v45 }
0x1b48   :  { %15073 = vmatprep.subr.mxu1 %v21229_v28  ;;  %15117 = vmatprep.subr.mxu0 %v21229_v28 }
0x1b49   :  { %15074 = vmatpush3.msra.mxu1 %v21236_v55  ;;  %15118 = vmatpush3.msra.mxu0 %v21236_v55 }
0x1b4a   :  { %15075 = vmatprep.subr.mxu1 %v21243_v24  ;;  %15119 = vmatprep.subr.mxu0 %v21243_v24 }
0x1b4b   :  { %15076 = vmatpush3.msra.mxu1 %v21250_v61  ;;  %15120 = vmatpush3.msra.mxu0 %v21250_v61 }
0x1bc6   :  { %v8498_v21 = vpop.f32.mrf.mxu1  ;;  %v8587_v54 = vpop.f32.mrf.mxu0 }
0x1bc8   :  { %v8500_v59 = vpop.f32.mrf.mxu1  ;;  %v8589_v41 = vpop.f32.mrf.mxu0 }
0x1bca   :  { %v8504_v43 = vpop.f32.mrf.mxu1  ;;  %v8593_v1 = vpop.f32.mrf.mxu0 }
0x1bcc   :  { %v8506_v11 = vpop.f32.mrf.mxu1  ;;  %v8595_v16 = vpop.f32.mrf.mxu0 }
0x1bce   :  { %v8510_v60 = vpop.f32.mrf.mxu1  ;;  %v8599_v4 = vpop.f32.mrf.mxu0 }
0x1bd0   :  { %v8512_v3 = vpop.f32.mrf.mxu1  ;;  %v8601_v38 = vpop.f32.mrf.mxu0 }
0x1bd2   :  { %v21254_v57 = vpop.f32.mrf.mxu1  ;;  %v21256_v37 = vpop.f32.mrf.mxu0 }
0x1bd4   :  { %v21258_v46 = vpop.f32.mrf.mxu1  ;;  %v21260_v9 = vpop.f32.mrf.mxu0 }
0x1bd6   :  { %v8688_v61 = vpop.f32.mrf.mxu1  ;;  %v8777_v24 = vpop.f32.mrf.mxu0 }
0x1bd7   :  { %v8689_v5 = vadd.f32 %v8688_v61, %v8498_v21  ;;  %v8778_v10 = vadd.f32 %v8777_v24, %v8587_v54  ;;  %v21265_v61 = vld [vmem:[%s23242_s7 + $0x8] sm:$0xff] }
0x1bd8   :  { %v8690_v55 = vpop.f32.mrf.mxu1  ;;  %v8779_v28 = vpop.f32.mrf.mxu0 }
0x1bd9   :  { %v8691_v12 = vadd.f32 %v8690_v55, %v8500_v59  ;;  %v8780_v27 = vadd.f32 %v8779_v28, %v8589_v41 }
0x1bda   :  { %v8694_v45 = vpop.f32.mrf.mxu1  ;;  %v8783_v51 = vpop.f32.mrf.mxu0 }
0x1bdb   :  { %v8695_v23 = vadd.f32 %v8694_v45, %v8504_v43  ;;  %v8784_v39 = vadd.f32 %v8783_v51, %v8593_v1 }
0x1bdc   :  { %v8696_v52 = vpop.f32.mrf.mxu1  ;;  %v8785_v20 = vpop.f32.mrf.mxu0 }
0x1bdd   :  { %v8697_v58 = vadd.f32 %v8696_v52, %v8506_v11  ;;  %v8786_v50 = vadd.f32 %v8785_v20, %v8595_v16  ;;  %v21297_v11 = vld [vmem:[%s23242_s7 + $0x28] sm:$0xff] }
0x1bde   :  { %v8700_v30 = vpop.f32.mrf.mxu1  ;;  %v8789_v56 = vpop.f32.mrf.mxu0 }
0x1bdf   :  { %v8701_v51 = vadd.f32 %v8700_v30, %v8510_v60 }
0x1be0   :  { %v8702_v34 = vpop.f32.mrf.mxu1  ;;  %v8791_v25 = vpop.f32.mrf.mxu0 }
0x1be1   :  { %v8703_v28 = vadd.f32 %v8702_v34, %v8512_v3  ;;  %v8792_v24 = vadd.f32 %v8791_v25, %v8601_v38 }
0x1be2   :  { %v8706_v6 = vpop.f32.mrf.mxu1  ;;  %v8795_v13 = vpop.f32.mrf.mxu0 }
0x1be3   :  { %v8707_v21 = vadd.f32 %v8706_v6, %v21254_v57  ;;  %v8796_v54 = vadd.f32 %v8795_v13, %v21256_v37  ;;  %v21304_v13 = vld [vmem:[%s23242_s7 + $0x20] sm:$0xff] }
0x1be4   :  { %v8708_v29 = vpop.f32.mrf.mxu1  ;;  %v8797_v33 = vpop.f32.mrf.mxu0 }
0x1be5   :  { %v8709_v43 = vadd.f32 %v8708_v29, %v21258_v46  ;;  %v8798_v1 = vadd.f32 %v8797_v33, %v21260_v9  ;;  %v21311_v46 = vld [vmem:[%s23242_s7 + $0x38] sm:$0xff] }
0x1be6   :  { %v8894_v63 = vpop.f32.mrf.mxu1  ;;  %v8983_v44 = vpop.f32.mrf.mxu0 }
0x1be7   :  { %v9006_v48 = vadd.f32 %v8894_v63, %v8689_v5  ;;  %v9008_v26 = vadd.f32 %v8983_v44, %v8778_v10 }
0x1be8   :  { %v8896_v18 = vpop.f32.mrf.mxu1  ;;  %v8985_v53 = vpop.f32.mrf.mxu0 }
0x1be9   :  { %v9007_v0 = vadd.f32 %v8896_v18, %v8691_v12  ;;  %v9009_v49 = vadd.f32 %v8985_v53, %v8780_v27  ;;  %v21272_v18 = vld [vmem:[%s23242_s7] sm:$0xff] }
0x1bea   :  { %v8900_v14 = vpop.f32.mrf.mxu1  ;;  %v8989_v47 = vpop.f32.mrf.mxu0  ;;  %v9054_v53 = vmul.f32 %v21272_v18, %v9006_v48  ;;  %v9147_v44 = vmul.f32 %v21272_v18, %v9008_v26 }
0x1beb   :  { %v9055_v55 = vmul.f32 %v21265_v61, %v9007_v0  ;;  %v9148_v63 = vmul.f32 %v21265_v61, %v9009_v49  ;;  %v9010_v27 = vadd.f32 %v8900_v14, %v8695_v23  ;;  %v9012_v5 = vadd.f32 %v8989_v47, %v8784_v39  ;;  %v21279_v14 = vld [vmem:[%s23242_s7 + $0x18] sm:$0xff] }
0x1bec   :  { %v8902_v12 = vpop.f32.mrf.mxu1  ;;  %v8991_v10 = vpop.f32.mrf.mxu0  ;;  %v8790_v0 = vadd.f32 %v8789_v56, %v8599_v4 }
0x1bed   :  { %v9011_v20 = vadd.f32 %v8902_v12, %v8697_v58  ;;  %v9013_v52 = vadd.f32 %v8991_v10, %v8786_v50  ;;  %9126 = vmatprep.mubr.f32.mxu1 %v9055_v55  ;;  %9219 = vmatprep.mubr.f32.mxu0 %v9148_v63  ;;  %v21286_v50 = vld [vmem:[%s23242_s7 + $0x10] sm:$0xff]  ;;  %v21325_v12 = vld [vmem:[%s23239_s4] sm:$0xff] }
0x1bee   :  { %v8906_v49 = vpop.f32.mrf.mxu1  ;;  %v8995_v45 = vpop.f32.mrf.mxu0  ;;  %9127 = vmatmul.mubr.f32.vlgmr.msra.gmra.mxu1 %v9054_v53  ;;  %9220 = vmatmul.mubr.f32.vlgmr.msra.gmra.mxu0 %v9147_v44  ;;  %v9056_v58 = vmul.f32 %v21286_v50, %v9010_v27  ;;  %v9149_v25 = vmul.f32 %v21286_v50, %v9012_v5  ;;  %v21318_v63 = vld [vmem:[%s23242_s7 + $0x30] sm:$0xff] }
0x1bef   :  { %v9057_v23 = vmul.f32 %v21279_v14, %v9011_v20  ;;  %v9150_v47 = vmul.f32 %v21279_v14, %v9013_v52  ;;  %v9014_v39 = vadd.f32 %v8906_v49, %v8701_v51  ;;  %v9016_v34 = vadd.f32 %v8995_v45, %v8790_v0  ;;  %v13882_v0 = vld [vmem:[%s23243_s0 + $0xa8] sm:$0xff]  ;;  %v13881_v45 = vld [vmem:[%s23243_s0 + $0xa0] sm:$0xff] }
0x1bf0   :  { %v8908_v26 = vpop.f32.mrf.mxu1  ;;  %v8997_v48 = vpop.f32.mrf.mxu0 }
0x1bf1   :  { %v9015_v56 = vadd.f32 %v8908_v26, %v8703_v28  ;;  %v9017_v30 = vadd.f32 %v8997_v48, %v8792_v24  ;;  %9131 = vmatprep.mubr.f32.mxu1 %v9057_v23  ;;  %9224 = vmatprep.mubr.f32.mxu0 %v9150_v47  ;;  %v9058_v6 = vmul.f32 %v21304_v13, %v9014_v39  ;;  %v13883_v24 = vld [vmem:[%s23243_s0 + $0xb0] sm:$0xff] }
0x1bf2   :  { %v8912_v59 = vpop.f32.mrf.mxu1  ;;  %v9001_v41 = vpop.f32.mrf.mxu0  ;;  %9132 = vmatmul.mubr.f32.gmra.mxu1 %v9056_v58  ;;  %9225 = vmatmul.mubr.f32.gmra.mxu0 %v9149_v25  ;;  %v9151_v3 = vmul.f32 %v21304_v13, %v9016_v34  ;;  %v13884_v25 = vld [vmem:[%s23243_s0 + $0xb8] sm:$0xff] }
0x1bf3   :  { %v9059_v16 = vmul.f32 %v21297_v11, %v9015_v56  ;;  %v9152_v60 = vmul.f32 %v21297_v11, %v9017_v30  ;;  %v9018_v29 = vadd.f32 %v8912_v59, %v8707_v21  ;;  %v9020_v38 = vadd.f32 %v9001_v41, %v8796_v54 }
0x1bf4   :  { %v8914_v4 = vpop.f32.mrf.mxu1  ;;  %v9003_v33 = vpop.f32.mrf.mxu0 }
0x1bf5   :  { %v9019_v57 = vadd.f32 %v8914_v4, %v8709_v43  ;;  %v9021_v37 = vadd.f32 %v9003_v33, %v8798_v1  ;;  %9136 = vmatprep.mubr.f32.mxu1 %v9059_v16  ;;  %9229 = vmatprep.mubr.f32.mxu0 %v9152_v60  ;;  %v9060_v53 = vmul.f32 %v21318_v63, %v9018_v29 }
0x1bf6   :  { %9137 = vmatmul.mubr.f32.gmra.mxu1 %v9058_v6  ;;  %9230 = vmatmul.mubr.f32.gmra.mxu0 %v9151_v3  ;;  %v9153_v27 = vmul.f32 %v21318_v63, %v9020_v38 }
0x1bf7   :  { %v9061_v9 = vmul.f32 %v21311_v46, %v9019_v57  ;;  %v9154_v55 = vmul.f32 %v21311_v46, %v9021_v37 }
0x1bf9   :  { %9141 = vmatprep.mubr.f32.mxu1 %v9061_v9  ;;  %9234 = vmatprep.mubr.f32.mxu0 %v9154_v55 }
0x1bfa   :  { %9142 = vmatmul.mubr.f32.gmra.mxu1 %v9060_v53  ;;  %9235 = vmatmul.mubr.f32.gmra.mxu0 %v9153_v27  ;;  %v13909_v27 = vld [vmem:[%s23244_s6 + $0x40] sm:$0xff] }
0x1bfb   :  { %15815 = vmatprep.mubr.msk.f32.mxu1 %vm56_vm0, %v21325_v12  ;;  %9527 = vmatprep.mubr.f32.mxu0 %v23534_v40 }
0x1cae   :  { %v15077_v10 = vpop.f32.mrf.mxu1 }
0x1cb0   :  { %v15078_v44 = vpop.f32.mrf.mxu1 }
0x1cb1   :  { %v15079_v51 = vadd.f32 %v15078_v44, %v15077_v10  ;;  %v13932_v10 = vld [vmem:[%s23244_s6 + $0xb8] sm:$0xff]  ;;  %v13931_v44 = vld [vmem:[%s23244_s6 + $0xb0] sm:$0xff] }
0x1cb2   :  { %v15080_v5 = vpop.f32.mrf.mxu1 }
0x1cb3   :  { %v9245_v58 = vadd.f32 %v15079_v51, %v13881_v45  ;;  %v13927_v51 = vld [vmem:[%s23244_s6 + $0x90] sm:$0xff]  ;;  %v13925_v45 = vld [vmem:[%s23244_s6 + $0x80] sm:$0xff] }
0x1cb4   :  { %v15081_v20 = vpop.f32.mrf.mxu1 }
0x1cb5   :  { %v15082_v52 = vadd.f32 %v15081_v20, %v15080_v5  ;;  %v13885_v21 = vmul.f32 -1.442695, %v9245_v58  ;;  %v13930_v5 = vld [vmem:[%s23244_s6 + $0xa8] sm:$0xff]  ;;  %v13929_v20 = vld [vmem:[%s23244_s6 + $0xa0] sm:$0xff] }
0x1cb6   :  { %v15083_v49 = vpop.f32.mrf.mxu1 }
0x1cb7   :  { %v9246_v23 = vadd.f32 %v15082_v52, %v13882_v0  ;;  %v13928_v52 = vld [vmem:[%s23244_s6 + $0x98] sm:$0xff] }
0x1cb8   :  { %v15084_v28 = vpop.f32.mrf.mxu1  ;;  %v9442_v0 = vld [vmem:[%s23244_s6 + $0x38] sm:$0xff] }
0x1cb9   :  { %v15085_v47 = vadd.f32 %v15084_v28, %v15083_v49  ;;  %v13886_v34 = vmul.f32 -1.442695, %v9246_v23  ;;  %v13926_v49 = vld [vmem:[%s23244_s6 + $0x88] sm:$0xff] }
0x1cba   :  { %v15086_v39 = vpop.f32.mrf.mxu1 }
0x1cbb   :  { %v9247_v26 = vadd.f32 %v15085_v47, %v13883_v24 }
0x1cbc   :  { %v15087_v48 = vpop.f32.mrf.mxu1 }
0x1cbd   :  { %v13887_v56 = vmul.f32 -1.442695, %v9247_v26  ;;  %v15088_v30 = vadd.f32 %v15087_v48, %v15086_v39  ;;  %v9441_v39 = vld [vmem:[%s23244_s6 + $0x30] sm:$0xff]  ;;  %v9440_v48 = vld [vmem:[%s23244_s6 + $0x28] sm:$0xff] }
0x1cbf   :  { %16146 = vpow2.f32 %v13887_v56  ;;  %v9248_v54 = vadd.f32 %v15088_v30, %v13884_v25  ;;  %v9439_v25 = vld [vmem:[%s23244_s6 + $0x20] sm:$0xff]  ;;  %v9438_v56 = vld [vmem:[%s23244_s6 + $0x18] sm:$0xff]  ;;  %v9437_v30 = vld [vmem:[%s23244_s6 + $0x10] sm:$0xff] }
0x1cc0   :  { %16148 = vpow2.f32 %v13886_v34 }
0x1cc1   :  { %v13888_v59 = vmul.f32 -1.442695, %v9248_v54  ;;  %16150 = vpow2.f32 %v13885_v21  ;;  %v9436_v54 = vld [vmem:[%s23244_s6 + $0x8] sm:$0xff] }
0x1cc3   :  { %16152 = vpow2.f32 %v13888_v59  ;;  %v9435_v59 = vld [vmem:[%s23244_s6] sm:$0xff] }
0x1ccc   :  { %v16147_v41 = vpop.eup %16146 }
0x1ccd   :  { %v16149_v43 = vpop.eup %16148  ;;  %v9263_v1 = vadd.f32 1.0, %v16147_v41 }
0x1cce   :  { %v16151_v16 = vpop.eup %16150  ;;  %v9262_v6 = vadd.f32 1.0, %v16149_v43 }
0x1ccf   :  { %16154 = vrcp.f32 %v9263_v1  ;;  %v9261_v4 = vadd.f32 1.0, %v16151_v16  ;;  %v23866_v16 = vld [vmem:[#allocation4_spill] sm:$0xff] }
0x1cd0   :  { %v16153_v60 = vpop.eup %16152 }
0x1cd1   :  { %v9264_v29 = vadd.f32 1.0, %v16153_v60 }
0x1cd3   :  { %16156 = vrcp.f32 %v9264_v29  ;;  %v23868_v29 = vld [vmem:[#allocation6_spill] sm:$0xff] }
0x1cd4   :  { %16158 = vrcp.f32 %v9262_v6  ;;  %v23867_v6 = vld [vmem:[#allocation5_spill] sm:$0xff] }
0x1cd5   :  { %16160 = vrcp.f32 %v9261_v4  ;;  %v23869_v4 = vld [vmem:[#allocation7_spill] sm:$0xff] }
0x1cdc   :  { %v16155_v33 = vpop.eup %16154 }
0x1cdd   :  { %v9308_v37 = vmul.f32 %v16155_v33, %v20727_v35  ;;  %v23870_v33 = vld [vmem:[#allocation8_spill] sm:$0xff] }
0x1ce0   :  { %v16157_v3 = vpop.eup %16156 }
0x1ce1   :  { %v9309_v38 = vmul.f32 %v16157_v3, %v20735_v36  ;;  %v16159_v57 = vpop.eup %16158  ;;  %v23871_v3 = vld [vmem:[#allocation9_spill] sm:$0xff] }
0x1ce2   :  { %v16161_v9 = vpop.eup %16160  ;;  %v9307_v55 = vmul.f32 %v16159_v57, %v20719_v62  ;;  %v23873_v57 = vld [vmem:[#allocation11_spill] sm:$0xff] }
0x1ce3   :  { %15807 = vmatprep.subr.mxu1 %v9309_v38  ;;  %v9306_v53 = vmul.f32 %v16161_v9, %v20711_v17  ;;  %v23875_v9 = vld [vmem:[#allocation13_spill] sm:$0xff] }
0x1ce4   :  { %15808 = vmatpush3.msra.mxu1 %v9309_v38  ;;  %v23872_v38 = vld [vmem:[#allocation10_spill] sm:$0xff] }
0x1ce5   :  { %15809 = vmatprep.subr.mxu1 %v9308_v37 }
0x1ce6   :  { %15810 = vmatpush3.msra.mxu1 %v9308_v37  ;;  %v23874_v37 = vld [vmem:[#allocation12_spill] sm:$0xff] }
0x1ce7   :  { %15811 = vmatprep.subr.mxu1 %v9307_v55 }
0x1ce8   :  { %15812 = vmatpush3.msra.mxu1 %v9307_v55  ;;  %v23876_v55 = vld [vmem:[#allocation14_spill] sm:$0xff] }
0x1ce9   :  { %15813 = vmatprep.subr.mxu1 %v9306_v53 }
0x1cea   :  { %15814 = vmatpush3.msra.mxu1 %v9306_v53  ;;  %v23877_v53 = vld [vmem:[#allocation15_spill] sm:$0xff] }
0x1ceb   :  { %15816 = vmatmul.mubr.msk.f32.vlgmr.msra.gmra.mxu1 %vm56_vm0, %v20759_v32  ;;  %v23864_v32 = vld [vmem:[#allocation2_spill] sm:$0xff]  ;;  %9697 = vmatprep.subr.mxu1 %v13932_v10  ;;  %v23889_v10 = vld [vmem:[#allocation27_spill] sm:$0xff] }
0x1cec   :  { %15818 = vmatprep.mubr.msk.f32.mxu1 %vm56_vm0, %v20766_v31  ;;  %v23865_v31 = vld [vmem:[#allocation3_spill] sm:$0xff]  ;;  %9698 = vmatpush1.msra.mxu1 %v13931_v44  ;;  %v23890_v44 = vld [vmem:[#allocation28_spill] sm:$0xff] }
0x1ced   :  { %9699 = vmatprep.subr.mxu1 %v13930_v5  ;;  %v23891_v5 = vld [vmem:[#allocation29_spill] sm:$0xff] }
0x1cee   :  { %9700 = vmatpush1.msra.mxu1 %v13929_v20  ;;  %v23892_v20 = vld [vmem:[#allocation30_spill] sm:$0xff] }
0x1cef   :  { %15819 = vmatmul.mubr.msk.f32.gmra.mxu1 %vm56_vm0, %v20773_v15  ;;  %v13916_v15 = vld [vmem:[%s23244_s6 + $0x78] sm:$0xff]  ;;  %9701 = vmatprep.subr.mxu1 %v13928_v52  ;;  %v23893_v52 = vld [vmem:[#allocation31_spill] sm:$0xff] }
0x1cf0   :  { %15821 = vmatprep.mubr.msk.f32.mxu1 %vm56_vm0, %v20780_v7  ;;  %9487 = vmatprep.subr.mxu0 %v13916_v15  ;;  %v13915_v7 = vld [vmem:[%s23244_s6 + $0x70] sm:$0xff]  ;;  %v23881_v15 = vld [vmem:[#allocation19_spill] sm:$0xff] }
0x1cf1   :  { %9488 = vmatpush1.msra.mxu0 %v13915_v7  ;;  %9702 = vmatpush1.msra.mxu1 %v13927_v51  ;;  %v23882_v7 = vld [vmem:[#allocation20_spill] sm:$0xff] }
0x1cf2   :  { %9703 = vmatprep.subr.mxu1 %v13926_v49  ;;  %v23894_v51 = vld [vmem:[#allocation32_spill] sm:$0xff]  ;;  %v23896_v49 = vld [vmem:[#allocation34_spill] sm:$0xff] }
0x1cf3   :  { %15822 = vmatmul.mubr.msk.f32.gmra.mxu1 %vm56_vm0, %v20787_v42  ;;  %v13914_v42 = vld [vmem:[%s23244_s6 + $0x68] sm:$0xff] }
0x1cf4   :  { %15824 = vmatprep.mubr.msk.f32.mxu1 %vm56_vm0, %v20794_v19  ;;  %9489 = vmatprep.subr.mxu0 %v13914_v42  ;;  %v13913_v19 = vld [vmem:[%s23244_s6 + $0x60] sm:$0xff]  ;;  %v23883_v42 = vld [vmem:[#allocation21_spill] sm:$0xff] }
0x1cf5   :  { %9490 = vmatpush1.msra.mxu0 %v13913_v19  ;;  %9704 = vmatpush1.msra.mxu1 %v13925_v45  ;;  %v23884_v19 = vld [vmem:[#allocation22_spill] sm:$0xff]  ;;  %v23897_v45 = vld [vmem:[#allocation35_spill] sm:$0xff] }
0x1cf7   :  { %15825 = vmatmul.mubr.msk.f32.gmra.mxu1 %vm56_vm0, %v20801_v8  ;;  %v13912_v8 = vld [vmem:[%s23244_s6 + $0x58] sm:$0xff] }
0x1cf8   :  { %15827 = vmatprep.mubr.msk.f32.mxu1 %vm56_vm0, %v20808_v22  ;;  %9491 = vmatprep.subr.mxu0 %v13912_v8  ;;  %v13911_v22 = vld [vmem:[%s23244_s6 + $0x50] sm:$0xff]  ;;  %v23885_v8 = vld [vmem:[#allocation23_spill] sm:$0xff] }
0x1cf9   :  { %9492 = vmatpush1.msra.mxu0 %v13911_v22  ;;  %v23886_v22 = vld [vmem:[#allocation24_spill] sm:$0xff] }
0x1cfb   :  { %15828 = vmatmul.mubr.msk.f32.gmra.mxu1 %vm56_vm0, %v20815_v2  ;;  %v13910_v2 = vld [vmem:[%s23244_s6 + $0x48] sm:$0xff] }
0x1cfc   :  { %15830 = vmatprep.mubr.msk.f32.mxu1 %vm56_vm0, %v23864_v32  ;;  %9493 = vmatprep.subr.mxu0 %v13910_v2  ;;  %v23879_v32 = vld [vmem:[#allocation17_spill] sm:$0xff] }
0x1cfd   :  { %9494 = vmatpush1.msra.mxu0 %v13909_v27  ;;  %v23887_v2 = vld [vmem:[#allocation25_spill] sm:$0xff]  ;;  %v23888_v27 = vld [vmem:[#allocation26_spill] sm:$0xff] }
0x1cfe   :  { %9588 = vmatprep.subr.mxu0 %v9442_v0  ;;  %v23895_v0 = vld [vmem:[#allocation33_spill] sm:$0xff] }
0x1cff   :  { %15831 = vmatmul.mubr.msk.f32.gmra.mxu1 %vm56_vm0, %v23865_v31  ;;  %v23880_v31 = vld [vmem:[#allocation18_spill] sm:$0xff] }
0x1d00   :  { %9737 = vmatprep.mubr.f32.mxu1 %v23534_v40 }
0x1dab   :  { %v15817_v28 = vpop.f32.mrf.mxu1 }
0x1dad   :  { %v9376_v24 = vpop.f32.mrf.mxu1 }
0x1daf   :  { %v15820_v23 = vpop.f32.mrf.mxu1 }
0x1db1   :  { %v9386_v47 = vpop.f32.mrf.mxu1 }
0x1db3   :  { %v15823_v58 = vpop.f32.mrf.mxu1 }
0x1db5   :  { %v9396_v26 = vpop.f32.mrf.mxu1 }
0x1db6   :  { %13917 = vmatmul.mubr.msk.f32.vlgmr.msra.gmra.mxu0 %vm56_vm0, %v9396_v26 }
0x1db7   :  { %v15826_v34 = vpop.f32.mrf.mxu1  ;;  %9533 = vmatprep.mubr.f32.mxu0 %v23534_v40  ;;  %9589 = vmatpush1.msra.mxu0 %v9441_v39 }
0x1db8   :  { %9590 = vmatprep.subr.mxu0 %v9440_v48 }
0x1db9   :  { %v9406_v21 = vpop.f32.mrf.mxu1  ;;  %9591 = vmatpush1.msra.mxu0 %v9439_v25 }
0x1dba   :  { %13918 = vmatmul.mubr.msk.f32.gmra.mxu0 %vm56_vm0, %v15823_v58  ;;  %9592 = vmatprep.subr.mxu0 %v9438_v56 }
0x1dbb   :  { %v15829_v41 = vpop.f32.mrf.mxu1  ;;  %9539 = vmatprep.mubr.f32.mxu0 %v23534_v40  ;;  %9593 = vmatpush1.msra.mxu0 %v9437_v30 }
0x1dbc   :  { %9594 = vmatprep.subr.mxu0 %v9436_v54 }
0x1dbd   :  { %v9416_v43 = vpop.f32.mrf.mxu1  ;;  %9595 = vmatpush1.msra.mxu0 %v9435_v59 }
0x1dbe   :  { %13919 = vmatmul.mubr.msk.f32.gmra.mxu0 %vm56_vm0, %v9406_v21  ;;  %13933 = vmatmul.mubr.msk.f32.vlgmr.msra.gmra.mxu1 %vm56_vm0, %v9416_v43 }
0x1dbf   :  { %9545 = vmatprep.mubr.f32.mxu0 %v23534_v40  ;;  %9743 = vmatprep.mubr.f32.mxu1 %v23534_v40  ;;  %v15832_v1 = vpop.f32.mrf.mxu1 }
0x1dc0   :  { %15149 = vmatprep.subr.mxu0 %v23866_v16 }
0x1dc1   :  { %v9426_v60 = vpop.f32.mrf.mxu1 }
0x1dc2   :  { %13920 = vmatmul.mubr.msk.f32.gmra.mxu0 %vm56_vm0, %v15826_v34  ;;  %13934 = vmatmul.mubr.msk.f32.gmra.mxu1 %vm56_vm0, %v15829_v41 }
0x1dc3   :  { %9628 = vmatprep.mubr.f32.mxu0 %v23534_v40  ;;  %9749 = vmatprep.mubr.f32.mxu1 %v23534_v40 }
0x1dc6   :  { %13921 = vmatmul.mubr.msk.f32.vlgmr.msra.gmra.mxu0 %vm56_vm0, %v9376_v24  ;;  %13935 = vmatmul.mubr.msk.f32.gmra.mxu1 %vm56_vm0, %v9426_v60 }
0x1dc7   :  { %9634 = vmatprep.mubr.f32.mxu0 %v23534_v40  ;;  %9755 = vmatprep.mubr.f32.mxu1 %v23534_v40 }
0x1dc8   :  { %15150 = vmatpush3.msra.mxu0 %v23867_v6 }
0x1dc9   :  { %15151 = vmatprep.subr.mxu0 %v23868_v29 }
0x1dca   :  { %13922 = vmatmul.mubr.msk.f32.gmra.mxu0 %vm56_vm0, %v15817_v28  ;;  %13936 = vmatmul.mubr.msk.f32.gmra.mxu1 %vm56_vm0, %v15832_v1  ;;  %v21497_v28 = vpop.f32.mrf.mxu0 }
0x1dcb   :  { %9640 = vmatprep.mubr.f32.mxu0 %v23534_v40  ;;  %15152 = vmatpush3.msra.mxu0 %v23869_v4 }
0x1dcc   :  { %15153 = vmatprep.subr.mxu0 %v23870_v33  ;;  %15841 = vmatprep.mubr.msk.f32.mxu1 %vm56_vm0, %v21325_v12  ;;  %v23878_v12 = vld [vmem:[#allocation16_spill] sm:$0xff]  ;;  %v21499_v24 = vpop.f32.mrf.mxu0 }
0x1dcd   :  { %15154 = vmatpush3.msra.mxu0 %v23871_v3 }
0x1dce   :  { %13923 = vmatmul.mubr.msk.f32.gmra.mxu0 %vm56_vm0, %v9386_v47  ;;  %15155 = vmatprep.subr.mxu0 %v23872_v38 }
0x1dcf   :  { %9646 = vmatprep.mubr.f32.mxu0 %v23534_v40  ;;  %15156 = vmatpush3.msra.mxu0 %v23873_v57 }
0x1dd0   :  { %15157 = vmatprep.subr.mxu0 %v23874_v37 }
0x1dd1   :  { %15158 = vmatpush3.msra.mxu0 %v23875_v9 }
0x1dd2   :  { %13924 = vmatmul.mubr.msk.f32.gmra.mxu0 %vm56_vm0, %v15820_v23  ;;  %15159 = vmatprep.subr.mxu0 %v23876_v55  ;;  %v21501_v23 = vpop.f32.mrf.mxu0 }
0x1dd3   :  { %15160 = vmatpush3.msra.mxu0 %v23877_v53 }
0x1dd4   :  { %15161 = vmatprep.subr.mxu0 %v23878_v12  ;;  %v21503_v47 = vpop.f32.mrf.mxu0 }
0x1dd5   :  { %15162 = vmatpush3.msra.mxu0 %v23879_v32 }
0x1dd6   :  { %15163 = vmatprep.subr.mxu0 %v23880_v31  ;;  %v21505_v58 = vpop.f32.mrf.mxu0 }
0x1dd7   :  { %15164 = vmatpush3.msra.mxu0 %v23881_v15 }
0x1dd8   :  { %15165 = vmatprep.subr.mxu0 %v23882_v7  ;;  %v21507_v39 = vpop.f32.mrf.mxu0 }
0x1dd9   :  { %15166 = vmatpush3.msra.mxu0 %v23883_v42 }
0x1dda   :  { %15167 = vmatprep.subr.mxu0 %v23884_v19  ;;  %v21509_v26 = vpop.f32.mrf.mxu0 }
0x1ddb   :  { %15168 = vmatpush3.msra.mxu0 %v23885_v8 }
0x1ddc   :  { %15169 = vmatprep.subr.mxu0 %v23886_v22  ;;  %v21511_v48 = vpop.f32.mrf.mxu0 }
0x1ddd   :  { %15170 = vmatpush3.msra.mxu0 %v23887_v2 }
0x1dde   :  { %15171 = vmatprep.subr.mxu0 %v23888_v27 }
0x1ddf   :  { %15172 = vmatpush3.msra.mxu0 %v23889_v10 }
0x1de0   :  { %15173 = vmatprep.subr.mxu0 %v23890_v44 }
0x1de1   :  { %15174 = vmatpush3.msra.mxu0 %v23891_v5 }
0x1de2   :  { %15175 = vmatprep.subr.mxu0 %v23892_v20 }
0x1de3   :  { %15176 = vmatpush3.msra.mxu0 %v23893_v52 }
0x1de4   :  { %15177 = vmatprep.subr.mxu0 %v23894_v51 }
0x1de5   :  { %15178 = vmatpush3.msra.mxu0 %v23895_v0 }
0x1de6   :  { %15179 = vmatprep.subr.mxu0 %v23896_v49 }
0x1de7   :  { %15180 = vmatpush3.msra.mxu0 %v23897_v45 }
0x1e76   :  { %v9529_v25 = vpop.f32.mrf.mxu0 }
0x1e78   :  { %v9531_v34 = vpop.f32.mrf.mxu0 }
0x1e7a   :  { %v9535_v56 = vpop.f32.mrf.mxu0 }
0x1e7c   :  { %v9537_v30 = vpop.f32.mrf.mxu0 }
0x1e7e   :  { %v9541_v21 = vpop.f32.mrf.mxu0  ;;  %v9739_v54 = vpop.f32.mrf.mxu1 }
0x1e80   :  { %v9543_v59 = vpop.f32.mrf.mxu0  ;;  %v9741_v41 = vpop.f32.mrf.mxu1 }
0x1e82   :  { %v9547_v43 = vpop.f32.mrf.mxu0  ;;  %v9745_v1 = vpop.f32.mrf.mxu1 }
0x1e84   :  { %v9549_v16 = vpop.f32.mrf.mxu0  ;;  %v9747_v6 = vpop.f32.mrf.mxu1 }
0x1e86   :  { %v9630_v60 = vpop.f32.mrf.mxu0  ;;  %v9751_v38 = vpop.f32.mrf.mxu1 }
0x1e87   :  { %v9631_v29 = vadd.f32 %v9630_v60, %v9529_v25 }
0x1e88   :  { %v9632_v4 = vpop.f32.mrf.mxu0  ;;  %v9753_v15 = vpop.f32.mrf.mxu1 }
0x1e89   :  { %v9633_v33 = vadd.f32 %v9632_v4, %v9531_v34  ;;  %v9762_v3 = vadd.f32 %v9739_v54, %v9631_v29  ;;  %v15123_v34 = vadd.f32 %v21499_v24, %v21497_v28  ;;  %v13891_v28 = vld [vmem:[%s23245_s1 + $0xb0] sm:$0xff] }
0x1e8a   :  { %v9636_v57 = vpop.f32.mrf.mxu0  ;;  %v9757_v10 = vpop.f32.mrf.mxu1 }
0x1e8b   :  { %v9763_v37 = vadd.f32 %v9741_v41, %v9633_v33  ;;  %v9637_v9 = vadd.f32 %v9636_v57, %v9535_v56  ;;  %v9770_v32 = vmul.f32 %v21272_v18, %v9762_v3  ;;  %v13938_v57 = vld [vmem:[%s23246_s2 + $0xa8] sm:$0xff] }
0x1e8c   :  { %v9638_v55 = vpop.f32.mrf.mxu0  ;;  %v9759_v49 = vpop.f32.mrf.mxu1 }
0x1e8d   :  { %v9639_v53 = vadd.f32 %v9638_v55, %v9537_v30  ;;  %v9771_v12 = vmul.f32 %v21265_v61, %v9763_v37  ;;  %v9764_v31 = vadd.f32 %v9745_v1, %v9637_v9  ;;  %v15129_v30 = vadd.f32 %v21507_v39, %v21505_v58 }
0x1e8e   :  { %v9642_v7 = vpop.f32.mrf.mxu0 }
0x1e8f   :  { %v9765_v42 = vadd.f32 %v9747_v6, %v9639_v53  ;;  %v9643_v19 = vadd.f32 %v9642_v7, %v9541_v21  ;;  %9842 = vmatprep.mubr.f32.mxu0 %v9771_v12  ;;  %v9772_v27 = vmul.f32 %v21286_v50, %v9764_v31  ;;  %v9280_v54 = vadd.f32 %v15129_v30, %v13891_v28  ;;  %v13939_v31 = vld [vmem:[%s23246_s2 + $0xb0] sm:$0xff]  ;;  %v13969_v30 = vld [vmem:[%s23240_s5 + $0xe0] sm:$0xff] }
0x1e90   :  { %v9644_v8 = vpop.f32.mrf.mxu0  ;;  %9843 = vmatmul.mubr.f32.vlgmr.msra.gmra.mxu0 %v9770_v32  ;;  %v21610_v28 = vld [vmem:[%s23239_s4 + $0x10] sm:$0xff] }
0x1e91   :  { %v9645_v22 = vadd.f32 %v9644_v8, %v9543_v59  ;;  %v9773_v2 = vmul.f32 %v21279_v14, %v9765_v42  ;;  %v9766_v44 = vadd.f32 %v9751_v38, %v9643_v19  ;;  %v15132_v59 = vadd.f32 %v21511_v48, %v21509_v26  ;;  %v13937_v26 = vld [vmem:[%s23246_s2 + $0xa0] sm:$0xff]  ;;  %v13940_v8 = vld [vmem:[%s23246_s2 + $0xb8] sm:$0xff] }
0x1e92   :  { %v9648_v5 = vpop.f32.mrf.mxu0 }
0x1e93   :  { %v9767_v20 = vadd.f32 %v9753_v15, %v9645_v22  ;;  %v9649_v61 = vadd.f32 %v9648_v5, %v9547_v43  ;;  %9847 = vmatprep.mubr.f32.mxu0 %v9773_v2  ;;  %v9774_v0 = vmul.f32 %v21304_v13, %v9766_v44  ;;  %v15126_v13 = vadd.f32 %v21503_v47, %v21501_v23  ;;  %v13892_v23 = vld [vmem:[%s23245_s1 + $0xb8] sm:$0xff] }
0x1e94   :  { %v9650_v18 = vpop.f32.mrf.mxu0  ;;  %9848 = vmatmul.mubr.f32.gmra.mxu0 %v9772_v27  ;;  %v13895_v47 = vmul.f32 -1.442695, %v9280_v54  ;;  %v9281_v41 = vadd.f32 %v15132_v59, %v13892_v23  ;;  %v21624_v54 = vld [vmem:[%s23239_s4 + $0x20] sm:$0xff]  ;;  %v21631_v59 = vld [vmem:[%s23239_s4 + $0x28] sm:$0xff]  ;;  %v21638_v23 = vld [vmem:[%s23239_s4 + $0x30] sm:$0xff] }
0x1e95   :  { %v9651_v52 = vadd.f32 %v9650_v18, %v9549_v16  ;;  %v9775_v51 = vmul.f32 %v21297_v11, %v9767_v20  ;;  %v9768_v45 = vadd.f32 %v9757_v10, %v9649_v61  ;;  %v13889_v11 = vld [vmem:[%s23245_s1 + $0xa0] sm:$0xff] }
0x1e96   :  { %v9278_v56 = vadd.f32 %v15123_v34, %v13889_v11  ;;  %v13896_v58 = vmul.f32 -1.442695, %v9281_v41  ;;  %v21652_v41 = vld [vmem:[%s23239_s4 + $0x40] sm:$0xff] }
0x1e97   :  { %v9769_v25 = vadd.f32 %v9759_v49, %v9651_v52  ;;  %9852 = vmatprep.mubr.f32.mxu0 %v9775_v51  ;;  %v9776_v50 = vmul.f32 %v21318_v63, %v9768_v45 }
0x1e98   :  { %9853 = vmatmul.mubr.f32.gmra.mxu0 %v9774_v0  ;;  %v13893_v21 = vmul.f32 -1.442695, %v9278_v56 }
0x1e99   :  { %v9777_v14 = vmul.f32 %v21311_v46, %v9769_v25  ;;  %v13890_v46 = vld [vmem:[%s23245_s1 + $0xa8] sm:$0xff] }
0x1e9a   :  { %v9279_v63 = vadd.f32 %v15126_v13, %v13890_v46  ;;  %16162 = vpow2.f32 %v13893_v21  ;;  %v21603_v21 = vld [vmem:[%s23239_s4 + $0x8] sm:$0xff] }
0x1e9b   :  { %9857 = vmatprep.mubr.f32.mxu0 %v9777_v14 }
0x1e9c   :  { %9858 = vmatmul.mubr.f32.gmra.mxu0 %v9776_v50  ;;  %v13894_v24 = vmul.f32 -1.442695, %v9279_v63 }
0x1e9d   :  { %10219 = vmatprep.mubr.f32.mxu0 %v23534_v40 }
0x1e9e   :  { %16164 = vpow2.f32 %v13894_v24  ;;  %v21617_v24 = vld [vmem:[%s23239_s4 + $0x18] sm:$0xff] }
0x1e9f   :  { %16166 = vpow2.f32 %v13895_v47  ;;  %v21645_v47 = vld [vmem:[%s23239_s4 + $0x38] sm:$0xff] }
0x1ea0   :  { %16168 = vpow2.f32 %v13896_v58  ;;  %v21659_v58 = vld [vmem:[%s23239_s4 + $0x48] sm:$0xff] }
0x1ea7   :  { %v16163_v39 = vpop.eup %16162 }
0x1ea8   :  { %v9294_v1 = vadd.f32 1.0, %v16163_v39  ;;  %v21666_v39 = vld [vmem:[%s23239_s4 + $0x50] sm:$0xff] }
0x1ea9   :  { %23898 = vst [vmem:[#allocation2_spill] sm:$0xff] %v21666_v39 }
0x1eaa   :  { %16170 = vrcp.f32 %v9294_v1  ;;  %v13966_v1 = vld [vmem:[%s23240_s5 + $0xc8] sm:$0xff] }
0x1eab   :  { %v16165_v43 = vpop.eup %16164 }
0x1eac   :  { %v9295_v60 = vadd.f32 1.0, %v16165_v43  ;;  %v16167_v48 = vpop.eup %16166  ;;  %v21673_v43 = vld [vmem:[%s23239_s4 + $0x58] sm:$0xff] }
0x1ead   :  { %v9296_v3 = vadd.f32 1.0, %v16167_v48  ;;  %v16169_v37 = vpop.eup %16168  ;;  %23899 = vst [vmem:[#allocation3_spill] sm:$0xff] %v21673_v43  ;;  %v13967_v48 = vld [vmem:[%s23240_s5 + $0xd0] sm:$0xff] }
0x1eae   :  { %16172 = vrcp.f32 %v9295_v60  ;;  %v9297_v12 = vadd.f32 1.0, %v16169_v37  ;;  %v13972_v60 = vld [vmem:[%s23240_s5 + $0xf8] sm:$0xff]  ;;  %v13957_v37 = vld [vmem:[%s23240_s5 + $0x80] sm:$0xff] }
0x1eaf   :  { %10179 = vmatprep.subr.mxu0 %v13972_v60  ;;  %v13990_v60 = vld [vmem:[%s23240_s5 + $0x108] sm:$0xff] }
0x1eb7   :  { %v16171_v2 = vpop.eup %16170 }
0x1eb8   :  { %v9880_v44 = vsub.f32 1.0, %v16171_v2  ;;  %v9876_v20 = vmul.f32 %v16171_v2, %v20711_v17  ;;  %v10033_v2 = vld [vmem:[%s23240_s5 + $0x58] sm:$0xff] }
0x1ebb   :  { %v16173_v10 = vpop.eup %16172 }
0x1ebc   :  { %v9881_v52 = vsub.f32 1.0, %v16173_v10  ;;  %v9877_v49 = vmul.f32 %v16173_v10, %v20719_v62  ;;  %v10030_v10 = vld [vmem:[%s23240_s5 + $0x40] sm:$0xff] }
0x1f50   :  { %v15181_v16 = vpop.f32.mrf.mxu0 }
0x1f52   :  { %v15182_v6 = vpop.f32.mrf.mxu0 }
0x1f53   :  { %v15183_v29 = vadd.f32 %v15182_v6, %v15181_v16  ;;  %v13965_v16 = vld [vmem:[%s23240_s5 + $0xc0] sm:$0xff]  ;;  %v13971_v6 = vld [vmem:[%s23240_s5 + $0xf0] sm:$0xff] }
0x1f54   :  { %v15184_v4 = vpop.f32.mrf.mxu0  ;;  %10180 = vmatpush1.msra.mxu0 %v13971_v6  ;;  %v13992_v6 = vld [vmem:[%s23240_s5 + $0x118] sm:$0xff] }
0x1f55   :  { %v9868_v33 = vadd.f32 %v15183_v29, %v13937_v26  ;;  %v13968_v26 = vld [vmem:[%s23240_s5 + $0xd8] sm:$0xff]  ;;  %v13962_v29 = vld [vmem:[%s23240_s5 + $0xa8] sm:$0xff] }
0x1f56   :  { %v15185_v38 = vpop.f32.mrf.mxu0  ;;  %10181 = vmatprep.subr.mxu0 %v13968_v26  ;;  %v13989_v26 = vld [vmem:[%s23240_s5 + $0x100] sm:$0xff] }
0x1f57   :  { %16174 = vtanh.f32 %v9868_v33  ;;  %v15186_v9 = vadd.f32 %v15185_v38, %v15184_v4  ;;  %v13964_v4 = vld [vmem:[%s23240_s5 + $0xb8] sm:$0xff]  ;;  %10182 = vmatpush1.msra.mxu0 %v13967_v48  ;;  %v13961_v33 = vld [vmem:[%s23240_s5 + $0xa0] sm:$0xff]  ;;  %v13958_v38 = vld [vmem:[%s23240_s5 + $0x88] sm:$0xff] }
0x1f58   :  { %v15187_v55 = vpop.f32.mrf.mxu0  ;;  %16176 = vrcp.f32 %v9296_v3  ;;  %10183 = vmatprep.subr.mxu0 %v13964_v4  ;;  %v13963_v3 = vld [vmem:[%s23240_s5 + $0xb0] sm:$0xff] }
0x1f59   :  { %v9869_v53 = vadd.f32 %v15186_v9, %v13938_v57  ;;  %10184 = vmatpush1.msra.mxu0 %v13963_v3  ;;  %v13960_v57 = vld [vmem:[%s23240_s5 + $0x98] sm:$0xff]  ;;  %v13959_v9 = vld [vmem:[%s23240_s5 + $0x90] sm:$0xff] }
0x1f5a   :  { %v15188_v32 = vpop.f32.mrf.mxu0  ;;  %10185 = vmatprep.subr.mxu0 %v13960_v57  ;;  %v21882_v57 = vld [vmem:[%s23241_s8 + $0x78] sm:$0xff] }
0x1f5b   :  { %16178 = vtanh.f32 %v9869_v53  ;;  %v15189_v15 = vadd.f32 %v15188_v32, %v15187_v55  ;;  %10186 = vmatpush1.msra.mxu0 %v13959_v9  ;;  %v10035_v55 = vld [vmem:[%s23240_s5 + $0x68] sm:$0xff]  ;;  %v10037_v53 = vld [vmem:[%s23240_s5 + $0x78] sm:$0xff]  ;;  %23901 = vst [vmem:[#allocation5_spill] sm:$0xff] %v21882_v57  ;;  %v21896_v9 = vld [vmem:[%s23241_s8 + $0x70] sm:$0xff] }
0x1f5c   :  { %v15190_v7 = vpop.f32.mrf.mxu0  ;;  %16180 = vrcp.f32 %v9297_v12  ;;  %10369 = vmatprep.subr.mxu0 %v10037_v53  ;;  %23903 = vst [vmem:[#allocation7_spill] sm:$0xff] %v21896_v9  ;;  %v21910_v53 = vld [vmem:[%s23241_s8 + $0x68] sm:$0xff] }
0x1f5d   :  { %v9870_v42 = vadd.f32 %v15189_v15, %v13939_v31  ;;  %23905 = vst [vmem:[#allocation9_spill] sm:$0xff] %v21910_v53 }
0x1f5e   :  { %v15191_v19 = vpop.f32.mrf.mxu0 }
0x1f5f   :  { %16182 = vtanh.f32 %v9870_v42  ;;  %v15192_v22 = vadd.f32 %v15191_v19, %v15190_v7  ;;  %v10034_v19 = vld [vmem:[%s23240_s5 + $0x60] sm:$0xff] }
0x1f61   :  { %v9871_v27 = vadd.f32 %v15192_v22, %v13940_v8  ;;  %v10036_v8 = vld [vmem:[%s23240_s5 + $0x70] sm:$0xff]  ;;  %v10031_v22 = vld [vmem:[%s23240_s5 + $0x48] sm:$0xff] }
0x1f63   :  { %16184 = vtanh.f32 %v9871_v27 }
0x1f64   :  { %v16175_v5 = vpop.eup %16174 }
0x1f65   :  { %v9884_v61 = vmul.f32 %v16175_v5, %v9880_v44  ;;  %v16177_v18 = vpop.eup %16176  ;;  %v10032_v44 = vld [vmem:[%s23240_s5 + $0x50] sm:$0xff]  ;;  %v10027_v5 = vld [vmem:[%s23240_s5 + $0x28] sm:$0xff] }
0x1f66   :  { %v9882_v14 = vsub.f32 1.0, %v16177_v18  ;;  %v9878_v34 = vmul.f32 %v16177_v18, %v20727_v35  ;;  %v10026_v18 = vld [vmem:[%s23240_s5 + $0x20] sm:$0xff] }
0x1f67   :  { %v21555_v51 = vadd.f32 %v9884_v61, %v9876_v20  ;;  %v10029_v20 = vld [vmem:[%s23240_s5 + $0x38] sm:$0xff] }
0x1f68   :  { %v16179_v0 = vpop.eup %16178 }
0x1f69   :  { %v9885_v45 = vmul.f32 %v16179_v0, %v9881_v52  ;;  %13941 = vst.msk [vmem:[%s23247_s9 + $0xa0] sm:$0xff] %vm56_vm0, %v21555_v51  ;;  %v16181_v25 = vpop.eup %16180  ;;  %v10028_v52 = vld [vmem:[%s23240_s5 + $0x30] sm:$0xff]  ;;  %v10023_v0 = vld [vmem:[%s23240_s5 + $0x8] sm:$0xff] }
0x1f6a   :  { %v9883_v62 = vsub.f32 1.0, %v16181_v25  ;;  %v9879_v46 = vmul.f32 %v16181_v25, %v20735_v36  ;;  %v13970_v36 = vld [vmem:[%s23240_s5 + $0xe8] sm:$0xff]  ;;  %v10024_v25 = vld [vmem:[%s23240_s5 + $0x10] sm:$0xff] }
0x1f6b   :  { %v21563_v50 = vadd.f32 %v9885_v45, %v9877_v49  ;;  %v10025_v49 = vld [vmem:[%s23240_s5 + $0x18] sm:$0xff]  ;;  %v10022_v45 = vld [vmem:[%s23240_s5] sm:$0xff] }
0x1f6c   :  { %v16183_v17 = vpop.eup %16182 }
0x1f6d   :  { %v9886_v11 = vmul.f32 %v16183_v17, %v9882_v14  ;;  %13942 = vst.msk [vmem:[%s23247_s9 + $0xa8] sm:$0xff] %vm56_vm0, %v21563_v50  ;;  %v14002_v14 = vld [vmem:[%s23240_s5 + $0x168] sm:$0xff]  ;;  %v14004_v17 = vld [vmem:[%s23240_s5 + $0x178] sm:$0xff] }
0x1f6f   :  { %v21571_v13 = vadd.f32 %v9886_v11, %v9878_v34  ;;  %v14001_v34 = vld [vmem:[%s23240_s5 + $0x160] sm:$0xff]  ;;  %v14003_v11 = vld [vmem:[%s23240_s5 + $0x170] sm:$0xff] }
0x1f70   :  { %v16185_v56 = vpop.eup %16184 }
0x1f71   :  { %v9887_v63 = vmul.f32 %v16185_v56, %v9883_v62  ;;  %13943 = vst.msk [vmem:[%s23247_s9 + $0xb0] sm:$0xff] %vm56_vm0, %v21571_v13  ;;  %v13998_v62 = vld [vmem:[%s23240_s5 + $0x148] sm:$0xff]  ;;  %v14000_v56 = vld [vmem:[%s23240_s5 + $0x158] sm:$0xff] }
0x1f73   :  { %v21579_v35 = vadd.f32 %v9887_v63, %v9879_v46  ;;  %v13997_v46 = vld [vmem:[%s23240_s5 + $0x140] sm:$0xff]  ;;  %v13999_v63 = vld [vmem:[%s23240_s5 + $0x150] sm:$0xff] }
0x1f75   :  { %13944 = vst.msk [vmem:[%s23247_s9 + $0xb8] sm:$0xff] %vm56_vm0, %v21579_v35  ;;  %15833 = vmatprep.subr.mxu1 %v21579_v35 }
0x1f76   :  { %15834 = vmatpush3.msra.mxu1 %v21579_v35 }
0x1f77   :  { %15835 = vmatprep.subr.mxu1 %v21571_v13 }
0x1f78   :  { %15836 = vmatpush3.msra.mxu1 %v21571_v13 }
0x1f79   :  { %15837 = vmatprep.subr.mxu1 %v21563_v50 }
0x1f7a   :  { %15838 = vmatpush3.msra.mxu1 %v21563_v50 }
0x1f7b   :  { %15839 = vmatprep.subr.mxu1 %v21555_v51 }
0x1f7c   :  { %15840 = vmatpush3.msra.mxu1 %v21555_v51 }
0x1f7d   :  { %15842 = vmatmul.mubr.msk.f32.vlgmr.msra.gmra.mxu1 %vm56_vm0, %v21603_v21  ;;  %10090 = vmatprep.subr.mxu1 %v13970_v36  ;;  %v13994_v36 = vld [vmem:[%s23240_s5 + $0x128] sm:$0xff] }
0x1f7e   :  { %15844 = vmatprep.mubr.msk.f32.mxu1 %vm56_vm0, %v21610_v28  ;;  %10091 = vmatpush1.msra.mxu1 %v13969_v30  ;;  %v13996_v30 = vld [vmem:[%s23240_s5 + $0x138] sm:$0xff] }
0x1f7f   :  { %10092 = vmatprep.subr.mxu1 %v13966_v1  ;;  %v13993_v1 = vld [vmem:[%s23240_s5 + $0x120] sm:$0xff] }
0x1f80   :  { %10093 = vmatpush1.msra.mxu1 %v13965_v16  ;;  %v13995_v16 = vld [vmem:[%s23240_s5 + $0x130] sm:$0xff] }
0x1f81   :  { %15845 = vmatmul.mubr.msk.f32.gmra.mxu1 %vm56_vm0, %v21617_v24  ;;  %10094 = vmatprep.subr.mxu1 %v13962_v29  ;;  %v13991_v29 = vld [vmem:[%s23240_s5 + $0x110] sm:$0xff] }
0x1f82   :  { %15847 = vmatprep.mubr.msk.f32.mxu1 %vm56_vm0, %v21624_v54  ;;  %10095 = vmatpush1.msra.mxu1 %v13961_v33 }
0x1f83   :  { %10096 = vmatprep.subr.mxu1 %v13958_v38  ;;  %v21877_v38 = vld [vmem:[%s23241_s8 + $0xf8] sm:$0xff] }
0x1f84   :  { %10097 = vmatpush1.msra.mxu1 %v13957_v37  ;;  %23900 = vst [vmem:[#allocation4_spill] sm:$0xff] %v21877_v38  ;;  %v21891_v37 = vld [vmem:[%s23241_s8 + $0xf0] sm:$0xff] }
0x1f85   :  { %15848 = vmatmul.mubr.msk.f32.gmra.mxu1 %vm56_vm0, %v21631_v59  ;;  %10280 = vmatprep.subr.mxu1 %v10035_v55  ;;  %23902 = vst [vmem:[#allocation6_spill] sm:$0xff] %v21891_v37  ;;  %v21905_v55 = vld [vmem:[%s23241_s8 + $0xe8] sm:$0xff] }
0x1f86   :  { %15850 = vmatprep.mubr.msk.f32.mxu1 %vm56_vm0, %v21638_v23  ;;  %23904 = vst [vmem:[#allocation8_spill] sm:$0xff] %v21905_v55 }
0x1f89   :  { %15851 = vmatmul.mubr.msk.f32.gmra.mxu1 %vm56_vm0, %v21645_v47 }
0x1f8a   :  { %15853 = vmatprep.mubr.msk.f32.mxu1 %vm56_vm0, %v21652_v41 }
0x1f8d   :  { %15854 = vmatmul.mubr.msk.f32.gmra.mxu1 %vm56_vm0, %v21659_v58 }
0x1f8e   :  { %15856 = vmatprep.mubr.msk.f32.mxu1 %vm56_vm0, %v21666_v39 }
0x1f91   :  { %15857 = vmatmul.mubr.msk.f32.gmra.mxu1 %vm56_vm0, %v21673_v43 }
0x1f92   :  { %10130 = vmatprep.mubr.f32.mxu1 %v23534_v40 }
0x203d   :  { %v21726_v12 = vpop.f32.mrf.mxu1 }
0x203f   :  { %v9963_v32 = vpop.f32.mrf.mxu1 }
0x2041   :  { %v21728_v31 = vpop.f32.mrf.mxu1 }
0x2043   :  { %v21730_v15 = vpop.f32.mrf.mxu1 }
0x2045   :  { %v15849_v7 = vpop.f32.mrf.mxu1 }
0x2047   :  { %v9983_v42 = vpop.f32.mrf.mxu1 }
0x2048   :  { %13973 = vmatmul.mubr.msk.f32.vlgmr.msra.gmra.mxu1 %vm56_vm0, %v9983_v42  ;;  %13977 = vmatmul.mubr.msk.f32.vlgmr.msra.gmra.mxu0 %vm56_vm0, %v9983_v42  ;;  %v21954_v42 = vld [vmem:[%s23241_s8 + $0x50] sm:$0xff] }
0x2049   :  { %10136 = vmatprep.mubr.f32.mxu1 %v23534_v40  ;;  %10225 = vmatprep.mubr.f32.mxu0 %v23534_v40  ;;  %v15852_v27 = vpop.f32.mrf.mxu1  ;;  %23911 = vst [vmem:[#allocation15_spill] sm:$0xff] %v21954_v42 }
0x204a   :  { %10281 = vmatpush1.msra.mxu1 %v10034_v19  ;;  %10370 = vmatpush1.msra.mxu0 %v10036_v8  ;;  %v21961_v19 = vld [vmem:[%s23241_s8 + $0xc8] sm:$0xff] }
0x204b   :  { %10282 = vmatprep.subr.mxu1 %v10031_v22  ;;  %10371 = vmatprep.subr.mxu0 %v10033_v2  ;;  %v9993_v61 = vpop.f32.mrf.mxu1  ;;  %23912 = vst [vmem:[#allocation16_spill] sm:$0xff] %v21961_v19  ;;  %v21968_v8 = vld [vmem:[%s23241_s8 + $0x48] sm:$0xff]  ;;  %v21975_v22 = vld [vmem:[%s23241_s8 + $0xc0] sm:$0xff] }
0x204c   :  { %13974 = vmatmul.mubr.msk.f32.gmra.mxu1 %vm56_vm0, %v15849_v7  ;;  %13978 = vmatmul.mubr.msk.f32.gmra.mxu0 %vm56_vm0, %v15849_v7  ;;  %v21947_v7 = vld [vmem:[%s23241_s8 + $0xd0] sm:$0xff]  ;;  %23913 = vst [vmem:[#allocation17_spill] sm:$0xff] %v21968_v8  ;;  %23914 = vst [vmem:[#allocation18_spill] sm:$0xff] %v21975_v22  ;;  %v21982_v2 = vld [vmem:[%s23241_s8 + $0x40] sm:$0xff] }
0x204d   :  { %10142 = vmatprep.mubr.f32.mxu1 %v23534_v40  ;;  %10231 = vmatprep.mubr.f32.mxu0 %v23534_v40  ;;  %v15855_v48 = vpop.f32.mrf.mxu1  ;;  %23910 = vst [vmem:[#allocation14_spill] sm:$0xff] %v21947_v7  ;;  %23915 = vst [vmem:[#allocation19_spill] sm:$0xff] %v21982_v2 }
0x204e   :  { %10283 = vmatpush1.msra.mxu1 %v10030_v10  ;;  %10372 = vmatpush1.msra.mxu0 %v10032_v44  ;;  %v21996_v10 = vld [vmem:[%s23241_s8 + $0x38] sm:$0xff]  ;;  %v22003_v44 = vld [vmem:[%s23241_s8 + $0xb0] sm:$0xff] }
0x204f   :  { %10284 = vmatprep.subr.mxu1 %v10027_v5  ;;  %10373 = vmatprep.subr.mxu0 %v10029_v20  ;;  %v10003_v4 = vpop.f32.mrf.mxu1  ;;  %23917 = vst [vmem:[#allocation21_spill] sm:$0xff] %v21996_v10  ;;  %23918 = vst [vmem:[#allocation22_spill] sm:$0xff] %v22003_v44  ;;  %v22010_v5 = vld [vmem:[%s23241_s8 + $0x30] sm:$0xff]  ;;  %v22017_v20 = vld [vmem:[%s23241_s8 + $0xa8] sm:$0xff] }
0x2050   :  { %13975 = vmatmul.mubr.msk.f32.gmra.mxu1 %vm56_vm0, %v9993_v61  ;;  %13979 = vmatmul.mubr.msk.f32.gmra.mxu0 %vm56_vm0, %v9993_v61  ;;  %23919 = vst [vmem:[#allocation23_spill] sm:$0xff] %v22010_v5  ;;  %23920 = vst [vmem:[#allocation24_spill] sm:$0xff] %v22017_v20  ;;  %v22024_v61 = vld [vmem:[%s23241_s8 + $0x28] sm:$0xff] }
0x2051   :  { %10148 = vmatprep.mubr.f32.mxu1 %v23534_v40  ;;  %10237 = vmatprep.mubr.f32.mxu0 %v23534_v40  ;;  %v15858_v33 = vpop.f32.mrf.mxu1  ;;  %23921 = vst [vmem:[#allocation25_spill] sm:$0xff] %v22024_v61 }
0x2052   :  { %10285 = vmatpush1.msra.mxu1 %v10026_v18  ;;  %10374 = vmatpush1.msra.mxu0 %v10028_v52  ;;  %v22031_v18 = vld [vmem:[%s23241_s8 + $0xa0] sm:$0xff] }
0x2053   :  { %10286 = vmatprep.subr.mxu1 %v10023_v0  ;;  %10375 = vmatprep.subr.mxu0 %v10025_v49  ;;  %v10013_v3 = vpop.f32.mrf.mxu1  ;;  %23922 = vst [vmem:[#allocation26_spill] sm:$0xff] %v22031_v18  ;;  %v22038_v52 = vld [vmem:[%s23241_s8 + $0x20] sm:$0xff]  ;;  %v22045_v0 = vld [vmem:[%s23241_s8 + $0x98] sm:$0xff] }
0x2054   :  { %13976 = vmatmul.mubr.msk.f32.gmra.mxu1 %vm56_vm0, %v15852_v27  ;;  %13980 = vmatmul.mubr.msk.f32.gmra.mxu0 %vm56_vm0, %v15852_v27  ;;  %v21989_v27 = vld [vmem:[%s23241_s8 + $0xb8] sm:$0xff]  ;;  %23923 = vst [vmem:[#allocation27_spill] sm:$0xff] %v22038_v52  ;;  %23924 = vst [vmem:[#allocation28_spill] sm:$0xff] %v22045_v0 }
0x2055   :  { %10287 = vmatpush1.msra.mxu1 %v10022_v45  ;;  %10320 = vmatprep.mubr.f32.mxu1 %v23534_v40  ;;  %23916 = vst [vmem:[#allocation20_spill] sm:$0xff] %v21989_v27  ;;  %v22052_v49 = vld [vmem:[%s23241_s8 + $0x18] sm:$0xff]  ;;  %v22059_v45 = vld [vmem:[%s23241_s8 + $0x90] sm:$0xff] }
0x2056   :  { %10376 = vmatpush1.msra.mxu0 %v10024_v25  ;;  %10409 = vmatprep.mubr.f32.mxu0 %v23534_v40  ;;  %23925 = vst [vmem:[#allocation29_spill] sm:$0xff] %v22052_v49  ;;  %23926 = vst [vmem:[#allocation30_spill] sm:$0xff] %v22059_v45  ;;  %v22066_v25 = vld [vmem:[%s23241_s8 + $0x10] sm:$0xff] }
0x2057   :  { %10486 = vmatprep.subr.mxu1 %v14002_v14  ;;  %10575 = vmatprep.subr.mxu0 %v14004_v17  ;;  %23927 = vst [vmem:[#allocation31_spill] sm:$0xff] %v22066_v25  ;;  %v22073_v14 = vld [vmem:[%s23241_s8 + $0x88] sm:$0xff] }
0x2058   :  { %13981 = vmatmul.mubr.msk.f32.vlgmr.msra.gmra.mxu1 %vm56_vm0, %v9963_v32  ;;  %13985 = vmatmul.mubr.msk.f32.vlgmr.msra.gmra.mxu0 %vm56_vm0, %v9963_v32  ;;  %v21924_v32 = vld [vmem:[%s23241_s8 + $0x60] sm:$0xff]  ;;  %23928 = vst [vmem:[#allocation32_spill] sm:$0xff] %v22073_v14  ;;  %v22080_v17 = vld [vmem:[%s23241_s8 + $0x8] sm:$0xff] }
0x2059   :  { %10326 = vmatprep.mubr.f32.mxu1 %v23534_v40  ;;  %10415 = vmatprep.mubr.f32.mxu0 %v23534_v40  ;;  %23907 = vst [vmem:[#allocation11_spill] sm:$0xff] %v21924_v32  ;;  %23929 = vst [vmem:[#allocation33_spill] sm:$0xff] %v22080_v17 }
0x205a   :  { %10487 = vmatpush1.msra.mxu1 %v14001_v34  ;;  %10576 = vmatpush1.msra.mxu0 %v14003_v11  ;;  %v22087_v34 = vld [vmem:[%s23241_s8 + $0x80] sm:$0xff] }
0x205b   :  { %10488 = vmatprep.subr.mxu1 %v13998_v62  ;;  %10577 = vmatprep.subr.mxu0 %v14000_v56  ;;  %23930 = vst [vmem:[#allocation34_spill] sm:$0xff] %v22087_v34  ;;  %v22094_v11 = vld [vmem:[%s23241_s8] sm:$0xff] }
0x205c   :  { %13982 = vmatmul.mubr.msk.f32.gmra.mxu1 %vm56_vm0, %v21726_v12  ;;  %13986 = vmatmul.mubr.msk.f32.gmra.mxu0 %vm56_vm0, %v21726_v12  ;;  %v21919_v12 = vld [vmem:[%s23241_s8 + $0xe0] sm:$0xff]  ;;  %23931 = vst [vmem:[#allocation35_spill] sm:$0xff] %v22094_v11 }
0x205d   :  { %10332 = vmatprep.mubr.f32.mxu1 %v23534_v40  ;;  %10421 = vmatprep.mubr.f32.mxu0 %v23534_v40  ;;  %23906 = vst [vmem:[#allocation10_spill] sm:$0xff] %v21919_v12 }
0x205e   :  { %10489 = vmatpush1.msra.mxu1 %v13997_v46  ;;  %10578 = vmatpush1.msra.mxu0 %v13999_v63 }
0x205f   :  { %10490 = vmatprep.subr.mxu1 %v13994_v36  ;;  %10579 = vmatprep.subr.mxu0 %v13996_v30 }
0x2060   :  { %13983 = vmatmul.mubr.msk.f32.gmra.mxu1 %vm56_vm0, %v21730_v15  ;;  %13987 = vmatmul.mubr.msk.f32.gmra.mxu0 %vm56_vm0, %v21730_v15  ;;  %v21940_v15 = vld [vmem:[%s23241_s8 + $0x58] sm:$0xff] }
0x2061   :  { %10338 = vmatprep.mubr.f32.mxu1 %v23534_v40  ;;  %10427 = vmatprep.mubr.f32.mxu0 %v23534_v40  ;;  %23909 = vst [vmem:[#allocation13_spill] sm:$0xff] %v21940_v15 }
0x2062   :  { %10491 = vmatpush1.msra.mxu1 %v13993_v1  ;;  %10580 = vmatpush1.msra.mxu0 %v13995_v16 }
0x2063   :  { %10492 = vmatprep.subr.mxu1 %v13990_v60  ;;  %10581 = vmatprep.subr.mxu0 %v13992_v6 }
0x2064   :  { %13984 = vmatmul.mubr.msk.f32.gmra.mxu1 %vm56_vm0, %v21728_v31  ;;  %13988 = vmatmul.mubr.msk.f32.gmra.mxu0 %vm56_vm0, %v21728_v31  ;;  %v21933_v31 = vld [vmem:[%s23241_s8 + $0xd8] sm:$0xff] }
0x2065   :  { %10493 = vmatpush1.msra.mxu1 %v13989_v26  ;;  %10526 = vmatprep.mubr.f32.mxu1 %v23534_v40  ;;  %23908 = vst [vmem:[#allocation12_spill] sm:$0xff] %v21933_v31 }
0x2066   :  { %10582 = vmatpush1.msra.mxu0 %v13991_v29  ;;  %10615 = vmatprep.mubr.f32.mxu0 %v23534_v40 }
0x2067   :  { %15209 = vmatprep.subr.mxu1 %v21877_v38  ;;  %15253 = vmatprep.subr.mxu0 %v21877_v38 }
0x2068   :  { %14005 = vmatmul.mubr.msk.f32.vlgmr.msra.gmra.mxu1 %vm56_vm0, %v10003_v4  ;;  %14009 = vmatmul.mubr.msk.f32.vlgmr.msra.gmra.mxu0 %vm56_vm0, %v10003_v4 }
0x2069   :  { %10532 = vmatprep.mubr.f32.mxu1 %v23534_v40  ;;  %10621 = vmatprep.mubr.f32.mxu0 %v23534_v40 }
0x206a   :  { %15210 = vmatpush3.msra.mxu1 %v21882_v57  ;;  %15254 = vmatpush3.msra.mxu0 %v21882_v57 }
0x206b   :  { %15211 = vmatprep.subr.mxu1 %v21891_v37  ;;  %15255 = vmatprep.subr.mxu0 %v21891_v37 }
0x206c   :  { %14006 = vmatmul.mubr.msk.f32.gmra.mxu1 %vm56_vm0, %v15855_v48  ;;  %14010 = vmatmul.mubr.msk.f32.gmra.mxu0 %vm56_vm0, %v15855_v48 }
0x206d   :  { %10538 = vmatprep.mubr.f32.mxu1 %v23534_v40  ;;  %10627 = vmatprep.mubr.f32.mxu0 %v23534_v40 }
0x206e   :  { %15212 = vmatpush3.msra.mxu1 %v21896_v9  ;;  %15256 = vmatpush3.msra.mxu0 %v21896_v9 }
0x206f   :  { %15213 = vmatprep.subr.mxu1 %v21905_v55  ;;  %15257 = vmatprep.subr.mxu0 %v21905_v55 }
0x2070   :  { %14007 = vmatmul.mubr.msk.f32.gmra.mxu1 %vm56_vm0, %v10013_v3  ;;  %14011 = vmatmul.mubr.msk.f32.gmra.mxu0 %vm56_vm0, %v10013_v3 }
0x2071   :  { %10544 = vmatprep.mubr.f32.mxu1 %v23534_v40  ;;  %10633 = vmatprep.mubr.f32.mxu0 %v23534_v40 }
0x2072   :  { %15214 = vmatpush3.msra.mxu1 %v21910_v53  ;;  %15258 = vmatpush3.msra.mxu0 %v21910_v53 }
0x2073   :  { %15215 = vmatprep.subr.mxu1 %v21919_v12  ;;  %15259 = vmatprep.subr.mxu0 %v21919_v12 }
0x2074   :  { %14008 = vmatmul.mubr.msk.f32.gmra.mxu1 %vm56_vm0, %v15858_v33  ;;  %14012 = vmatmul.mubr.msk.f32.gmra.mxu0 %vm56_vm0, %v15858_v33 }
0x2075   :  { %15216 = vmatpush3.msra.mxu1 %v21924_v32  ;;  %15260 = vmatpush3.msra.mxu0 %v21924_v32 }
0x2076   :  { %15217 = vmatprep.subr.mxu1 %v21933_v31  ;;  %15261 = vmatprep.subr.mxu0 %v21933_v31 }
0x2077   :  { %15218 = vmatpush3.msra.mxu1 %v21940_v15  ;;  %15262 = vmatpush3.msra.mxu0 %v21940_v15 }
0x2078   :  { %15219 = vmatprep.subr.mxu1 %v21947_v7  ;;  %15263 = vmatprep.subr.mxu0 %v21947_v7 }
0x2079   :  { %15220 = vmatpush3.msra.mxu1 %v21954_v42  ;;  %15264 = vmatpush3.msra.mxu0 %v21954_v42 }
0x207a   :  { %15221 = vmatprep.subr.mxu1 %v21961_v19  ;;  %15265 = vmatprep.subr.mxu0 %v21961_v19 }
0x207b   :  { %15222 = vmatpush3.msra.mxu1 %v21968_v8  ;;  %15266 = vmatpush3.msra.mxu0 %v21968_v8 }
0x207c   :  { %15223 = vmatprep.subr.mxu1 %v21975_v22  ;;  %15267 = vmatprep.subr.mxu0 %v21975_v22 }
0x207d   :  { %15224 = vmatpush3.msra.mxu1 %v21982_v2  ;;  %15268 = vmatpush3.msra.mxu0 %v21982_v2 }
0x207e   :  { %15225 = vmatprep.subr.mxu1 %v21989_v27  ;;  %15269 = vmatprep.subr.mxu0 %v21989_v27 }
0x207f   :  { %15226 = vmatpush3.msra.mxu1 %v21996_v10  ;;  %15270 = vmatpush3.msra.mxu0 %v21996_v10 }
0x2080   :  { %15227 = vmatprep.subr.mxu1 %v22003_v44  ;;  %15271 = vmatprep.subr.mxu0 %v22003_v44 }
0x2081   :  { %15228 = vmatpush3.msra.mxu1 %v22010_v5  ;;  %15272 = vmatpush3.msra.mxu0 %v22010_v5 }
0x2082   :  { %15229 = vmatprep.subr.mxu1 %v22017_v20  ;;  %15273 = vmatprep.subr.mxu0 %v22017_v20 }
0x2083   :  { %15230 = vmatpush3.msra.mxu1 %v22024_v61  ;;  %15274 = vmatpush3.msra.mxu0 %v22024_v61 }
0x2084   :  { %15231 = vmatprep.subr.mxu1 %v22031_v18  ;;  %15275 = vmatprep.subr.mxu0 %v22031_v18 }
0x2085   :  { %15232 = vmatpush3.msra.mxu1 %v22038_v52  ;;  %15276 = vmatpush3.msra.mxu0 %v22038_v52 }
0x2086   :  { %15233 = vmatprep.subr.mxu1 %v22045_v0  ;;  %15277 = vmatprep.subr.mxu0 %v22045_v0 }
0x2087   :  { %15234 = vmatpush3.msra.mxu1 %v22052_v49  ;;  %15278 = vmatpush3.msra.mxu0 %v22052_v49 }
0x2088   :  { %15235 = vmatprep.subr.mxu1 %v22059_v45  ;;  %15279 = vmatprep.subr.mxu0 %v22059_v45 }
0x2089   :  { %15236 = vmatpush3.msra.mxu1 %v22066_v25  ;;  %15280 = vmatpush3.msra.mxu0 %v22066_v25 }
0x208a   :  { %15237 = vmatprep.subr.mxu1 %v22073_v14  ;;  %15281 = vmatprep.subr.mxu0 %v22073_v14 }
0x208b   :  { %15238 = vmatpush3.msra.mxu1 %v22080_v17  ;;  %15282 = vmatpush3.msra.mxu0 %v22080_v17 }
0x208c   :  { %15239 = vmatprep.subr.mxu1 %v22087_v34  ;;  %15283 = vmatprep.subr.mxu0 %v22087_v34 }
0x208d   :  { %15240 = vmatpush3.msra.mxu1 %v22094_v11  ;;  %15284 = vmatpush3.msra.mxu0 %v22094_v11 }
0x2108   :  { %v10132_v62 = vpop.f32.mrf.mxu1  ;;  %v10221_v56 = vpop.f32.mrf.mxu0 }
0x210a   :  { %v10134_v46 = vpop.f32.mrf.mxu1  ;;  %v10223_v63 = vpop.f32.mrf.mxu0 }
0x210c   :  { %v10138_v36 = vpop.f32.mrf.mxu1  ;;  %v10227_v30 = vpop.f32.mrf.mxu0 }
0x210e   :  { %v10140_v1 = vpop.f32.mrf.mxu1  ;;  %v10229_v16 = vpop.f32.mrf.mxu0 }
0x2110   :  { %v10144_v60 = vpop.f32.mrf.mxu1  ;;  %v10233_v6 = vpop.f32.mrf.mxu0 }
0x2112   :  { %v10146_v26 = vpop.f32.mrf.mxu1  ;;  %v10235_v48 = vpop.f32.mrf.mxu0 }
0x2114   :  { %v22098_v29 = vpop.f32.mrf.mxu1  ;;  %v22100_v4 = vpop.f32.mrf.mxu0 }
0x2116   :  { %v22102_v33 = vpop.f32.mrf.mxu1  ;;  %v22104_v3 = vpop.f32.mrf.mxu0 }
0x2118   :  { %v10322_v11 = vpop.f32.mrf.mxu1  ;;  %v10411_v34 = vpop.f32.mrf.mxu0 }
0x2119   :  { %v10323_v2 = vadd.f32 %v10322_v11, %v10132_v62  ;;  %v10412_v19 = vadd.f32 %v10411_v34, %v10221_v56  ;;  %v22109_v11 = vld [vmem:[%s23242_s7 + $0x8] sm:$0xff] }
0x211a   :  { %v10324_v17 = vpop.f32.mrf.mxu1  ;;  %v10413_v14 = vpop.f32.mrf.mxu0 }
0x211b   :  { %v10325_v42 = vadd.f32 %v10324_v17, %v10134_v46  ;;  %v10414_v7 = vadd.f32 %v10413_v14, %v10223_v63 }
0x211c   :  { %v10328_v25 = vpop.f32.mrf.mxu1  ;;  %v10417_v45 = vpop.f32.mrf.mxu0 }
0x211d   :  { %v10329_v9 = vadd.f32 %v10328_v25, %v10138_v36  ;;  %v10418_v37 = vadd.f32 %v10417_v45, %v10227_v30 }
0x211e   :  { %v10330_v49 = vpop.f32.mrf.mxu1  ;;  %v10419_v0 = vpop.f32.mrf.mxu0 }
0x211f   :  { %v10331_v43 = vadd.f32 %v10330_v49, %v10140_v1  ;;  %v10420_v39 = vadd.f32 %v10419_v0, %v10229_v16  ;;  %v22141_v1 = vld [vmem:[%s23242_s7 + $0x28] sm:$0xff] }
0x2120   :  { %v10334_v52 = vpop.f32.mrf.mxu1  ;;  %v10423_v18 = vpop.f32.mrf.mxu0 }
0x2121   :  { %v10335_v45 = vadd.f32 %v10334_v52, %v10144_v60 }
0x2122   :  { %v10336_v61 = vpop.f32.mrf.mxu1  ;;  %v10425_v20 = vpop.f32.mrf.mxu0 }
0x2123   :  { %v10337_v14 = vadd.f32 %v10336_v61, %v10146_v26  ;;  %v10426_v34 = vadd.f32 %v10425_v20, %v10235_v48 }
0x2124   :  { %v10340_v5 = vpop.f32.mrf.mxu1  ;;  %v10429_v44 = vpop.f32.mrf.mxu0 }
0x2125   :  { %v10341_v62 = vadd.f32 %v10340_v5, %v22098_v29  ;;  %v10430_v56 = vadd.f32 %v10429_v44, %v22100_v4  ;;  %v22148_v44 = vld [vmem:[%s23242_s7 + $0x20] sm:$0xff] }
0x2126   :  { %v10342_v10 = vpop.f32.mrf.mxu1  ;;  %v10431_v27 = vpop.f32.mrf.mxu0 }
0x2127   :  { %v10343_v36 = vadd.f32 %v10342_v10, %v22102_v33  ;;  %v10432_v30 = vadd.f32 %v10431_v27, %v22104_v3  ;;  %v22155_v33 = vld [vmem:[%s23242_s7 + $0x38] sm:$0xff] }
0x2128   :  { %v10528_v22 = vpop.f32.mrf.mxu1  ;;  %v10617_v8 = vpop.f32.mrf.mxu0 }
0x2129   :  { %v10640_v15 = vadd.f32 %v10528_v22, %v10323_v2  ;;  %v10642_v12 = vadd.f32 %v10617_v8, %v10412_v19 }
0x212a   :  { %v10530_v31 = vpop.f32.mrf.mxu1  ;;  %v10619_v32 = vpop.f32.mrf.mxu0 }
0x212b   :  { %v10641_v53 = vadd.f32 %v10530_v31, %v10325_v42  ;;  %v10643_v55 = vadd.f32 %v10619_v32, %v10414_v7  ;;  %v22116_v31 = vld [vmem:[%s23242_s7] sm:$0xff] }
0x212c   :  { %v10534_v57 = vpop.f32.mrf.mxu1  ;;  %v10623_v38 = vpop.f32.mrf.mxu0  ;;  %v10688_v32 = vmul.f32 %v22116_v31, %v10640_v15  ;;  %v10781_v8 = vmul.f32 %v22116_v31, %v10642_v12 }
0x212d   :  { %v10689_v17 = vmul.f32 %v22109_v11, %v10641_v53  ;;  %v10782_v22 = vmul.f32 %v22109_v11, %v10643_v55  ;;  %v10644_v7 = vadd.f32 %v10534_v57, %v10329_v9  ;;  %v10646_v2 = vadd.f32 %v10623_v38, %v10418_v37  ;;  %v22123_v57 = vld [vmem:[%s23242_s7 + $0x18] sm:$0xff] }
0x212e   :  { %v10536_v42 = vpop.f32.mrf.mxu1  ;;  %v10625_v19 = vpop.f32.mrf.mxu0  ;;  %v10424_v53 = vadd.f32 %v10423_v18, %v10233_v6 }
0x212f   :  { %v10645_v0 = vadd.f32 %v10536_v42, %v10331_v43  ;;  %v10647_v49 = vadd.f32 %v10625_v19, %v10420_v39  ;;  %10760 = vmatprep.mubr.f32.mxu1 %v10689_v17  ;;  %10853 = vmatprep.mubr.f32.mxu0 %v10782_v22  ;;  %v22130_v39 = vld [vmem:[%s23242_s7 + $0x10] sm:$0xff]  ;;  %v22169_v42 = vld [vmem:[%s23239_s4] sm:$0xff] }
0x2130   :  { %v10540_v55 = vpop.f32.mrf.mxu1  ;;  %v10629_v25 = vpop.f32.mrf.mxu0  ;;  %10761 = vmatmul.mubr.f32.vlgmr.msra.gmra.mxu1 %v10688_v32  ;;  %10854 = vmatmul.mubr.f32.vlgmr.msra.gmra.mxu0 %v10781_v8  ;;  %v10690_v43 = vmul.f32 %v22130_v39, %v10644_v7  ;;  %v10783_v20 = vmul.f32 %v22130_v39, %v10646_v2  ;;  %v22162_v22 = vld [vmem:[%s23242_s7 + $0x30] sm:$0xff] }
0x2131   :  { %v10691_v9 = vmul.f32 %v22123_v57, %v10645_v0  ;;  %v10784_v38 = vmul.f32 %v22123_v57, %v10647_v49  ;;  %v10648_v37 = vadd.f32 %v10540_v55, %v10335_v45  ;;  %v10650_v61 = vadd.f32 %v10629_v25, %v10424_v53 }
0x2132   :  { %v10542_v12 = vpop.f32.mrf.mxu1  ;;  %v10631_v15 = vpop.f32.mrf.mxu0 }
0x2133   :  { %v10649_v18 = vadd.f32 %v10542_v12, %v10337_v14  ;;  %v10651_v52 = vadd.f32 %v10631_v15, %v10426_v34  ;;  %10765 = vmatprep.mubr.f32.mxu1 %v10691_v9  ;;  %10858 = vmatprep.mubr.f32.mxu0 %v10784_v38  ;;  %v10692_v5 = vmul.f32 %v22148_v44, %v10648_v37  ;;  %v14014_v9 = vld [vmem:[%s23243_s0 + $0xc8] sm:$0xff]  ;;  %v14013_v37 = vld [vmem:[%s23243_s0 + $0xc0] sm:$0xff] }
0x2134   :  { %v10546_v46 = vpop.f32.mrf.mxu1  ;;  %v10635_v63 = vpop.f32.mrf.mxu0  ;;  %10766 = vmatmul.mubr.f32.gmra.mxu1 %v10690_v43  ;;  %10859 = vmatmul.mubr.f32.gmra.mxu0 %v10783_v20  ;;  %v10785_v26 = vmul.f32 %v22148_v44, %v10650_v61  ;;  %v14015_v20 = vld [vmem:[%s23243_s0 + $0xd0] sm:$0xff] }
0x2135   :  { %v10693_v16 = vmul.f32 %v22141_v1, %v10649_v18  ;;  %v10786_v60 = vmul.f32 %v22141_v1, %v10651_v52  ;;  %v10652_v10 = vadd.f32 %v10546_v46, %v10341_v62  ;;  %v10654_v48 = vadd.f32 %v10635_v63, %v10430_v56 }
0x2136   :  { %v10548_v6 = vpop.f32.mrf.mxu1  ;;  %v10637_v27 = vpop.f32.mrf.mxu0 }
0x2137   :  { %v10653_v29 = vadd.f32 %v10548_v6, %v10343_v36  ;;  %v10655_v4 = vadd.f32 %v10637_v27, %v10432_v30  ;;  %10770 = vmatprep.mubr.f32.mxu1 %v10693_v16  ;;  %10863 = vmatprep.mubr.f32.mxu0 %v10786_v60  ;;  %v10694_v32 = vmul.f32 %v22162_v22, %v10652_v10  ;;  %v14016_v30 = vld [vmem:[%s23243_s0 + $0xd8] sm:$0xff] }
0x2138   :  { %10771 = vmatmul.mubr.f32.gmra.mxu1 %v10692_v5  ;;  %10864 = vmatmul.mubr.f32.gmra.mxu0 %v10785_v26  ;;  %v10787_v7 = vmul.f32 %v22162_v22, %v10654_v48 }
0x2139   :  { %v10695_v3 = vmul.f32 %v22155_v33, %v10653_v29  ;;  %v10788_v17 = vmul.f32 %v22155_v33, %v10655_v4 }
0x213b   :  { %10775 = vmatprep.mubr.f32.mxu1 %v10695_v3  ;;  %10868 = vmatprep.mubr.f32.mxu0 %v10788_v17 }
0x213c   :  { %10776 = vmatmul.mubr.f32.gmra.mxu1 %v10694_v32  ;;  %10869 = vmatmul.mubr.f32.gmra.mxu0 %v10787_v7 }
0x213d   :  { %15867 = vmatprep.mubr.msk.f32.mxu1 %vm56_vm0, %v22169_v42  ;;  %11161 = vmatprep.mubr.f32.mxu0 %v23534_v40 }
0x21f0   :  { %v15241_v19 = vpop.f32.mrf.mxu1  ;;  %v15285_v8 = vpop.f32.mrf.mxu0 }
0x21f2   :  { %v15242_v2 = vpop.f32.mrf.mxu1  ;;  %v15286_v0 = vpop.f32.mrf.mxu0 }
0x21f3   :  { %v22174_v49 = vadd.f32 %v15286_v0, %v15285_v8  ;;  %v15243_v34 = vadd.f32 %v15242_v2, %v15241_v19 }
0x21f4   :  { %v15244_v45 = vpop.f32.mrf.mxu1  ;;  %v15288_v53 = vpop.f32.mrf.mxu0 }
0x21f5   :  { %v10879_v62 = vadd.f32 %v15243_v34, %v14013_v37  ;;  %v14064_v34 = vld [vmem:[%s23244_s6 + $0xb8] sm:$0xff]  ;;  %v14061_v37 = vld [vmem:[%s23244_s6 + $0xa0] sm:$0xff] }
0x21f6   :  { %v15245_v55 = vpop.f32.mrf.mxu1  ;;  %v15289_v14 = vpop.f32.mrf.mxu0 }
0x21f7   :  { %v15246_v25 = vadd.f32 %v15245_v55, %v15244_v45  ;;  %v22179_v38 = vadd.f32 %v15289_v14, %v15288_v53  ;;  %v14017_v10 = vmul.f32 -1.442695, %v10879_v62  ;;  %v14041_v14 = vld [vmem:[%s23244_s6 + $0x40] sm:$0xff] }
0x21f8   :  { %v15247_v43 = vpop.f32.mrf.mxu1  ;;  %v15291_v12 = vpop.f32.mrf.mxu0 }
0x21f9   :  { %v10880_v61 = vadd.f32 %v15246_v25, %v14014_v9  ;;  %v14063_v9 = vld [vmem:[%s23244_s6 + $0xb0] sm:$0xff] }
0x21fa   :  { %v15248_v15 = vpop.f32.mrf.mxu1  ;;  %v15292_v52 = vpop.f32.mrf.mxu0 }
0x21fb   :  { %v15249_v18 = vadd.f32 %v15248_v15, %v15247_v43  ;;  %v22187_v56 = vadd.f32 %v15292_v52, %v15291_v12  ;;  %v14018_v16 = vmul.f32 -1.442695, %v10880_v61  ;;  %v14062_v43 = vld [vmem:[%s23244_s6 + $0xa8] sm:$0xff]  ;;  %v14060_v12 = vld [vmem:[%s23244_s6 + $0x98] sm:$0xff]  ;;  %v14059_v15 = vld [vmem:[%s23244_s6 + $0x90] sm:$0xff] }
0x21fc   :  { %v15250_v46 = vpop.f32.mrf.mxu1  ;;  %v14058_v61 = vld [vmem:[%s23244_s6 + $0x88] sm:$0xff] }
0x21fd   :  { %v10881_v63 = vadd.f32 %v15249_v18, %v14015_v20  ;;  %v11076_v20 = vld [vmem:[%s23244_s6 + $0x38] sm:$0xff]  ;;  %v14057_v18 = vld [vmem:[%s23244_s6 + $0x80] sm:$0xff] }
0x21fe   :  { %v15251_v36 = vpop.f32.mrf.mxu1 }
0x21ff   :  { %v14019_v60 = vmul.f32 -1.442695, %v10881_v63  ;;  %v15252_v5 = vadd.f32 %v15251_v36, %v15250_v46 }
0x2201   :  { %16186 = vpow2.f32 %v14019_v60  ;;  %v10882_v6 = vadd.f32 %v15252_v5, %v14016_v30  ;;  %v11075_v30 = vld [vmem:[%s23244_s6 + $0x30] sm:$0xff]  ;;  %v11074_v60 = vld [vmem:[%s23244_s6 + $0x28] sm:$0xff]  ;;  %v11073_v5 = vld [vmem:[%s23244_s6 + $0x20] sm:$0xff] }
0x2202   :  { %16188 = vpow2.f32 %v14018_v16 }
0x2203   :  { %v14020_v27 = vmul.f32 -1.442695, %v10882_v6  ;;  %16190 = vpow2.f32 %v14017_v10  ;;  %v11072_v6 = vld [vmem:[%s23244_s6 + $0x18] sm:$0xff] }
0x2205   :  { %16192 = vpow2.f32 %v14020_v27  ;;  %v11071_v27 = vld [vmem:[%s23244_s6 + $0x10] sm:$0xff] }
0x220e   :  { %v16187_v26 = vpop.eup %16186 }
0x220f   :  { %v16189_v48 = vpop.eup %16188  ;;  %v10897_v29 = vadd.f32 1.0, %v16187_v26 }
0x2210   :  { %v16191_v4 = vpop.eup %16190  ;;  %v10896_v17 = vadd.f32 1.0, %v16189_v48  ;;  %v11070_v48 = vld [vmem:[%s23244_s6 + $0x8] sm:$0xff] }
0x2211   :  { %16194 = vrcp.f32 %v10897_v29  ;;  %v10895_v7 = vadd.f32 1.0, %v16191_v4  ;;  %v11069_v29 = vld [vmem:[%s23244_s6] sm:$0xff] }
0x2212   :  { %v16193_v3 = vpop.eup %16192 }
0x2213   :  { %v10898_v32 = vadd.f32 1.0, %v16193_v3 }
0x2215   :  { %16196 = vrcp.f32 %v10898_v32  ;;  %v23934_v32 = vld [vmem:[#allocation4_spill] sm:$0xff] }
0x2216   :  { %16198 = vrcp.f32 %v10896_v17 }
0x2217   :  { %16200 = vrcp.f32 %v10895_v7 }
0x221e   :  { %v16195_v19 = vpop.eup %16194 }
0x221f   :  { %v10942_v45 = vmul.f32 %v16195_v19, %v21571_v13  ;;  %v23935_v19 = vld [vmem:[#allocation5_spill] sm:$0xff] }
0x2222   :  { %v16197_v8 = vpop.eup %16196 }
0x2223   :  { %v10943_v2 = vmul.f32 %v16197_v8, %v21579_v35  ;;  %v16199_v0 = vpop.eup %16198  ;;  %v23936_v8 = vld [vmem:[#allocation6_spill] sm:$0xff] }
0x2224   :  { %v16201_v53 = vpop.eup %16200  ;;  %v10941_v55 = vmul.f32 %v16199_v0, %v21563_v50  ;;  %v23938_v0 = vld [vmem:[#allocation8_spill] sm:$0xff] }
0x2225   :  { %15859 = vmatprep.subr.mxu1 %v10943_v2  ;;  %v10940_v25 = vmul.f32 %v16201_v53, %v21555_v51  ;;  %v23940_v53 = vld [vmem:[#allocation10_spill] sm:$0xff] }
0x2226   :  { %15860 = vmatpush3.msra.mxu1 %v10943_v2  ;;  %v23937_v2 = vld [vmem:[#allocation7_spill] sm:$0xff] }
0x2227   :  { %15861 = vmatprep.subr.mxu1 %v10942_v45 }
0x2228   :  { %15862 = vmatpush3.msra.mxu1 %v10942_v45  ;;  %v23939_v45 = vld [vmem:[#allocation9_spill] sm:$0xff] }
0x2229   :  { %15863 = vmatprep.subr.mxu1 %v10941_v55 }
0x222a   :  { %15864 = vmatpush3.msra.mxu1 %v10941_v55  ;;  %v23941_v55 = vld [vmem:[#allocation11_spill] sm:$0xff] }
0x222b   :  { %15865 = vmatprep.subr.mxu1 %v10940_v25 }
0x222c   :  { %15866 = vmatpush3.msra.mxu1 %v10940_v25  ;;  %v23942_v25 = vld [vmem:[#allocation12_spill] sm:$0xff] }
0x222d   :  { %15868 = vmatmul.mubr.msk.f32.vlgmr.msra.gmra.mxu1 %vm56_vm0, %v21603_v21  ;;  %v23932_v21 = vld [vmem:[#allocation2_spill] sm:$0xff]  ;;  %11331 = vmatprep.subr.mxu1 %v14064_v34  ;;  %v23954_v34 = vld [vmem:[#allocation24_spill] sm:$0xff] }
0x222e   :  { %15870 = vmatprep.mubr.msk.f32.mxu1 %vm56_vm0, %v21610_v28  ;;  %v23933_v28 = vld [vmem:[#allocation3_spill] sm:$0xff]  ;;  %11332 = vmatpush1.msra.mxu1 %v14063_v9  ;;  %v23955_v9 = vld [vmem:[#allocation25_spill] sm:$0xff] }
0x222f   :  { %11333 = vmatprep.subr.mxu1 %v14062_v43  ;;  %v23956_v43 = vld [vmem:[#allocation26_spill] sm:$0xff] }
0x2230   :  { %11334 = vmatpush1.msra.mxu1 %v14061_v37  ;;  %v23957_v37 = vld [vmem:[#allocation27_spill] sm:$0xff] }
0x2231   :  { %15871 = vmatmul.mubr.msk.f32.gmra.mxu1 %vm56_vm0, %v21617_v24  ;;  %v14048_v24 = vld [vmem:[%s23244_s6 + $0x78] sm:$0xff]  ;;  %11335 = vmatprep.subr.mxu1 %v14060_v12  ;;  %v23958_v12 = vld [vmem:[#allocation28_spill] sm:$0xff] }
0x2232   :  { %15873 = vmatprep.mubr.msk.f32.mxu1 %vm56_vm0, %v21624_v54  ;;  %11121 = vmatprep.subr.mxu0 %v14048_v24  ;;  %v14047_v54 = vld [vmem:[%s23244_s6 + $0x70] sm:$0xff]  ;;  %v23945_v24 = vld [vmem:[#allocation15_spill] sm:$0xff] }
0x2233   :  { %11122 = vmatpush1.msra.mxu0 %v14047_v54  ;;  %11336 = vmatpush1.msra.mxu1 %v14059_v15  ;;  %v23947_v54 = vld [vmem:[#allocation17_spill] sm:$0xff] }
0x2234   :  { %11337 = vmatprep.subr.mxu1 %v14058_v61  ;;  %v23959_v15 = vld [vmem:[#allocation29_spill] sm:$0xff]  ;;  %v23961_v61 = vld [vmem:[#allocation31_spill] sm:$0xff] }
0x2235   :  { %15874 = vmatmul.mubr.msk.f32.gmra.mxu1 %vm56_vm0, %v21631_v59  ;;  %v14046_v59 = vld [vmem:[%s23244_s6 + $0x68] sm:$0xff] }
0x2236   :  { %15876 = vmatprep.mubr.msk.f32.mxu1 %vm56_vm0, %v21638_v23  ;;  %11123 = vmatprep.subr.mxu0 %v14046_v59  ;;  %v14045_v23 = vld [vmem:[%s23244_s6 + $0x60] sm:$0xff] }
0x2237   :  { %11124 = vmatpush1.msra.mxu0 %v14045_v23  ;;  %11338 = vmatpush1.msra.mxu1 %v14057_v18  ;;  %v23948_v59 = vld [vmem:[#allocation18_spill] sm:$0xff]  ;;  %v23949_v23 = vld [vmem:[#allocation19_spill] sm:$0xff]  ;;  %v23962_v18 = vld [vmem:[#allocation32_spill] sm:$0xff] }
0x2239   :  { %15877 = vmatmul.mubr.msk.f32.gmra.mxu1 %vm56_vm0, %v21645_v47  ;;  %v14044_v47 = vld [vmem:[%s23244_s6 + $0x58] sm:$0xff] }
0x223a   :  { %15879 = vmatprep.mubr.msk.f32.mxu1 %vm56_vm0, %v21652_v41  ;;  %11125 = vmatprep.subr.mxu0 %v14044_v47  ;;  %v14043_v41 = vld [vmem:[%s23244_s6 + $0x50] sm:$0xff] }
0x223b   :  { %11126 = vmatpush1.msra.mxu0 %v14043_v41  ;;  %v23950_v47 = vld [vmem:[#allocation20_spill] sm:$0xff]  ;;  %v23951_v41 = vld [vmem:[#allocation21_spill] sm:$0xff] }
0x223d   :  { %15880 = vmatmul.mubr.msk.f32.gmra.mxu1 %vm56_vm0, %v21659_v58  ;;  %v14042_v58 = vld [vmem:[%s23244_s6 + $0x48] sm:$0xff] }
0x223e   :  { %15882 = vmatprep.mubr.msk.f32.mxu1 %vm56_vm0, %v23932_v21  ;;  %11127 = vmatprep.subr.mxu0 %v14042_v58  ;;  %v23943_v21 = vld [vmem:[#allocation13_spill] sm:$0xff]  ;;  %v23952_v58 = vld [vmem:[#allocation22_spill] sm:$0xff] }
0x223f   :  { %11128 = vmatpush1.msra.mxu0 %v14041_v14  ;;  %v23953_v14 = vld [vmem:[#allocation23_spill] sm:$0xff] }
0x2240   :  { %11222 = vmatprep.subr.mxu0 %v11076_v20  ;;  %v23960_v20 = vld [vmem:[#allocation30_spill] sm:$0xff] }
0x2241   :  { %15883 = vmatmul.mubr.msk.f32.gmra.mxu1 %vm56_vm0, %v23933_v28  ;;  %v23944_v28 = vld [vmem:[#allocation14_spill] sm:$0xff] }
0x2242   :  { %11371 = vmatprep.mubr.f32.mxu1 %v23534_v40 }
0x22ed   :  { %v15869_v52 = vpop.f32.mrf.mxu1 }
0x22ef   :  { %v11010_v62 = vpop.f32.mrf.mxu1 }
0x22f1   :  { %v15872_v46 = vpop.f32.mrf.mxu1 }
0x22f3   :  { %v11020_v63 = vpop.f32.mrf.mxu1 }
0x22f5   :  { %v15875_v36 = vpop.f32.mrf.mxu1 }
0x22f7   :  { %v11030_v16 = vpop.f32.mrf.mxu1 }
0x22f8   :  { %14049 = vmatmul.mubr.msk.f32.vlgmr.msra.gmra.mxu0 %vm56_vm0, %v11030_v16 }
0x22f9   :  { %v15878_v10 = vpop.f32.mrf.mxu1  ;;  %11167 = vmatprep.mubr.f32.mxu0 %v23534_v40  ;;  %11223 = vmatpush1.msra.mxu0 %v11075_v30 }
0x22fa   :  { %11224 = vmatprep.subr.mxu0 %v11074_v60 }
0x22fb   :  { %v11040_v26 = vpop.f32.mrf.mxu1  ;;  %11225 = vmatpush1.msra.mxu0 %v11073_v5 }
0x22fc   :  { %14050 = vmatmul.mubr.msk.f32.gmra.mxu0 %vm56_vm0, %v15875_v36  ;;  %11226 = vmatprep.subr.mxu0 %v11072_v6 }
0x22fd   :  { %v15881_v4 = vpop.f32.mrf.mxu1  ;;  %11173 = vmatprep.mubr.f32.mxu0 %v23534_v40  ;;  %11227 = vmatpush1.msra.mxu0 %v11071_v27 }
0x22fe   :  { %11228 = vmatprep.subr.mxu0 %v11070_v48 }
0x22ff   :  { %v11050_v3 = vpop.f32.mrf.mxu1  ;;  %11229 = vmatpush1.msra.mxu0 %v11069_v29 }
0x2300   :  { %14051 = vmatmul.mubr.msk.f32.gmra.mxu0 %vm56_vm0, %v11040_v26  ;;  %14065 = vmatmul.mubr.msk.f32.vlgmr.msra.gmra.mxu1 %vm56_vm0, %v11050_v3 }
0x2301   :  { %11179 = vmatprep.mubr.f32.mxu0 %v23534_v40  ;;  %11377 = vmatprep.mubr.f32.mxu1 %v23534_v40  ;;  %v15884_v17 = vpop.f32.mrf.mxu1 }
0x2302   :  { %15313 = vmatprep.subr.mxu0 %v23934_v32 }
0x2303   :  { %v11060_v7 = vpop.f32.mrf.mxu1 }
0x2304   :  { %14052 = vmatmul.mubr.msk.f32.gmra.mxu0 %vm56_vm0, %v15878_v10  ;;  %14066 = vmatmul.mubr.msk.f32.gmra.mxu1 %vm56_vm0, %v15881_v4 }
0x2305   :  { %11262 = vmatprep.mubr.f32.mxu0 %v23534_v40  ;;  %11383 = vmatprep.mubr.f32.mxu1 %v23534_v40 }
0x2308   :  { %14053 = vmatmul.mubr.msk.f32.vlgmr.msra.gmra.mxu0 %vm56_vm0, %v11010_v62  ;;  %14067 = vmatmul.mubr.msk.f32.gmra.mxu1 %vm56_vm0, %v11060_v7  ;;  %v23964_v62 = vld [vmem:[#allocation34_spill] sm:$0xff] }
0x2309   :  { %11268 = vmatprep.mubr.f32.mxu0 %v23534_v40  ;;  %11389 = vmatprep.mubr.f32.mxu1 %v23534_v40 }
0x230a   :  { %15314 = vmatpush3.msra.mxu0 %v23935_v19 }
0x230b   :  { %15315 = vmatprep.subr.mxu0 %v23936_v8 }
0x230c   :  { %14054 = vmatmul.mubr.msk.f32.gmra.mxu0 %vm56_vm0, %v15869_v52  ;;  %14068 = vmatmul.mubr.msk.f32.gmra.mxu1 %vm56_vm0, %v15884_v17  ;;  %v23963_v52 = vld [vmem:[#allocation33_spill] sm:$0xff] }
0x230d   :  { %11274 = vmatprep.mubr.f32.mxu0 %v23534_v40  ;;  %15316 = vmatpush3.msra.mxu0 %v23937_v2 }
0x230e   :  { %15317 = vmatprep.subr.mxu0 %v23938_v0  ;;  %15893 = vmatprep.mubr.msk.f32.mxu1 %vm56_vm0, %v22169_v42  ;;  %v23946_v42 = vld [vmem:[#allocation16_spill] sm:$0xff] }
0x230f   :  { %15318 = vmatpush3.msra.mxu0 %v23939_v45 }
0x2310   :  { %14055 = vmatmul.mubr.msk.f32.gmra.mxu0 %vm56_vm0, %v11020_v63  ;;  %15319 = vmatprep.subr.mxu0 %v23940_v53  ;;  %v22347_v63 = vpop.f32.mrf.mxu0 }
0x2311   :  { %11280 = vmatprep.mubr.f32.mxu0 %v23534_v40  ;;  %15320 = vmatpush3.msra.mxu0 %v23941_v55 }
0x2312   :  { %15321 = vmatprep.subr.mxu0 %v23942_v25  ;;  %v22349_v36 = vpop.f32.mrf.mxu0 }
0x2313   :  { %15322 = vmatpush3.msra.mxu0 %v23943_v21 }
0x2314   :  { %14056 = vmatmul.mubr.msk.f32.gmra.mxu0 %vm56_vm0, %v15872_v46  ;;  %15323 = vmatprep.subr.mxu0 %v23944_v28  ;;  %v23965_v46 = vld [vmem:[#allocation35_spill] sm:$0xff] }
0x2315   :  { %15324 = vmatpush3.msra.mxu0 %v23945_v24 }
0x2316   :  { %15325 = vmatprep.subr.mxu0 %v23946_v42 }
0x2317   :  { %15326 = vmatpush3.msra.mxu0 %v23947_v54 }
0x2318   :  { %15327 = vmatprep.subr.mxu0 %v23948_v59 }
0x2319   :  { %15328 = vmatpush3.msra.mxu0 %v23949_v23 }
0x231a   :  { %15329 = vmatprep.subr.mxu0 %v23950_v47 }
0x231b   :  { %15330 = vmatpush3.msra.mxu0 %v23951_v41 }
0x231c   :  { %15331 = vmatprep.subr.mxu0 %v23952_v58 }
0x231d   :  { %15332 = vmatpush3.msra.mxu0 %v23953_v14 }
0x231e   :  { %15333 = vmatprep.subr.mxu0 %v23954_v34 }
0x231f   :  { %15334 = vmatpush3.msra.mxu0 %v23955_v9 }
0x2320   :  { %15335 = vmatprep.subr.mxu0 %v23956_v43 }
0x2321   :  { %15336 = vmatpush3.msra.mxu0 %v23957_v37 }
0x2322   :  { %15337 = vmatprep.subr.mxu0 %v23958_v12 }
0x2323   :  { %15338 = vmatpush3.msra.mxu0 %v23959_v15 }
0x2324   :  { %15339 = vmatprep.subr.mxu0 %v23960_v20 }
0x2325   :  { %15340 = vmatpush3.msra.mxu0 %v23961_v61 }
0x2326   :  { %15341 = vmatprep.subr.mxu0 %v23962_v18 }
0x2327   :  { %15342 = vmatpush3.msra.mxu0 %v23963_v52 }
0x2328   :  { %15343 = vmatprep.subr.mxu0 %v23964_v62  ;;  %v14021_v62 = vld [vmem:[%s23245_s1 + $0xc0] sm:$0xff] }
0x2329   :  { %15344 = vmatpush3.msra.mxu0 %v23965_v46 }
0x23b8   :  { %v11163_v30 = vpop.f32.mrf.mxu0 }
0x23ba   :  { %v11165_v16 = vpop.f32.mrf.mxu0 }
0x23bc   :  { %v11169_v60 = vpop.f32.mrf.mxu0 }
0x23be   :  { %v11171_v5 = vpop.f32.mrf.mxu0 }
0x23c0   :  { %v11175_v10 = vpop.f32.mrf.mxu0  ;;  %v11373_v6 = vpop.f32.mrf.mxu1 }
0x23c2   :  { %v11177_v27 = vpop.f32.mrf.mxu0  ;;  %v11375_v26 = vpop.f32.mrf.mxu1 }
0x23c4   :  { %v11181_v48 = vpop.f32.mrf.mxu0  ;;  %v11379_v29 = vpop.f32.mrf.mxu1 }
0x23c6   :  { %v11183_v4 = vpop.f32.mrf.mxu0  ;;  %v11381_v17 = vpop.f32.mrf.mxu1 }
0x23c8   :  { %v11264_v3 = vpop.f32.mrf.mxu0  ;;  %v11385_v2 = vpop.f32.mrf.mxu1 }
0x23c9   :  { %v11265_v32 = vadd.f32 %v11264_v3, %v11163_v30 }
0x23ca   :  { %v11266_v7 = vpop.f32.mrf.mxu0  ;;  %v11387_v42 = vpop.f32.mrf.mxu1 }
0x23cb   :  { %v11267_v19 = vadd.f32 %v11266_v7, %v11165_v16  ;;  %v11396_v8 = vadd.f32 %v11373_v6, %v11265_v32 }
0x23cc   :  { %v11270_v0 = vpop.f32.mrf.mxu0  ;;  %v11391_v34 = vpop.f32.mrf.mxu1 }
0x23cd   :  { %v11397_v45 = vadd.f32 %v11375_v26, %v11267_v19  ;;  %v11271_v53 = vadd.f32 %v11270_v0, %v11169_v60  ;;  %v11404_v28 = vmul.f32 %v22116_v31, %v11396_v8  ;;  %v15296_v60 = vadd.f32 %v22349_v36, %v22347_v63  ;;  %v14069_v63 = vld [vmem:[%s23246_s2 + $0xc0] sm:$0xff]  ;;  %v14070_v19 = vld [vmem:[%s23246_s2 + $0xc8] sm:$0xff] }
0x23ce   :  { %v11272_v55 = vpop.f32.mrf.mxu0  ;;  %v11393_v61 = vpop.f32.mrf.mxu1 }
0x23cf   :  { %v11273_v25 = vadd.f32 %v11272_v55, %v11171_v5  ;;  %v11405_v21 = vmul.f32 %v22109_v11, %v11397_v45  ;;  %v11398_v24 = vadd.f32 %v11379_v29, %v11271_v53 }
0x23d0   :  { %v11276_v54 = vpop.f32.mrf.mxu0 }
0x23d1   :  { %v11399_v59 = vadd.f32 %v11381_v17, %v11273_v25  ;;  %v11277_v23 = vadd.f32 %v11276_v54, %v11175_v10  ;;  %11476 = vmatprep.mubr.f32.mxu0 %v11405_v21  ;;  %v11406_v14 = vmul.f32 %v22130_v39, %v11398_v24  ;;  %v14071_v25 = vld [vmem:[%s23246_s2 + $0xd0] sm:$0xff]  ;;  %v14072_v54 = vld [vmem:[%s23246_s2 + $0xd8] sm:$0xff] }
0x23d2   :  { %v11278_v47 = vpop.f32.mrf.mxu0  ;;  %11477 = vmatmul.mubr.f32.vlgmr.msra.gmra.mxu0 %v11404_v28 }
0x23d3   :  { %v11279_v41 = vadd.f32 %v11278_v47, %v11177_v27  ;;  %v11407_v58 = vmul.f32 %v22123_v57, %v11399_v59  ;;  %v11400_v9 = vadd.f32 %v11385_v2, %v11277_v23 }
0x23d4   :  { %v11282_v43 = vpop.f32.mrf.mxu0 }
0x23d5   :  { %v11401_v37 = vadd.f32 %v11387_v42, %v11279_v41  ;;  %v11283_v11 = vadd.f32 %v11282_v43, %v11181_v48  ;;  %11481 = vmatprep.mubr.f32.mxu0 %v11407_v58  ;;  %v11408_v20 = vmul.f32 %v22148_v44, %v11400_v9  ;;  %v14022_v44 = vld [vmem:[%s23245_s1 + $0xc8] sm:$0xff] }
0x23d6   :  { %v11284_v31 = vpop.f32.mrf.mxu0  ;;  %11482 = vmatmul.mubr.f32.gmra.mxu0 %v11406_v14  ;;  %v10913_v46 = vadd.f32 %v22179_v38, %v14022_v44 }
0x23d7   :  { %v11285_v12 = vadd.f32 %v11284_v31, %v11183_v4  ;;  %v11409_v15 = vmul.f32 %v22141_v1, %v11401_v37  ;;  %v11402_v18 = vadd.f32 %v11391_v34, %v11283_v11  ;;  %v10912_v1 = vadd.f32 %v22174_v49, %v14021_v62  ;;  %v14024_v49 = vld [vmem:[%s23245_s1 + $0xd8] sm:$0xff] }
0x23d8   :  { %v10915_v10 = vadd.f32 %v15296_v60, %v14024_v49  ;;  %v22466_v60 = vld [vmem:[%s23239_s4 + $0x28] sm:$0xff]  ;;  %v22473_v49 = vld [vmem:[%s23239_s4 + $0x30] sm:$0xff] }
0x23d9   :  { %v11403_v52 = vadd.f32 %v11393_v61, %v11285_v12  ;;  %11486 = vmatprep.mubr.f32.mxu0 %v11409_v15  ;;  %v11410_v39 = vmul.f32 %v22162_v22, %v11402_v18  ;;  %v14025_v30 = vmul.f32 -1.442695, %v10912_v1  ;;  %v14026_v22 = vmul.f32 -1.442695, %v10913_v46  ;;  %v14101_v46 = vld [vmem:[%s23240_s5 + $0xe0] sm:$0xff] }
0x23da   :  { %11487 = vmatmul.mubr.f32.gmra.mxu0 %v11408_v20  ;;  %v14028_v38 = vmul.f32 -1.442695, %v10915_v10  ;;  %v22487_v10 = vld [vmem:[%s23239_s4 + $0x40] sm:$0xff] }
0x23db   :  { %v11411_v57 = vmul.f32 %v22155_v33, %v11403_v52  ;;  %v14023_v33 = vld [vmem:[%s23245_s1 + $0xd0] sm:$0xff]  ;;  %16202 = vpow2.f32 %v14025_v30  ;;  %v22438_v30 = vld [vmem:[%s23239_s4 + $0x8] sm:$0xff] }
0x23dc   :  { %v10914_v16 = vadd.f32 %v22187_v56, %v14023_v33  ;;  %16204 = vpow2.f32 %v14026_v22  ;;  %v22445_v33 = vld [vmem:[%s23239_s4 + $0x10] sm:$0xff]  ;;  %v22452_v22 = vld [vmem:[%s23239_s4 + $0x18] sm:$0xff] }
0x23dd   :  { %11491 = vmatprep.mubr.f32.mxu0 %v11411_v57 }
0x23de   :  { %11492 = vmatmul.mubr.f32.gmra.mxu0 %v11410_v39  ;;  %v14027_v5 = vmul.f32 -1.442695, %v10914_v16  ;;  %v22459_v16 = vld [vmem:[%s23239_s4 + $0x20] sm:$0xff] }
0x23df   :  { %11853 = vmatprep.mubr.f32.mxu0 %v23534_v40 }
0x23e0   :  { %16206 = vpow2.f32 %v14027_v5  ;;  %v22480_v5 = vld [vmem:[%s23239_s4 + $0x38] sm:$0xff] }
0x23e1   :  { %16208 = vpow2.f32 %v14028_v38  ;;  %v22494_v38 = vld [vmem:[%s23239_s4 + $0x48] sm:$0xff] }
0x23e8   :  { %v16203_v6 = vpop.eup %16202 }
0x23e9   :  { %v16205_v27 = vpop.eup %16204  ;;  %v10928_v26 = vadd.f32 1.0, %v16203_v6  ;;  %v22501_v6 = vld [vmem:[%s23239_s4 + $0x50] sm:$0xff] }
0x23ea   :  { %v10929_v29 = vadd.f32 1.0, %v16205_v27  ;;  %23966 = vst [vmem:[#allocation2_spill] sm:$0xff] %v22501_v6  ;;  %v22508_v27 = vld [vmem:[%s23239_s4 + $0x58] sm:$0xff] }
0x23eb   :  { %16210 = vrcp.f32 %v10928_v26  ;;  %23967 = vst [vmem:[#allocation3_spill] sm:$0xff] %v22508_v27  ;;  %v14098_v26 = vld [vmem:[%s23240_s5 + $0xc8] sm:$0xff] }
0x23ec   :  { %16212 = vrcp.f32 %v10929_v29  ;;  %v14104_v29 = vld [vmem:[%s23240_s5 + $0xf8] sm:$0xff] }
0x23ed   :  { %v16207_v36 = vpop.eup %16206  ;;  %11813 = vmatprep.subr.mxu0 %v14104_v29  ;;  %v14122_v29 = vld [vmem:[%s23240_s5 + $0x108] sm:$0xff] }
0x23ee   :  { %v10930_v32 = vadd.f32 1.0, %v16207_v36  ;;  %v16209_v8 = vpop.eup %16208  ;;  %v14099_v36 = vld [vmem:[%s23240_s5 + $0xd0] sm:$0xff] }
0x23ef   :  { %v10931_v53 = vadd.f32 1.0, %v16209_v8  ;;  %v14089_v8 = vld [vmem:[%s23240_s5 + $0x80] sm:$0xff] }
0x23f8   :  { %v16211_v23 = vpop.eup %16210 }
0x23f9   :  { %v16213_v41 = vpop.eup %16212  ;;  %v11514_v58 = vsub.f32 1.0, %v16211_v23  ;;  %v11510_v34 = vmul.f32 %v16211_v23, %v21555_v51  ;;  %v11667_v23 = vld [vmem:[%s23240_s5 + $0x58] sm:$0xff] }
0x23fa   :  { %v11515_v37 = vsub.f32 1.0, %v16213_v41  ;;  %v11511_v12 = vmul.f32 %v16213_v41, %v21563_v50  ;;  %v11664_v41 = vld [vmem:[%s23240_s5 + $0x40] sm:$0xff] }
0x2492   :  { %v15345_v48 = vpop.f32.mrf.mxu0 }
0x2494   :  { %v15346_v56 = vpop.f32.mrf.mxu0 }
0x2495   :  { %v15347_v4 = vadd.f32 %v15346_v56, %v15345_v48  ;;  %v14097_v48 = vld [vmem:[%s23240_s5 + $0xc0] sm:$0xff]  ;;  %v14103_v56 = vld [vmem:[%s23240_s5 + $0xf0] sm:$0xff] }
0x2496   :  { %v15348_v3 = vpop.f32.mrf.mxu0  ;;  %11814 = vmatpush1.msra.mxu0 %v14103_v56  ;;  %v14124_v56 = vld [vmem:[%s23240_s5 + $0x118] sm:$0xff] }
0x2497   :  { %v11502_v17 = vadd.f32 %v15347_v4, %v14069_v63  ;;  %v14100_v63 = vld [vmem:[%s23240_s5 + $0xd8] sm:$0xff]  ;;  %v14094_v4 = vld [vmem:[%s23240_s5 + $0xa8] sm:$0xff] }
0x2498   :  { %v15349_v7 = vpop.f32.mrf.mxu0  ;;  %11815 = vmatprep.subr.mxu0 %v14100_v63  ;;  %v14121_v63 = vld [vmem:[%s23240_s5 + $0x100] sm:$0xff] }
0x2499   :  { %16214 = vtanh.f32 %v11502_v17  ;;  %v15350_v2 = vadd.f32 %v15349_v7, %v15348_v3  ;;  %v14096_v3 = vld [vmem:[%s23240_s5 + $0xb8] sm:$0xff]  ;;  %11816 = vmatpush1.msra.mxu0 %v14099_v36  ;;  %v14093_v17 = vld [vmem:[%s23240_s5 + $0xa0] sm:$0xff]  ;;  %v14090_v7 = vld [vmem:[%s23240_s5 + $0x88] sm:$0xff] }
0x249a   :  { %v15351_v0 = vpop.f32.mrf.mxu0  ;;  %16216 = vrcp.f32 %v10930_v32  ;;  %11817 = vmatprep.subr.mxu0 %v14096_v3  ;;  %v14095_v32 = vld [vmem:[%s23240_s5 + $0xb0] sm:$0xff] }
0x249b   :  { %v11503_v45 = vadd.f32 %v15350_v2, %v14070_v19  ;;  %11818 = vmatpush1.msra.mxu0 %v14095_v32  ;;  %v14092_v19 = vld [vmem:[%s23240_s5 + $0x98] sm:$0xff]  ;;  %v14091_v2 = vld [vmem:[%s23240_s5 + $0x90] sm:$0xff] }
0x249c   :  { %v15352_v55 = vpop.f32.mrf.mxu0  ;;  %11819 = vmatprep.subr.mxu0 %v14092_v19  ;;  %v22717_v19 = vld [vmem:[%s23241_s8 + $0x78] sm:$0xff] }
0x249d   :  { %16218 = vtanh.f32 %v11503_v45  ;;  %v15353_v21 = vadd.f32 %v15352_v55, %v15351_v0  ;;  %11820 = vmatpush1.msra.mxu0 %v14091_v2  ;;  %v11669_v0 = vld [vmem:[%s23240_s5 + $0x68] sm:$0xff]  ;;  %v11671_v45 = vld [vmem:[%s23240_s5 + $0x78] sm:$0xff]  ;;  %23969 = vst [vmem:[#allocation5_spill] sm:$0xff] %v22717_v19  ;;  %v22731_v2 = vld [vmem:[%s23241_s8 + $0x70] sm:$0xff] }
0x249e   :  { %v15354_v28 = vpop.f32.mrf.mxu0  ;;  %16220 = vrcp.f32 %v10931_v53  ;;  %12003 = vmatprep.subr.mxu0 %v11671_v45  ;;  %23971 = vst [vmem:[#allocation7_spill] sm:$0xff] %v22731_v2  ;;  %v22745_v45 = vld [vmem:[%s23241_s8 + $0x68] sm:$0xff] }
0x249f   :  { %v11504_v24 = vadd.f32 %v15353_v21, %v14071_v25  ;;  %23973 = vst [vmem:[#allocation9_spill] sm:$0xff] %v22745_v45 }
0x24a0   :  { %v15355_v42 = vpop.f32.mrf.mxu0 }
0x24a1   :  { %16222 = vtanh.f32 %v11504_v24  ;;  %v15356_v59 = vadd.f32 %v15355_v42, %v15354_v28  ;;  %v11668_v42 = vld [vmem:[%s23240_s5 + $0x60] sm:$0xff] }
0x24a3   :  { %v11505_v47 = vadd.f32 %v15356_v59, %v14072_v54  ;;  %v11670_v54 = vld [vmem:[%s23240_s5 + $0x70] sm:$0xff]  ;;  %v11665_v59 = vld [vmem:[%s23240_s5 + $0x48] sm:$0xff] }
0x24a5   :  { %16224 = vtanh.f32 %v11505_v47 }
0x24a6   :  { %v16215_v14 = vpop.eup %16214 }
0x24a7   :  { %v11518_v9 = vmul.f32 %v16215_v14, %v11514_v58  ;;  %v16217_v43 = vpop.eup %16216  ;;  %v11666_v58 = vld [vmem:[%s23240_s5 + $0x50] sm:$0xff]  ;;  %v11661_v14 = vld [vmem:[%s23240_s5 + $0x28] sm:$0xff] }
0x24a8   :  { %v11516_v61 = vsub.f32 1.0, %v16217_v43  ;;  %v11512_v52 = vmul.f32 %v16217_v43, %v21571_v13  ;;  %v11660_v43 = vld [vmem:[%s23240_s5 + $0x20] sm:$0xff] }
0x24a9   :  { %v22390_v11 = vadd.f32 %v11518_v9, %v11510_v34  ;;  %v11663_v34 = vld [vmem:[%s23240_s5 + $0x38] sm:$0xff] }
0x24aa   :  { %v16219_v31 = vpop.eup %16218 }
0x24ab   :  { %v11519_v15 = vmul.f32 %v16219_v31, %v11515_v37  ;;  %14073 = vst.msk [vmem:[%s23247_s9 + $0xc0] sm:$0xff] %vm56_vm0, %v22390_v11  ;;  %v16221_v20 = vpop.eup %16220  ;;  %v11662_v37 = vld [vmem:[%s23240_s5 + $0x30] sm:$0xff]  ;;  %v11657_v31 = vld [vmem:[%s23240_s5 + $0x8] sm:$0xff] }
0x24ac   :  { %v11517_v50 = vsub.f32 1.0, %v16221_v20  ;;  %v11513_v1 = vmul.f32 %v16221_v20, %v21579_v35  ;;  %v14102_v35 = vld [vmem:[%s23240_s5 + $0xe8] sm:$0xff]  ;;  %v11658_v20 = vld [vmem:[%s23240_s5 + $0x10] sm:$0xff] }
0x24ad   :  { %v22398_v18 = vadd.f32 %v11519_v15, %v11511_v12  ;;  %v11659_v12 = vld [vmem:[%s23240_s5 + $0x18] sm:$0xff]  ;;  %v11656_v15 = vld [vmem:[%s23240_s5] sm:$0xff] }
0x24ae   :  { %v16223_v51 = vpop.eup %16222 }
0x24af   :  { %v11520_v57 = vmul.f32 %v16223_v51, %v11516_v61  ;;  %14074 = vst.msk [vmem:[%s23247_s9 + $0xc8] sm:$0xff] %vm56_vm0, %v22398_v18  ;;  %v14134_v61 = vld [vmem:[%s23240_s5 + $0x168] sm:$0xff]  ;;  %v14136_v51 = vld [vmem:[%s23240_s5 + $0x178] sm:$0xff] }
0x24b1   :  { %v22406_v39 = vadd.f32 %v11520_v57, %v11512_v52  ;;  %v14133_v52 = vld [vmem:[%s23240_s5 + $0x160] sm:$0xff]  ;;  %v14135_v57 = vld [vmem:[%s23240_s5 + $0x170] sm:$0xff] }
0x24b2   :  { %v16225_v62 = vpop.eup %16224 }
0x24b3   :  { %v11521_v44 = vmul.f32 %v16225_v62, %v11517_v50  ;;  %14075 = vst.msk [vmem:[%s23247_s9 + $0xd0] sm:$0xff] %vm56_vm0, %v22406_v39  ;;  %v14130_v50 = vld [vmem:[%s23240_s5 + $0x148] sm:$0xff]  ;;  %v14132_v62 = vld [vmem:[%s23240_s5 + $0x158] sm:$0xff] }
0x24b5   :  { %v22414_v13 = vadd.f32 %v11521_v44, %v11513_v1  ;;  %v14129_v1 = vld [vmem:[%s23240_s5 + $0x140] sm:$0xff]  ;;  %v14131_v44 = vld [vmem:[%s23240_s5 + $0x150] sm:$0xff] }
0x24b7   :  { %14076 = vst.msk [vmem:[%s23247_s9 + $0xd8] sm:$0xff] %vm56_vm0, %v22414_v13  ;;  %15885 = vmatprep.subr.mxu1 %v22414_v13 }
0x24b8   :  { %15886 = vmatpush3.msra.mxu1 %v22414_v13 }
0x24b9   :  { %15887 = vmatprep.subr.mxu1 %v22406_v39 }
0x24ba   :  { %15888 = vmatpush3.msra.mxu1 %v22406_v39 }
0x24bb   :  { %15889 = vmatprep.subr.mxu1 %v22398_v18 }
0x24bc   :  { %15890 = vmatpush3.msra.mxu1 %v22398_v18 }
0x24bd   :  { %15891 = vmatprep.subr.mxu1 %v22390_v11 }
0x24be   :  { %15892 = vmatpush3.msra.mxu1 %v22390_v11 }
0x24bf   :  { %15894 = vmatmul.mubr.msk.f32.vlgmr.msra.gmra.mxu1 %vm56_vm0, %v22438_v30  ;;  %11724 = vmatprep.subr.mxu1 %v14102_v35  ;;  %v14126_v35 = vld [vmem:[%s23240_s5 + $0x128] sm:$0xff] }
0x24c0   :  { %15896 = vmatprep.mubr.msk.f32.mxu1 %vm56_vm0, %v22445_v33  ;;  %11725 = vmatpush1.msra.mxu1 %v14101_v46  ;;  %v14128_v46 = vld [vmem:[%s23240_s5 + $0x138] sm:$0xff] }
0x24c1   :  { %11726 = vmatprep.subr.mxu1 %v14098_v26  ;;  %v14125_v26 = vld [vmem:[%s23240_s5 + $0x120] sm:$0xff] }
0x24c2   :  { %11727 = vmatpush1.msra.mxu1 %v14097_v48  ;;  %v14127_v48 = vld [vmem:[%s23240_s5 + $0x130] sm:$0xff] }
0x24c3   :  { %15897 = vmatmul.mubr.msk.f32.gmra.mxu1 %vm56_vm0, %v22452_v22  ;;  %11728 = vmatprep.subr.mxu1 %v14094_v4  ;;  %v14123_v4 = vld [vmem:[%s23240_s5 + $0x110] sm:$0xff] }
0x24c4   :  { %15899 = vmatprep.mubr.msk.f32.mxu1 %vm56_vm0, %v22459_v16  ;;  %11729 = vmatpush1.msra.mxu1 %v14093_v17 }
0x24c5   :  { %11730 = vmatprep.subr.mxu1 %v14090_v7  ;;  %v22712_v7 = vld [vmem:[%s23241_s8 + $0xf8] sm:$0xff] }
0x24c6   :  { %11731 = vmatpush1.msra.mxu1 %v14089_v8  ;;  %23968 = vst [vmem:[#allocation4_spill] sm:$0xff] %v22712_v7  ;;  %v22726_v8 = vld [vmem:[%s23241_s8 + $0xf0] sm:$0xff] }
0x24c7   :  { %15900 = vmatmul.mubr.msk.f32.gmra.mxu1 %vm56_vm0, %v22466_v60  ;;  %11914 = vmatprep.subr.mxu1 %v11669_v0  ;;  %23970 = vst [vmem:[#allocation6_spill] sm:$0xff] %v22726_v8  ;;  %v22740_v0 = vld [vmem:[%s23241_s8 + $0xe8] sm:$0xff] }
0x24c8   :  { %15902 = vmatprep.mubr.msk.f32.mxu1 %vm56_vm0, %v22473_v49  ;;  %23972 = vst [vmem:[#allocation8_spill] sm:$0xff] %v22740_v0 }
0x24cb   :  { %15903 = vmatmul.mubr.msk.f32.gmra.mxu1 %vm56_vm0, %v22480_v5 }
0x24cc   :  { %15905 = vmatprep.mubr.msk.f32.mxu1 %vm56_vm0, %v22487_v10 }
0x24cf   :  { %15906 = vmatmul.mubr.msk.f32.gmra.mxu1 %vm56_vm0, %v22494_v38 }
0x24d0   :  { %15908 = vmatprep.mubr.msk.f32.mxu1 %vm56_vm0, %v22501_v6 }
0x24d3   :  { %15909 = vmatmul.mubr.msk.f32.gmra.mxu1 %vm56_vm0, %v22508_v27 }
0x24d4   :  { %11764 = vmatprep.mubr.f32.mxu1 %v23534_v40 }
0x257f   :  { %v22561_v53 = vpop.f32.mrf.mxu1 }
0x2581   :  { %v11597_v55 = vpop.f32.mrf.mxu1 }
0x2583   :  { %v22563_v25 = vpop.f32.mrf.mxu1 }
0x2585   :  { %v22565_v21 = vpop.f32.mrf.mxu1 }
0x2587   :  { %v15901_v28 = vpop.f32.mrf.mxu1 }
0x2589   :  { %v11617_v24 = vpop.f32.mrf.mxu1 }
0x258a   :  { %14105 = vmatmul.mubr.msk.f32.vlgmr.msra.gmra.mxu1 %vm56_vm0, %v11617_v24  ;;  %14109 = vmatmul.mubr.msk.f32.vlgmr.msra.gmra.mxu0 %vm56_vm0, %v11617_v24  ;;  %v22789_v24 = vld [vmem:[%s23241_s8 + $0x50] sm:$0xff] }
0x258b   :  { %11770 = vmatprep.mubr.f32.mxu1 %v23534_v40  ;;  %11859 = vmatprep.mubr.f32.mxu0 %v23534_v40  ;;  %v15904_v47 = vpop.f32.mrf.mxu1  ;;  %23979 = vst [vmem:[#allocation15_spill] sm:$0xff] %v22789_v24 }
0x258c   :  { %11915 = vmatpush1.msra.mxu1 %v11668_v42  ;;  %12004 = vmatpush1.msra.mxu0 %v11670_v54  ;;  %v22796_v42 = vld [vmem:[%s23241_s8 + $0xc8] sm:$0xff] }
0x258d   :  { %11916 = vmatprep.subr.mxu1 %v11665_v59  ;;  %12005 = vmatprep.subr.mxu0 %v11667_v23  ;;  %v11627_v9 = vpop.f32.mrf.mxu1  ;;  %23980 = vst [vmem:[#allocation16_spill] sm:$0xff] %v22796_v42  ;;  %v22803_v54 = vld [vmem:[%s23241_s8 + $0x48] sm:$0xff]  ;;  %v22810_v59 = vld [vmem:[%s23241_s8 + $0xc0] sm:$0xff] }
0x258e   :  { %14106 = vmatmul.mubr.msk.f32.gmra.mxu1 %vm56_vm0, %v15901_v28  ;;  %14110 = vmatmul.mubr.msk.f32.gmra.mxu0 %vm56_vm0, %v15901_v28  ;;  %v22782_v28 = vld [vmem:[%s23241_s8 + $0xd0] sm:$0xff]  ;;  %23981 = vst [vmem:[#allocation17_spill] sm:$0xff] %v22803_v54  ;;  %23982 = vst [vmem:[#allocation18_spill] sm:$0xff] %v22810_v59  ;;  %v22817_v23 = vld [vmem:[%s23241_s8 + $0x40] sm:$0xff] }
0x258f   :  { %11776 = vmatprep.mubr.f32.mxu1 %v23534_v40  ;;  %11865 = vmatprep.mubr.f32.mxu0 %v23534_v40  ;;  %v15907_v36 = vpop.f32.mrf.mxu1  ;;  %23978 = vst [vmem:[#allocation14_spill] sm:$0xff] %v22782_v28  ;;  %23983 = vst [vmem:[#allocation19_spill] sm:$0xff] %v22817_v23 }
0x2590   :  { %11917 = vmatpush1.msra.mxu1 %v11664_v41  ;;  %12006 = vmatpush1.msra.mxu0 %v11666_v58  ;;  %v22831_v41 = vld [vmem:[%s23241_s8 + $0x38] sm:$0xff]  ;;  %v22838_v58 = vld [vmem:[%s23241_s8 + $0xb0] sm:$0xff] }
0x2591   :  { %11918 = vmatprep.subr.mxu1 %v11661_v14  ;;  %12007 = vmatprep.subr.mxu0 %v11663_v34  ;;  %v11637_v3 = vpop.f32.mrf.mxu1  ;;  %23985 = vst [vmem:[#allocation21_spill] sm:$0xff] %v22831_v41  ;;  %23986 = vst [vmem:[#allocation22_spill] sm:$0xff] %v22838_v58  ;;  %v22845_v14 = vld [vmem:[%s23241_s8 + $0x30] sm:$0xff]  ;;  %v22852_v34 = vld [vmem:[%s23241_s8 + $0xa8] sm:$0xff] }
0x2592   :  { %14107 = vmatmul.mubr.msk.f32.gmra.mxu1 %vm56_vm0, %v11627_v9  ;;  %14111 = vmatmul.mubr.msk.f32.gmra.mxu0 %vm56_vm0, %v11627_v9  ;;  %23987 = vst [vmem:[#allocation23_spill] sm:$0xff] %v22845_v14  ;;  %23988 = vst [vmem:[#allocation24_spill] sm:$0xff] %v22852_v34  ;;  %v22859_v9 = vld [vmem:[%s23241_s8 + $0x28] sm:$0xff] }
0x2593   :  { %11782 = vmatprep.mubr.f32.mxu1 %v23534_v40  ;;  %11871 = vmatprep.mubr.f32.mxu0 %v23534_v40  ;;  %v15910_v17 = vpop.f32.mrf.mxu1  ;;  %23989 = vst [vmem:[#allocation25_spill] sm:$0xff] %v22859_v9 }
0x2594   :  { %11919 = vmatpush1.msra.mxu1 %v11660_v43  ;;  %12008 = vmatpush1.msra.mxu0 %v11662_v37  ;;  %v22866_v43 = vld [vmem:[%s23241_s8 + $0xa0] sm:$0xff] }
0x2595   :  { %11920 = vmatprep.subr.mxu1 %v11657_v31  ;;  %12009 = vmatprep.subr.mxu0 %v11659_v12  ;;  %v11647_v32 = vpop.f32.mrf.mxu1  ;;  %23990 = vst [vmem:[#allocation26_spill] sm:$0xff] %v22866_v43  ;;  %v22873_v37 = vld [vmem:[%s23241_s8 + $0x20] sm:$0xff]  ;;  %v22880_v31 = vld [vmem:[%s23241_s8 + $0x98] sm:$0xff] }
0x2596   :  { %14108 = vmatmul.mubr.msk.f32.gmra.mxu1 %vm56_vm0, %v15904_v47  ;;  %14112 = vmatmul.mubr.msk.f32.gmra.mxu0 %vm56_vm0, %v15904_v47  ;;  %v22824_v47 = vld [vmem:[%s23241_s8 + $0xb8] sm:$0xff]  ;;  %23991 = vst [vmem:[#allocation27_spill] sm:$0xff] %v22873_v37  ;;  %23992 = vst [vmem:[#allocation28_spill] sm:$0xff] %v22880_v31 }
0x2597   :  { %11921 = vmatpush1.msra.mxu1 %v11656_v15  ;;  %11954 = vmatprep.mubr.f32.mxu1 %v23534_v40  ;;  %23984 = vst [vmem:[#allocation20_spill] sm:$0xff] %v22824_v47  ;;  %v22887_v12 = vld [vmem:[%s23241_s8 + $0x18] sm:$0xff]  ;;  %v22894_v15 = vld [vmem:[%s23241_s8 + $0x90] sm:$0xff] }
0x2598   :  { %12010 = vmatpush1.msra.mxu0 %v11658_v20  ;;  %12043 = vmatprep.mubr.f32.mxu0 %v23534_v40  ;;  %23993 = vst [vmem:[#allocation29_spill] sm:$0xff] %v22887_v12  ;;  %23994 = vst [vmem:[#allocation30_spill] sm:$0xff] %v22894_v15  ;;  %v22901_v20 = vld [vmem:[%s23241_s8 + $0x10] sm:$0xff] }
0x2599   :  { %12120 = vmatprep.subr.mxu1 %v14134_v61  ;;  %12209 = vmatprep.subr.mxu0 %v14136_v51  ;;  %23995 = vst [vmem:[#allocation31_spill] sm:$0xff] %v22901_v20  ;;  %v22908_v61 = vld [vmem:[%s23241_s8 + $0x88] sm:$0xff] }
0x259a   :  { %14113 = vmatmul.mubr.msk.f32.vlgmr.msra.gmra.mxu1 %vm56_vm0, %v11597_v55  ;;  %14117 = vmatmul.mubr.msk.f32.vlgmr.msra.gmra.mxu0 %vm56_vm0, %v11597_v55  ;;  %v22759_v55 = vld [vmem:[%s23241_s8 + $0x60] sm:$0xff]  ;;  %23996 = vst [vmem:[#allocation32_spill] sm:$0xff] %v22908_v61  ;;  %v22915_v51 = vld [vmem:[%s23241_s8 + $0x8] sm:$0xff] }
0x259b   :  { %11960 = vmatprep.mubr.f32.mxu1 %v23534_v40  ;;  %12049 = vmatprep.mubr.f32.mxu0 %v23534_v40  ;;  %23975 = vst [vmem:[#allocation11_spill] sm:$0xff] %v22759_v55  ;;  %23997 = vst [vmem:[#allocation33_spill] sm:$0xff] %v22915_v51 }
0x259c   :  { %12121 = vmatpush1.msra.mxu1 %v14133_v52  ;;  %12210 = vmatpush1.msra.mxu0 %v14135_v57  ;;  %v22922_v52 = vld [vmem:[%s23241_s8 + $0x80] sm:$0xff] }
0x259d   :  { %12122 = vmatprep.subr.mxu1 %v14130_v50  ;;  %12211 = vmatprep.subr.mxu0 %v14132_v62  ;;  %23998 = vst [vmem:[#allocation34_spill] sm:$0xff] %v22922_v52  ;;  %v22929_v57 = vld [vmem:[%s23241_s8] sm:$0xff] }
0x259e   :  { %14114 = vmatmul.mubr.msk.f32.gmra.mxu1 %vm56_vm0, %v22561_v53  ;;  %14118 = vmatmul.mubr.msk.f32.gmra.mxu0 %vm56_vm0, %v22561_v53  ;;  %v22754_v53 = vld [vmem:[%s23241_s8 + $0xe0] sm:$0xff]  ;;  %23999 = vst [vmem:[#allocation35_spill] sm:$0xff] %v22929_v57 }
0x259f   :  { %11966 = vmatprep.mubr.f32.mxu1 %v23534_v40  ;;  %12055 = vmatprep.mubr.f32.mxu0 %v23534_v40  ;;  %23974 = vst [vmem:[#allocation10_spill] sm:$0xff] %v22754_v53 }
0x25a0   :  { %12123 = vmatpush1.msra.mxu1 %v14129_v1  ;;  %12212 = vmatpush1.msra.mxu0 %v14131_v44 }
0x25a1   :  { %12124 = vmatprep.subr.mxu1 %v14126_v35  ;;  %12213 = vmatprep.subr.mxu0 %v14128_v46 }
0x25a2   :  { %14115 = vmatmul.mubr.msk.f32.gmra.mxu1 %vm56_vm0, %v22565_v21  ;;  %14119 = vmatmul.mubr.msk.f32.gmra.mxu0 %vm56_vm0, %v22565_v21  ;;  %v22775_v21 = vld [vmem:[%s23241_s8 + $0x58] sm:$0xff] }
0x25a3   :  { %11972 = vmatprep.mubr.f32.mxu1 %v23534_v40  ;;  %12061 = vmatprep.mubr.f32.mxu0 %v23534_v40  ;;  %23977 = vst [vmem:[#allocation13_spill] sm:$0xff] %v22775_v21 }
0x25a4   :  { %12125 = vmatpush1.msra.mxu1 %v14125_v26  ;;  %12214 = vmatpush1.msra.mxu0 %v14127_v48 }
0x25a5   :  { %12126 = vmatprep.subr.mxu1 %v14122_v29  ;;  %12215 = vmatprep.subr.mxu0 %v14124_v56 }
0x25a6   :  { %14116 = vmatmul.mubr.msk.f32.gmra.mxu1 %vm56_vm0, %v22563_v25  ;;  %14120 = vmatmul.mubr.msk.f32.gmra.mxu0 %vm56_vm0, %v22563_v25  ;;  %v22768_v25 = vld [vmem:[%s23241_s8 + $0xd8] sm:$0xff] }
0x25a7   :  { %12127 = vmatpush1.msra.mxu1 %v14121_v63  ;;  %12160 = vmatprep.mubr.f32.mxu1 %v23534_v40  ;;  %23976 = vst [vmem:[#allocation12_spill] sm:$0xff] %v22768_v25 }
0x25a8   :  { %12216 = vmatpush1.msra.mxu0 %v14123_v4  ;;  %12249 = vmatprep.mubr.f32.mxu0 %v23534_v40 }
0x25a9   :  { %15373 = vmatprep.subr.mxu1 %v22712_v7  ;;  %15417 = vmatprep.subr.mxu0 %v22712_v7 }
0x25aa   :  { %14137 = vmatmul.mubr.msk.f32.vlgmr.msra.gmra.mxu1 %vm56_vm0, %v11637_v3  ;;  %14141 = vmatmul.mubr.msk.f32.vlgmr.msra.gmra.mxu0 %vm56_vm0, %v11637_v3 }
0x25ab   :  { %12166 = vmatprep.mubr.f32.mxu1 %v23534_v40  ;;  %12255 = vmatprep.mubr.f32.mxu0 %v23534_v40 }
0x25ac   :  { %15374 = vmatpush3.msra.mxu1 %v22717_v19  ;;  %15418 = vmatpush3.msra.mxu0 %v22717_v19 }
0x25ad   :  { %15375 = vmatprep.subr.mxu1 %v22726_v8  ;;  %15419 = vmatprep.subr.mxu0 %v22726_v8 }
0x25ae   :  { %14138 = vmatmul.mubr.msk.f32.gmra.mxu1 %vm56_vm0, %v15907_v36  ;;  %14142 = vmatmul.mubr.msk.f32.gmra.mxu0 %vm56_vm0, %v15907_v36 }
0x25af   :  { %12172 = vmatprep.mubr.f32.mxu1 %v23534_v40  ;;  %12261 = vmatprep.mubr.f32.mxu0 %v23534_v40 }
0x25b0   :  { %15376 = vmatpush3.msra.mxu1 %v22731_v2  ;;  %15420 = vmatpush3.msra.mxu0 %v22731_v2 }
0x25b1   :  { %15377 = vmatprep.subr.mxu1 %v22740_v0  ;;  %15421 = vmatprep.subr.mxu0 %v22740_v0 }
0x25b2   :  { %14139 = vmatmul.mubr.msk.f32.gmra.mxu1 %vm56_vm0, %v11647_v32  ;;  %14143 = vmatmul.mubr.msk.f32.gmra.mxu0 %vm56_vm0, %v11647_v32 }
0x25b3   :  { %12178 = vmatprep.mubr.f32.mxu1 %v23534_v40  ;;  %12267 = vmatprep.mubr.f32.mxu0 %v23534_v40 }
0x25b4   :  { %15378 = vmatpush3.msra.mxu1 %v22745_v45  ;;  %15422 = vmatpush3.msra.mxu0 %v22745_v45 }
0x25b5   :  { %15379 = vmatprep.subr.mxu1 %v22754_v53  ;;  %15423 = vmatprep.subr.mxu0 %v22754_v53 }
0x25b6   :  { %14140 = vmatmul.mubr.msk.f32.gmra.mxu1 %vm56_vm0, %v15910_v17  ;;  %14144 = vmatmul.mubr.msk.f32.gmra.mxu0 %vm56_vm0, %v15910_v17 }
0x25b7   :  { %15380 = vmatpush3.msra.mxu1 %v22759_v55  ;;  %15424 = vmatpush3.msra.mxu0 %v22759_v55 }
0x25b8   :  { %15381 = vmatprep.subr.mxu1 %v22768_v25  ;;  %15425 = vmatprep.subr.mxu0 %v22768_v25 }
0x25b9   :  { %15382 = vmatpush3.msra.mxu1 %v22775_v21  ;;  %15426 = vmatpush3.msra.mxu0 %v22775_v21 }
0x25ba   :  { %15383 = vmatprep.subr.mxu1 %v22782_v28  ;;  %15427 = vmatprep.subr.mxu0 %v22782_v28 }
0x25bb   :  { %15384 = vmatpush3.msra.mxu1 %v22789_v24  ;;  %15428 = vmatpush3.msra.mxu0 %v22789_v24 }
0x25bc   :  { %15385 = vmatprep.subr.mxu1 %v22796_v42  ;;  %15429 = vmatprep.subr.mxu0 %v22796_v42 }
0x25bd   :  { %15386 = vmatpush3.msra.mxu1 %v22803_v54  ;;  %15430 = vmatpush3.msra.mxu0 %v22803_v54 }
0x25be   :  { %15387 = vmatprep.subr.mxu1 %v22810_v59  ;;  %15431 = vmatprep.subr.mxu0 %v22810_v59 }
0x25bf   :  { %15388 = vmatpush3.msra.mxu1 %v22817_v23  ;;  %15432 = vmatpush3.msra.mxu0 %v22817_v23 }
0x25c0   :  { %15389 = vmatprep.subr.mxu1 %v22824_v47  ;;  %15433 = vmatprep.subr.mxu0 %v22824_v47 }
0x25c1   :  { %15390 = vmatpush3.msra.mxu1 %v22831_v41  ;;  %15434 = vmatpush3.msra.mxu0 %v22831_v41 }
0x25c2   :  { %15391 = vmatprep.subr.mxu1 %v22838_v58  ;;  %15435 = vmatprep.subr.mxu0 %v22838_v58 }
0x25c3   :  { %15392 = vmatpush3.msra.mxu1 %v22845_v14  ;;  %15436 = vmatpush3.msra.mxu0 %v22845_v14 }
0x25c4   :  { %15393 = vmatprep.subr.mxu1 %v22852_v34  ;;  %15437 = vmatprep.subr.mxu0 %v22852_v34 }
0x25c5   :  { %15394 = vmatpush3.msra.mxu1 %v22859_v9  ;;  %15438 = vmatpush3.msra.mxu0 %v22859_v9 }
0x25c6   :  { %15395 = vmatprep.subr.mxu1 %v22866_v43  ;;  %15439 = vmatprep.subr.mxu0 %v22866_v43 }
0x25c7   :  { %15396 = vmatpush3.msra.mxu1 %v22873_v37  ;;  %15440 = vmatpush3.msra.mxu0 %v22873_v37 }
0x25c8   :  { %15397 = vmatprep.subr.mxu1 %v22880_v31  ;;  %15441 = vmatprep.subr.mxu0 %v22880_v31 }
0x25c9   :  { %15398 = vmatpush3.msra.mxu1 %v22887_v12  ;;  %15442 = vmatpush3.msra.mxu0 %v22887_v12 }
0x25ca   :  { %15399 = vmatprep.subr.mxu1 %v22894_v15  ;;  %15443 = vmatprep.subr.mxu0 %v22894_v15 }
0x25cb   :  { %15400 = vmatpush3.msra.mxu1 %v22901_v20  ;;  %15444 = vmatpush3.msra.mxu0 %v22901_v20 }
0x25cc   :  { %15401 = vmatprep.subr.mxu1 %v22908_v61  ;;  %15445 = vmatprep.subr.mxu0 %v22908_v61 }
0x25cd   :  { %15402 = vmatpush3.msra.mxu1 %v22915_v51  ;;  %15446 = vmatpush3.msra.mxu0 %v22915_v51 }
0x25ce   :  { %15403 = vmatprep.subr.mxu1 %v22922_v52  ;;  %15447 = vmatprep.subr.mxu0 %v22922_v52 }
0x25cf   :  { %15404 = vmatpush3.msra.mxu1 %v22929_v57  ;;  %15448 = vmatpush3.msra.mxu0 %v22929_v57 }
0x264a   :  { %v11766_v50 = vpop.f32.mrf.mxu1  ;;  %v11855_v62 = vpop.f32.mrf.mxu0 }
0x264c   :  { %v11768_v1 = vpop.f32.mrf.mxu1  ;;  %v11857_v44 = vpop.f32.mrf.mxu0 }
0x264e   :  { %v11772_v35 = vpop.f32.mrf.mxu1  ;;  %v11861_v46 = vpop.f32.mrf.mxu0 }
0x2650   :  { %v11774_v26 = vpop.f32.mrf.mxu1  ;;  %v11863_v48 = vpop.f32.mrf.mxu0 }
0x2652   :  { %v11778_v29 = vpop.f32.mrf.mxu1  ;;  %v11867_v56 = vpop.f32.mrf.mxu0 }
0x2654   :  { %v11780_v63 = vpop.f32.mrf.mxu1  ;;  %v11869_v36 = vpop.f32.mrf.mxu0 }
0x2656   :  { %v22933_v4 = vpop.f32.mrf.mxu1  ;;  %v22935_v3 = vpop.f32.mrf.mxu0 }
0x2658   :  { %v22937_v17 = vpop.f32.mrf.mxu1  ;;  %v22939_v32 = vpop.f32.mrf.mxu0 }
0x265a   :  { %v11956_v57 = vpop.f32.mrf.mxu1  ;;  %v12045_v52 = vpop.f32.mrf.mxu0 }
0x265b   :  { %v11957_v23 = vadd.f32 %v11956_v57, %v11766_v50  ;;  %v12046_v42 = vadd.f32 %v12045_v52, %v11855_v62  ;;  %v22944_v57 = vld [vmem:[%s23242_s7 + $0x8] sm:$0xff] }
0x265c   :  { %v11958_v51 = vpop.f32.mrf.mxu1  ;;  %v12047_v61 = vpop.f32.mrf.mxu0 }
0x265d   :  { %v11959_v24 = vadd.f32 %v11958_v51, %v11768_v1  ;;  %v12048_v28 = vadd.f32 %v12047_v61, %v11857_v44 }
0x265e   :  { %v11962_v20 = vpop.f32.mrf.mxu1  ;;  %v12051_v15 = vpop.f32.mrf.mxu0 }
0x265f   :  { %v11963_v2 = vadd.f32 %v11962_v20, %v11772_v35  ;;  %v12052_v8 = vadd.f32 %v12051_v15, %v11861_v46 }
0x2660   :  { %v11964_v12 = vpop.f32.mrf.mxu1  ;;  %v12053_v31 = vpop.f32.mrf.mxu0 }
0x2661   :  { %v11965_v27 = vadd.f32 %v11964_v12, %v11774_v26  ;;  %v12054_v6 = vadd.f32 %v12053_v31, %v11863_v48  ;;  %v22976_v26 = vld [vmem:[%s23242_s7 + $0x28] sm:$0xff] }
0x2662   :  { %v11968_v37 = vpop.f32.mrf.mxu1  ;;  %v12057_v43 = vpop.f32.mrf.mxu0 }
0x2663   :  { %v11969_v15 = vadd.f32 %v11968_v37, %v11778_v29 }
0x2664   :  { %v11970_v9 = vpop.f32.mrf.mxu1  ;;  %v12059_v34 = vpop.f32.mrf.mxu0 }
0x2665   :  { %v11971_v61 = vadd.f32 %v11970_v9, %v11780_v63  ;;  %v12060_v52 = vadd.f32 %v12059_v34, %v11869_v36 }
0x2666   :  { %v11974_v14 = vpop.f32.mrf.mxu1  ;;  %v12063_v58 = vpop.f32.mrf.mxu0 }
0x2667   :  { %v11975_v50 = vadd.f32 %v11974_v14, %v22933_v4  ;;  %v12064_v62 = vadd.f32 %v12063_v58, %v22935_v3  ;;  %v22983_v58 = vld [vmem:[%s23242_s7 + $0x20] sm:$0xff] }
0x2668   :  { %v11976_v41 = vpop.f32.mrf.mxu1  ;;  %v12065_v47 = vpop.f32.mrf.mxu0 }
0x2669   :  { %v11977_v35 = vadd.f32 %v11976_v41, %v22937_v17  ;;  %v12066_v46 = vadd.f32 %v12065_v47, %v22939_v32  ;;  %v22990_v17 = vld [vmem:[%s23242_s7 + $0x38] sm:$0xff] }
0x266a   :  { %v12162_v59 = vpop.f32.mrf.mxu1  ;;  %v12251_v54 = vpop.f32.mrf.mxu0 }
0x266b   :  { %v12274_v21 = vadd.f32 %v12162_v59, %v11957_v23  ;;  %v12276_v53 = vadd.f32 %v12251_v54, %v12046_v42 }
0x266c   :  { %v12164_v25 = vpop.f32.mrf.mxu1  ;;  %v12253_v55 = vpop.f32.mrf.mxu0 }
0x266d   :  { %v12275_v45 = vadd.f32 %v12164_v25, %v11959_v24  ;;  %v12277_v0 = vadd.f32 %v12253_v55, %v12048_v28  ;;  %v22951_v25 = vld [vmem:[%s23242_s7] sm:$0xff] }
0x266e   :  { %v12168_v19 = vpop.f32.mrf.mxu1  ;;  %v12257_v7 = vpop.f32.mrf.mxu0  ;;  %v12322_v55 = vmul.f32 %v22951_v25, %v12274_v21  ;;  %v12415_v54 = vmul.f32 %v22951_v25, %v12276_v53 }
0x266f   :  { %v12323_v51 = vmul.f32 %v22944_v57, %v12275_v45  ;;  %v12416_v59 = vmul.f32 %v22944_v57, %v12277_v0  ;;  %v12278_v28 = vadd.f32 %v12168_v19, %v11963_v2  ;;  %v12280_v23 = vadd.f32 %v12257_v7, %v12052_v8  ;;  %v22958_v19 = vld [vmem:[%s23242_s7 + $0x18] sm:$0xff] }
0x2670   :  { %v12170_v24 = vpop.f32.mrf.mxu1  ;;  %v12259_v42 = vpop.f32.mrf.mxu0  ;;  %v12058_v45 = vadd.f32 %v12057_v43, %v11867_v56 }
0x2671   :  { %v12279_v31 = vadd.f32 %v12170_v24, %v11965_v27  ;;  %v12281_v12 = vadd.f32 %v12259_v42, %v12054_v6  ;;  %12394 = vmatprep.mubr.f32.mxu1 %v12323_v51  ;;  %12487 = vmatprep.mubr.f32.mxu0 %v12416_v59  ;;  %v22965_v6 = vld [vmem:[%s23242_s7 + $0x10] sm:$0xff]  ;;  %v16410_v24 = vld [vmem:[%s23239_s4] sm:$0xff] }
0x2672   :  { %v12174_v0 = vpop.f32.mrf.mxu1  ;;  %v12263_v20 = vpop.f32.mrf.mxu0  ;;  %12395 = vmatmul.mubr.f32.vlgmr.msra.gmra.mxu1 %v12322_v55  ;;  %12488 = vmatmul.mubr.f32.vlgmr.msra.gmra.mxu0 %v12415_v54  ;;  %v12324_v27 = vmul.f32 %v22965_v6, %v12278_v28  ;;  %v12417_v34 = vmul.f32 %v22965_v6, %v12280_v23  ;;  %v22997_v59 = vld [vmem:[%s23242_s7 + $0x30] sm:$0xff] }
0x2673   :  { %v12325_v2 = vmul.f32 %v22958_v19, %v12279_v31  ;;  %v12418_v7 = vmul.f32 %v22958_v19, %v12281_v12  ;;  %v12282_v8 = vadd.f32 %v12174_v0, %v11969_v15  ;;  %v12284_v9 = vadd.f32 %v12263_v20, %v12058_v45 }
0x2674   :  { %v12176_v53 = vpop.f32.mrf.mxu1  ;;  %v12265_v21 = vpop.f32.mrf.mxu0 }
0x2675   :  { %v12283_v43 = vadd.f32 %v12176_v53, %v11971_v61  ;;  %v12285_v37 = vadd.f32 %v12265_v21, %v12060_v52  ;;  %12399 = vmatprep.mubr.f32.mxu1 %v12325_v2  ;;  %12492 = vmatprep.mubr.f32.mxu0 %v12418_v7  ;;  %v12326_v14 = vmul.f32 %v22983_v58, %v12282_v8  ;;  %v14146_v2 = vld [vmem:[%s23243_s0 + $0xe8] sm:$0xff]  ;;  %v14145_v8 = vld [vmem:[%s23243_s0 + $0xe0] sm:$0xff] }
0x2676   :  { %v12180_v1 = vpop.f32.mrf.mxu1  ;;  %v12269_v44 = vpop.f32.mrf.mxu0  ;;  %12400 = vmatmul.mubr.f32.gmra.mxu1 %v12324_v27  ;;  %12493 = vmatmul.mubr.f32.gmra.mxu0 %v12417_v34  ;;  %v12419_v63 = vmul.f32 %v22983_v58, %v12284_v9  ;;  %v14147_v34 = vld [vmem:[%s23243_s0 + $0xf0] sm:$0xff] }
0x2677   :  { %v12327_v48 = vmul.f32 %v22976_v26, %v12283_v43  ;;  %v12420_v29 = vmul.f32 %v22976_v26, %v12285_v37  ;;  %v12286_v41 = vadd.f32 %v12180_v1, %v11975_v50  ;;  %v12288_v36 = vadd.f32 %v12269_v44, %v12064_v62 }
0x2678   :  { %v12182_v56 = vpop.f32.mrf.mxu1  ;;  %v12271_v47 = vpop.f32.mrf.mxu0 }
0x2679   :  { %v12287_v4 = vadd.f32 %v12182_v56, %v11977_v35  ;;  %v12289_v3 = vadd.f32 %v12271_v47, %v12066_v46  ;;  %12404 = vmatprep.mubr.f32.mxu1 %v12327_v48  ;;  %12497 = vmatprep.mubr.f32.mxu0 %v12420_v29  ;;  %v12328_v55 = vmul.f32 %v22997_v59, %v12286_v41  ;;  %v14148_v46 = vld [vmem:[%s23243_s0 + $0xf8] sm:$0xff] }
0x267a   :  { %12405 = vmatmul.mubr.f32.gmra.mxu1 %v12326_v14  ;;  %12498 = vmatmul.mubr.f32.gmra.mxu0 %v12419_v63  ;;  %v12421_v28 = vmul.f32 %v22997_v59, %v12288_v36 }
0x267b   :  { %v12329_v32 = vmul.f32 %v22990_v17, %v12287_v4  ;;  %v12422_v51 = vmul.f32 %v22990_v17, %v12289_v3 }
0x267d   :  { %12409 = vmatprep.mubr.f32.mxu1 %v12329_v32  ;;  %12502 = vmatprep.mubr.f32.mxu0 %v12422_v51 }
0x267e   :  { %12410 = vmatmul.mubr.f32.gmra.mxu1 %v12328_v55  ;;  %12503 = vmatmul.mubr.f32.gmra.mxu0 %v12421_v28 }
0x267f   :  { %15919 = vmatprep.mubr.msk.f32.mxu1 %vm56_vm0, %v16410_v24  ;;  %12795 = vmatprep.mubr.f32.mxu0 %v23534_v40 }
0x2732   :  { %v15405_v42 = vpop.f32.mrf.mxu1  ;;  %v15449_v54 = vpop.f32.mrf.mxu0 }
0x2734   :  { %v15406_v23 = vpop.f32.mrf.mxu1  ;;  %v15450_v31 = vpop.f32.mrf.mxu0 }
0x2735   :  { %v23006_v12 = vadd.f32 %v15450_v31, %v15449_v54  ;;  %v15407_v52 = vadd.f32 %v15406_v23, %v15405_v42 }
0x2736   :  { %v15408_v15 = vpop.f32.mrf.mxu1  ;;  %v15452_v45 = vpop.f32.mrf.mxu0 }
0x2737   :  { %v12513_v50 = vadd.f32 %v15407_v52, %v14145_v8  ;;  %v14195_v52 = vld [vmem:[%s23244_s6 + $0xb0] sm:$0xff]  ;;  %v14192_v8 = vld [vmem:[%s23244_s6 + $0x98] sm:$0xff] }
0x2738   :  { %v15409_v0 = vpop.f32.mrf.mxu1  ;;  %v15453_v61 = vpop.f32.mrf.mxu0 }
0x2739   :  { %v15410_v20 = vadd.f32 %v15409_v0, %v15408_v15  ;;  %v23011_v7 = vadd.f32 %v15453_v61, %v15452_v45  ;;  %v14149_v41 = vmul.f32 -1.442695, %v12513_v50  ;;  %v14196_v61 = vld [vmem:[%s23244_s6 + $0xb8] sm:$0xff] }
0x273a   :  { %v15411_v27 = vpop.f32.mrf.mxu1  ;;  %v15455_v53 = vpop.f32.mrf.mxu0 }
0x273b   :  { %v12514_v9 = vadd.f32 %v15410_v20, %v14146_v2  ;;  %v14173_v20 = vld [vmem:[%s23244_s6 + $0x40] sm:$0xff]  ;;  %v14194_v2 = vld [vmem:[%s23244_s6 + $0xa8] sm:$0xff] }
0x273c   :  { %v15412_v21 = vpop.f32.mrf.mxu1  ;;  %v15456_v37 = vpop.f32.mrf.mxu0 }
0x273d   :  { %v15413_v43 = vadd.f32 %v15412_v21, %v15411_v27  ;;  %v23019_v62 = vadd.f32 %v15456_v37, %v15455_v53  ;;  %v14150_v48 = vmul.f32 -1.442695, %v12514_v9  ;;  %v14193_v27 = vld [vmem:[%s23244_s6 + $0xa0] sm:$0xff]  ;;  %v14191_v53 = vld [vmem:[%s23244_s6 + $0x90] sm:$0xff]  ;;  %v12710_v21 = vld [vmem:[%s23244_s6 + $0x38] sm:$0xff] }
0x273e   :  { %v15414_v1 = vpop.f32.mrf.mxu1  ;;  %v14189_v9 = vld [vmem:[%s23244_s6 + $0x80] sm:$0xff] }
0x273f   :  { %v12515_v44 = vadd.f32 %v15413_v43, %v14147_v34  ;;  %v14190_v34 = vld [vmem:[%s23244_s6 + $0x88] sm:$0xff] }
0x2740   :  { %v15415_v35 = vpop.f32.mrf.mxu1 }
0x2741   :  { %v14151_v29 = vmul.f32 -1.442695, %v12515_v44  ;;  %v15416_v14 = vadd.f32 %v15415_v35, %v15414_v1  ;;  %v12709_v35 = vld [vmem:[%s23244_s6 + $0x30] sm:$0xff] }
0x2743   :  { %16226 = vpow2.f32 %v14151_v29  ;;  %v12516_v56 = vadd.f32 %v15416_v14, %v14148_v46  ;;  %v12707_v29 = vld [vmem:[%s23244_s6 + $0x20] sm:$0xff] }
0x2744   :  { %16228 = vpow2.f32 %v14150_v48  ;;  %v12708_v48 = vld [vmem:[%s23244_s6 + $0x28] sm:$0xff] }
0x2745   :  { %v14152_v47 = vmul.f32 -1.442695, %v12516_v56  ;;  %16230 = vpow2.f32 %v14149_v41  ;;  %v12706_v41 = vld [vmem:[%s23244_s6 + $0x18] sm:$0xff]  ;;  %v12705_v56 = vld [vmem:[%s23244_s6 + $0x10] sm:$0xff] }
0x2747   :  { %16232 = vpow2.f32 %v14152_v47 }
0x2750   :  { %v16227_v63 = vpop.eup %16226 }
0x2751   :  { %v16229_v36 = vpop.eup %16228  ;;  %v12531_v4 = vadd.f32 1.0, %v16227_v63  ;;  %v12704_v63 = vld [vmem:[%s23244_s6 + $0x8] sm:$0xff] }
0x2752   :  { %v16231_v3 = vpop.eup %16230  ;;  %v12530_v51 = vadd.f32 1.0, %v16229_v36  ;;  %v12703_v36 = vld [vmem:[%s23244_s6] sm:$0xff] }
0x2753   :  { %16234 = vrcp.f32 %v12531_v4  ;;  %v12529_v28 = vadd.f32 1.0, %v16231_v3 }
0x2754   :  { %v16233_v32 = vpop.eup %16232 }
0x2755   :  { %v12532_v55 = vadd.f32 1.0, %v16233_v32 }
0x2757   :  { %16236 = vrcp.f32 %v12532_v55 }
0x2758   :  { %16238 = vrcp.f32 %v12530_v51  ;;  %v24002_v51 = vld [vmem:[#allocation4_spill] sm:$0xff] }
0x2759   :  { %16240 = vrcp.f32 %v12529_v28  ;;  %v24003_v28 = vld [vmem:[#allocation5_spill] sm:$0xff] }
0x2760   :  { %v16235_v24 = vpop.eup %16234 }
0x2761   :  { %v12576_v31 = vmul.f32 %v16235_v24, %v22406_v39  ;;  %v24004_v24 = vld [vmem:[#allocation6_spill] sm:$0xff] }
0x2764   :  { %v16237_v42 = vpop.eup %16236 }
0x2765   :  { %v12577_v54 = vmul.f32 %v16237_v42, %v22414_v13  ;;  %v16239_v23 = vpop.eup %16238  ;;  %v24005_v42 = vld [vmem:[#allocation7_spill] sm:$0xff] }
0x2766   :  { %v16241_v15 = vpop.eup %16240  ;;  %v12575_v45 = vmul.f32 %v16239_v23, %v22398_v18  ;;  %v24007_v23 = vld [vmem:[#allocation9_spill] sm:$0xff] }
0x2767   :  { %15911 = vmatprep.subr.mxu1 %v12577_v54  ;;  %v12574_v0 = vmul.f32 %v16241_v15, %v22390_v11  ;;  %v24009_v15 = vld [vmem:[#allocation11_spill] sm:$0xff] }
0x2768   :  { %15912 = vmatpush3.msra.mxu1 %v12577_v54  ;;  %v24006_v54 = vld [vmem:[#allocation8_spill] sm:$0xff] }
0x2769   :  { %15913 = vmatprep.subr.mxu1 %v12576_v31 }
0x276a   :  { %15914 = vmatpush3.msra.mxu1 %v12576_v31  ;;  %v24008_v31 = vld [vmem:[#allocation10_spill] sm:$0xff] }
0x276b   :  { %15915 = vmatprep.subr.mxu1 %v12575_v45 }
0x276c   :  { %15916 = vmatpush3.msra.mxu1 %v12575_v45  ;;  %v24010_v45 = vld [vmem:[#allocation12_spill] sm:$0xff] }
0x276d   :  { %15917 = vmatprep.subr.mxu1 %v12574_v0 }
0x276e   :  { %15918 = vmatpush3.msra.mxu1 %v12574_v0  ;;  %v24011_v0 = vld [vmem:[#allocation13_spill] sm:$0xff] }
0x276f   :  { %15920 = vmatmul.mubr.msk.f32.vlgmr.msra.gmra.mxu1 %vm56_vm0, %v22438_v30  ;;  %v24000_v30 = vld [vmem:[#allocation2_spill] sm:$0xff]  ;;  %12965 = vmatprep.subr.mxu1 %v14196_v61  ;;  %v24023_v61 = vld [vmem:[#allocation25_spill] sm:$0xff] }
0x2770   :  { %15922 = vmatprep.mubr.msk.f32.mxu1 %vm56_vm0, %v22445_v33  ;;  %v24001_v33 = vld [vmem:[#allocation3_spill] sm:$0xff]  ;;  %12966 = vmatpush1.msra.mxu1 %v14195_v52  ;;  %v24024_v52 = vld [vmem:[#allocation26_spill] sm:$0xff] }
0x2771   :  { %12967 = vmatprep.subr.mxu1 %v14194_v2  ;;  %v24025_v2 = vld [vmem:[#allocation27_spill] sm:$0xff] }
0x2772   :  { %12968 = vmatpush1.msra.mxu1 %v14193_v27  ;;  %v24026_v27 = vld [vmem:[#allocation28_spill] sm:$0xff] }
0x2773   :  { %15923 = vmatmul.mubr.msk.f32.gmra.mxu1 %vm56_vm0, %v22452_v22  ;;  %v14180_v22 = vld [vmem:[%s23244_s6 + $0x78] sm:$0xff]  ;;  %12969 = vmatprep.subr.mxu1 %v14192_v8 }
0x2774   :  { %15925 = vmatprep.mubr.msk.f32.mxu1 %vm56_vm0, %v22459_v16  ;;  %12755 = vmatprep.subr.mxu0 %v14180_v22  ;;  %v14179_v16 = vld [vmem:[%s23244_s6 + $0x70] sm:$0xff]  ;;  %v24027_v8 = vld [vmem:[#allocation29_spill] sm:$0xff] }
0x2775   :  { %12756 = vmatpush1.msra.mxu0 %v14179_v16  ;;  %12970 = vmatpush1.msra.mxu1 %v14191_v53  ;;  %v24014_v22 = vld [vmem:[#allocation16_spill] sm:$0xff]  ;;  %v24015_v16 = vld [vmem:[#allocation17_spill] sm:$0xff]  ;;  %v24028_v53 = vld [vmem:[#allocation30_spill] sm:$0xff] }
0x2776   :  { %12971 = vmatprep.subr.mxu1 %v14190_v34  ;;  %v24030_v34 = vld [vmem:[#allocation32_spill] sm:$0xff] }
0x2777   :  { %15926 = vmatmul.mubr.msk.f32.gmra.mxu1 %vm56_vm0, %v22466_v60  ;;  %v14178_v60 = vld [vmem:[%s23244_s6 + $0x68] sm:$0xff] }
0x2778   :  { %15928 = vmatprep.mubr.msk.f32.mxu1 %vm56_vm0, %v22473_v49  ;;  %12757 = vmatprep.subr.mxu0 %v14178_v60  ;;  %v14177_v49 = vld [vmem:[%s23244_s6 + $0x60] sm:$0xff] }
0x2779   :  { %12758 = vmatpush1.msra.mxu0 %v14177_v49  ;;  %12972 = vmatpush1.msra.mxu1 %v14189_v9  ;;  %v24016_v60 = vld [vmem:[#allocation18_spill] sm:$0xff]  ;;  %v24017_v49 = vld [vmem:[#allocation19_spill] sm:$0xff]  ;;  %v24031_v9 = vld [vmem:[#allocation33_spill] sm:$0xff] }
0x277b   :  { %15929 = vmatmul.mubr.msk.f32.gmra.mxu1 %vm56_vm0, %v22480_v5  ;;  %v14176_v5 = vld [vmem:[%s23244_s6 + $0x58] sm:$0xff] }
0x277c   :  { %15931 = vmatprep.mubr.msk.f32.mxu1 %vm56_vm0, %v22487_v10  ;;  %12759 = vmatprep.subr.mxu0 %v14176_v5  ;;  %v14175_v10 = vld [vmem:[%s23244_s6 + $0x50] sm:$0xff]  ;;  %v24019_v5 = vld [vmem:[#allocation21_spill] sm:$0xff] }
0x277d   :  { %12760 = vmatpush1.msra.mxu0 %v14175_v10  ;;  %v24020_v10 = vld [vmem:[#allocation22_spill] sm:$0xff] }
0x277f   :  { %15932 = vmatmul.mubr.msk.f32.gmra.mxu1 %vm56_vm0, %v22494_v38  ;;  %v14174_v38 = vld [vmem:[%s23244_s6 + $0x48] sm:$0xff] }
0x2780   :  { %15934 = vmatprep.mubr.msk.f32.mxu1 %vm56_vm0, %v24000_v30  ;;  %12761 = vmatprep.subr.mxu0 %v14174_v38  ;;  %v24012_v30 = vld [vmem:[#allocation14_spill] sm:$0xff]  ;;  %v24021_v38 = vld [vmem:[#allocation23_spill] sm:$0xff] }
0x2781   :  { %12762 = vmatpush1.msra.mxu0 %v14173_v20  ;;  %v24022_v20 = vld [vmem:[#allocation24_spill] sm:$0xff] }
0x2782   :  { %12856 = vmatprep.subr.mxu0 %v12710_v21  ;;  %v24029_v21 = vld [vmem:[#allocation31_spill] sm:$0xff] }
0x2783   :  { %15935 = vmatmul.mubr.msk.f32.gmra.mxu1 %vm56_vm0, %v24001_v33  ;;  %v24013_v33 = vld [vmem:[#allocation15_spill] sm:$0xff] }
0x2784   :  { %13005 = vmatprep.mubr.f32.mxu1 %v23534_v40 }
0x282f   :  { %v15921_v43 = vpop.f32.mrf.mxu1 }
0x2831   :  { %v12644_v37 = vpop.f32.mrf.mxu1 }
0x2833   :  { %v15924_v50 = vpop.f32.mrf.mxu1 }
0x2835   :  { %v12654_v1 = vpop.f32.mrf.mxu1 }
0x2837   :  { %v15927_v44 = vpop.f32.mrf.mxu1 }
0x2839   :  { %v12664_v46 = vpop.f32.mrf.mxu1 }
0x283a   :  { %14181 = vmatmul.mubr.msk.f32.vlgmr.msra.gmra.mxu0 %vm56_vm0, %v12664_v46 }
0x283b   :  { %12801 = vmatprep.mubr.f32.mxu0 %v23534_v40  ;;  %v15930_v14 = vpop.f32.mrf.mxu1  ;;  %12857 = vmatpush1.msra.mxu0 %v12709_v35 }
0x283c   :  { %12858 = vmatprep.subr.mxu0 %v12708_v48 }
0x283d   :  { %v12674_v47 = vpop.f32.mrf.mxu1  ;;  %12859 = vmatpush1.msra.mxu0 %v12707_v29 }
0x283e   :  { %14182 = vmatmul.mubr.msk.f32.gmra.mxu0 %vm56_vm0, %v15927_v44  ;;  %12860 = vmatprep.subr.mxu0 %v12706_v41 }
0x283f   :  { %12807 = vmatprep.mubr.f32.mxu0 %v23534_v40  ;;  %12861 = vmatpush1.msra.mxu0 %v12705_v56  ;;  %v15933_v4 = vpop.f32.mrf.mxu1 }
0x2840   :  { %12862 = vmatprep.subr.mxu0 %v12704_v63 }
0x2841   :  { %12863 = vmatpush1.msra.mxu0 %v12703_v36  ;;  %v12684_v3 = vpop.f32.mrf.mxu1 }
0x2842   :  { %14183 = vmatmul.mubr.msk.f32.gmra.mxu0 %vm56_vm0, %v12674_v47  ;;  %14197 = vmatmul.mubr.msk.f32.vlgmr.msra.gmra.mxu1 %vm56_vm0, %v12684_v3 }
0x2843   :  { %12813 = vmatprep.mubr.f32.mxu0 %v23534_v40  ;;  %13011 = vmatprep.mubr.f32.mxu1 %v23534_v40  ;;  %v15936_v32 = vpop.f32.mrf.mxu1 }
0x2844   :  { %15477 = vmatprep.subr.mxu0 %v24002_v51 }
0x2845   :  { %v12694_v55 = vpop.f32.mrf.mxu1 }
0x2846   :  { %14184 = vmatmul.mubr.msk.f32.gmra.mxu0 %vm56_vm0, %v15930_v14  ;;  %14198 = vmatmul.mubr.msk.f32.gmra.mxu1 %vm56_vm0, %v15933_v4 }
0x2847   :  { %12896 = vmatprep.mubr.f32.mxu0 %v23534_v40  ;;  %13017 = vmatprep.mubr.f32.mxu1 %v23534_v40 }
0x284a   :  { %14185 = vmatmul.mubr.msk.f32.vlgmr.msra.gmra.mxu0 %vm56_vm0, %v12644_v37  ;;  %14199 = vmatmul.mubr.msk.f32.gmra.mxu1 %vm56_vm0, %v12694_v55  ;;  %v24033_v37 = vld [vmem:[#allocation35_spill] sm:$0xff] }
0x284b   :  { %12902 = vmatprep.mubr.f32.mxu0 %v23534_v40  ;;  %13023 = vmatprep.mubr.f32.mxu1 %v23534_v40 }
0x284c   :  { %15478 = vmatpush3.msra.mxu0 %v24003_v28 }
0x284d   :  { %15479 = vmatprep.subr.mxu0 %v24004_v24 }
0x284e   :  { %14186 = vmatmul.mubr.msk.f32.gmra.mxu0 %vm56_vm0, %v15921_v43  ;;  %14200 = vmatmul.mubr.msk.f32.gmra.mxu1 %vm56_vm0, %v15936_v32  ;;  %v24032_v43 = vld [vmem:[#allocation34_spill] sm:$0xff] }
0x284f   :  { %12908 = vmatprep.mubr.f32.mxu0 %v23534_v40  ;;  %15480 = vmatpush3.msra.mxu0 %v24005_v42 }
0x2850   :  { %15481 = vmatprep.subr.mxu0 %v24006_v54 }
0x2851   :  { %15482 = vmatpush3.msra.mxu0 %v24007_v23 }
0x2852   :  { %14187 = vmatmul.mubr.msk.f32.gmra.mxu0 %vm56_vm0, %v12654_v1  ;;  %15483 = vmatprep.subr.mxu0 %v24008_v31 }
0x2853   :  { %12914 = vmatprep.mubr.f32.mxu0 %v23534_v40  ;;  %15484 = vmatpush3.msra.mxu0 %v24009_v15  ;;  %v24018_v40 = vld [vmem:[#allocation20_spill] sm:$0xff] }
0x2854   :  { %15485 = vmatprep.subr.mxu0 %v24010_v45 }
0x2855   :  { %15486 = vmatpush3.msra.mxu0 %v24011_v0 }
0x2856   :  { %14188 = vmatmul.mubr.msk.f32.gmra.mxu0 %vm56_vm0, %v15924_v50  ;;  %15487 = vmatprep.subr.mxu0 %v24012_v30  ;;  %v23177_v50 = vpop.f32.mrf.mxu0 }
0x2857   :  { %15488 = vmatpush3.msra.mxu0 %v24013_v33 }
0x2858   :  { %15489 = vmatprep.subr.mxu0 %v24014_v22  ;;  %v23179_v1 = vpop.f32.mrf.mxu0 }
0x2859   :  { %15490 = vmatpush3.msra.mxu0 %v24015_v16 }
0x285a   :  { %15491 = vmatprep.subr.mxu0 %v24016_v60 }
0x285b   :  { %15492 = vmatpush3.msra.mxu0 %v24017_v49 }
0x285c   :  { %15493 = vmatprep.subr.mxu0 %v24018_v40 }
0x285d   :  { %15494 = vmatpush3.msra.mxu0 %v24019_v5 }
0x285e   :  { %15495 = vmatprep.subr.mxu0 %v24020_v10 }
0x285f   :  { %15496 = vmatpush3.msra.mxu0 %v24021_v38 }
0x2860   :  { %15497 = vmatprep.subr.mxu0 %v24022_v20 }
0x2861   :  { %15498 = vmatpush3.msra.mxu0 %v24023_v61 }
0x2862   :  { %15499 = vmatprep.subr.mxu0 %v24024_v52 }
0x2863   :  { %15500 = vmatpush3.msra.mxu0 %v24025_v2 }
0x2864   :  { %15501 = vmatprep.subr.mxu0 %v24026_v27 }
0x2865   :  { %15502 = vmatpush3.msra.mxu0 %v24027_v8 }
0x2866   :  { %15503 = vmatprep.subr.mxu0 %v24028_v53 }
0x2867   :  { %15504 = vmatpush3.msra.mxu0 %v24029_v21 }
0x2868   :  { %15505 = vmatprep.subr.mxu0 %v24030_v34 }
0x2869   :  { %15506 = vmatpush3.msra.mxu0 %v24031_v9  ;;  %v14153_v9 = vld [vmem:[%s23245_s1 + $0xe0] sm:$0xff] }
0x286a   :  { %15507 = vmatprep.subr.mxu0 %v24032_v43 }
0x286b   :  { %15508 = vmatpush3.msra.mxu0 %v24033_v37 }
0x28fa   :  { %v12797_v44 = vpop.f32.mrf.mxu0 }
0x28fc   :  { %v12799_v35 = vpop.f32.mrf.mxu0 }
0x28fe   :  { %v12803_v46 = vpop.f32.mrf.mxu0 }
0x2900   :  { %v12805_v48 = vpop.f32.mrf.mxu0 }
0x2902   :  { %v12809_v29 = vpop.f32.mrf.mxu0  ;;  %v13007_v14 = vpop.f32.mrf.mxu1 }
0x2904   :  { %v12811_v41 = vpop.f32.mrf.mxu0  ;;  %v13009_v56 = vpop.f32.mrf.mxu1 }
0x2906   :  { %v12815_v47 = vpop.f32.mrf.mxu0  ;;  %v13013_v63 = vpop.f32.mrf.mxu1 }
0x2908   :  { %v12817_v36 = vpop.f32.mrf.mxu0  ;;  %v13015_v3 = vpop.f32.mrf.mxu1 }
0x290a   :  { %v12898_v4 = vpop.f32.mrf.mxu0  ;;  %v13019_v42 = vpop.f32.mrf.mxu1 }
0x290b   :  { %v12899_v32 = vadd.f32 %v12898_v4, %v12797_v44 }
0x290c   :  { %v12900_v51 = vpop.f32.mrf.mxu0  ;;  %v13021_v22 = vpop.f32.mrf.mxu1 }
0x290d   :  { %v12901_v55 = vadd.f32 %v12900_v51, %v12799_v35  ;;  %v13030_v28 = vadd.f32 %v13007_v14, %v12899_v32  ;;  %v15460_v35 = vadd.f32 %v23179_v1, %v23177_v50  ;;  %v14201_v50 = vld [vmem:[%s23246_s2 + $0xe0] sm:$0xff]  ;;  %v14202_v51 = vld [vmem:[%s23246_s2 + $0xe8] sm:$0xff] }
0x290e   :  { %v12904_v24 = vpop.f32.mrf.mxu0  ;;  %v13025_v61 = vpop.f32.mrf.mxu1 }
0x290f   :  { %v12905_v54 = vadd.f32 %v12904_v24, %v12803_v46  ;;  %v13031_v23 = vadd.f32 %v13009_v56, %v12901_v55  ;;  %v13038_v0 = vmul.f32 %v22951_v25, %v13030_v28 }
0x2910   :  { %v12906_v31 = vpop.f32.mrf.mxu0  ;;  %v13027_v21 = vpop.f32.mrf.mxu1 }
0x2911   :  { %v13039_v15 = vmul.f32 %v22944_v57, %v13031_v23  ;;  %v12907_v45 = vadd.f32 %v12906_v31, %v12805_v48  ;;  %v13032_v30 = vadd.f32 %v13013_v63, %v12905_v54  ;;  %v14203_v31 = vld [vmem:[%s23246_s2 + $0xf0] sm:$0xff] }
0x2912   :  { %v12910_v33 = vpop.f32.mrf.mxu0 }
0x2913   :  { %v12911_v16 = vadd.f32 %v12910_v33, %v12809_v29  ;;  %v13033_v60 = vadd.f32 %v13015_v3, %v12907_v45  ;;  %13110 = vmatprep.mubr.f32.mxu0 %v13039_v15  ;;  %v13040_v10 = vmul.f32 %v22965_v6, %v13032_v30  ;;  %v14204_v33 = vld [vmem:[%s23246_s2 + $0xf8] sm:$0xff] }
0x2914   :  { %v12912_v49 = vpop.f32.mrf.mxu0  ;;  %13111 = vmatmul.mubr.f32.vlgmr.msra.gmra.mxu0 %v13038_v0 }
0x2915   :  { %v13041_v40 = vmul.f32 %v22958_v19, %v13033_v60  ;;  %v12913_v5 = vadd.f32 %v12912_v49, %v12811_v41  ;;  %v13034_v38 = vadd.f32 %v13019_v42, %v12911_v16 }
0x2916   :  { %v12916_v20 = vpop.f32.mrf.mxu0 }
0x2917   :  { %v12917_v57 = vadd.f32 %v12916_v20, %v12815_v47  ;;  %v13035_v52 = vadd.f32 %v13021_v22, %v12913_v5  ;;  %13115 = vmatprep.mubr.f32.mxu0 %v13041_v40  ;;  %v13042_v8 = vmul.f32 %v22983_v58, %v13034_v38  ;;  %v14154_v58 = vld [vmem:[%s23245_s1 + $0xe8] sm:$0xff] }
0x2918   :  { %v12918_v25 = vpop.f32.mrf.mxu0  ;;  %13116 = vmatmul.mubr.f32.gmra.mxu0 %v13040_v10  ;;  %v12547_v43 = vadd.f32 %v23011_v7, %v14154_v58 }
0x2919   :  { %v13043_v2 = vmul.f32 %v22976_v26, %v13035_v52  ;;  %v12919_v27 = vadd.f32 %v12918_v25, %v12817_v36  ;;  %v13036_v53 = vadd.f32 %v13025_v61, %v12917_v57  ;;  %v12546_v26 = vadd.f32 %v23006_v12, %v14153_v9  ;;  %v14156_v12 = vld [vmem:[%s23245_s1 + $0xf8] sm:$0xff] }
0x291a   :  { %v12549_v48 = vadd.f32 %v15460_v35, %v14156_v12 }
0x291b   :  { %v13037_v34 = vadd.f32 %v13027_v21, %v12919_v27  ;;  %13120 = vmatprep.mubr.f32.mxu0 %v13043_v2  ;;  %v13044_v6 = vmul.f32 %v22997_v59, %v13036_v53  ;;  %v14157_v37 = vmul.f32 -1.442695, %v12546_v26  ;;  %v14158_v59 = vmul.f32 -1.442695, %v12547_v43 }
0x291c   :  { %13121 = vmatmul.mubr.f32.gmra.mxu0 %v13042_v8  ;;  %v14160_v7 = vmul.f32 -1.442695, %v12549_v48 }
0x291d   :  { %v13045_v19 = vmul.f32 %v22990_v17, %v13037_v34  ;;  %v14155_v17 = vld [vmem:[%s23245_s1 + $0xf0] sm:$0xff]  ;;  %16242 = vpow2.f32 %v14157_v37 }
0x291e   :  { %v12548_v44 = vadd.f32 %v23019_v62, %v14155_v17  ;;  %16244 = vpow2.f32 %v14158_v59 }
0x291f   :  { %13125 = vmatprep.mubr.f32.mxu0 %v13045_v19 }
0x2920   :  { %13126 = vmatmul.mubr.f32.gmra.mxu0 %v13044_v6  ;;  %v14159_v46 = vmul.f32 -1.442695, %v12548_v44 }
0x2922   :  { %16246 = vpow2.f32 %v14159_v46 }
0x2923   :  { %16248 = vpow2.f32 %v14160_v7 }
0x292a   :  { %v16243_v29 = vpop.eup %16242 }
0x292b   :  { %v16245_v14 = vpop.eup %16244  ;;  %v12562_v41 = vadd.f32 1.0, %v16243_v29 }
0x292c   :  { %v12563_v47 = vadd.f32 1.0, %v16245_v14 }
0x292d   :  { %16250 = vrcp.f32 %v12562_v41 }
0x292e   :  { %16252 = vrcp.f32 %v12563_v47 }
0x292f   :  { %v16247_v1 = vpop.eup %16246 }
0x2930   :  { %v12564_v3 = vadd.f32 1.0, %v16247_v1  ;;  %v16249_v55 = vpop.eup %16248 }
0x2931   :  { %v12565_v54 = vadd.f32 1.0, %v16249_v55 }
0x293a   :  { %v16251_v16 = vpop.eup %16250 }
0x293b   :  { %v16253_v49 = vpop.eup %16252  ;;  %v13148_v40 = vsub.f32 1.0, %v16251_v16  ;;  %v13144_v10 = vmul.f32 %v16251_v16, %v22390_v11 }
0x293c   :  { %v13149_v57 = vsub.f32 1.0, %v16253_v49  ;;  %v13145_v25 = vmul.f32 %v16253_v49, %v22398_v18 }
0x29d4   :  { %v15509_v56 = vpop.f32.mrf.mxu0 }
0x29d6   :  { %v15510_v62 = vpop.f32.mrf.mxu0 }
0x29d7   :  { %v15511_v63 = vadd.f32 %v15510_v62, %v15509_v56 }
0x29d8   :  { %v15512_v36 = vpop.f32.mrf.mxu0 }
0x29d9   :  { %v13136_v4 = vadd.f32 %v15511_v63, %v14201_v50 }
0x29da   :  { %v15513_v32 = vpop.f32.mrf.mxu0 }
0x29db   :  { %16254 = vtanh.f32 %v13136_v4  ;;  %v15514_v28 = vadd.f32 %v15513_v32, %v15512_v36 }
0x29dc   :  { %v15515_v24 = vpop.f32.mrf.mxu0  ;;  %16256 = vrcp.f32 %v12564_v3 }
0x29dd   :  { %v13137_v42 = vadd.f32 %v15514_v28, %v14202_v51 }
0x29de   :  { %v15516_v23 = vpop.f32.mrf.mxu0 }
0x29df   :  { %16258 = vtanh.f32 %v13137_v42  ;;  %v15517_v15 = vadd.f32 %v15516_v23, %v15515_v24 }
0x29e0   :  { %v15518_v45 = vpop.f32.mrf.mxu0  ;;  %16260 = vrcp.f32 %v12565_v54 }
0x29e1   :  { %v13138_v0 = vadd.f32 %v15517_v15, %v14203_v31 }
0x29e2   :  { %v15519_v30 = vpop.f32.mrf.mxu0 }
0x29e3   :  { %16262 = vtanh.f32 %v13138_v0  ;;  %v15520_v22 = vadd.f32 %v15519_v30, %v15518_v45 }
0x29e5   :  { %v13139_v60 = vadd.f32 %v15520_v22, %v14204_v33 }
0x29e7   :  { %16264 = vtanh.f32 %v13139_v60 }
0x29e8   :  { %v16255_v5 = vpop.eup %16254 }
0x29e9   :  { %v13152_v38 = vmul.f32 %v16255_v5, %v13148_v40  ;;  %v16257_v20 = vpop.eup %16256 }
0x29ea   :  { %v13150_v53 = vsub.f32 1.0, %v16257_v20  ;;  %v13146_v11 = vmul.f32 %v16257_v20, %v22406_v39 }
0x29eb   :  { %v13156_v61 = vadd.f32 %v13152_v38, %v13144_v10 }
0x29ec   :  { %v16259_v52 = vpop.eup %16258 }
0x29ed   :  { %14205 = vst.msk [vmem:[%s23247_s9 + $0xe0] sm:$0xff] %vm56_vm0, %v13156_v61  ;;  %v13153_v2 = vmul.f32 %v16259_v52, %v13149_v57  ;;  %v16261_v27 = vpop.eup %16260 }
0x29ee   :  { %v13151_v6 = vsub.f32 1.0, %v16261_v27  ;;  %v13147_v18 = vmul.f32 %v16261_v27, %v22414_v13 }
0x29ef   :  { %v13157_v8 = vadd.f32 %v13153_v2, %v13145_v25 }
0x29f0   :  { %v16263_v21 = vpop.eup %16262 }
0x29f1   :  { %14206 = vst.msk [vmem:[%s23247_s9 + $0xe8] sm:$0xff] %vm56_vm0, %v13157_v8  ;;  %v13154_v34 = vmul.f32 %v16263_v21, %v13150_v53 }
0x29f3   :  { %v13158_v19 = vadd.f32 %v13154_v34, %v13146_v11 }
0x29f4   :  { %v16265_v9 = vpop.eup %16264 }
0x29f5   :  { %14207 = vst.msk [vmem:[%s23247_s9 + $0xf0] sm:$0xff] %vm56_vm0, %v13158_v19  ;;  %v13155_v26 = vmul.f32 %v16265_v9, %v13151_v6 }
0x29f7   :  { %v13159_v58 = vadd.f32 %v13155_v26, %v13147_v18 }
0x29f9   :  { %14208 = vst.msk [vmem:[%s23247_s9 + $0xf8] sm:$0xff] %vm56_vm0, %v13159_v58 }

</bundles_post_ra>
